<compile_context>
chip_gen: v6e
topology: v6e:2x2x1
jax: 0.10.0
libtpu: 0.0.40
codegen_flags: <defaults>
</compile_context>

<pallas_src>
import functools

import jax
import jax.numpy as jnp
from jax.experimental import pallas as pl
from jax.experimental.pallas import tpu as pltpu

EPS = 1e-5
VMEM_LIMIT = 32 * 1024 * 1024   # explicit budget, safe on v5e/v6e/v7x


def _swish(x):
    return x * jax.nn.sigmoid(x)


def _bn_relu(a, gamma, beta):
    """Training-mode BatchNorm over rows (single-pass stats) + ReLU, in f32."""
    mean = jnp.mean(a, axis=0, keepdims=True)
    var = jnp.mean(a * a, axis=0, keepdims=True) - mean * mean
    y = (a - mean) * jax.lax.rsqrt(var + EPS) * gamma + beta
    return jnp.maximum(y, 0.0)


def _full_spec(a):
    zeros = (0,) * a.ndim
    return pl.BlockSpec(a.shape, lambda i, _z=zeros: _z)


# --------------------------- image branch kernel ----------------------------
# Fused: conv1(1->64,4,2,1)+Swish -> in-VMEM im2col -> conv2(64->128,4,2,1)+Swish.
# conv1 patches are built on the host (raw 28x28 image, tiny); conv1 output is
# scattered into four zero-padded 9x9 parity buckets in VMEM, from which every
# conv2 tap is a contiguous 8x8 window (output computed on an 8x8 grid).

def _img_branch_kernel(col_ref, w1_ref, w2_ref, o_ref,
                       b00, b01, b10, b11, *, nb):
    # conv1 + Swish as a single (nb*224,16)@(16,64) matmul
    h1 = _swish(jnp.dot(col_ref[...], w1_ref[...],
                        preferred_element_type=jnp.float32))
    h1 = h1.reshape(nb, 224, 64)              # (img, group*56, C)

    bucks = (b00, b01, b10, b11)              # bucket (py,px) -> index 2*py+px
    offs = ((1, 1), (1, 0), (0, 1), (0, 0))   # write offsets per host group
    for s in bucks:
        s[...] = jnp.zeros_like(s)
    for g, (dy, dx) in enumerate(offs):
        grp = h1[:, g * 56:(g + 1) * 56, :].reshape(nb, 7, 8, 64)[:, :, 0:7, :]
        bucks[g][:, dy:dy + 7, dx:dx + 7, :] = grp

    # conv2 + Swish: 16 K=64 partial dots, one per (ki,kj) tap
    w2 = w2_ref[...]
    acc = jnp.zeros((nb * 64, 128), jnp.float32)
    for i in range(4):
        for j in range(4):
            src = bucks[2 * (i % 2) + (j % 2)]
            tap = src[:, i // 2:i // 2 + 8, j // 2:j // 2 + 8, :]
            tap = tap.astype(jnp.bfloat16).reshape(nb * 64, 64)
            t = i * 4 + j
            acc += jnp.dot(tap, w2[t * 64:(t + 1) * 64, :],
                           preferred_element_type=jnp.float32)
    o_ref[...] = _swish(acc).astype(o_ref.dtype)


def img_branch(col, w1, w2, *, batch, nb):
    return pl.pallas_call(
        functools.partial(_img_branch_kernel, nb=nb),
        out_shape=jax.ShapeDtypeStruct((batch * 64, 128), jnp.bfloat16),
        grid=(pl.cdiv(batch, nb),),
        in_specs=[pl.BlockSpec((nb * 224, 16), lambda i: (i, 0)),
                  pl.BlockSpec((16, 64), lambda i: (0, 0)),
                  pl.BlockSpec((1024, 128), lambda i: (0, 0))],
        out_specs=pl.BlockSpec((nb * 64, 128), lambda i: (i, 0)),
        scratch_shapes=[pltpu.VMEM((nb, 9, 9, 64), jnp.float32)] * 4,
        compiler_params=pltpu.CompilerParams(
            dimension_semantics=("parallel",),
            vmem_limit_bytes=VMEM_LIMIT),
    )(col, w1, w2)


# --------------------------- sound branch kernel ----------------------------
# Fused: conv(1->128,(1,128)) + BN + ReLU, conv(128->128,(4,1),s2,p1) + BN +
# ReLU, conv(128->256,(4,1),s2,p1) + BN + ReLU.  BatchNorm needs whole-batch
# statistics, so the whole batch is resident (grid=(1,)).
# TODO(synk): for very large batches this should become a two-pass (sum/sumsq
# scratch) M-tiled variant so VMEM does not scale with B.

def _sound_branch_kernel(xs_ref, w1_ref, w2_ref, w3_ref,
                         g1_ref, b1_ref, g2_ref, b2_ref, g3_ref, b3_ref,
                         o_ref, s10, s11, s12, s13, s20, s21):
    B = xs_ref.shape[0]
    dot = functools.partial(jnp.dot, preferred_element_type=jnp.float32)

    # ---- layer 1: (1,128) conv == per-row dense over W; BN over B*32 rows
    a1 = dot(xs_ref[...].reshape(B * 32, 128), w1_ref[...])
    y1 = _bn_relu(a1, g1_ref[...], b1_ref[...]).reshape(B, 32, 128)

    # scatter into mod-4 buckets of the zero-padded H axis (32 -> 34):
    # bucket c slot t == padded row 4t+c (host row-permutation makes the
    # y1 row blocks land contiguously).
    for s in (s10, s11, s12, s13, s20, s21):
        s[...] = jnp.zeros_like(s)
    s10[:, 1:9, :] = y1[:, 0:8, :]
    s11[:, 0:8, :] = y1[:, 8:16, :]
    s12[:, 0:8, :] = y1[:, 16:24, :]
    s13[:, 0:8, :] = y1[:, 24:32, :]
    s1b = (s10, s11, s12, s13)

    def tap1(c, lo, hi):
        return s1b[c][:, lo:hi, :].astype(jnp.bfloat16).reshape(B * 8, 128)

    # ---- layer 2: (4,1) conv s2 p1; even-/odd-output rows as 4 K=128 dots each
    w2 = w2_ref[...]
    a2e = (dot(tap1(0, 0, 8), w2[0:128]) + dot(tap1(1, 0, 8), w2[128:256]) +
           dot(tap1(2, 0, 8), w2[256:384]) + dot(tap1(3, 0, 8), w2[384:512]))
    a2o = (dot(tap1(2, 0, 8), w2[0:128]) + dot(tap1(3, 0, 8), w2[128:256]) +
           dot(tap1(0, 1, 9), w2[256:384]) + dot(tap1(1, 1, 9), w2[384:512]))
    y2 = _bn_relu(jnp.concatenate([a2e, a2o], axis=0), g2_ref[...], b2_ref[...])

    # parity buckets of the zero-padded layer-2 map (16 -> 18):
    # s20 slot t == padded row 2t (odd outputs), s21 slot t == 2t+1 (even).
    s21[:, 0:8, :] = y2[0:B * 8].reshape(B, 8, 128)
    s20[:, 1:9, :] = y2[B * 8:].reshape(B, 8, 128)
    s2b = (s20, s21)

    def tap2(c, lo, hi):
        return s2b[c][:, lo:hi, :].astype(jnp.bfloat16).reshape(B * 8, 128)

    # ---- layer 3: (4,1) conv s2 p1, 128 -> 256 channels
    w3 = w3_ref[...]
    a3 = (dot(tap2(0, 0, 8), w3[0:128]) + dot(tap2(1, 0, 8), w3[128:256]) +
          dot(tap2(0, 1, 9), w3[256:384]) + dot(tap2(1, 1, 9), w3[384:512]))
    y3 = _bn_relu(a3, g3_ref[...], b3_ref[...])            # (B*8, 256)
    o_ref[...] = y3.astype(o_ref.dtype)


def sound_branch(xs, w1, w2, w3, g1, b1, g2, b2, g3, b3):
    B = xs.shape[0]
    args = (xs, w1, w2, w3, g1, b1, g2, b2, g3, b3)
    return pl.pallas_call(
        _sound_branch_kernel,
        out_shape=jax.ShapeDtypeStruct((B * 8, 256), jnp.bfloat16),
        grid=(1,),
        in_specs=[_full_spec(a) for a in args],
        out_specs=pl.BlockSpec((B * 8, 256), lambda i: (0, 0)),
        scratch_shapes=[pltpu.VMEM((B, 9, 128), jnp.float32)] * 6,
        compiler_params=pltpu.CompilerParams(
            dimension_semantics=("arbitrary",),
            vmem_limit_bytes=VMEM_LIMIT),
    )(*args)


# ------------------------- trajectory MLP kernel ----------------------------

def _traj_mlp_kernel(x_ref, w1_ref, b1_ref, w2_ref, b2_ref, o_ref):
    h = jnp.dot(x_ref[...], w1_ref[...],
                preferred_element_type=jnp.float32) + b1_ref[...]
    h = _swish(h)
    h = jnp.dot(h.astype(jnp.bfloat16), w2_ref[...],
                preferred_element_type=jnp.float32) + b2_ref[...]
    o_ref[...] = _swish(h).astype(o_ref.dtype)


def traj_mlp(x, w1, b1, w2, b2, *, tb):
    B, K1 = x.shape
    H = w1.shape[1]
    N = w2.shape[1]
    return pl.pallas_call(
        _traj_mlp_kernel,
        out_shape=jax.ShapeDtypeStruct((B, N), jnp.bfloat16),
        grid=(pl.cdiv(B, tb),),
        in_specs=[pl.BlockSpec((tb, K1), lambda i: (i, 0)),
                  pl.BlockSpec((K1, H), lambda i: (0, 0)),
                  pl.BlockSpec((1, H), lambda i: (0, 0)),
                  pl.BlockSpec((H, N), lambda i: (0, 0)),
                  pl.BlockSpec((1, N), lambda i: (0, 0))],
        out_specs=pl.BlockSpec((tb, N), lambda i: (i, 0)),
        compiler_params=pltpu.CompilerParams(
            dimension_semantics=("parallel",),
            vmem_limit_bytes=VMEM_LIMIT),
    )(x, w1, b1, w2, b2)


# -------------------- fused concat + projector kernel -----------------------

def _joint_proj_kernel(hi_ref, hs_ref, ht_ref, hl_ref,
                       wi_ref, ws_ref, wt_ref, wl_ref, b_ref, o_ref):
    acc = jnp.dot(hi_ref[...], wi_ref[...], preferred_element_type=jnp.float32)
    acc += jnp.dot(hs_ref[...], ws_ref[...], preferred_element_type=jnp.float32)
    acc += jnp.dot(ht_ref[...], wt_ref[...], preferred_element_type=jnp.float32)
    acc += jnp.dot(hl_ref[...], wl_ref[...], preferred_element_type=jnp.float32)
    o_ref[...] = (acc + b_ref[...]).astype(o_ref.dtype)


def joint_projection(h_img, h_snd, h_traj, x_lbl,
                     w_img, w_snd, w_traj, w_lbl, bias, *, tb):
    B = h_img.shape[0]
    N = w_img.shape[1]

    def act(a):
        return pl.BlockSpec((tb, a.shape[1]), lambda i: (i, 0))

    def res(a):
        return pl.BlockSpec(a.shape, lambda i: (0, 0))

    return pl.pallas_call(
        _joint_proj_kernel,
        out_shape=jax.ShapeDtypeStruct((B, N), jnp.float32),
        grid=(pl.cdiv(B, tb),),
        in_specs=[act(h_img), act(h_snd), act(h_traj), act(x_lbl),
                  res(w_img), res(w_snd), res(w_traj), res(w_lbl), res(bias)],
        out_specs=pl.BlockSpec((tb, N), lambda i: (i, 0)),
        compiler_params=pltpu.CompilerParams(
            dimension_semantics=("parallel",),
            vmem_limit_bytes=VMEM_LIMIT),
    )(h_img, h_snd, h_traj, x_lbl, w_img, w_snd, w_traj, w_lbl, bias)


# --------------------- host-side input prep (no duplication-heavy im2col) ----

def prep_image_patches(x_img):
    """(B,1,28,28) -> (B*224,16) bf16 conv1 patches, rows grouped per image by
    output-pixel parity (y odd/x odd, y odd/x even, y even/x odd, y even/x even),
    each group's x extent zero-padded 7->8 so in-kernel reshapes are tile-aligned."""
    B = x_img.shape[0]
    x = x_img.reshape(B, 28, 28).astype(jnp.bfloat16)
    xp = jnp.pad(x, ((0, 0), (1, 1), (1, 1)))
    taps = [xp[:, i:i + 28:2, j:j + 28:2] for i in range(4) for j in range(4)]
    col = jnp.stack(taps, axis=-1)                    # (B,14,14,16), feat (ki,kj)
    yo, ye = col[:, 1::2], col[:, 0::2]
    groups = [yo[:, :, 1::2], yo[:, :, 0::2],
              ye[:, :, 1::2], ye[:, :, 0::2]]         # each (B,7,7,16)
    groups = [jnp.pad(g, ((0, 0), (0, 0), (0, 1), (0, 0))) for g in groups]
    return jnp.stack(groups, axis=1).reshape(B * 224, 16)


def prep_sound(x_sound):
    """(B,1,32,128) -> (B,32,128) bf16 with H rows permuted so the layer-1
    output lands contiguously in the kernel's mod-4 padded-H buckets."""
    B = x_sound.shape[0]
    perm = jnp.concatenate([jnp.arange(3, 32, 4), jnp.arange(0, 32, 4),
                            jnp.arange(1, 32, 4), jnp.arange(2, 32, 4)])
    return x_sound.reshape(B, 32, 128)[:, perm, :].astype(jnp.bfloat16)


# ------------------------- model parameters & forward ----------------------

def init_params(common_dim, key):
    ks = jax.random.split(key, 11)

    def w(k, shape, fan_in):
        return (jax.random.normal(k, shape, jnp.float32) /
                jnp.sqrt(jnp.float32(fan_in))).astype(jnp.bfloat16)

    # Weight rows are stored pre-permuted (documented mapping from PyTorch):
    #   img_w1  rows (kh,kw)      <- torch (64,1,4,4).reshape(64,16).T
    #   img_w2  rows (kh,kw,Cin)  <- torch (128,64,4,4).permute(2,3,1,0).reshape(1024,128)
    #   snd_w1  rows (kw)         <- torch (128,1,1,128).reshape(128,128).T
    #   snd_w2  rows (kh,Cin)     <- torch (128,128,4,1).permute(2,1,0,3).reshape(512,128)
    #   snd_w3  rows (kh,Cin)     <- torch (256,128,4,1).permute(2,1,0,3).reshape(512,256)
    #   proj_w_img rows (oy,ox,C) over the kernel's 8x8 output grid; rows with
    #              oy==7 or ox==7 are the padded conv2 positions and MUST be
    #              zero; real rows <- torch projector cols [0:6272] (C,oy,ox).
    #   proj_w_snd rows (h,C)     <- torch projector cols [6272:8320] (C,h).
    proj_in = 128 * 7 * 7 + 2048 + 512 + 10           # 8842

    wi = w(ks[7], (8, 8, 128, common_dim), proj_in)
    valid = (jnp.arange(8) < 7).astype(jnp.bfloat16)
    wi = wi * valid[:, None, None, None] * valid[None, :, None, None]

    return {
        "img_w1": w(ks[0], (16, 64), 16),
        "img_w2": w(ks[1], (1024, 128), 1024),
        "snd_w1": w(ks[2], (128, 128), 128),
        "snd_w2": w(ks[3], (512, 128), 512),
        "snd_w3": w(ks[4], (512, 256), 512),
        "snd_g1": jnp.ones((1, 128), jnp.float32), "snd_b1": jnp.zeros((1, 128), jnp.float32),
        "snd_g2": jnp.ones((1, 128), jnp.float32), "snd_b2": jnp.zeros((1, 128), jnp.float32),
        "snd_g3": jnp.ones((1, 256), jnp.float32), "snd_b3": jnp.zeros((1, 256), jnp.float32),
        "traj_w1": w(ks[5], (200, 512), 200), "traj_b1": jnp.zeros((1, 512), jnp.float32),
        "traj_w2": w(ks[6], (512, 512), 512), "traj_b2": jnp.zeros((1, 512), jnp.float32),
        "proj_w_img": wi.reshape(8 * 8 * 128, common_dim),
        "proj_w_snd": w(ks[8], (8 * 256, common_dim), proj_in),
        "proj_w_traj": w(ks[9], (512, common_dim), proj_in),
        "proj_w_lbl": w(ks[10], (10, common_dim), proj_in),
        "proj_b": jnp.zeros((1, common_dim), jnp.float32),
    }


def mhd_joint_processor_forward(params, x_img, x_sound, x_traj, x_label):
    B = x_img.shape[0]
    nb = min(B, 16)           # images per grid step in the fused image kernel
    tb = min(B, 256)          # row tile for the dense kernels

    # image branch: one fused kernel (conv1+Swish -> VMEM im2col -> conv2+Swish)
    col1 = prep_image_patches(x_img)
    h_img = img_branch(col1, params["img_w1"], params["img_w2"],
                       batch=B, nb=nb).reshape(B, 8 * 8 * 128)

    # sound branch: one fused kernel (3x conv + BN(batch stats) + ReLU)
    xs = prep_sound(x_sound)
    h_sound = sound_branch(xs, params["snd_w1"], params["snd_w2"], params["snd_w3"],
                           params["snd_g1"], params["snd_b1"],
                           params["snd_g2"], params["snd_b2"],
                           params["snd_g3"], params["snd_b3"]).reshape(B, 8 * 256)

    # trajectory branch: fused Linear+Swish, Linear+Swish
    h_traj = traj_mlp(x_traj.astype(jnp.bfloat16),
                      params["traj_w1"], params["traj_b1"],
                      params["traj_w2"], params["traj_b2"], tb=tb)

    # fused concat + projector (partial dots against four K-slices of proj_w)
    return joint_projection(h_img, h_sound, h_traj, x_label.astype(jnp.bfloat16),
                            params["proj_w_img"], params["proj_w_snd"],
                            params["proj_w_traj"], params["proj_w_lbl"],
                            params["proj_b"], tb=tb)


# ---------------------------------- main -----------------------------------

if __name__ == "__main__":
    common_dim = 64
    B = 2

    key = jax.random.PRNGKey(0)
    k_params, k_img, k_snd, k_trj = jax.random.split(key, 4)

    params = init_params(common_dim, k_params)

    x_img = jax.random.normal(k_img, (B, 1, 28, 28), jnp.float32)     # NCHW
    x_sound = jax.random.normal(k_snd, (B, 1, 32, 128), jnp.float32)  # NCHW
    x_traj = jax.random.normal(k_trj, (B, 200), jnp.float32)
    x_label = jax.nn.one_hot(jnp.arange(B) % 10, 10, dtype=jnp.float32)

    fwd = jax.jit(mhd_joint_processor_forward)
    out = fwd(params, x_img, x_sound, x_traj, x_label)
    jax.block_until_ready(out)

    assert out.shape == (B, common_dim), out.shape
    assert out.dtype == jnp.float32
    print("KERNEL_OK")
</pallas_src>

<mosaic_0001>
module attributes {stable_mosaic.version = 11 : i64} {
  func.func @_traj_mlp_kernel(%arg0: i32, %arg1: memref<2x200xbf16, #tpu.memory_space<vmem>>, %arg2: memref<200x512xbf16, #tpu.memory_space<vmem>>, %arg3: memref<1x512xf32, #tpu.memory_space<vmem>>, %arg4: memref<512x512xbf16, #tpu.memory_space<vmem>>, %arg5: memref<1x512xf32, #tpu.memory_space<vmem>>, %arg6: memref<2x512xbf16, #tpu.memory_space<vmem>>) attributes {dimension_semantics = [#tpu.dimension_semantics<parallel>], iteration_bounds = array<i64: 1>, scalar_prefetch = 0 : i64, scratch_operands = 0 : i64, tpu.core_type = #tpu.core_type<tc>, window_params = [{transform_indices = @transform_0, window_bounds = array<i64: 2, 200>}, {pipeline_mode = #tpu.pipeline_mode<synchronous>, transform_indices = @transform_1, window_bounds = array<i64: 200, 512>}, {pipeline_mode = #tpu.pipeline_mode<synchronous>, transform_indices = @transform_2, window_bounds = array<i64: 1, 512>}, {pipeline_mode = #tpu.pipeline_mode<synchronous>, transform_indices = @transform_3, window_bounds = array<i64: 512, 512>}, {pipeline_mode = #tpu.pipeline_mode<synchronous>, transform_indices = @transform_4, window_bounds = array<i64: 1, 512>}, {transform_indices = @transform_5, window_bounds = array<i64: 2, 512>}]} {
    %c0 = arith.constant 0 : index
    %c0_0 = arith.constant 0 : index
    %0 = vector.load %arg1[%c0, %c0_0] : memref<2x200xbf16, #tpu.memory_space<vmem>>, vector<2x200xbf16>
    %c0_1 = arith.constant 0 : index
    %c0_2 = arith.constant 0 : index
    %1 = vector.load %arg2[%c0_1, %c0_2] : memref<200x512xbf16, #tpu.memory_space<vmem>>, vector<200x512xbf16>
    %cst = arith.constant dense<0.000000e+00> : vector<2x512xf32>
    %2 = tpu.matmul %0, %1, %cst {dimension_numbers = #tpu.dot_dimension_numbers<[1], [0], [0], [1], [0, 0, 1, 1], [], []>} : vector<2x200xbf16>, vector<200x512xbf16>, vector<2x512xf32> -> vector<2x512xf32>
    %c0_3 = arith.constant 0 : index
    %c0_4 = arith.constant 0 : index
    %3 = vector.load %arg3[%c0_3, %c0_4] : memref<1x512xf32, #tpu.memory_space<vmem>>, vector<1x512xf32>
    %4 = vector.broadcast %3 : vector<1x512xf32> to vector<2x512xf32>
    %5 = arith.addf %2, %4 : vector<2x512xf32>
    %6 = arith.negf %5 : vector<2x512xf32>
    %7 = math.exp %6 : vector<2x512xf32>
    %cst_5 = arith.constant 1.000000e+00 : f32
    %8 = vector.broadcast %cst_5 : f32 to vector<2x512xf32>
    %9 = arith.addf %8, %7 : vector<2x512xf32>
    %10 = arith.divf %8, %9 : vector<2x512xf32>
    %11 = arith.mulf %5, %10 : vector<2x512xf32>
    %12 = arith.truncf %11 : vector<2x512xf32> to vector<2x512xbf16>
    %c0_6 = arith.constant 0 : index
    %c0_7 = arith.constant 0 : index
    %13 = vector.load %arg4[%c0_6, %c0_7] : memref<512x512xbf16, #tpu.memory_space<vmem>>, vector<512x512xbf16>
    %cst_8 = arith.constant dense<0.000000e+00> : vector<2x512xf32>
    %14 = tpu.matmul %12, %13, %cst_8 {dimension_numbers = #tpu.dot_dimension_numbers<[1], [0], [0], [1], [0, 0, 1, 1], [], []>} : vector<2x512xbf16>, vector<512x512xbf16>, vector<2x512xf32> -> vector<2x512xf32>
    %c0_9 = arith.constant 0 : index
    %c0_10 = arith.constant 0 : index
    %15 = vector.load %arg5[%c0_9, %c0_10] : memref<1x512xf32, #tpu.memory_space<vmem>>, vector<1x512xf32>
    %16 = vector.broadcast %15 : vector<1x512xf32> to vector<2x512xf32>
    %17 = arith.addf %14, %16 : vector<2x512xf32>
    %18 = arith.negf %17 : vector<2x512xf32>
    %19 = math.exp %18 : vector<2x512xf32>
    %cst_11 = arith.constant 1.000000e+00 : f32
    %20 = vector.broadcast %cst_11 : f32 to vector<2x512xf32>
    %21 = arith.addf %20, %19 : vector<2x512xf32>
    %22 = arith.divf %20, %21 : vector<2x512xf32>
    %23 = arith.mulf %17, %22 : vector<2x512xf32>
    %24 = arith.truncf %23 : vector<2x512xf32> to vector<2x512xbf16>
    %c0_12 = arith.constant 0 : index
    %c0_13 = arith.constant 0 : index
    %25 = vector.load %arg6[%c0_12, %c0_13] : memref<2x512xbf16, #tpu.memory_space<vmem>>, vector<2x512xbf16>
    tpu.vector_store %arg6[%c0_12, %c0_13], %24 {strides = array<i32>} : memref<2x512xbf16, #tpu.memory_space<vmem>>, vector<2x512xbf16>,
    return
  }
  func.func @transform_0(%arg0: i32) -> (i32, i32) {
    %c0_i32 = arith.constant 0 : i32
    %c0_i32_0 = arith.constant 0 : i32
    return %arg0, %c0_i32 : i32, i32
  }
  func.func @transform_1(%arg0: i32) -> (i32, i32) {
    %c0_i32 = arith.constant 0 : i32
    %c0_i32_0 = arith.constant 0 : i32
    %c0_i32_1 = arith.constant 0 : i32
    return %c0_i32, %c0_i32_0 : i32, i32
  }
  func.func @transform_2(%arg0: i32) -> (i32, i32) {
    %c0_i32 = arith.constant 0 : i32
    %c0_i32_0 = arith.constant 0 : i32
    %c0_i32_1 = arith.constant 0 : i32
    return %c0_i32, %c0_i32_0 : i32, i32
  }
  func.func @transform_3(%arg0: i32) -> (i32, i32) {
    %c0_i32 = arith.constant 0 : i32
    %c0_i32_0 = arith.constant 0 : i32
    %c0_i32_1 = arith.constant 0 : i32
    return %c0_i32, %c0_i32_0 : i32, i32
  }
  func.func @transform_4(%arg0: i32) -> (i32, i32) {
    %c0_i32 = arith.constant 0 : i32
    %c0_i32_0 = arith.constant 0 : i32
    %c0_i32_1 = arith.constant 0 : i32
    return %c0_i32, %c0_i32_0 : i32, i32
  }
  func.func @transform_5(%arg0: i32) -> (i32, i32) {
    %c0_i32 = arith.constant 0 : i32
    %c0_i32_0 = arith.constant 0 : i32
    return %arg0, %c0_i32 : i32, i32
  }
}

module attributes {stable_mosaic.version = 11 : i64} {
  func.func @_sound_branch_kernel(%arg0: i32, %arg1: memref<2x32x128xbf16, #tpu.memory_space<vmem>>, %arg2: memref<128x128xbf16, #tpu.memory_space<vmem>>, %arg3: memref<512x128xbf16, #tpu.memory_space<vmem>>, %arg4: memref<512x256xbf16, #tpu.memory_space<vmem>>, %arg5: memref<1x128xf32, #tpu.memory_space<vmem>>, %arg6: memref<1x128xf32, #tpu.memory_space<vmem>>, %arg7: memref<1x128xf32, #tpu.memory_space<vmem>>, %arg8: memref<1x128xf32, #tpu.memory_space<vmem>>, %arg9: memref<1x256xf32, #tpu.memory_space<vmem>>, %arg10: memref<1x256xf32, #tpu.memory_space<vmem>>, %arg11: memref<16x256xbf16, #tpu.memory_space<vmem>>, %arg12: memref<2x9x128xf32, #tpu.memory_space<vmem>>, %arg13: memref<2x9x128xf32, #tpu.memory_space<vmem>>, %arg14: memref<2x9x128xf32, #tpu.memory_space<vmem>>, %arg15: memref<2x9x128xf32, #tpu.memory_space<vmem>>, %arg16: memref<2x9x128xf32, #tpu.memory_space<vmem>>, %arg17: memref<2x9x128xf32, #tpu.memory_space<vmem>>) attributes {dimension_semantics = [#tpu.dimension_semantics<arbitrary>], iteration_bounds = array<i64: 1>, scalar_prefetch = 0 : i64, scratch_operands = 6 : i64, tpu.core_type = #tpu.core_type<tc>, window_params = [{pipeline_mode = #tpu.pipeline_mode<synchronous>, transform_indices = @transform_0, window_bounds = array<i64: 2, 32, 128>}, {pipeline_mode = #tpu.pipeline_mode<synchronous>, transform_indices = @transform_1, window_bounds = array<i64: 128, 128>}, {pipeline_mode = #tpu.pipeline_mode<synchronous>, transform_indices = @transform_2, window_bounds = array<i64: 512, 128>}, {pipeline_mode = #tpu.pipeline_mode<synchronous>, transform_indices = @transform_3, window_bounds = array<i64: 512, 256>}, {pipeline_mode = #tpu.pipeline_mode<synchronous>, transform_indices = @transform_4, window_bounds = array<i64: 1, 128>}, {pipeline_mode = #tpu.pipeline_mode<synchronous>, transform_indices = @transform_5, window_bounds = array<i64: 1, 128>}, {pipeline_mode = #tpu.pipeline_mode<synchronous>, transform_indices = @transform_6, window_bounds = array<i64: 1, 128>}, {pipeline_mode = #tpu.pipeline_mode<synchronous>, transform_indices = @transform_7, window_bounds = array<i64: 1, 128>}, {pipeline_mode = #tpu.pipeline_mode<synchronous>, transform_indices = @transform_8, window_bounds = array<i64: 1, 256>}, {pipeline_mode = #tpu.pipeline_mode<synchronous>, transform_indices = @transform_9, window_bounds = array<i64: 1, 256>}, {pipeline_mode = #tpu.pipeline_mode<synchronous>, transform_indices = @transform_10, window_bounds = array<i64: 16, 256>}]} {
    %c0 = arith.constant 0 : index
    %c0_0 = arith.constant 0 : index
    %c0_1 = arith.constant 0 : index
    %0 = vector.load %arg1[%c0, %c0_0, %c0_1] : memref<2x32x128xbf16, #tpu.memory_space<vmem>>, vector<2x32x128xbf16>
    %1 = vector.shape_cast %0 : vector<2x32x128xbf16> to vector<64x128xbf16>
    %c0_2 = arith.constant 0 : index
    %c0_3 = arith.constant 0 : index
    %2 = vector.load %arg2[%c0_2, %c0_3] : memref<128x128xbf16, #tpu.memory_space<vmem>>, vector<128x128xbf16>
    %cst = arith.constant dense<0.000000e+00> : vector<64x128xf32>
    %3 = tpu.matmul %1, %2, %cst {dimension_numbers = #tpu.dot_dimension_numbers<[1], [0], [0], [1], [0, 0, 1, 1], [], []>} : vector<64x128xbf16>, vector<128x128xbf16>, vector<64x128xf32> -> vector<64x128xf32>
    %c0_4 = arith.constant 0 : index
    %c0_5 = arith.constant 0 : index
    %4 = vector.load %arg5[%c0_4, %c0_5] : memref<1x128xf32, #tpu.memory_space<vmem>>, vector<1x128xf32>
    %c0_6 = arith.constant 0 : index
    %c0_7 = arith.constant 0 : index
    %5 = vector.load %arg6[%c0_6, %c0_7] : memref<1x128xf32, #tpu.memory_space<vmem>>, vector<1x128xf32>
    %cst_8 = arith.constant dense<0.000000e+00> : vector<128xf32>
    %6 = vector.multi_reduction <add>, %3, %cst_8 [0] : vector<64x128xf32> to vector<128xf32>
    %7 = vector.shape_cast %6 : vector<128xf32> to vector<1x128xf32>
    %cst_9 = arith.constant 6.400000e+01 : f32
    %8 = vector.broadcast %cst_9 : f32 to vector<1x128xf32>
    %9 = arith.divf %7, %8 : vector<1x128xf32>
    %10 = arith.mulf %3, %3 : vector<64x128xf32>
    %cst_10 = arith.constant dense<0.000000e+00> : vector<128xf32>
    %11 = vector.multi_reduction <add>, %10, %cst_10 [0] : vector<64x128xf32> to vector<128xf32>
    %12 = vector.shape_cast %11 : vector<128xf32> to vector<1x128xf32>
    %cst_11 = arith.constant 6.400000e+01 : f32
    %13 = vector.broadcast %cst_11 : f32 to vector<1x128xf32>
    %14 = arith.divf %12, %13 : vector<1x128xf32>
    %15 = arith.mulf %9, %9 : vector<1x128xf32>
    %16 = arith.subf %14, %15 : vector<1x128xf32>
    %17 = vector.broadcast %9 : vector<1x128xf32> to vector<64x128xf32>
    %18 = arith.subf %3, %17 : vector<64x128xf32>
    %cst_12 = arith.constant 9.99999974E-6 : f32
    %19 = vector.broadcast %cst_12 : f32 to vector<1x128xf32>
    %20 = arith.addf %16, %19 : vector<1x128xf32>
    %21 = math.rsqrt %20 : vector<1x128xf32>
    %22 = vector.broadcast %21 : vector<1x128xf32> to vector<64x128xf32>
    %23 = arith.mulf %18, %22 : vector<64x128xf32>
    %24 = vector.broadcast %4 : vector<1x128xf32> to vector<64x128xf32>
    %25 = arith.mulf %23, %24 : vector<64x128xf32>
    %26 = vector.broadcast %5 : vector<1x128xf32> to vector<64x128xf32>
    %27 = arith.addf %25, %26 : vector<64x128xf32>
    %cst_13 = arith.constant 0.000000e+00 : f32
    %28 = vector.broadcast %cst_13 : f32 to vector<64x128xf32>
    %29 = arith.maximumf %27, %28 : vector<64x128xf32>
    %30 = vector.shape_cast %29 : vector<64x128xf32> to vector<2x32x128xf32>
    %cst_14 = arith.constant 0.000000e+00 : f32
    %31 = vector.broadcast %cst_14 : f32 to vector<2x9x128xf32>
    %c0_15 = arith.constant 0 : index
    %c0_16 = arith.constant 0 : index
    %c0_17 = arith.constant 0 : index
    %32 = vector.load %arg12[%c0_15, %c0_16, %c0_17] : memref<2x9x128xf32, #tpu.memory_space<vmem>>, vector<2x9x128xf32>
    tpu.vector_store %arg12[%c0_15, %c0_16, %c0_17], %31 {strides = array<i32>} : memref<2x9x128xf32, #tpu.memory_space<vmem>>, vector<2x9x128xf32>,
    %cst_18 = arith.constant 0.000000e+00 : f32
    %33 = vector.broadcast %cst_18 : f32 to vector<2x9x128xf32>
    %c0_19 = arith.constant 0 : index
    %c0_20 = arith.constant 0 : index
    %c0_21 = arith.constant 0 : index
    %34 = vector.load %arg13[%c0_19, %c0_20, %c0_21] : memref<2x9x128xf32, #tpu.memory_space<vmem>>, vector<2x9x128xf32>
    tpu.vector_store %arg13[%c0_19, %c0_20, %c0_21], %33 {strides = array<i32>} : memref<2x9x128xf32, #tpu.memory_space<vmem>>, vector<2x9x128xf32>,
    %cst_22 = arith.constant 0.000000e+00 : f32
    %35 = vector.broadcast %cst_22 : f32 to vector<2x9x128xf32>
    %c0_23 = arith.constant 0 : index
    %c0_24 = arith.constant 0 : index
    %c0_25 = arith.constant 0 : index
    %36 = vector.load %arg14[%c0_23, %c0_24, %c0_25] : memref<2x9x128xf32, #tpu.memory_space<vmem>>, vector<2x9x128xf32>
    tpu.vector_store %arg14[%c0_23, %c0_24, %c0_25], %35 {strides = array<i32>} : memref<2x9x128xf32, #tpu.memory_space<vmem>>, vector<2x9x128xf32>,
    %cst_26 = arith.constant 0.000000e+00 : f32
    %37 = vector.broadcast %cst_26 : f32 to vector<2x9x128xf32>
    %c0_27 = arith.constant 0 : index
    %c0_28 = arith.constant 0 : index
    %c0_29 = arith.constant 0 : index
    %38 = vector.load %arg15[%c0_27, %c0_28, %c0_29] : memref<2x9x128xf32, #tpu.memory_space<vmem>>, vector<2x9x128xf32>
    tpu.vector_store %arg15[%c0_27, %c0_28, %c0_29], %37 {strides = array<i32>} : memref<2x9x128xf32, #tpu.memory_space<vmem>>, vector<2x9x128xf32>,
    %cst_30 = arith.constant 0.000000e+00 : f32
    %39 = vector.broadcast %cst_30 : f32 to vector<2x9x128xf32>
    %c0_31 = arith.constant 0 : index
    %c0_32 = arith.constant 0 : index
    %c0_33 = arith.constant 0 : index
    %40 = vector.load %arg16[%c0_31, %c0_32, %c0_33] : memref<2x9x128xf32, #tpu.memory_space<vmem>>, vector<2x9x128xf32>
    tpu.vector_store %arg16[%c0_31, %c0_32, %c0_33], %39 {strides = array<i32>} : memref<2x9x128xf32, #tpu.memory_space<vmem>>, vector<2x9x128xf32>,
    %cst_34 = arith.constant 0.000000e+00 : f32
    %41 = vector.broadcast %cst_34 : f32 to vector<2x9x128xf32>
    %c0_35 = arith.constant 0 : index
    %c0_36 = arith.constant 0 : index
    %c0_37 = arith.constant 0 : index
    %42 = vector.load %arg17[%c0_35, %c0_36, %c0_37] : memref<2x9x128xf32, #tpu.memory_space<vmem>>, vector<2x9x128xf32>
    tpu.vector_store %arg17[%c0_35, %c0_36, %c0_37], %41 {strides = array<i32>} : memref<2x9x128xf32, #tpu.memory_space<vmem>>, vector<2x9x128xf32>,
    %43 = vector.extract_strided_slice %30 {offsets = [0, 0, 0], sizes = [2, 8, 128], strides = [1, 1, 1]} : vector<2x32x128xf32> to vector<2x8x128xf32>
    %c0_38 = arith.constant 0 : index
    %c1 = arith.constant 1 : index
    %c0_39 = arith.constant 0 : index
    %44 = vector.load %arg12[%c0_38, %c1, %c0_39] : memref<2x9x128xf32, #tpu.memory_space<vmem>>, vector<2x8x128xf32>
    tpu.vector_store %arg12[%c0_38, %c1, %c0_39], %43 {strides = array<i32>} : memref<2x9x128xf32, #tpu.memory_space<vmem>>, vector<2x8x128xf32>,
    %45 = vector.extract_strided_slice %30 {offsets = [0, 8, 0], sizes = [2, 8, 128], strides = [1, 1, 1]} : vector<2x32x128xf32> to vector<2x8x128xf32>
    %c0_40 = arith.constant 0 : index
    %c0_41 = arith.constant 0 : index
    %c0_42 = arith.constant 0 : index
    %46 = vector.load %arg13[%c0_40, %c0_41, %c0_42] : memref<2x9x128xf32, #tpu.memory_space<vmem>>, vector<2x8x128xf32>
    tpu.vector_store %arg13[%c0_40, %c0_41, %c0_42], %45 {strides = array<i32>} : memref<2x9x128xf32, #tpu.memory_space<vmem>>, vector<2x8x128xf32>,
    %47 = vector.extract_strided_slice %30 {offsets = [0, 16, 0], sizes = [2, 8, 128], strides = [1, 1, 1]} : vector<2x32x128xf32> to vector<2x8x128xf32>
    %c0_43 = arith.constant 0 : index
    %c0_44 = arith.constant 0 : index
    %c0_45 = arith.constant 0 : index
    %48 = vector.load %arg14[%c0_43, %c0_44, %c0_45] : memref<2x9x128xf32, #tpu.memory_space<vmem>>, vector<2x8x128xf32>
    tpu.vector_store %arg14[%c0_43, %c0_44, %c0_45], %47 {strides = array<i32>} : memref<2x9x128xf32, #tpu.memory_space<vmem>>, vector<2x8x128xf32>,
    %49 = vector.extract_strided_slice %30 {offsets = [0, 24, 0], sizes = [2, 8, 128], strides = [1, 1, 1]} : vector<2x32x128xf32> to vector<2x8x128xf32>
    %c0_46 = arith.constant 0 : index
    %c0_47 = arith.constant 0 : index
    %c0_48 = arith.constant 0 : index
    %50 = vector.load %arg15[%c0_46, %c0_47, %c0_48] : memref<2x9x128xf32, #tpu.memory_space<vmem>>, vector<2x8x128xf32>
    tpu.vector_store %arg15[%c0_46, %c0_47, %c0_48], %49 {strides = array<i32>} : memref<2x9x128xf32, #tpu.memory_space<vmem>>, vector<2x8x128xf32>,
    %c0_49 = arith.constant 0 : index
    %c0_50 = arith.constant 0 : index
    %51 = vector.load %arg3[%c0_49, %c0_50] : memref<512x128xbf16, #tpu.memory_space<vmem>>, vector<512x128xbf16>
    %c0_51 = arith.constant 0 : index
    %c0_52 = arith.constant 0 : index
    %c0_53 = arith.constant 0 : index
    %52 = vector.load %arg12[%c0_51, %c0_52, %c0_53] : memref<2x9x128xf32, #tpu.memory_space<vmem>>, vector<2x8x128xf32>
    %53 = arith.truncf %52 : vector<2x8x128xf32> to vector<2x8x128xbf16>
    %54 = vector.shape_cast %53 : vector<2x8x128xbf16> to vector<16x128xbf16>
    %55 = vector.extract_strided_slice %51 {offsets = [0, 0], sizes = [128, 128], strides = [1, 1]} : vector<512x128xbf16> to vector<128x128xbf16>
    %cst_54 = arith.constant dense<0.000000e+00> : vector<16x128xf32>
    %56 = tpu.matmul %54, %55, %cst_54 {dimension_numbers = #tpu.dot_dimension_numbers<[1], [0], [0], [1], [0, 0, 1, 1], [], []>} : vector<16x128xbf16>, vector<128x128xbf16>, vector<16x128xf32> -> vector<16x128xf32>
    %c0_55 = arith.constant 0 : index
    %c0_56 = arith.constant 0 : index
    %c0_57 = arith.constant 0 : index
    %57 = vector.load %arg13[%c0_55, %c0_56, %c0_57] : memref<2x9x128xf32, #tpu.memory_space<vmem>>, vector<2x8x128xf32>
    %58 = arith.truncf %57 : vector<2x8x128xf32> to vector<2x8x128xbf16>
    %59 = vector.shape_cast %58 : vector<2x8x128xbf16> to vector<16x128xbf16>
    %60 = vector.extract_strided_slice %51 {offsets = [128, 0], sizes = [128, 128], strides = [1, 1]} : vector<512x128xbf16> to vector<128x128xbf16>
    %cst_58 = arith.constant dense<0.000000e+00> : vector<16x128xf32>
    %61 = tpu.matmul %59, %60, %cst_58 {dimension_numbers = #tpu.dot_dimension_numbers<[1], [0], [0], [1], [0, 0, 1, 1], [], []>} : vector<16x128xbf16>, vector<128x128xbf16>, vector<16x128xf32> -> vector<16x128xf32>
    %62 = arith.addf %56, %61 : vector<16x128xf32>
    %c0_59 = arith.constant 0 : index
    %c0_60 = arith.constant 0 : index
    %c0_61 = arith.constant 0 : index
    %63 = vector.load %arg14[%c0_59, %c0_60, %c0_61] : memref<2x9x128xf32, #tpu.memory_space<vmem>>, vector<2x8x128xf32>
    %64 = arith.truncf %63 : vector<2x8x128xf32> to vector<2x8x128xbf16>
    %65 = vector.shape_cast %64 : vector<2x8x128xbf16> to vector<16x128xbf16>
    %66 = vector.extract_strided_slice %51 {offsets = [256, 0], sizes = [128, 128], strides = [1, 1]} : vector<512x128xbf16> to vector<128x128xbf16>
    %cst_62 = arith.constant dense<0.000000e+00> : vector<16x128xf32>
    %67 = tpu.matmul %65, %66, %cst_62 {dimension_numbers = #tpu.dot_dimension_numbers<[1], [0], [0], [1], [0, 0, 1, 1], [], []>} : vector<16x128xbf16>, vector<128x128xbf16>, vector<16x128xf32> -> vector<16x128xf32>
    %68 = arith.addf %62, %67 : vector<16x128xf32>
    %c0_63 = arith.constant 0 : index
    %c0_64 = arith.constant 0 : index
    %c0_65 = arith.constant 0 : index
    %69 = vector.load %arg15[%c0_63, %c0_64, %c0_65] : memref<2x9x128xf32, #tpu.memory_space<vmem>>, vector<2x8x128xf32>
    %70 = arith.truncf %69 : vector<2x8x128xf32> to vector<2x8x128xbf16>
    %71 = vector.shape_cast %70 : vector<2x8x128xbf16> to vector<16x128xbf16>
    %72 = vector.extract_strided_slice %51 {offsets = [384, 0], sizes = [128, 128], strides = [1, 1]} : vector<512x128xbf16> to vector<128x128xbf16>
    %cst_66 = arith.constant dense<0.000000e+00> : vector<16x128xf32>
    %73 = tpu.matmul %71, %72, %cst_66 {dimension_numbers = #tpu.dot_dimension_numbers<[1], [0], [0], [1], [0, 0, 1, 1], [], []>} : vector<16x128xbf16>, vector<128x128xbf16>, vector<16x128xf32> -> vector<16x128xf32>
    %74 = arith.addf %68, %73 : vector<16x128xf32>
    %c0_67 = arith.constant 0 : index
    %c0_68 = arith.constant 0 : index
    %c0_69 = arith.constant 0 : index
    %75 = vector.load %arg14[%c0_67, %c0_68, %c0_69] : memref<2x9x128xf32, #tpu.memory_space<vmem>>, vector<2x8x128xf32>
    %76 = arith.truncf %75 : vector<2x8x128xf32> to vector<2x8x128xbf16>
    %77 = vector.shape_cast %76 : vector<2x8x128xbf16> to vector<16x128xbf16>
    %78 = vector.extract_strided_slice %51 {offsets = [0, 0], sizes = [128, 128], strides = [1, 1]} : vector<512x128xbf16> to vector<128x128xbf16>
    %cst_70 = arith.constant dense<0.000000e+00> : vector<16x128xf32>
    %79 = tpu.matmul %77, %78, %cst_70 {dimension_numbers = #tpu.dot_dimension_numbers<[1], [0], [0], [1], [0, 0, 1, 1], [], []>} : vector<16x128xbf16>, vector<128x128xbf16>, vector<16x128xf32> -> vector<16x128xf32>
    %c0_71 = arith.constant 0 : index
    %c0_72 = arith.constant 0 : index
    %c0_73 = arith.constant 0 : index
    %80 = vector.load %arg15[%c0_71, %c0_72, %c0_73] : memref<2x9x128xf32, #tpu.memory_space<vmem>>, vector<2x8x128xf32>
    %81 = arith.truncf %80 : vector<2x8x128xf32> to vector<2x8x128xbf16>
    %82 = vector.shape_cast %81 : vector<2x8x128xbf16> to vector<16x128xbf16>
    %83 = vector.extract_strided_slice %51 {offsets = [128, 0], sizes = [128, 128], strides = [1, 1]} : vector<512x128xbf16> to vector<128x128xbf16>
    %cst_74 = arith.constant dense<0.000000e+00> : vector<16x128xf32>
    %84 = tpu.matmul %82, %83, %cst_74 {dimension_numbers = #tpu.dot_dimension_numbers<[1], [0], [0], [1], [0, 0, 1, 1], [], []>} : vector<16x128xbf16>, vector<128x128xbf16>, vector<16x128xf32> -> vector<16x128xf32>
    %85 = arith.addf %79, %84 : vector<16x128xf32>
    %c0_75 = arith.constant 0 : index
    %c1_76 = arith.constant 1 : index
    %c0_77 = arith.constant 0 : index
    %86 = vector.load %arg12[%c0_75, %c1_76, %c0_77] : memref<2x9x128xf32, #tpu.memory_space<vmem>>, vector<2x8x128xf32>
    %87 = arith.truncf %86 : vector<2x8x128xf32> to vector<2x8x128xbf16>
    %88 = vector.shape_cast %87 : vector<2x8x128xbf16> to vector<16x128xbf16>
    %89 = vector.extract_strided_slice %51 {offsets = [256, 0], sizes = [128, 128], strides = [1, 1]} : vector<512x128xbf16> to vector<128x128xbf16>
    %cst_78 = arith.constant dense<0.000000e+00> : vector<16x128xf32>
    %90 = tpu.matmul %88, %89, %cst_78 {dimension_numbers = #tpu.dot_dimension_numbers<[1], [0], [0], [1], [0, 0, 1, 1], [], []>} : vector<16x128xbf16>, vector<128x128xbf16>, vector<16x128xf32> -> vector<16x128xf32>
    %91 = arith.addf %85, %90 : vector<16x128xf32>
    %c0_79 = arith.constant 0 : index
    %c1_80 = arith.constant 1 : index
    %c0_81 = arith.constant 0 : index
    %92 = vector.load %arg13[%c0_79, %c1_80, %c0_81] : memref<2x9x128xf32, #tpu.memory_space<vmem>>, vector<2x8x128xf32>
    %93 = arith.truncf %92 : vector<2x8x128xf32> to vector<2x8x128xbf16>
    %94 = vector.shape_cast %93 : vector<2x8x128xbf16> to vector<16x128xbf16>
    %95 = vector.extract_strided_slice %51 {offsets = [384, 0], sizes = [128, 128], strides = [1, 1]} : vector<512x128xbf16> to vector<128x128xbf16>
    %cst_82 = arith.constant dense<0.000000e+00> : vector<16x128xf32>
    %96 = tpu.matmul %94, %95, %cst_82 {dimension_numbers = #tpu.dot_dimension_numbers<[1], [0], [0], [1], [0, 0, 1, 1], [], []>} : vector<16x128xbf16>, vector<128x128xbf16>, vector<16x128xf32> -> vector<16x128xf32>
    %97 = arith.addf %91, %96 : vector<16x128xf32>
    %98 = tpu.concatenate %74, %97 in 0 : vector<16x128xf32>, vector<16x128xf32> -> vector<32x128xf32>
    %c0_83 = arith.constant 0 : index
    %c0_84 = arith.constant 0 : index
    %99 = vector.load %arg7[%c0_83, %c0_84] : memref<1x128xf32, #tpu.memory_space<vmem>>, vector<1x128xf32>
    %c0_85 = arith.constant 0 : index
    %c0_86 = arith.constant 0 : index
    %100 = vector.load %arg8[%c0_85, %c0_86] : memref<1x128xf32, #tpu.memory_space<vmem>>, vector<1x128xf32>
    %cst_87 = arith.constant dense<0.000000e+00> : vector<128xf32>
    %101 = vector.multi_reduction <add>, %98, %cst_87 [0] : vector<32x128xf32> to vector<128xf32>
    %102 = vector.shape_cast %101 : vector<128xf32> to vector<1x128xf32>
    %cst_88 = arith.constant 3.200000e+01 : f32
    %103 = vector.broadcast %cst_88 : f32 to vector<1x128xf32>
    %104 = arith.divf %102, %103 : vector<1x128xf32>
    %105 = arith.mulf %98, %98 : vector<32x128xf32>
    %cst_89 = arith.constant dense<0.000000e+00> : vector<128xf32>
    %106 = vector.multi_reduction <add>, %105, %cst_89 [0] : vector<32x128xf32> to vector<128xf32>
    %107 = vector.shape_cast %106 : vector<128xf32> to vector<1x128xf32>
    %cst_90 = arith.constant 3.200000e+01 : f32
    %108 = vector.broadcast %cst_90 : f32 to vector<1x128xf32>
    %109 = arith.divf %107, %108 : vector<1x128xf32>
    %110 = arith.mulf %104, %104 : vector<1x128xf32>
    %111 = arith.subf %109, %110 : vector<1x128xf32>
    %112 = vector.broadcast %104 : vector<1x128xf32> to vector<32x128xf32>
    %113 = arith.subf %98, %112 : vector<32x128xf32>
    %cst_91 = arith.constant 9.99999974E-6 : f32
    %114 = vector.broadcast %cst_91 : f32 to vector<1x128xf32>
    %115 = arith.addf %111, %114 : vector<1x128xf32>
    %116 = math.rsqrt %115 : vector<1x128xf32>
    %117 = vector.broadcast %116 : vector<1x128xf32> to vector<32x128xf32>
    %118 = arith.mulf %113, %117 : vector<32x128xf32>
    %119 = vector.broadcast %99 : vector<1x128xf32> to vector<32x128xf32>
    %120 = arith.mulf %118, %119 : vector<32x128xf32>
    %121 = vector.broadcast %100 : vector<1x128xf32> to vector<32x128xf32>
    %122 = arith.addf %120, %121 : vector<32x128xf32>
    %cst_92 = arith.constant 0.000000e+00 : f32
    %123 = vector.broadcast %cst_92 : f32 to vector<32x128xf32>
    %124 = arith.maximumf %122, %123 : vector<32x128xf32>
    %125 = vector.extract_strided_slice %124 {offsets = [0, 0], sizes = [16, 128], strides = [1, 1]} : vector<32x128xf32> to vector<16x128xf32>
    %126 = vector.shape_cast %125 : vector<16x128xf32> to vector<2x8x128xf32>
    %c0_93 = arith.constant 0 : index
    %c0_94 = arith.constant 0 : index
    %c0_95 = arith.constant 0 : index
    %127 = vector.load %arg17[%c0_93, %c0_94, %c0_95] : memref<2x9x128xf32, #tpu.memory_space<vmem>>, vector<2x8x128xf32>
    tpu.vector_store %arg17[%c0_93, %c0_94, %c0_95], %126 {strides = array<i32>} : memref<2x9x128xf32, #tpu.memory_space<vmem>>, vector<2x8x128xf32>,
    %128 = vector.extract_strided_slice %124 {offsets = [16, 0], sizes = [16, 128], strides = [1, 1]} : vector<32x128xf32> to vector<16x128xf32>
    %129 = vector.shape_cast %128 : vector<16x128xf32> to vector<2x8x128xf32>
    %c0_96 = arith.constant 0 : index
    %c1_97 = arith.constant 1 : index
    %c0_98 = arith.constant 0 : index
    %130 = vector.load %arg16[%c0_96, %c1_97, %c0_98] : memref<2x9x128xf32, #tpu.memory_space<vmem>>, vector<2x8x128xf32>
    tpu.vector_store %arg16[%c0_96, %c1_97, %c0_98], %129 {strides = array<i32>} : memref<2x9x128xf32, #tpu.memory_space<vmem>>, vector<2x8x128xf32>,
    %c0_99 = arith.constant 0 : index
    %c0_100 = arith.constant 0 : index
    %131 = vector.load %arg4[%c0_99, %c0_100] : memref<512x256xbf16, #tpu.memory_space<vmem>>, vector<512x256xbf16>
    %c0_101 = arith.constant 0 : index
    %c0_102 = arith.constant 0 : index
    %c0_103 = arith.constant 0 : index
    %132 = vector.load %arg16[%c0_101, %c0_102, %c0_103] : memref<2x9x128xf32, #tpu.memory_space<vmem>>, vector<2x8x128xf32>
    %133 = arith.truncf %132 : vector<2x8x128xf32> to vector<2x8x128xbf16>
    %134 = vector.shape_cast %133 : vector<2x8x128xbf16> to vector<16x128xbf16>
    %135 = vector.extract_strided_slice %131 {offsets = [0, 0], sizes = [128, 256], strides = [1, 1]} : vector<512x256xbf16> to vector<128x256xbf16>
    %cst_104 = arith.constant dense<0.000000e+00> : vector<16x256xf32>
    %136 = tpu.matmul %134, %135, %cst_104 {dimension_numbers = #tpu.dot_dimension_numbers<[1], [0], [0], [1], [0, 0, 1, 1], [], []>} : vector<16x128xbf16>, vector<128x256xbf16>, vector<16x256xf32> -> vector<16x256xf32>
    %c0_105 = arith.constant 0 : index
    %c0_106 = arith.constant 0 : index
    %c0_107 = arith.constant 0 : index
    %137 = vector.load %arg17[%c0_105, %c0_106, %c0_107] : memref<2x9x128xf32, #tpu.memory_space<vmem>>, vector<2x8x128xf32>
    %138 = arith.truncf %137 : vector<2x8x128xf32> to vector<2x8x128xbf16>
    %139 = vector.shape_cast %138 : vector<2x8x128xbf16> to vector<16x128xbf16>
    %140 = vector.extract_strided_slice %131 {offsets = [128, 0], sizes = [128, 256], strides = [1, 1]} : vector<512x256xbf16> to vector<128x256xbf16>
    %cst_108 = arith.constant dense<0.000000e+00> : vector<16x256xf32>
    %141 = tpu.matmul %139, %140, %cst_108 {dimension_numbers = #tpu.dot_dimension_numbers<[1], [0], [0], [1], [0, 0, 1, 1], [], []>} : vector<16x128xbf16>, vector<128x256xbf16>, vector<16x256xf32> -> vector<16x256xf32>
    %142 = arith.addf %136, %141 : vector<16x256xf32>
    %c0_109 = arith.constant 0 : index
    %c1_110 = arith.constant 1 : index
    %c0_111 = arith.constant 0 : index
    %143 = vector.load %arg16[%c0_109, %c1_110, %c0_111] : memref<2x9x128xf32, #tpu.memory_space<vmem>>, vector<2x8x128xf32>
    %144 = arith.truncf %143 : vector<2x8x128xf32> to vector<2x8x128xbf16>
    %145 = vector.shape_cast %144 : vector<2x8x128xbf16> to vector<16x128xbf16>
    %146 = vector.extract_strided_slice %131 {offsets = [256, 0], sizes = [128, 256], strides = [1, 1]} : vector<512x256xbf16> to vector<128x256xbf16>
    %cst_112 = arith.constant dense<0.000000e+00> : vector<16x256xf32>
    %147 = tpu.matmul %145, %146, %cst_112 {dimension_numbers = #tpu.dot_dimension_numbers<[1], [0], [0], [1], [0, 0, 1, 1], [], []>} : vector<16x128xbf16>, vector<128x256xbf16>, vector<16x256xf32> -> vector<16x256xf32>
    %148 = arith.addf %142, %147 : vector<16x256xf32>
    %c0_113 = arith.constant 0 : index
    %c1_114 = arith.constant 1 : index
    %c0_115 = arith.constant 0 : index
    %149 = vector.load %arg17[%c0_113, %c1_114, %c0_115] : memref<2x9x128xf32, #tpu.memory_space<vmem>>, vector<2x8x128xf32>
    %150 = arith.truncf %149 : vector<2x8x128xf32> to vector<2x8x128xbf16>
    %151 = vector.shape_cast %150 : vector<2x8x128xbf16> to vector<16x128xbf16>
    %152 = vector.extract_strided_slice %131 {offsets = [384, 0], sizes = [128, 256], strides = [1, 1]} : vector<512x256xbf16> to vector<128x256xbf16>
    %cst_116 = arith.constant dense<0.000000e+00> : vector<16x256xf32>
    %153 = tpu.matmul %151, %152, %cst_116 {dimension_numbers = #tpu.dot_dimension_numbers<[1], [0], [0], [1], [0, 0, 1, 1], [], []>} : vector<16x128xbf16>, vector<128x256xbf16>, vector<16x256xf32> -> vector<16x256xf32>
    %154 = arith.addf %148, %153 : vector<16x256xf32>
    %c0_117 = arith.constant 0 : index
    %c0_118 = arith.constant 0 : index
    %155 = vector.load %arg9[%c0_117, %c0_118] : memref<1x256xf32, #tpu.memory_space<vmem>>, vector<1x256xf32>
    %c0_119 = arith.constant 0 : index
    %c0_120 = arith.constant 0 : index
    %156 = vector.load %arg10[%c0_119, %c0_120] : memref<1x256xf32, #tpu.memory_space<vmem>>, vector<1x256xf32>
    %cst_121 = arith.constant dense<0.000000e+00> : vector<256xf32>
    %157 = vector.multi_reduction <add>, %154, %cst_121 [0] : vector<16x256xf32> to vector<256xf32>
    %158 = vector.shape_cast %157 : vector<256xf32> to vector<1x256xf32>
    %cst_122 = arith.constant 1.600000e+01 : f32
    %159 = vector.broadcast %cst_122 : f32 to vector<1x256xf32>
    %160 = arith.divf %158, %159 : vector<1x256xf32>
    %161 = arith.mulf %154, %154 : vector<16x256xf32>
    %cst_123 = arith.constant dense<0.000000e+00> : vector<256xf32>
    %162 = vector.multi_reduction <add>, %161, %cst_123 [0] : vector<16x256xf32> to vector<256xf32>
    %163 = vector.shape_cast %162 : vector<256xf32> to vector<1x256xf32>
    %cst_124 = arith.constant 1.600000e+01 : f32
    %164 = vector.broadcast %cst_124 : f32 to vector<1x256xf32>
    %165 = arith.divf %163, %164 : vector<1x256xf32>
    %166 = arith.mulf %160, %160 : vector<1x256xf32>
    %167 = arith.subf %165, %166 : vector<1x256xf32>
    %168 = vector.broadcast %160 : vector<1x256xf32> to vector<16x256xf32>
    %169 = arith.subf %154, %168 : vector<16x256xf32>
    %cst_125 = arith.constant 9.99999974E-6 : f32
    %170 = vector.broadcast %cst_125 : f32 to vector<1x256xf32>
    %171 = arith.addf %167, %170 : vector<1x256xf32>
    %172 = math.rsqrt %171 : vector<1x256xf32>
    %173 = vector.broadcast %172 : vector<1x256xf32> to vector<16x256xf32>
    %174 = arith.mulf %169, %173 : vector<16x256xf32>
    %175 = vector.broadcast %155 : vector<1x256xf32> to vector<16x256xf32>
    %176 = arith.mulf %174, %175 : vector<16x256xf32>
    %177 = vector.broadcast %156 : vector<1x256xf32> to vector<16x256xf32>
    %178 = arith.addf %176, %177 : vector<16x256xf32>
    %cst_126 = arith.constant 0.000000e+00 : f32
    %179 = vector.broadcast %cst_126 : f32 to vector<16x256xf32>
    %180 = arith.maximumf %178, %179 : vector<16x256xf32>
    %181 = arith.truncf %180 : vector<16x256xf32> to vector<16x256xbf16>
    %c0_127 = arith.constant 0 : index
    %c0_128 = arith.constant 0 : index
    %182 = vector.load %arg11[%c0_127, %c0_128] : memref<16x256xbf16, #tpu.memory_space<vmem>>, vector<16x256xbf16>
    tpu.vector_store %arg11[%c0_127, %c0_128], %181 {strides = array<i32>} : memref<16x256xbf16, #tpu.memory_space<vmem>>, vector<16x256xbf16>,
    return
  }
  func.func @transform_0(%arg0: i32) -> (i32, i32, i32) {
    %c0_i32 = arith.constant 0 : i32
    %c0_i32_0 = arith.constant 0 : i32
    %c0_i32_1 = arith.constant 0 : i32
    %c0_i32_2 = arith.constant 0 : i32
    return %c0_i32, %c0_i32_0, %c0_i32_1 : i32, i32, i32
  }
  func.func @transform_1(%arg0: i32) -> (i32, i32) {
    %c0_i32 = arith.constant 0 : i32
    %c0_i32_0 = arith.constant 0 : i32
    %c0_i32_1 = arith.constant 0 : i32
    return %c0_i32, %c0_i32_0 : i32, i32
  }
  func.func @transform_2(%arg0: i32) -> (i32, i32) {
    %c0_i32 = arith.constant 0 : i32
    %c0_i32_0 = arith.constant 0 : i32
    %c0_i32_1 = arith.constant 0 : i32
    return %c0_i32, %c0_i32_0 : i32, i32
  }
  func.func @transform_3(%arg0: i32) -> (i32, i32) {
    %c0_i32 = arith.constant 0 : i32
    %c0_i32_0 = arith.constant 0 : i32
    %c0_i32_1 = arith.constant 0 : i32
    return %c0_i32, %c0_i32_0 : i32, i32
  }
  func.func @transform_4(%arg0: i32) -> (i32, i32) {
    %c0_i32 = arith.constant 0 : i32
    %c0_i32_0 = arith.constant 0 : i32
    %c0_i32_1 = arith.constant 0 : i32
    return %c0_i32, %c0_i32_0 : i32, i32
  }
  func.func @transform_5(%arg0: i32) -> (i32, i32) {
    %c0_i32 = arith.constant 0 : i32
    %c0_i32_0 = arith.constant 0 : i32
    %c0_i32_1 = arith.constant 0 : i32
    return %c0_i32, %c0_i32_0 : i32, i32
  }
  func.func @transform_6(%arg0: i32) -> (i32, i32) {
    %c0_i32 = arith.constant 0 : i32
    %c0_i32_0 = arith.constant 0 : i32
    %c0_i32_1 = arith.constant 0 : i32
    return %c0_i32, %c0_i32_0 : i32, i32
  }
  func.func @transform_7(%arg0: i32) -> (i32, i32) {
    %c0_i32 = arith.constant 0 : i32
    %c0_i32_0 = arith.constant 0 : i32
    %c0_i32_1 = arith.constant 0 : i32
    return %c0_i32, %c0_i32_0 : i32, i32
  }
  func.func @transform_8(%arg0: i32) -> (i32, i32) {
    %c0_i32 = arith.constant 0 : i32
    %c0_i32_0 = arith.constant 0 : i32
    %c0_i32_1 = arith.constant 0 : i32
    return %c0_i32, %c0_i32_0 : i32, i32
  }
  func.func @transform_9(%arg0: i32) -> (i32, i32) {
    %c0_i32 = arith.constant 0 : i32
    %c0_i32_0 = arith.constant 0 : i32
    %c0_i32_1 = arith.constant 0 : i32
    return %c0_i32, %c0_i32_0 : i32, i32
  }
  func.func @transform_10(%arg0: i32) -> (i32, i32) {
    %c0_i32 = arith.constant 0 : i32
    %c0_i32_0 = arith.constant 0 : i32
    %c0_i32_1 = arith.constant 0 : i32
    return %c0_i32, %c0_i32_0 : i32, i32
  }
}

module attributes {stable_mosaic.version = 11 : i64} {
  func.func @_img_branch_kernel(%arg0: i32, %arg1: memref<448x16xbf16, #tpu.memory_space<vmem>>, %arg2: memref<16x64xbf16, #tpu.memory_space<vmem>>, %arg3: memref<1024x128xbf16, #tpu.memory_space<vmem>>, %arg4: memref<128x128xbf16, #tpu.memory_space<vmem>>, %arg5: memref<2x9x9x64xf32, #tpu.memory_space<vmem>>, %arg6: memref<2x9x9x64xf32, #tpu.memory_space<vmem>>, %arg7: memref<2x9x9x64xf32, #tpu.memory_space<vmem>>, %arg8: memref<2x9x9x64xf32, #tpu.memory_space<vmem>>) attributes {dimension_semantics = [#tpu.dimension_semantics<parallel>], iteration_bounds = array<i64: 1>, scalar_prefetch = 0 : i64, scratch_operands = 4 : i64, tpu.core_type = #tpu.core_type<tc>, window_params = [{transform_indices = @transform_0, window_bounds = array<i64: 448, 16>}, {pipeline_mode = #tpu.pipeline_mode<synchronous>, transform_indices = @transform_1, window_bounds = array<i64: 16, 64>}, {pipeline_mode = #tpu.pipeline_mode<synchronous>, transform_indices = @transform_2, window_bounds = array<i64: 1024, 128>}, {transform_indices = @transform_3, window_bounds = array<i64: 128, 128>}]} {
    %c0 = arith.constant 0 : index
    %c0_0 = arith.constant 0 : index
    %0 = vector.load %arg1[%c0, %c0_0] : memref<448x16xbf16, #tpu.memory_space<vmem>>, vector<448x16xbf16>
    %c0_1 = arith.constant 0 : index
    %c0_2 = arith.constant 0 : index
    %1 = vector.load %arg2[%c0_1, %c0_2] : memref<16x64xbf16, #tpu.memory_space<vmem>>, vector<16x64xbf16>
    %cst = arith.constant dense<0.000000e+00> : vector<448x64xf32>
    %2 = tpu.matmul %0, %1, %cst {dimension_numbers = #tpu.dot_dimension_numbers<[1], [0], [0], [1], [0, 0, 1, 1], [], []>} : vector<448x16xbf16>, vector<16x64xbf16>, vector<448x64xf32> -> vector<448x64xf32>
    %3 = arith.negf %2 : vector<448x64xf32>
    %4 = math.exp %3 : vector<448x64xf32>
    %cst_3 = arith.constant 1.000000e+00 : f32
    %5 = vector.broadcast %cst_3 : f32 to vector<448x64xf32>
    %6 = arith.addf %5, %4 : vector<448x64xf32>
    %7 = arith.divf %5, %6 : vector<448x64xf32>
    %8 = arith.mulf %2, %7 : vector<448x64xf32>
    %9 = vector.shape_cast %8 : vector<448x64xf32> to vector<2x224x64xf32>
    %cst_4 = arith.constant 0.000000e+00 : f32
    %10 = vector.broadcast %cst_4 : f32 to vector<2x9x9x64xf32>
    %c0_5 = arith.constant 0 : index
    %c0_6 = arith.constant 0 : index
    %c0_7 = arith.constant 0 : index
    %c0_8 = arith.constant 0 : index
    %11 = vector.load %arg5[%c0_5, %c0_6, %c0_7, %c0_8] : memref<2x9x9x64xf32, #tpu.memory_space<vmem>>, vector<2x9x9x64xf32>
    tpu.vector_store %arg5[%c0_5, %c0_6, %c0_7, %c0_8], %10 {strides = array<i32>} : memref<2x9x9x64xf32, #tpu.memory_space<vmem>>, vector<2x9x9x64xf32>,
    %cst_9 = arith.constant 0.000000e+00 : f32
    %12 = vector.broadcast %cst_9 : f32 to vector<2x9x9x64xf32>
    %c0_10 = arith.constant 0 : index
    %c0_11 = arith.constant 0 : index
    %c0_12 = arith.constant 0 : index
    %c0_13 = arith.constant 0 : index
    %13 = vector.load %arg6[%c0_10, %c0_11, %c0_12, %c0_13] : memref<2x9x9x64xf32, #tpu.memory_space<vmem>>, vector<2x9x9x64xf32>
    tpu.vector_store %arg6[%c0_10, %c0_11, %c0_12, %c0_13], %12 {strides = array<i32>} : memref<2x9x9x64xf32, #tpu.memory_space<vmem>>, vector<2x9x9x64xf32>,
    %cst_14 = arith.constant 0.000000e+00 : f32
    %14 = vector.broadcast %cst_14 : f32 to vector<2x9x9x64xf32>
    %c0_15 = arith.constant 0 : index
    %c0_16 = arith.constant 0 : index
    %c0_17 = arith.constant 0 : index
    %c0_18 = arith.constant 0 : index
    %15 = vector.load %arg7[%c0_15, %c0_16, %c0_17, %c0_18] : memref<2x9x9x64xf32, #tpu.memory_space<vmem>>, vector<2x9x9x64xf32>
    tpu.vector_store %arg7[%c0_15, %c0_16, %c0_17, %c0_18], %14 {strides = array<i32>} : memref<2x9x9x64xf32, #tpu.memory_space<vmem>>, vector<2x9x9x64xf32>,
    %cst_19 = arith.constant 0.000000e+00 : f32
    %16 = vector.broadcast %cst_19 : f32 to vector<2x9x9x64xf32>
    %c0_20 = arith.constant 0 : index
    %c0_21 = arith.constant 0 : index
    %c0_22 = arith.constant 0 : index
    %c0_23 = arith.constant 0 : index
    %17 = vector.load %arg8[%c0_20, %c0_21, %c0_22, %c0_23] : memref<2x9x9x64xf32, #tpu.memory_space<vmem>>, vector<2x9x9x64xf32>
    tpu.vector_store %arg8[%c0_20, %c0_21, %c0_22, %c0_23], %16 {strides = array<i32>} : memref<2x9x9x64xf32, #tpu.memory_space<vmem>>, vector<2x9x9x64xf32>,
    %18 = vector.extract_strided_slice %9 {offsets = [0, 0, 0], sizes = [2, 56, 64], strides = [1, 1, 1]} : vector<2x224x64xf32> to vector<2x56x64xf32>
    %19 = vector.shape_cast %18 : vector<2x56x64xf32> to vector<2x7x8x64xf32>
    %20 = vector.extract_strided_slice %19 {offsets = [0, 0, 0, 0], sizes = [2, 7, 7, 64], strides = [1, 1, 1, 1]} : vector<2x7x8x64xf32> to vector<2x7x7x64xf32>
    %c0_24 = arith.constant 0 : index
    %c1 = arith.constant 1 : index
    %c1_25 = arith.constant 1 : index
    %c0_26 = arith.constant 0 : index
    %21 = vector.load %arg5[%c0_24, %c1, %c1_25, %c0_26] : memref<2x9x9x64xf32, #tpu.memory_space<vmem>>, vector<2x7x7x64xf32>
    tpu.vector_store %arg5[%c0_24, %c1, %c1_25, %c0_26], %20 {strides = array<i32>} : memref<2x9x9x64xf32, #tpu.memory_space<vmem>>, vector<2x7x7x64xf32>,
    %22 = vector.extract_strided_slice %9 {offsets = [0, 56, 0], sizes = [2, 56, 64], strides = [1, 1, 1]} : vector<2x224x64xf32> to vector<2x56x64xf32>
    %23 = vector.shape_cast %22 : vector<2x56x64xf32> to vector<2x7x8x64xf32>
    %24 = vector.extract_strided_slice %23 {offsets = [0, 0, 0, 0], sizes = [2, 7, 7, 64], strides = [1, 1, 1, 1]} : vector<2x7x8x64xf32> to vector<2x7x7x64xf32>
    %c0_27 = arith.constant 0 : index
    %c1_28 = arith.constant 1 : index
    %c0_29 = arith.constant 0 : index
    %c0_30 = arith.constant 0 : index
    %25 = vector.load %arg6[%c0_27, %c1_28, %c0_29, %c0_30] : memref<2x9x9x64xf32, #tpu.memory_space<vmem>>, vector<2x7x7x64xf32>
    tpu.vector_store %arg6[%c0_27, %c1_28, %c0_29, %c0_30], %24 {strides = array<i32>} : memref<2x9x9x64xf32, #tpu.memory_space<vmem>>, vector<2x7x7x64xf32>,
    %26 = vector.extract_strided_slice %9 {offsets = [0, 112, 0], sizes = [2, 56, 64], strides = [1, 1, 1]} : vector<2x224x64xf32> to vector<2x56x64xf32>
    %27 = vector.shape_cast %26 : vector<2x56x64xf32> to vector<2x7x8x64xf32>
    %28 = vector.extract_strided_slice %27 {offsets = [0, 0, 0, 0], sizes = [2, 7, 7, 64], strides = [1, 1, 1, 1]} : vector<2x7x8x64xf32> to vector<2x7x7x64xf32>
    %c0_31 = arith.constant 0 : index
    %c0_32 = arith.constant 0 : index
    %c1_33 = arith.constant 1 : index
    %c0_34 = arith.constant 0 : index
    %29 = vector.load %arg7[%c0_31, %c0_32, %c1_33, %c0_34] : memref<2x9x9x64xf32, #tpu.memory_space<vmem>>, vector<2x7x7x64xf32>
    tpu.vector_store %arg7[%c0_31, %c0_32, %c1_33, %c0_34], %28 {strides = array<i32>} : memref<2x9x9x64xf32, #tpu.memory_space<vmem>>, vector<2x7x7x64xf32>,
    %30 = vector.extract_strided_slice %9 {offsets = [0, 168, 0], sizes = [2, 56, 64], strides = [1, 1, 1]} : vector<2x224x64xf32> to vector<2x56x64xf32>
    %31 = vector.shape_cast %30 : vector<2x56x64xf32> to vector<2x7x8x64xf32>
    %32 = vector.extract_strided_slice %31 {offsets = [0, 0, 0, 0], sizes = [2, 7, 7, 64], strides = [1, 1, 1, 1]} : vector<2x7x8x64xf32> to vector<2x7x7x64xf32>
    %c0_35 = arith.constant 0 : index
    %c0_36 = arith.constant 0 : index
    %c0_37 = arith.constant 0 : index
    %c0_38 = arith.constant 0 : index
    %33 = vector.load %arg8[%c0_35, %c0_36, %c0_37, %c0_38] : memref<2x9x9x64xf32, #tpu.memory_space<vmem>>, vector<2x7x7x64xf32>
    tpu.vector_store %arg8[%c0_35, %c0_36, %c0_37, %c0_38], %32 {strides = array<i32>} : memref<2x9x9x64xf32, #tpu.memory_space<vmem>>, vector<2x7x7x64xf32>,
    %c0_39 = arith.constant 0 : index
    %c0_40 = arith.constant 0 : index
    %34 = vector.load %arg3[%c0_39, %c0_40] : memref<1024x128xbf16, #tpu.memory_space<vmem>>, vector<1024x128xbf16>
    %cst_41 = arith.constant 0.000000e+00 : f32
    %35 = vector.broadcast %cst_41 : f32 to vector<128x128xf32>
    %c0_42 = arith.constant 0 : index
    %c0_43 = arith.constant 0 : index
    %c0_44 = arith.constant 0 : index
    %c0_45 = arith.constant 0 : index
    %36 = vector.load %arg5[%c0_42, %c0_43, %c0_44, %c0_45] : memref<2x9x9x64xf32, #tpu.memory_space<vmem>>, vector<2x8x8x64xf32>
    %37 = arith.truncf %36 : vector<2x8x8x64xf32> to vector<2x8x8x64xbf16>
    %38 = vector.shape_cast %37 : vector<2x8x8x64xbf16> to vector<128x64xbf16>
    %39 = vector.extract_strided_slice %34 {offsets = [0, 0], sizes = [64, 128], strides = [1, 1]} : vector<1024x128xbf16> to vector<64x128xbf16>
    %cst_46 = arith.constant dense<0.000000e+00> : vector<128x128xf32>
    %40 = tpu.matmul %38, %39, %cst_46 {dimension_numbers = #tpu.dot_dimension_numbers<[1], [0], [0], [1], [0, 0, 1, 1], [], []>} : vector<128x64xbf16>, vector<64x128xbf16>, vector<128x128xf32> -> vector<128x128xf32>
    %41 = arith.addf %35, %40 : vector<128x128xf32>
    %c0_47 = arith.constant 0 : index
    %c0_48 = arith.constant 0 : index
    %c0_49 = arith.constant 0 : index
    %c0_50 = arith.constant 0 : index
    %42 = vector.load %arg6[%c0_47, %c0_48, %c0_49, %c0_50] : memref<2x9x9x64xf32, #tpu.memory_space<vmem>>, vector<2x8x8x64xf32>
    %43 = arith.truncf %42 : vector<2x8x8x64xf32> to vector<2x8x8x64xbf16>
    %44 = vector.shape_cast %43 : vector<2x8x8x64xbf16> to vector<128x64xbf16>
    %45 = vector.extract_strided_slice %34 {offsets = [64, 0], sizes = [64, 128], strides = [1, 1]} : vector<1024x128xbf16> to vector<64x128xbf16>
    %cst_51 = arith.constant dense<0.000000e+00> : vector<128x128xf32>
    %46 = tpu.matmul %44, %45, %cst_51 {dimension_numbers = #tpu.dot_dimension_numbers<[1], [0], [0], [1], [0, 0, 1, 1], [], []>} : vector<128x64xbf16>, vector<64x128xbf16>, vector<128x128xf32> -> vector<128x128xf32>
    %47 = arith.addf %41, %46 : vector<128x128xf32>
    %c0_52 = arith.constant 0 : index
    %c0_53 = arith.constant 0 : index
    %c1_54 = arith.constant 1 : index
    %c0_55 = arith.constant 0 : index
    %48 = vector.load %arg5[%c0_52, %c0_53, %c1_54, %c0_55] : memref<2x9x9x64xf32, #tpu.memory_space<vmem>>, vector<2x8x8x64xf32>
    %49 = arith.truncf %48 : vector<2x8x8x64xf32> to vector<2x8x8x64xbf16>
    %50 = vector.shape_cast %49 : vector<2x8x8x64xbf16> to vector<128x64xbf16>
    %51 = vector.extract_strided_slice %34 {offsets = [128, 0], sizes = [64, 128], strides = [1, 1]} : vector<1024x128xbf16> to vector<64x128xbf16>
    %cst_56 = arith.constant dense<0.000000e+00> : vector<128x128xf32>
    %52 = tpu.matmul %50, %51, %cst_56 {dimension_numbers = #tpu.dot_dimension_numbers<[1], [0], [0], [1], [0, 0, 1, 1], [], []>} : vector<128x64xbf16>, vector<64x128xbf16>, vector<128x128xf32> -> vector<128x128xf32>
    %53 = arith.addf %47, %52 : vector<128x128xf32>
    %c0_57 = arith.constant 0 : index
    %c0_58 = arith.constant 0 : index
    %c1_59 = arith.constant 1 : index
    %c0_60 = arith.constant 0 : index
    %54 = vector.load %arg6[%c0_57, %c0_58, %c1_59, %c0_60] : memref<2x9x9x64xf32, #tpu.memory_space<vmem>>, vector<2x8x8x64xf32>
    %55 = arith.truncf %54 : vector<2x8x8x64xf32> to vector<2x8x8x64xbf16>
    %56 = vector.shape_cast %55 : vector<2x8x8x64xbf16> to vector<128x64xbf16>
    %57 = vector.extract_strided_slice %34 {offsets = [192, 0], sizes = [64, 128], strides = [1, 1]} : vector<1024x128xbf16> to vector<64x128xbf16>
    %cst_61 = arith.constant dense<0.000000e+00> : vector<128x128xf32>
    %58 = tpu.matmul %56, %57, %cst_61 {dimension_numbers = #tpu.dot_dimension_numbers<[1], [0], [0], [1], [0, 0, 1, 1], [], []>} : vector<128x64xbf16>, vector<64x128xbf16>, vector<128x128xf32> -> vector<128x128xf32>
    %59 = arith.addf %53, %58 : vector<128x128xf32>
    %c0_62 = arith.constant 0 : index
    %c0_63 = arith.constant 0 : index
    %c0_64 = arith.constant 0 : index
    %c0_65 = arith.constant 0 : index
    %60 = vector.load %arg7[%c0_62, %c0_63, %c0_64, %c0_65] : memref<2x9x9x64xf32, #tpu.memory_space<vmem>>, vector<2x8x8x64xf32>
    %61 = arith.truncf %60 : vector<2x8x8x64xf32> to vector<2x8x8x64xbf16>
    %62 = vector.shape_cast %61 : vector<2x8x8x64xbf16> to vector<128x64xbf16>
    %63 = vector.extract_strided_slice %34 {offsets = [256, 0], sizes = [64, 128], strides = [1, 1]} : vector<1024x128xbf16> to vector<64x128xbf16>
    %cst_66 = arith.constant dense<0.000000e+00> : vector<128x128xf32>
    %64 = tpu.matmul %62, %63, %cst_66 {dimension_numbers = #tpu.dot_dimension_numbers<[1], [0], [0], [1], [0, 0, 1, 1], [], []>} : vector<128x64xbf16>, vector<64x128xbf16>, vector<128x128xf32> -> vector<128x128xf32>
    %65 = arith.addf %59, %64 : vector<128x128xf32>
    %c0_67 = arith.constant 0 : index
    %c0_68 = arith.constant 0 : index
    %c0_69 = arith.constant 0 : index
    %c0_70 = arith.constant 0 : index
    %66 = vector.load %arg8[%c0_67, %c0_68, %c0_69, %c0_70] : memref<2x9x9x64xf32, #tpu.memory_space<vmem>>, vector<2x8x8x64xf32>
    %67 = arith.truncf %66 : vector<2x8x8x64xf32> to vector<2x8x8x64xbf16>
    %68 = vector.shape_cast %67 : vector<2x8x8x64xbf16> to vector<128x64xbf16>
    %69 = vector.extract_strided_slice %34 {offsets = [320, 0], sizes = [64, 128], strides = [1, 1]} : vector<1024x128xbf16> to vector<64x128xbf16>
    %cst_71 = arith.constant dense<0.000000e+00> : vector<128x128xf32>
    %70 = tpu.matmul %68, %69, %cst_71 {dimension_numbers = #tpu.dot_dimension_numbers<[1], [0], [0], [1], [0, 0, 1, 1], [], []>} : vector<128x64xbf16>, vector<64x128xbf16>, vector<128x128xf32> -> vector<128x128xf32>
    %71 = arith.addf %65, %70 : vector<128x128xf32>
    %c0_72 = arith.constant 0 : index
    %c0_73 = arith.constant 0 : index
    %c1_74 = arith.constant 1 : index
    %c0_75 = arith.constant 0 : index
    %72 = vector.load %arg7[%c0_72, %c0_73, %c1_74, %c0_75] : memref<2x9x9x64xf32, #tpu.memory_space<vmem>>, vector<2x8x8x64xf32>
    %73 = arith.truncf %72 : vector<2x8x8x64xf32> to vector<2x8x8x64xbf16>
    %74 = vector.shape_cast %73 : vector<2x8x8x64xbf16> to vector<128x64xbf16>
    %75 = vector.extract_strided_slice %34 {offsets = [384, 0], sizes = [64, 128], strides = [1, 1]} : vector<1024x128xbf16> to vector<64x128xbf16>
    %cst_76 = arith.constant dense<0.000000e+00> : vector<128x128xf32>
    %76 = tpu.matmul %74, %75, %cst_76 {dimension_numbers = #tpu.dot_dimension_numbers<[1], [0], [0], [1], [0, 0, 1, 1], [], []>} : vector<128x64xbf16>, vector<64x128xbf16>, vector<128x128xf32> -> vector<128x128xf32>
    %77 = arith.addf %71, %76 : vector<128x128xf32>
    %c0_77 = arith.constant 0 : index
    %c0_78 = arith.constant 0 : index
    %c1_79 = arith.constant 1 : index
    %c0_80 = arith.constant 0 : index
    %78 = vector.load %arg8[%c0_77, %c0_78, %c1_79, %c0_80] : memref<2x9x9x64xf32, #tpu.memory_space<vmem>>, vector<2x8x8x64xf32>
    %79 = arith.truncf %78 : vector<2x8x8x64xf32> to vector<2x8x8x64xbf16>
    %80 = vector.shape_cast %79 : vector<2x8x8x64xbf16> to vector<128x64xbf16>
    %81 = vector.extract_strided_slice %34 {offsets = [448, 0], sizes = [64, 128], strides = [1, 1]} : vector<1024x128xbf16> to vector<64x128xbf16>
    %cst_81 = arith.constant dense<0.000000e+00> : vector<128x128xf32>
    %82 = tpu.matmul %80, %81, %cst_81 {dimension_numbers = #tpu.dot_dimension_numbers<[1], [0], [0], [1], [0, 0, 1, 1], [], []>} : vector<128x64xbf16>, vector<64x128xbf16>, vector<128x128xf32> -> vector<128x128xf32>
    %83 = arith.addf %77, %82 : vector<128x128xf32>
    %c0_82 = arith.constant 0 : index
    %c1_83 = arith.constant 1 : index
    %c0_84 = arith.constant 0 : index
    %c0_85 = arith.constant 0 : index
    %84 = vector.load %arg5[%c0_82, %c1_83, %c0_84, %c0_85] : memref<2x9x9x64xf32, #tpu.memory_space<vmem>>, vector<2x8x8x64xf32>
    %85 = arith.truncf %84 : vector<2x8x8x64xf32> to vector<2x8x8x64xbf16>
    %86 = vector.shape_cast %85 : vector<2x8x8x64xbf16> to vector<128x64xbf16>
    %87 = vector.extract_strided_slice %34 {offsets = [512, 0], sizes = [64, 128], strides = [1, 1]} : vector<1024x128xbf16> to vector<64x128xbf16>
    %cst_86 = arith.constant dense<0.000000e+00> : vector<128x128xf32>
    %88 = tpu.matmul %86, %87, %cst_86 {dimension_numbers = #tpu.dot_dimension_numbers<[1], [0], [0], [1], [0, 0, 1, 1], [], []>} : vector<128x64xbf16>, vector<64x128xbf16>, vector<128x128xf32> -> vector<128x128xf32>
    %89 = arith.addf %83, %88 : vector<128x128xf32>
    %c0_87 = arith.constant 0 : index
    %c1_88 = arith.constant 1 : index
    %c0_89 = arith.constant 0 : index
    %c0_90 = arith.constant 0 : index
    %90 = vector.load %arg6[%c0_87, %c1_88, %c0_89, %c0_90] : memref<2x9x9x64xf32, #tpu.memory_space<vmem>>, vector<2x8x8x64xf32>
    %91 = arith.truncf %90 : vector<2x8x8x64xf32> to vector<2x8x8x64xbf16>
    %92 = vector.shape_cast %91 : vector<2x8x8x64xbf16> to vector<128x64xbf16>
    %93 = vector.extract_strided_slice %34 {offsets = [576, 0], sizes = [64, 128], strides = [1, 1]} : vector<1024x128xbf16> to vector<64x128xbf16>
    %cst_91 = arith.constant dense<0.000000e+00> : vector<128x128xf32>
    %94 = tpu.matmul %92, %93, %cst_91 {dimension_numbers = #tpu.dot_dimension_numbers<[1], [0], [0], [1], [0, 0, 1, 1], [], []>} : vector<128x64xbf16>, vector<64x128xbf16>, vector<128x128xf32> -> vector<128x128xf32>
    %95 = arith.addf %89, %94 : vector<128x128xf32>
    %c0_92 = arith.constant 0 : index
    %c1_93 = arith.constant 1 : index
    %c1_94 = arith.constant 1 : index
    %c0_95 = arith.constant 0 : index
    %96 = vector.load %arg5[%c0_92, %c1_93, %c1_94, %c0_95] : memref<2x9x9x64xf32, #tpu.memory_space<vmem>>, vector<2x8x8x64xf32>
    %97 = arith.truncf %96 : vector<2x8x8x64xf32> to vector<2x8x8x64xbf16>
    %98 = vector.shape_cast %97 : vector<2x8x8x64xbf16> to vector<128x64xbf16>
    %99 = vector.extract_strided_slice %34 {offsets = [640, 0], sizes = [64, 128], strides = [1, 1]} : vector<1024x128xbf16> to vector<64x128xbf16>
    %cst_96 = arith.constant dense<0.000000e+00> : vector<128x128xf32>
    %100 = tpu.matmul %98, %99, %cst_96 {dimension_numbers = #tpu.dot_dimension_numbers<[1], [0], [0], [1], [0, 0, 1, 1], [], []>} : vector<128x64xbf16>, vector<64x128xbf16>, vector<128x128xf32> -> vector<128x128xf32>
    %101 = arith.addf %95, %100 : vector<128x128xf32>
    %c0_97 = arith.constant 0 : index
    %c1_98 = arith.constant 1 : index
    %c1_99 = arith.constant 1 : index
    %c0_100 = arith.constant 0 : index
    %102 = vector.load %arg6[%c0_97, %c1_98, %c1_99, %c0_100] : memref<2x9x9x64xf32, #tpu.memory_space<vmem>>, vector<2x8x8x64xf32>
    %103 = arith.truncf %102 : vector<2x8x8x64xf32> to vector<2x8x8x64xbf16>
    %104 = vector.shape_cast %103 : vector<2x8x8x64xbf16> to vector<128x64xbf16>
    %105 = vector.extract_strided_slice %34 {offsets = [704, 0], sizes = [64, 128], strides = [1, 1]} : vector<1024x128xbf16> to vector<64x128xbf16>
    %cst_101 = arith.constant dense<0.000000e+00> : vector<128x128xf32>
    %106 = tpu.matmul %104, %105, %cst_101 {dimension_numbers = #tpu.dot_dimension_numbers<[1], [0], [0], [1], [0, 0, 1, 1], [], []>} : vector<128x64xbf16>, vector<64x128xbf16>, vector<128x128xf32> -> vector<128x128xf32>
    %107 = arith.addf %101, %106 : vector<128x128xf32>
    %c0_102 = arith.constant 0 : index
    %c1_103 = arith.constant 1 : index
    %c0_104 = arith.constant 0 : index
    %c0_105 = arith.constant 0 : index
    %108 = vector.load %arg7[%c0_102, %c1_103, %c0_104, %c0_105] : memref<2x9x9x64xf32, #tpu.memory_space<vmem>>, vector<2x8x8x64xf32>
    %109 = arith.truncf %108 : vector<2x8x8x64xf32> to vector<2x8x8x64xbf16>
    %110 = vector.shape_cast %109 : vector<2x8x8x64xbf16> to vector<128x64xbf16>
    %111 = vector.extract_strided_slice %34 {offsets = [768, 0], sizes = [64, 128], strides = [1, 1]} : vector<1024x128xbf16> to vector<64x128xbf16>
    %cst_106 = arith.constant dense<0.000000e+00> : vector<128x128xf32>
    %112 = tpu.matmul %110, %111, %cst_106 {dimension_numbers = #tpu.dot_dimension_numbers<[1], [0], [0], [1], [0, 0, 1, 1], [], []>} : vector<128x64xbf16>, vector<64x128xbf16>, vector<128x128xf32> -> vector<128x128xf32>
    %113 = arith.addf %107, %112 : vector<128x128xf32>
    %c0_107 = arith.constant 0 : index
    %c1_108 = arith.constant 1 : index
    %c0_109 = arith.constant 0 : index
    %c0_110 = arith.constant 0 : index
    %114 = vector.load %arg8[%c0_107, %c1_108, %c0_109, %c0_110] : memref<2x9x9x64xf32, #tpu.memory_space<vmem>>, vector<2x8x8x64xf32>
    %115 = arith.truncf %114 : vector<2x8x8x64xf32> to vector<2x8x8x64xbf16>
    %116 = vector.shape_cast %115 : vector<2x8x8x64xbf16> to vector<128x64xbf16>
    %117 = vector.extract_strided_slice %34 {offsets = [832, 0], sizes = [64, 128], strides = [1, 1]} : vector<1024x128xbf16> to vector<64x128xbf16>
    %cst_111 = arith.constant dense<0.000000e+00> : vector<128x128xf32>
    %118 = tpu.matmul %116, %117, %cst_111 {dimension_numbers = #tpu.dot_dimension_numbers<[1], [0], [0], [1], [0, 0, 1, 1], [], []>} : vector<128x64xbf16>, vector<64x128xbf16>, vector<128x128xf32> -> vector<128x128xf32>
    %119 = arith.addf %113, %118 : vector<128x128xf32>
    %c0_112 = arith.constant 0 : index
    %c1_113 = arith.constant 1 : index
    %c1_114 = arith.constant 1 : index
    %c0_115 = arith.constant 0 : index
    %120 = vector.load %arg7[%c0_112, %c1_113, %c1_114, %c0_115] : memref<2x9x9x64xf32, #tpu.memory_space<vmem>>, vector<2x8x8x64xf32>
    %121 = arith.truncf %120 : vector<2x8x8x64xf32> to vector<2x8x8x64xbf16>
    %122 = vector.shape_cast %121 : vector<2x8x8x64xbf16> to vector<128x64xbf16>
    %123 = vector.extract_strided_slice %34 {offsets = [896, 0], sizes = [64, 128], strides = [1, 1]} : vector<1024x128xbf16> to vector<64x128xbf16>
    %cst_116 = arith.constant dense<0.000000e+00> : vector<128x128xf32>
    %124 = tpu.matmul %122, %123, %cst_116 {dimension_numbers = #tpu.dot_dimension_numbers<[1], [0], [0], [1], [0, 0, 1, 1], [], []>} : vector<128x64xbf16>, vector<64x128xbf16>, vector<128x128xf32> -> vector<128x128xf32>
    %125 = arith.addf %119, %124 : vector<128x128xf32>
    %c0_117 = arith.constant 0 : index
    %c1_118 = arith.constant 1 : index
    %c1_119 = arith.constant 1 : index
    %c0_120 = arith.constant 0 : index
    %126 = vector.load %arg8[%c0_117, %c1_118, %c1_119, %c0_120] : memref<2x9x9x64xf32, #tpu.memory_space<vmem>>, vector<2x8x8x64xf32>
    %127 = arith.truncf %126 : vector<2x8x8x64xf32> to vector<2x8x8x64xbf16>
    %128 = vector.shape_cast %127 : vector<2x8x8x64xbf16> to vector<128x64xbf16>
    %129 = vector.extract_strided_slice %34 {offsets = [960, 0], sizes = [64, 128], strides = [1, 1]} : vector<1024x128xbf16> to vector<64x128xbf16>
    %cst_121 = arith.constant dense<0.000000e+00> : vector<128x128xf32>
    %130 = tpu.matmul %128, %129, %cst_121 {dimension_numbers = #tpu.dot_dimension_numbers<[1], [0], [0], [1], [0, 0, 1, 1], [], []>} : vector<128x64xbf16>, vector<64x128xbf16>, vector<128x128xf32> -> vector<128x128xf32>
    %131 = arith.addf %125, %130 : vector<128x128xf32>
    %132 = arith.negf %131 : vector<128x128xf32>
    %133 = math.exp %132 : vector<128x128xf32>
    %cst_122 = arith.constant 1.000000e+00 : f32
    %134 = vector.broadcast %cst_122 : f32 to vector<128x128xf32>
    %135 = arith.addf %134, %133 : vector<128x128xf32>
    %136 = arith.divf %134, %135 : vector<128x128xf32>
    %137 = arith.mulf %131, %136 : vector<128x128xf32>
    %138 = arith.truncf %137 : vector<128x128xf32> to vector<128x128xbf16>
    %c0_123 = arith.constant 0 : index
    %c0_124 = arith.constant 0 : index
    %139 = vector.load %arg4[%c0_123, %c0_124] : memref<128x128xbf16, #tpu.memory_space<vmem>>, vector<128x128xbf16>
    tpu.vector_store %arg4[%c0_123, %c0_124], %138 {strides = array<i32>} : memref<128x128xbf16, #tpu.memory_space<vmem>>, vector<128x128xbf16>,
    return
  }
  func.func @transform_0(%arg0: i32) -> (i32, i32) {
    %c0_i32 = arith.constant 0 : i32
    %c0_i32_0 = arith.constant 0 : i32
    return %arg0, %c0_i32 : i32, i32
  }
  func.func @transform_1(%arg0: i32) -> (i32, i32) {
    %c0_i32 = arith.constant 0 : i32
    %c0_i32_0 = arith.constant 0 : i32
    %c0_i32_1 = arith.constant 0 : i32
    return %c0_i32, %c0_i32_0 : i32, i32
  }
  func.func @transform_2(%arg0: i32) -> (i32, i32) {
    %c0_i32 = arith.constant 0 : i32
    %c0_i32_0 = arith.constant 0 : i32
    %c0_i32_1 = arith.constant 0 : i32
    return %c0_i32, %c0_i32_0 : i32, i32
  }
  func.func @transform_3(%arg0: i32) -> (i32, i32) {
    %c0_i32 = arith.constant 0 : i32
    %c0_i32_0 = arith.constant 0 : i32
    return %arg0, %c0_i32 : i32, i32
  }
}

module attributes {stable_mosaic.version = 11 : i64} {
  func.func @_joint_proj_kernel(%arg0: i32, %arg1: memref<2x8192xbf16, #tpu.memory_space<vmem>>, %arg2: memref<2x2048xbf16, #tpu.memory_space<vmem>>, %arg3: memref<2x512xbf16, #tpu.memory_space<vmem>>, %arg4: memref<2x10xbf16, #tpu.memory_space<vmem>>, %arg5: memref<8192x64xbf16, #tpu.memory_space<vmem>>, %arg6: memref<2048x64xbf16, #tpu.memory_space<vmem>>, %arg7: memref<512x64xbf16, #tpu.memory_space<vmem>>, %arg8: memref<10x64xbf16, #tpu.memory_space<vmem>>, %arg9: memref<1x64xf32, #tpu.memory_space<vmem>>, %arg10: memref<2x64xf32, #tpu.memory_space<vmem>>) attributes {dimension_semantics = [#tpu.dimension_semantics<parallel>], iteration_bounds = array<i64: 1>, scalar_prefetch = 0 : i64, scratch_operands = 0 : i64, tpu.core_type = #tpu.core_type<tc>, window_params = [{transform_indices = @transform_0, window_bounds = array<i64: 2, 8192>}, {transform_indices = @transform_1, window_bounds = array<i64: 2, 2048>}, {transform_indices = @transform_2, window_bounds = array<i64: 2, 512>}, {transform_indices = @transform_3, window_bounds = array<i64: 2, 10>}, {pipeline_mode = #tpu.pipeline_mode<synchronous>, transform_indices = @transform_4, window_bounds = array<i64: 8192, 64>}, {pipeline_mode = #tpu.pipeline_mode<synchronous>, transform_indices = @transform_5, window_bounds = array<i64: 2048, 64>}, {pipeline_mode = #tpu.pipeline_mode<synchronous>, transform_indices = @transform_6, window_bounds = array<i64: 512, 64>}, {pipeline_mode = #tpu.pipeline_mode<synchronous>, transform_indices = @transform_7, window_bounds = array<i64: 10, 64>}, {pipeline_mode = #tpu.pipeline_mode<synchronous>, transform_indices = @transform_8, window_bounds = array<i64: 1, 64>}, {transform_indices = @transform_9, window_bounds = array<i64: 2, 64>}]} {
    %c0 = arith.constant 0 : index
    %c0_0 = arith.constant 0 : index
    %0 = vector.load %arg1[%c0, %c0_0] : memref<2x8192xbf16, #tpu.memory_space<vmem>>, vector<2x8192xbf16>
    %c0_1 = arith.constant 0 : index
    %c0_2 = arith.constant 0 : index
    %1 = vector.load %arg5[%c0_1, %c0_2] : memref<8192x64xbf16, #tpu.memory_space<vmem>>, vector<8192x64xbf16>
    %cst = arith.constant dense<0.000000e+00> : vector<2x64xf32>
    %2 = tpu.matmul %0, %1, %cst {dimension_numbers = #tpu.dot_dimension_numbers<[1], [0], [0], [1], [0, 0, 1, 1], [], []>} : vector<2x8192xbf16>, vector<8192x64xbf16>, vector<2x64xf32> -> vector<2x64xf32>
    %c0_3 = arith.constant 0 : index
    %c0_4 = arith.constant 0 : index
    %3 = vector.load %arg2[%c0_3, %c0_4] : memref<2x2048xbf16, #tpu.memory_space<vmem>>, vector<2x2048xbf16>
    %c0_5 = arith.constant 0 : index
    %c0_6 = arith.constant 0 : index
    %4 = vector.load %arg6[%c0_5, %c0_6] : memref<2048x64xbf16, #tpu.memory_space<vmem>>, vector<2048x64xbf16>
    %cst_7 = arith.constant dense<0.000000e+00> : vector<2x64xf32>
    %5 = tpu.matmul %3, %4, %cst_7 {dimension_numbers = #tpu.dot_dimension_numbers<[1], [0], [0], [1], [0, 0, 1, 1], [], []>} : vector<2x2048xbf16>, vector<2048x64xbf16>, vector<2x64xf32> -> vector<2x64xf32>
    %6 = arith.addf %2, %5 : vector<2x64xf32>
    %c0_8 = arith.constant 0 : index
    %c0_9 = arith.constant 0 : index
    %7 = vector.load %arg3[%c0_8, %c0_9] : memref<2x512xbf16, #tpu.memory_space<vmem>>, vector<2x512xbf16>
    %c0_10 = arith.constant 0 : index
    %c0_11 = arith.constant 0 : index
    %8 = vector.load %arg7[%c0_10, %c0_11] : memref<512x64xbf16, #tpu.memory_space<vmem>>, vector<512x64xbf16>
    %cst_12 = arith.constant dense<0.000000e+00> : vector<2x64xf32>
    %9 = tpu.matmul %7, %8, %cst_12 {dimension_numbers = #tpu.dot_dimension_numbers<[1], [0], [0], [1], [0, 0, 1, 1], [], []>} : vector<2x512xbf16>, vector<512x64xbf16>, vector<2x64xf32> -> vector<2x64xf32>
    %10 = arith.addf %6, %9 : vector<2x64xf32>
    %c0_13 = arith.constant 0 : index
    %c0_14 = arith.constant 0 : index
    %11 = vector.load %arg4[%c0_13, %c0_14] : memref<2x10xbf16, #tpu.memory_space<vmem>>, vector<2x10xbf16>
    %c0_15 = arith.constant 0 : index
    %c0_16 = arith.constant 0 : index
    %12 = vector.load %arg8[%c0_15, %c0_16] : memref<10x64xbf16, #tpu.memory_space<vmem>>, vector<10x64xbf16>
    %cst_17 = arith.constant dense<0.000000e+00> : vector<2x64xf32>
    %13 = tpu.matmul %11, %12, %cst_17 {dimension_numbers = #tpu.dot_dimension_numbers<[1], [0], [0], [1], [0, 0, 1, 1], [], []>} : vector<2x10xbf16>, vector<10x64xbf16>, vector<2x64xf32> -> vector<2x64xf32>
    %14 = arith.addf %10, %13 : vector<2x64xf32>
    %c0_18 = arith.constant 0 : index
    %c0_19 = arith.constant 0 : index
    %15 = vector.load %arg9[%c0_18, %c0_19] : memref<1x64xf32, #tpu.memory_space<vmem>>, vector<1x64xf32>
    %16 = vector.broadcast %15 : vector<1x64xf32> to vector<2x64xf32>
    %17 = arith.addf %14, %16 : vector<2x64xf32>
    %c0_20 = arith.constant 0 : index
    %c0_21 = arith.constant 0 : index
    %18 = vector.load %arg10[%c0_20, %c0_21] : memref<2x64xf32, #tpu.memory_space<vmem>>, vector<2x64xf32>
    tpu.vector_store %arg10[%c0_20, %c0_21], %17 {strides = array<i32>} : memref<2x64xf32, #tpu.memory_space<vmem>>, vector<2x64xf32>,
    return
  }
  func.func @transform_0(%arg0: i32) -> (i32, i32) {
    %c0_i32 = arith.constant 0 : i32
    %c0_i32_0 = arith.constant 0 : i32
    return %arg0, %c0_i32 : i32, i32
  }
  func.func @transform_1(%arg0: i32) -> (i32, i32) {
    %c0_i32 = arith.constant 0 : i32
    %c0_i32_0 = arith.constant 0 : i32
    return %arg0, %c0_i32 : i32, i32
  }
  func.func @transform_2(%arg0: i32) -> (i32, i32) {
    %c0_i32 = arith.constant 0 : i32
    %c0_i32_0 = arith.constant 0 : i32
    return %arg0, %c0_i32 : i32, i32
  }
  func.func @transform_3(%arg0: i32) -> (i32, i32) {
    %c0_i32 = arith.constant 0 : i32
    %c0_i32_0 = arith.constant 0 : i32
    return %arg0, %c0_i32 : i32, i32
  }
  func.func @transform_4(%arg0: i32) -> (i32, i32) {
    %c0_i32 = arith.constant 0 : i32
    %c0_i32_0 = arith.constant 0 : i32
    %c0_i32_1 = arith.constant 0 : i32
    return %c0_i32, %c0_i32_0 : i32, i32
  }
  func.func @transform_5(%arg0: i32) -> (i32, i32) {
    %c0_i32 = arith.constant 0 : i32
    %c0_i32_0 = arith.constant 0 : i32
    %c0_i32_1 = arith.constant 0 : i32
    return %c0_i32, %c0_i32_0 : i32, i32
  }
  func.func @transform_6(%arg0: i32) -> (i32, i32) {
    %c0_i32 = arith.constant 0 : i32
    %c0_i32_0 = arith.constant 0 : i32
    %c0_i32_1 = arith.constant 0 : i32
    return %c0_i32, %c0_i32_0 : i32, i32
  }
  func.func @transform_7(%arg0: i32) -> (i32, i32) {
    %c0_i32 = arith.constant 0 : i32
    %c0_i32_0 = arith.constant 0 : i32
    %c0_i32_1 = arith.constant 0 : i32
    return %c0_i32, %c0_i32_0 : i32, i32
  }
  func.func @transform_8(%arg0: i32) -> (i32, i32) {
    %c0_i32 = arith.constant 0 : i32
    %c0_i32_0 = arith.constant 0 : i32
    %c0_i32_1 = arith.constant 0 : i32
    return %c0_i32, %c0_i32_0 : i32, i32
  }
  func.func @transform_9(%arg0: i32) -> (i32, i32) {
    %c0_i32 = arith.constant 0 : i32
    %c0_i32_0 = arith.constant 0 : i32
    return %arg0, %c0_i32 : i32, i32
  }
}

</mosaic_0001>

<bundles_post_ra>
// kernel: mhd_joint_processor_forward.6
= control target key start
LH: loop header
LB: loop body
LE: loop exit
PB: predicated region body
PF: predicated region fallthrough
CT: control target
= control target key end

     0   :  { %10 = vsyncpa [#allocation3], 0  ;;  %s2254_s0 = inlined_call_operand.vmem [shape: bf16[2,200], index: 0, kind: input, shape index: {}]   ;;  %s2255_s1 = inlined_call_operand.hbm [shape: bf16[200,512], index: 1, kind: input, shape index: {}]   ;;  %s2256_s2 = inlined_call_operand.hbm [shape: f32[1,512], index: 2, kind: input, shape index: {}]   ;;  %s2257_s3 = inlined_call_operand.hbm [shape: bf16[512,512], index: 3, kind: input, shape index: {}]   ;;  %s2258_s4 = inlined_call_operand.hbm [shape: f32[1,512], index: 4, kind: input, shape index: {}]   ;;  %s2259_s5 = inlined_call_operand.vmem [shape: bf16[2,512], index: 5, kind: output, shape index: {}]  }
   0x1   :  { %11 = vsyncpa [#allocation5], 0 }
   0x2   :  { %12 = vsyncpa [#allocation8], 0  ;;  %s2162_s18 = smov [#allocation4]   ;;  %s2163_s20 = smov [#allocation2]  }
   0x3   :  { %s33_s19 = sshll.u32 %s2162_s18, 4  ;;  %s20_s21 = sshll.u32 %s2163_s20, 4  ;;  %s34_s19 = int_to_ptr.vmem [resolvable:$true] %s33_s19  ;;  %s21_s21 = int_to_ptr.vmem [resolvable:$true] %s20_s21 }
   0x4   :  { %s2084_s22 = scalar_lea.vmem %s34_s19, 64  ;;  %p2089_p1 = scmp.lt.s32.totalorder %s34_s19, %s34_s19 }
   0x5   :  { %p2085_p0 = scmp.ne.s32.totalorder %s34_s19, %s2084_s22  ;;  %p2090_p2 = scmp.lt.s32.totalorder %s2084_s22, %s2084_s22 }
   0x7   :  { %p2091_p3 = por %p2090_p2, %p2089_p1 }
   0x9   :  { %p2092_p4 = pnand %p2091_p3, %p2085_p0 }
   0xb   :  { %2095 = shalt.err (!%p2092_p4)
}
   0xc   :  { %36 = dma.hbm_to_vmem [thread:$0]  %s2256_s2, 64, %s34_s19, [#allocation5]  }
   0xd   :  { %s2104_s25 = scalar_lea.vmem %s21_s21, 6400  ;;  %p2109_p6 = scmp.lt.s32.totalorder %s21_s21, %s21_s21 }
   0xe   :  { %p2105_p5 = scmp.ne.s32.totalorder %s21_s21, %s2104_s25  ;;  %p2110_p7 = scmp.lt.s32.totalorder %s2104_s25, %s2104_s25 }
  0x10   :  { %p2111_p8 = por %p2110_p7, %p2109_p6 }
  0x12   :  { %p2112_p9 = pnand %p2111_p8, %p2105_p5 }
  0x14   :  { %2115 = shalt.err (!%p2112_p9)
}
  0x15   :  { %s2164_s26 = smov 256   ;;  %s2165_s27 = smov 16  }
  0x16   :  { %26 = dma.hbm_to_vmem [thread:$0]  %s2255_s1, 6400, %s21_s21, [#allocation3], %s2164_s26, %s2164_s26, %s2165_s27  }
  0x17   :  { %s2166_s30 = smov [#allocation6]   ;;  %s2167_s7 = smov [#allocation7]  }
  0x18   :  { %s42_s6 = sshll.u32 %s2166_s30, 4  ;;  %s55_s8 = sshll.u32 %s2167_s7, 4  ;;  %s43_s6 = int_to_ptr.vmem [resolvable:$true] %s42_s6  ;;  %s56_s8 = int_to_ptr.vmem [resolvable:$true] %s55_s8 }
  0x19   :  { %s2124_s2 = scalar_lea.vmem %s43_s6, 16384  ;;  %p2129_p11 = scmp.lt.s32.totalorder %s43_s6, %s43_s6 }
  0x1a   :  { %p2125_p10 = scmp.ne.s32.totalorder %s43_s6, %s2124_s2  ;;  %p2130_p12 = scmp.lt.s32.totalorder %s2124_s2, %s2124_s2 }
  0x1c   :  { %p2131_p13 = por %p2130_p12, %p2129_p11 }
  0x1e   :  { %p2132_p0 = pnand %p2131_p13, %p2125_p10 }
  0x20   :  { %2135 = shalt.err (!%p2132_p0)
}
  0x21   :  { %48 = dma.hbm_to_vmem [thread:$0]  %s2257_s3, 16384, %s43_s6, [#allocation5], %s2164_s26, %s2164_s26, %s2165_s27  }
  0x22   :  { %s2144_s11 = scalar_lea.vmem %s56_s8, 64  ;;  %p2149_p2 = scmp.lt.s32.totalorder %s56_s8, %s56_s8 }
  0x23   :  { %p2145_p1 = scmp.ne.s32.totalorder %s56_s8, %s2144_s11  ;;  %p2150_p3 = scmp.lt.s32.totalorder %s2144_s11, %s2144_s11 }
  0x25   :  { %p2151_p4 = por %p2150_p3, %p2149_p2 }
  0x27   :  { %p2152_p5 = pnand %p2151_p4, %p2145_p1 }
  0x29   :  { %2155 = shalt.err (!%p2152_p5)
}
  0x2a   :  { %58 = dma.hbm_to_vmem [thread:$0]  %s2258_s4, 64, %s56_s8, [#allocation8]  }
  0x2b   :  { %2156 = dma.done.wait [#allocation3], 6400  }
  0x2c   :  { %2157 = vsyncadd [#allocation3], 4294960896 }
  0x2d   :  { %2158 = dma.done.wait [#allocation5], 16448  }
  0x2e   :  { %2159 = vsyncadd [#allocation5], 4294950848 }
  0x2f   :  { %2160 = dma.done.wait [#allocation8], 64  }
  0x30   :  { %2161 = vsyncadd [#allocation8], 4294967232  ;;  %v1776_v0 = vld [vmem:[#allocation2 + $0xe4] ss:$16 sps:$4 sm:$0xff]   ;;  %v1778_v1 = vld [vmem:[#allocation2 + $0xec] ss:$16 sps:$4 sm:$0xff]   ;;  %v125_v31 = vlaneseq }
  0x31   :  { %436 = vmatprep.subr.bf16.mxu0 %v1776_v0  ;;  %v1780_v2 = vld [vmem:[#allocation2 + $0xe0] ss:$16 sps:$4 sm:$0xff]   ;;  %v1781_v3 = vld [vmem:[#allocation2 + $0xe8] ss:$16 sps:$4 sm:$0xff]   ;;  %477 = vmatprep.subr.bf16.mxu1 %v1778_v1  ;;  %v1782_v4 = vld [vmem:[#allocation2 + $0xc4] ss:$16 sps:$4 sm:$0xff]  }
  0x32   :  { %437 = vmatpush1.bf16.msra.mxu0 %v1780_v2  ;;  %478 = vmatpush1.bf16.msra.mxu1 %v1781_v3  ;;  %v1784_v5 = vld [vmem:[#allocation2 + $0xcc] ss:$16 sps:$4 sm:$0xff]   ;;  %v1786_v6 = vld [vmem:[#allocation2 + $0xc0] ss:$16 sps:$4 sm:$0xff]   ;;  %v1787_v7 = vld [vmem:[#allocation2 + $0xc8] ss:$16 sps:$4 sm:$0xff]  }
  0x33   :  { %438 = vmatprep.subr.bf16.mxu0 %v1782_v4  ;;  %479 = vmatprep.subr.bf16.mxu1 %v1784_v5  ;;  %v1788_v8 = vld [vmem:[#allocation2 + $0xa4] ss:$16 sps:$4 sm:$0xff]   ;;  %v1790_v9 = vld [vmem:[#allocation2 + $0xac] ss:$16 sps:$4 sm:$0xff]   ;;  %v1792_v10 = vld [vmem:[#allocation2 + $0xa0] ss:$16 sps:$4 sm:$0xff]  }
  0x34   :  { %v1793_v11 = vld [vmem:[#allocation2 + $0xa8] ss:$16 sps:$4 sm:$0xff]   ;;  %v1794_v12 = vld [vmem:[#allocation2 + $0x84] ss:$16 sps:$4 sm:$0xff]   ;;  %v1796_v13 = vld [vmem:[#allocation2 + $0x8c] ss:$16 sps:$4 sm:$0xff]  }
  0x35   :  { %v1798_v14 = vld [vmem:[#allocation2 + $0x80] ss:$16 sps:$4 sm:$0xff]   ;;  %v1799_v15 = vld [vmem:[#allocation2 + $0x88] ss:$16 sps:$4 sm:$0xff]   ;;  %v1800_v16 = vld [vmem:[#allocation2 + $0x64] ss:$16 sps:$4 sm:$0xff]  }
  0x36   :  { %439 = vmatpush1.bf16.msra.mxu0 %v1786_v6  ;;  %480 = vmatpush1.bf16.msra.mxu1 %v1787_v7  ;;  %v1802_v17 = vld [vmem:[#allocation2 + $0x6c] ss:$16 sps:$4 sm:$0xff]   ;;  %v1804_v18 = vld [vmem:[#allocation2 + $0x60] ss:$16 sps:$4 sm:$0xff]   ;;  %v1805_v19 = vld [vmem:[#allocation2 + $0x68] ss:$16 sps:$4 sm:$0xff]  }
  0x37   :  { %440 = vmatprep.subr.bf16.mxu0 %v1788_v8  ;;  %481 = vmatprep.subr.bf16.mxu1 %v1790_v9  ;;  %v1806_v20 = vld [vmem:[#allocation2 + $0x44] ss:$16 sps:$4 sm:$0xff]   ;;  %v1808_v21 = vld [vmem:[#allocation2 + $0x4c] ss:$16 sps:$4 sm:$0xff]   ;;  %v1810_v22 = vld [vmem:[#allocation2 + $0x40] ss:$16 sps:$4 sm:$0xff]  }
  0x38   :  { %v1811_v23 = vld [vmem:[#allocation2 + $0x48] ss:$16 sps:$4 sm:$0xff]   ;;  %v1812_v24 = vld [vmem:[#allocation2 + $0x24] ss:$16 sps:$4 sm:$0xff]   ;;  %v1814_v25 = vld [vmem:[#allocation2 + $0x2c] ss:$16 sps:$4 sm:$0xff]  }
  0x39   :  { %v1816_v26 = vld [vmem:[#allocation2 + $0x20] ss:$16 sps:$4 sm:$0xff]   ;;  %v1817_v27 = vld [vmem:[#allocation2 + $0x28] ss:$16 sps:$4 sm:$0xff]   ;;  %v1818_v28 = vld [vmem:[#allocation2 + $0x4] ss:$16 sps:$4 sm:$0xff]  }
  0x3a   :  { %441 = vmatpush1.bf16.msra.mxu0 %v1792_v10  ;;  %482 = vmatpush1.bf16.msra.mxu1 %v1793_v11  ;;  %v1820_v29 = vld [vmem:[#allocation2 + $0xc] ss:$16 sps:$4 sm:$0xff]   ;;  %v121_v30 = vld [vmem:[#allocation2 + $0x180] sm:$0xff]  ;;  %v2168_v32 = vmov 1966171168   ;;  %v2211_v39 = vshrl.u32 %v125_v31, 7 }
  0x3b   :  { %442 = vmatprep.subr.bf16.mxu0 %v1794_v12  ;;  %483 = vmatprep.subr.bf16.mxu1 %v1796_v13  ;;  %v155_v33 = vunpack.c.l.s4 %v2168_v32  ;;  %v122_v34 = vld [vmem:[#allocation2 + $0x188] sm:$0xff]  ;;  %v1822_v35 = vld [vmem:[#allocation2] ss:$16 sps:$4 sm:$0xff]   ;;  %v1622_v37 = vcombine.low %v121_v30, %v121_v30  ;;  %v1623_v41 = vcombine.high %v121_v30, %v121_v30  ;;  %vm423_vm0 = vcmask 1043456   ;;  %v1828_v45 = vld [vmem:[#allocation2 + $0x164] ss:$16 sps:$4 sm:$0xff]  }
  0x3c   :  { %v1823_v36 = vld [vmem:[#allocation2 + $0x8] ss:$16 sps:$4 sm:$0xff]   ;;  %v1624_v38 = vcombine.low %v122_v34, %v122_v34  ;;  %v1625_v42 = vcombine.high %v122_v34, %v122_v34  ;;  %v1830_v46 = vld [vmem:[#allocation2 + $0x16c] ss:$16 sps:$4 sm:$0xff]   ;;  %v1832_v50 = vld [vmem:[#allocation2 + $0x160] ss:$16 sps:$4 sm:$0xff]  }
  0x3d   :  { %v156_v40 = vunpack.c.0.s8 %v155_v33  ;;  %v425_v43 = vsel %vm423_vm0, %v1622_v37, 0  ;;  %v1573_v48 = vld.sshfl [vmem:[%s2254_s0] sm:$0x11 pattern:$0x75316420]  ;;  %vm419_vm1 = vcmask 588800  }
  0x3e   :  { %443 = vmatpush1.bf16.msra.mxu0 %v1798_v14  ;;  %484 = vmatpush1.bf16.msra.mxu1 %v1799_v15  ;;  %v431_v44 = vsel %vm423_vm0, %v1624_v38, 0  ;;  %v153_v49 = vcombine.high %v1573_v48, %v1573_v48  ;;  %v1833_v51 = vld [vmem:[#allocation2 + $0x168] ss:$16 sps:$4 sm:$0xff]   ;;  %v1834_v52 = vld [vmem:[#allocation2 + $0x144] ss:$16 sps:$4 sm:$0xff]  }
  0x3f   :  { %444 = vmatprep.subr.bf16.mxu0 %v1800_v16  ;;  %485 = vmatprep.subr.bf16.mxu1 %v1802_v17  ;;  %v2214_v47 = vsub.s32 %v156_v40, %v2211_v39  ;;  %v1836_v54 = vld [vmem:[#allocation2 + $0x14c] ss:$16 sps:$4 sm:$0xff]   ;;  %v1838_v55 = vld [vmem:[#allocation2 + $0x140] ss:$16 sps:$4 sm:$0xff]   ;;  %v1839_v56 = vld [vmem:[#allocation2 + $0x148] ss:$16 sps:$4 sm:$0xff]  }
  0x40   :  { %v1840_v57 = vld [vmem:[#allocation2 + $0x124] ss:$16 sps:$4 sm:$0xff]   ;;  %v1842_v58 = vld [vmem:[#allocation2 + $0x12c] ss:$16 sps:$4 sm:$0xff]   ;;  %v1844_v59 = vld [vmem:[#allocation2 + $0x120] ss:$16 sps:$4 sm:$0xff]  }
  0x41   :  { %v167_v53 = vrot.slane %v153_v49, %v2214_v47  ;;  %v1845_v60 = vld [vmem:[#allocation2 + $0x128] ss:$16 sps:$4 sm:$0xff]   ;;  %v1846_v61 = vld [vmem:[#allocation2 + $0x104] ss:$16 sps:$4 sm:$0xff]   ;;  %v1848_v62 = vld [vmem:[#allocation2 + $0x10c] ss:$16 sps:$4 sm:$0xff]   ;;  %v160_v5 = vrot.slane %v1573_v48, %v2214_v47 }
  0x42   :  { %445 = vmatpush1.bf16.msra.mxu0 %v1804_v18  ;;  %486 = vmatpush1.bf16.msra.mxu1 %v1805_v19  ;;  %v1850_v63 = vld [vmem:[#allocation2 + $0x100] ss:$16 sps:$4 sm:$0xff]   ;;  %v1851_v0 = vld [vmem:[#allocation2 + $0x108] ss:$16 sps:$4 sm:$0xff]   ;;  %v1852_v3 = vld [vmem:[#allocation6 + $0xe0] ss:$16 sps:$4 sm:$0xff]  }
  0x43   :  { %446 = vmatprep.subr.bf16.mxu0 %v1806_v20  ;;  %487 = vmatprep.subr.bf16.mxu1 %v1808_v21  ;;  %v1854_v1 = vld [vmem:[#allocation6 + $0xe4] ss:$16 sps:$4 sm:$0xff]   ;;  %v1855_v4 = vld [vmem:[#allocation6 + $0x2e0] ss:$16 sps:$4 sm:$0xff]  }
  0x44   :  { %1627 = vmatprep.mubr.msk.bf16.mxu0 %vm419_vm1, %v167_v53  ;;  %1629 = vmatprep.mubr.msk.bf16.mxu1 %vm419_vm1, %v167_v53  ;;  %v1857_v2 = vld [vmem:[#allocation6 + $0x2e4] ss:$16 sps:$4 sm:$0xff]   ;;  %v1858_v8 = vld [vmem:[#allocation6 + $0xc0] ss:$16 sps:$4 sm:$0xff]  }
  0x45   :  { %v1860_v6 = vld [vmem:[#allocation6 + $0xc4] ss:$16 sps:$4 sm:$0xff]   ;;  %v1861_v9 = vld [vmem:[#allocation6 + $0x2c0] ss:$16 sps:$4 sm:$0xff]  }
  0x46   :  { %447 = vmatpush1.bf16.msra.mxu0 %v1810_v22  ;;  %488 = vmatpush1.bf16.msra.mxu1 %v1811_v23  ;;  %v1863_v7 = vld [vmem:[#allocation6 + $0x2c4] ss:$16 sps:$4 sm:$0xff]   ;;  %v1864_v12 = vld [vmem:[#allocation6 + $0xa0] ss:$16 sps:$4 sm:$0xff]  }
  0x47   :  { %448 = vmatprep.subr.bf16.mxu0 %v1812_v24  ;;  %489 = vmatprep.subr.bf16.mxu1 %v1814_v25  ;;  %v1866_v10 = vld [vmem:[#allocation6 + $0xa4] ss:$16 sps:$4 sm:$0xff]   ;;  %v1867_v13 = vld [vmem:[#allocation6 + $0x2a0] ss:$16 sps:$4 sm:$0xff]  }
  0x48   :  { %v1869_v11 = vld [vmem:[#allocation6 + $0x2a4] ss:$16 sps:$4 sm:$0xff]   ;;  %v1870_v16 = vld [vmem:[#allocation6 + $0x80] ss:$16 sps:$4 sm:$0xff]  }
  0x49   :  { %v1872_v14 = vld [vmem:[#allocation6 + $0x84] ss:$16 sps:$4 sm:$0xff]   ;;  %v1873_v17 = vld [vmem:[#allocation6 + $0x280] ss:$16 sps:$4 sm:$0xff]  }
  0x4a   :  { %449 = vmatpush1.bf16.msra.mxu0 %v1816_v26  ;;  %490 = vmatpush1.bf16.msra.mxu1 %v1817_v27  ;;  %v1875_v15 = vld [vmem:[#allocation6 + $0x284] ss:$16 sps:$4 sm:$0xff]   ;;  %v1876_v20 = vld [vmem:[#allocation6 + $0x60] ss:$16 sps:$4 sm:$0xff]  }
  0x4b   :  { %450 = vmatprep.subr.bf16.mxu0 %v1818_v28  ;;  %491 = vmatprep.subr.bf16.mxu1 %v1820_v29  ;;  %v1878_v18 = vld [vmem:[#allocation6 + $0x64] ss:$16 sps:$4 sm:$0xff]   ;;  %v1879_v21 = vld [vmem:[#allocation6 + $0x260] ss:$16 sps:$4 sm:$0xff]  }
  0x4c   :  { %v1881_v19 = vld [vmem:[#allocation6 + $0x264] ss:$16 sps:$4 sm:$0xff]   ;;  %v1882_v24 = vld [vmem:[#allocation6 + $0x40] ss:$16 sps:$4 sm:$0xff]  }
  0x4d   :  { %v1884_v22 = vld [vmem:[#allocation6 + $0x44] ss:$16 sps:$4 sm:$0xff]   ;;  %v1885_v25 = vld [vmem:[#allocation6 + $0x240] ss:$16 sps:$4 sm:$0xff]  }
  0x4e   :  { %451 = vmatpush1.bf16.msra.mxu0 %v1822_v35  ;;  %492 = vmatpush1.bf16.msra.mxu1 %v1823_v36  ;;  %v1887_v23 = vld [vmem:[#allocation6 + $0x244] ss:$16 sps:$4 sm:$0xff]   ;;  %v1888_v28 = vld [vmem:[#allocation6 + $0x20] ss:$16 sps:$4 sm:$0xff]  }
  0x4f   :  { %1626 = vmatprep.subr.msk.bf16.mxu0 %vm423_vm0, %v1623_v41  ;;  %1628 = vmatprep.subr.msk.bf16.mxu1 %vm423_vm0, %v1625_v42  ;;  %v1890_v26 = vld [vmem:[#allocation6 + $0x24] ss:$16 sps:$4 sm:$0xff]   ;;  %v1891_v29 = vld [vmem:[#allocation6 + $0x220] ss:$16 sps:$4 sm:$0xff]  }
  0x50   :  { %v1893_v27 = vld [vmem:[#allocation6 + $0x224] ss:$16 sps:$4 sm:$0xff]   ;;  %v1894_v32 = vld [vmem:[#allocation6] ss:$16 sps:$4 sm:$0xff]  }
  0x51   :  { %v1896_v30 = vld [vmem:[#allocation6 + $0x4] ss:$16 sps:$4 sm:$0xff]   ;;  %v1897_v33 = vld [vmem:[#allocation6 + $0x200] ss:$16 sps:$4 sm:$0xff]  }
  0x52   :  { %459 = vmatpush2.bf16.msra.mxu0 %v425_v43  ;;  %500 = vmatpush2.bf16.msra.mxu1 %v431_v44  ;;  %v1899_v31 = vld [vmem:[#allocation6 + $0x204] ss:$16 sps:$4 sm:$0xff]   ;;  %v1900_v36 = vld [vmem:[#allocation6 + $0x1e0] ss:$16 sps:$4 sm:$0xff]  }
  0x53   :  { %460 = vmatprep.subr.bf16.mxu0 %v1828_v45  ;;  %501 = vmatprep.subr.bf16.mxu1 %v1830_v46  ;;  %v1902_v34 = vld [vmem:[#allocation6 + $0x1e4] ss:$16 sps:$4 sm:$0xff]   ;;  %v1903_v37 = vld [vmem:[#allocation6 + $0x3e0] ss:$16 sps:$4 sm:$0xff]  }
  0x54   :  { %v1905_v35 = vld [vmem:[#allocation6 + $0x3e4] ss:$16 sps:$4 sm:$0xff]   ;;  %v1906_v41 = vld [vmem:[#allocation6 + $0x1c0] ss:$16 sps:$4 sm:$0xff]  }
  0x55   :  { %v1908_v38 = vld [vmem:[#allocation6 + $0x1c4] ss:$16 sps:$4 sm:$0xff]   ;;  %v1909_v42 = vld [vmem:[#allocation6 + $0x3c0] ss:$16 sps:$4 sm:$0xff]  }
  0x56   :  { %461 = vmatpush2.bf16.msra.mxu0 %v1832_v50  ;;  %502 = vmatpush2.bf16.msra.mxu1 %v1833_v51  ;;  %v1911_v40 = vld [vmem:[#allocation6 + $0x3c4] ss:$16 sps:$4 sm:$0xff]   ;;  %v1912_v45 = vld [vmem:[#allocation6 + $0x1a0] ss:$16 sps:$4 sm:$0xff]  }
  0x57   :  { %462 = vmatprep.subr.bf16.mxu0 %v1834_v52  ;;  %503 = vmatprep.subr.bf16.mxu1 %v1836_v54  ;;  %v1914_v43 = vld [vmem:[#allocation6 + $0x1a4] ss:$16 sps:$4 sm:$0xff]   ;;  %v1915_v46 = vld [vmem:[#allocation6 + $0x3a0] ss:$16 sps:$4 sm:$0xff]  }
  0x58   :  { %v1917_v44 = vld [vmem:[#allocation6 + $0x3a4] ss:$16 sps:$4 sm:$0xff]   ;;  %v1918_v50 = vld [vmem:[#allocation6 + $0x180] ss:$16 sps:$4 sm:$0xff]  }
  0x59   :  { %v1920_v48 = vld [vmem:[#allocation6 + $0x184] ss:$16 sps:$4 sm:$0xff]   ;;  %v1921_v51 = vld [vmem:[#allocation6 + $0x380] ss:$16 sps:$4 sm:$0xff]  }
  0x5a   :  { %463 = vmatpush2.bf16.msra.mxu0 %v1838_v55  ;;  %504 = vmatpush2.bf16.msra.mxu1 %v1839_v56  ;;  %v1923_v49 = vld [vmem:[#allocation6 + $0x384] ss:$16 sps:$4 sm:$0xff]   ;;  %v1924_v54 = vld [vmem:[#allocation6 + $0x160] ss:$16 sps:$4 sm:$0xff]  }
  0x5b   :  { %464 = vmatprep.subr.bf16.mxu0 %v1840_v57  ;;  %505 = vmatprep.subr.bf16.mxu1 %v1842_v58  ;;  %v1926_v52 = vld [vmem:[#allocation6 + $0x164] ss:$16 sps:$4 sm:$0xff]   ;;  %v1927_v55 = vld [vmem:[#allocation6 + $0x360] ss:$16 sps:$4 sm:$0xff]  }
  0x5c   :  { %v1929_v53 = vld [vmem:[#allocation6 + $0x364] ss:$16 sps:$4 sm:$0xff]   ;;  %v1930_v58 = vld [vmem:[#allocation6 + $0x140] ss:$16 sps:$4 sm:$0xff]  }
  0x5d   :  { %v1932_v56 = vld [vmem:[#allocation6 + $0x144] ss:$16 sps:$4 sm:$0xff]  }
  0x5e   :  { %465 = vmatpush2.bf16.msra.mxu0 %v1844_v59  ;;  %506 = vmatpush2.bf16.msra.mxu1 %v1845_v60  ;;  %v1935_v57 = vld [vmem:[#allocation6 + $0x344] ss:$16 sps:$4 sm:$0xff]   ;;  %v1933_v59 = vld [vmem:[#allocation6 + $0x340] ss:$16 sps:$4 sm:$0xff]  }
  0x5f   :  { %466 = vmatprep.subr.bf16.mxu0 %v1846_v61  ;;  %507 = vmatprep.subr.bf16.mxu1 %v1848_v62  ;;  %v1938_v60 = vld [vmem:[#allocation6 + $0x124] ss:$16 sps:$4 sm:$0xff]   ;;  %v1936_v62 = vld [vmem:[#allocation6 + $0x120] ss:$16 sps:$4 sm:$0xff]  }
  0x60   :  { %v1941_v61 = vld [vmem:[#allocation6 + $0x324] ss:$16 sps:$4 sm:$0xff]  }
  0x62   :  { %467 = vmatpush2.bf16.msra.mxu0 %v1850_v63  ;;  %508 = vmatpush2.bf16.msra.mxu1 %v1851_v0  ;;  %v1939_v63 = vld [vmem:[#allocation6 + $0x320] ss:$16 sps:$4 sm:$0xff]   ;;  %v1944_v0 = vld [vmem:[#allocation6 + $0x104] ss:$16 sps:$4 sm:$0xff]  }
  0x63   :  { %1340 = vmatprep.subr.bf16.mxu0 %v1854_v1  ;;  %1381 = vmatprep.subr.bf16.mxu1 %v1857_v2  ;;  %v1947_v1 = vld [vmem:[#allocation6 + $0x304] ss:$16 sps:$4 sm:$0xff]   ;;  %v1942_v2 = vld [vmem:[#allocation6 + $0x100] ss:$16 sps:$4 sm:$0xff]  }
  0x65   :  { %469 = vmatmul.mubr.bf16.vlgmr.msra.gmra.mxu0 %v160_v5  ;;  %510 = vmatmul.mubr.bf16.vlgmr.msra.gmra.mxu1 %v160_v5  ;;  %v1953_v5 = vld [vmem:[#allocation6 + $0x2ec] ss:$16 sps:$4 sm:$0xff]  }
  0x66   :  { %1341 = vmatpush1.bf16.msra.mxu0 %v1852_v3  ;;  %1382 = vmatpush1.bf16.msra.mxu1 %v1855_v4  ;;  %v1945_v3 = vld [vmem:[#allocation6 + $0x300] ss:$16 sps:$4 sm:$0xff]   ;;  %v1950_v4 = vld [vmem:[#allocation6 + $0xec] ss:$16 sps:$4 sm:$0xff]  }
  0x67   :  { %1342 = vmatprep.subr.bf16.mxu0 %v1860_v6  ;;  %1383 = vmatprep.subr.bf16.mxu1 %v1863_v7  ;;  %v127_v6 = vsub.s32 0, %v2211_v39  ;;  %v135_v7 = vsub.s32 2, %v2211_v39 }
  0x6a   :  { %1343 = vmatpush1.bf16.msra.mxu0 %v1858_v8  ;;  %1384 = vmatpush1.bf16.msra.mxu1 %v1861_v9  ;;  %v123_v8 = vld [vmem:[#allocation4] sm:$0xf]  ;;  %v131_v9 = vsub.s32 1, %v2211_v39 }
  0x6b   :  { %1344 = vmatprep.subr.bf16.mxu0 %v1866_v10  ;;  %1385 = vmatprep.subr.bf16.mxu1 %v1869_v11  ;;  %v139_v10 = vsub.s32 3, %v2211_v39  ;;  %v128_v11 = vrot.slane %v123_v8, %v127_v6 }
  0x6e   :  { %1345 = vmatpush1.bf16.msra.mxu0 %v1864_v12  ;;  %1386 = vmatpush1.bf16.msra.mxu1 %v1867_v13  ;;  %v136_v12 = vrot.slane %v123_v8, %v135_v7  ;;  %v132_v13 = vrot.slane %v123_v8, %v131_v9 }
  0x6f   :  { %1346 = vmatprep.subr.bf16.mxu0 %v1872_v14  ;;  %1387 = vmatprep.subr.bf16.mxu1 %v1875_v15  ;;  %v140_v14 = vrot.slane %v123_v8, %v139_v10  ;;  %v1975_v8 = vld [vmem:[#allocation6 + $0x268] ss:$16 sps:$4 sm:$0xff]  }
  0x72   :  { %1347 = vmatpush1.bf16.msra.mxu0 %v1870_v16  ;;  %1388 = vmatpush1.bf16.msra.mxu1 %v1873_v17 }
  0x73   :  { %1348 = vmatprep.subr.bf16.mxu0 %v1878_v18  ;;  %1389 = vmatprep.subr.bf16.mxu1 %v1881_v19 }
  0x76   :  { %1349 = vmatpush1.bf16.msra.mxu0 %v1876_v20  ;;  %1390 = vmatpush1.bf16.msra.mxu1 %v1879_v21 }
  0x77   :  { %1350 = vmatprep.subr.bf16.mxu0 %v1884_v22  ;;  %1391 = vmatprep.subr.bf16.mxu1 %v1887_v23 }
  0x7a   :  { %1351 = vmatpush1.bf16.msra.mxu0 %v1882_v24  ;;  %1392 = vmatpush1.bf16.msra.mxu1 %v1885_v25 }
  0x7b   :  { %1352 = vmatprep.subr.bf16.mxu0 %v1890_v26  ;;  %1393 = vmatprep.subr.bf16.mxu1 %v1893_v27 }
  0x7e   :  { %1353 = vmatpush1.bf16.msra.mxu0 %v1888_v28  ;;  %1394 = vmatpush1.bf16.msra.mxu1 %v1891_v29 }
  0x7f   :  { %1354 = vmatprep.subr.bf16.mxu0 %v1896_v30  ;;  %1395 = vmatprep.subr.bf16.mxu1 %v1899_v31 }
  0x82   :  { %1355 = vmatpush1.bf16.msra.mxu0 %v1894_v32  ;;  %1396 = vmatpush1.bf16.msra.mxu1 %v1897_v33 }
  0x83   :  { %1356 = vmatprep.subr.bf16.mxu0 %v1902_v34  ;;  %1397 = vmatprep.subr.bf16.mxu1 %v1905_v35 }
  0x86   :  { %1357 = vmatpush2.bf16.msra.mxu0 %v1900_v36  ;;  %1398 = vmatpush2.bf16.msra.mxu1 %v1903_v37 }
  0x87   :  { %1358 = vmatprep.subr.bf16.mxu0 %v1908_v38  ;;  %1399 = vmatprep.subr.bf16.mxu1 %v1911_v40 }
  0x8a   :  { %1359 = vmatpush2.bf16.msra.mxu0 %v1906_v41  ;;  %1400 = vmatpush2.bf16.msra.mxu1 %v1909_v42 }
  0x8b   :  { %1360 = vmatprep.subr.bf16.mxu0 %v1914_v43  ;;  %1401 = vmatprep.subr.bf16.mxu1 %v1917_v44 }
  0x8e   :  { %1361 = vmatpush2.bf16.msra.mxu0 %v1912_v45  ;;  %1402 = vmatpush2.bf16.msra.mxu1 %v1915_v46 }
  0x8f   :  { %1362 = vmatprep.subr.bf16.mxu0 %v1920_v48  ;;  %1403 = vmatprep.subr.bf16.mxu1 %v1923_v49 }
  0x92   :  { %1363 = vmatpush2.bf16.msra.mxu0 %v1918_v50  ;;  %1404 = vmatpush2.bf16.msra.mxu1 %v1921_v51  ;;  %v1948_v50 = vld [vmem:[#allocation6 + $0xe8] ss:$16 sps:$4 sm:$0xff]  }
  0x93   :  { %1364 = vmatprep.subr.bf16.mxu0 %v1926_v52  ;;  %1405 = vmatprep.subr.bf16.mxu1 %v1929_v53  ;;  %v1951_v53 = vld [vmem:[#allocation6 + $0x2e8] ss:$16 sps:$4 sm:$0xff]  }
  0x96   :  { %1365 = vmatpush2.bf16.msra.mxu0 %v1924_v54  ;;  %1406 = vmatpush2.bf16.msra.mxu1 %v1927_v55  ;;  %v1956_v55 = vld [vmem:[#allocation6 + $0xcc] ss:$16 sps:$4 sm:$0xff]  }
  0x97   :  { %1366 = vmatprep.subr.bf16.mxu0 %v1932_v56  ;;  %1407 = vmatprep.subr.bf16.mxu1 %v1935_v57  ;;  %v1959_v56 = vld [vmem:[#allocation6 + $0x2cc] ss:$16 sps:$4 sm:$0xff]   ;;  %v1954_v57 = vld [vmem:[#allocation6 + $0xc8] ss:$16 sps:$4 sm:$0xff]  }
  0x9a   :  { %1367 = vmatpush2.bf16.msra.mxu0 %v1930_v58  ;;  %1408 = vmatpush2.bf16.msra.mxu1 %v1933_v59  ;;  %v1957_v58 = vld [vmem:[#allocation6 + $0x2c8] ss:$16 sps:$4 sm:$0xff]   ;;  %v1962_v59 = vld [vmem:[#allocation6 + $0xac] ss:$16 sps:$4 sm:$0xff]  }
  0x9b   :  { %1368 = vmatprep.subr.bf16.mxu0 %v1938_v60  ;;  %1409 = vmatprep.subr.bf16.mxu1 %v1941_v61  ;;  %v1965_v60 = vld [vmem:[#allocation6 + $0x2ac] ss:$16 sps:$4 sm:$0xff]   ;;  %v1960_v61 = vld [vmem:[#allocation6 + $0xa8] ss:$16 sps:$4 sm:$0xff]  }
  0x9e   :  { %1369 = vmatpush2.bf16.msra.mxu0 %v1936_v62  ;;  %1410 = vmatpush2.bf16.msra.mxu1 %v1939_v63  ;;  %v1963_v62 = vld [vmem:[#allocation6 + $0x2a8] ss:$16 sps:$4 sm:$0xff]   ;;  %v1968_v63 = vld [vmem:[#allocation6 + $0x8c] ss:$16 sps:$4 sm:$0xff]  }
  0x9f   :  { %1370 = vmatprep.subr.bf16.mxu0 %v1944_v0  ;;  %1411 = vmatprep.subr.bf16.mxu1 %v1947_v1  ;;  %v1971_v0 = vld [vmem:[#allocation6 + $0x28c] ss:$16 sps:$4 sm:$0xff]   ;;  %v1966_v1 = vld [vmem:[#allocation6 + $0x88] ss:$16 sps:$4 sm:$0xff]  }
  0xa2   :  { %1371 = vmatpush2.bf16.msra.mxu0 %v1942_v2  ;;  %1412 = vmatpush2.bf16.msra.mxu1 %v1945_v3  ;;  %v1969_v2 = vld [vmem:[#allocation6 + $0x288] ss:$16 sps:$4 sm:$0xff]   ;;  %v1974_v3 = vld [vmem:[#allocation6 + $0x6c] ss:$16 sps:$4 sm:$0xff]  }
  0xa3   :  { %1422 = vmatprep.subr.bf16.mxu0 %v1950_v4  ;;  %1463 = vmatprep.subr.bf16.mxu1 %v1953_v5  ;;  %v1977_v4 = vld [vmem:[#allocation6 + $0x26c] ss:$16 sps:$4 sm:$0xff]   ;;  %v1972_v5 = vld [vmem:[#allocation6 + $0x68] ss:$16 sps:$4 sm:$0xff]  }
 0x125   :  { %v470_v15 = vpop.f32.mrf.mxu0  ;;  %v511_v16 = vpop.f32.mrf.mxu1 }
 0x126   :  { %v471_v17 = vadd.f32 %v470_v15, %v128_v11  ;;  %v512_v18 = vadd.f32 %v511_v16, %v136_v12  ;;  %v1980_v11 = vld [vmem:[#allocation6 + $0x4c] ss:$16 sps:$4 sm:$0xff]  }
 0x127   :  { %v472_v19 = vpop.f32.mrf.mxu0  ;;  %v513_v20 = vpop.f32.mrf.mxu1  ;;  %v1983_v12 = vld [vmem:[#allocation6 + $0x24c] ss:$16 sps:$4 sm:$0xff]  }
 0x128   :  { %v1630_v21 = vmul.f32 -1.442695, %v471_v17  ;;  %v1632_v22 = vmul.f32 -1.442695, %v512_v18  ;;  %v473_v23 = vadd.f32 %v472_v19, %v132_v13  ;;  %v514_v24 = vadd.f32 %v513_v20, %v140_v14  ;;  %v1978_v13 = vld [vmem:[#allocation6 + $0x48] ss:$16 sps:$4 sm:$0xff]  }
 0x129   :  { %v474_v25 = vpop.f32.mrf.mxu0  ;;  %v515_v26 = vpop.f32.mrf.mxu1  ;;  %v1981_v14 = vld [vmem:[#allocation6 + $0x248] ss:$16 sps:$4 sm:$0xff]   ;;  %v1986_v15 = vld [vmem:[#allocation6 + $0x2c] ss:$16 sps:$4 sm:$0xff]  }
 0x12a   :  { %2044 = vpow2.f32 %v1630_v21  ;;  %v1631_v27 = vmul.f32 -1.442695, %v473_v23  ;;  %v1633_v28 = vmul.f32 -1.442695, %v514_v24  ;;  %v1989_v16 = vld [vmem:[#allocation6 + $0x22c] ss:$16 sps:$4 sm:$0xff]  }
 0x12b   :  { %2046 = vpow2.f32 %v1632_v22  ;;  %v475_v29 = vpop.f32.mrf.mxu0  ;;  %v516_v30 = vpop.f32.mrf.mxu1  ;;  %v1992_v19 = vld [vmem:[#allocation6 + $0xc] ss:$16 sps:$4 sm:$0xff]   ;;  %v1990_v21 = vld [vmem:[#allocation6 + $0x8] ss:$16 sps:$4 sm:$0xff]  }
 0x12c   :  { %2048 = vpow2.f32 %v1631_v27  ;;  %v1995_v20 = vld [vmem:[#allocation6 + $0x20c] ss:$16 sps:$4 sm:$0xff]   ;;  %v1993_v22 = vld [vmem:[#allocation6 + $0x208] ss:$16 sps:$4 sm:$0xff]  }
 0x12d   :  { %2050 = vpow2.f32 %v1633_v28  ;;  %v1996_v25 = vld [vmem:[#allocation6 + $0x1e8] ss:$16 sps:$4 sm:$0xff]   ;;  %v2004_v27 = vld [vmem:[#allocation6 + $0x1cc] ss:$16 sps:$4 sm:$0xff]  }
 0x12e   :  { %v1999_v26 = vld [vmem:[#allocation6 + $0x3e8] ss:$16 sps:$4 sm:$0xff]   ;;  %v2007_v28 = vld [vmem:[#allocation6 + $0x3cc] ss:$16 sps:$4 sm:$0xff]  }
 0x12f   :  { %v2002_v29 = vld [vmem:[#allocation6 + $0x1c8] ss:$16 sps:$4 sm:$0xff]  }
 0x130   :  { %v2005_v30 = vld [vmem:[#allocation6 + $0x3c8] ss:$16 sps:$4 sm:$0xff]  }
 0x137   :  { %v2045_v31 = vpop.eup %2044 }
 0x138   :  { %v2047_v32 = vpop.eup %2046  ;;  %v530_v33 = vadd.f32 1.0, %v2045_v31  ;;  %v2010_v31 = vld [vmem:[#allocation6 + $0x1ac] ss:$16 sps:$4 sm:$0xff]  }
 0x139   :  { %v2049_v34 = vpop.eup %2048  ;;  %v532_v35 = vadd.f32 1.0, %v2047_v32  ;;  %v2013_v32 = vld [vmem:[#allocation6 + $0x3ac] ss:$16 sps:$4 sm:$0xff]  }
 0x13a   :  { %v2051_v36 = vpop.eup %2050  ;;  %2052 = vrcp.f32 %v530_v33  ;;  %v531_v37 = vadd.f32 1.0, %v2049_v34  ;;  %v2008_v33 = vld [vmem:[#allocation6 + $0x1a8] ss:$16 sps:$4 sm:$0xff]  }
 0x13b   :  { %2054 = vrcp.f32 %v532_v35  ;;  %v533_v38 = vadd.f32 1.0, %v2051_v36  ;;  %v2011_v34 = vld [vmem:[#allocation6 + $0x3a8] ss:$16 sps:$4 sm:$0xff]   ;;  %v2016_v35 = vld [vmem:[#allocation6 + $0x18c] ss:$16 sps:$4 sm:$0xff]  }
 0x13c   :  { %2056 = vrcp.f32 %v531_v37  ;;  %v2019_v36 = vld [vmem:[#allocation6 + $0x38c] ss:$16 sps:$4 sm:$0xff]   ;;  %v2014_v37 = vld [vmem:[#allocation6 + $0x188] ss:$16 sps:$4 sm:$0xff]  }
 0x13d   :  { %2058 = vrcp.f32 %v533_v38  ;;  %v2017_v38 = vld [vmem:[#allocation6 + $0x388] ss:$16 sps:$4 sm:$0xff]  }
 0x147   :  { %v2053_v40 = vpop.eup %2052 }
 0x148   :  { %v2055_v41 = vpop.eup %2054  ;;  %v542_v43 = vmul.f32 %v2053_v40, %v471_v17  ;;  %v1984_v17 = vld [vmem:[#allocation6 + $0x28] ss:$16 sps:$4 sm:$0xff]   ;;  %v2022_v40 = vld [vmem:[#allocation6 + $0x16c] ss:$16 sps:$4 sm:$0xff]  }
 0x149   :  { %v2057_v42 = vpop.eup %2056  ;;  %v544_v45 = vmul.f32 %v2055_v41, %v512_v18  ;;  %v1987_v18 = vld [vmem:[#allocation6 + $0x228] ss:$16 sps:$4 sm:$0xff]   ;;  %v2025_v41 = vld [vmem:[#allocation6 + $0x36c] ss:$16 sps:$4 sm:$0xff]  }
 0x14a   :  { %v2059_v44 = vpop.eup %2058  ;;  %v543_v46 = vmul.f32 %v2057_v42, %v473_v23  ;;  %v2233_v51 = vpack.c.bf16 %v542_v43, %v542_v43  ;;  %v1998_v23 = vld [vmem:[#allocation6 + $0x1ec] ss:$16 sps:$4 sm:$0xff]   ;;  %v2020_v42 = vld [vmem:[#allocation6 + $0x168] ss:$16 sps:$4 sm:$0xff]  }
 0x14b   :  { %v545_v48 = vmul.f32 %v2059_v44, %v514_v24  ;;  %v2235_v54 = vpack.c.bf16 %v544_v45, %v544_v45  ;;  %v2001_v24 = vld [vmem:[#allocation6 + $0x3ec] ss:$16 sps:$4 sm:$0xff]   ;;  %v2023_v43 = vld [vmem:[#allocation6 + $0x368] ss:$16 sps:$4 sm:$0xff]  }
 0x14c   :  { %v547_v49 = vpack.c.bf16 %v543_v46, %v543_v46  ;;  %v2028_v44 = vld [vmem:[#allocation6 + $0x14c] ss:$16 sps:$4 sm:$0xff]   ;;  %v2026_v46 = vld [vmem:[#allocation6 + $0x148] ss:$16 sps:$4 sm:$0xff]  }
 0x14d   :  { %v549_v52 = vpack.c.bf16 %v545_v48, %v545_v48  ;;  %v2031_v45 = vld [vmem:[#allocation6 + $0x34c] ss:$16 sps:$4 sm:$0xff]   ;;  %v2029_v48 = vld [vmem:[#allocation6 + $0x348] ss:$16 sps:$4 sm:$0xff]  }
 0x14e   :  { %1372 = vmatprep.mubr.bf16.mxu0 %v547_v49 }
 0x14f   :  { %1413 = vmatprep.mubr.bf16.mxu1 %v549_v52  ;;  %1373 = vmatmul.mubr.bf16.vlgmr.msra.gmra.mxu0 %v2233_v51 }
 0x150   :  { %1414 = vmatmul.mubr.bf16.vlgmr.msra.gmra.mxu1 %v2235_v54  ;;  %1423 = vmatpush1.bf16.msra.mxu0 %v1948_v50  ;;  %v2037_v50 = vld [vmem:[#allocation6 + $0x32c] ss:$16 sps:$4 sm:$0xff]  }
 0x151   :  { %1464 = vmatpush1.bf16.msra.mxu1 %v1951_v53  ;;  %1454 = vmatprep.mubr.bf16.mxu0 %v547_v49  ;;  %v2034_v49 = vld [vmem:[#allocation6 + $0x12c] ss:$16 sps:$4 sm:$0xff]   ;;  %v2035_v53 = vld [vmem:[#allocation6 + $0x328] ss:$16 sps:$4 sm:$0xff]  }
 0x152   :  { %1495 = vmatprep.mubr.bf16.mxu1 %v549_v52  ;;  %1424 = vmatprep.subr.bf16.mxu0 %v1956_v55  ;;  %v2032_v52 = vld [vmem:[#allocation6 + $0x128] ss:$16 sps:$4 sm:$0xff]   ;;  %v2040_v55 = vld [vmem:[#allocation6 + $0x10c] ss:$16 sps:$4 sm:$0xff]  }
 0x153   :  { %1465 = vmatprep.subr.bf16.mxu1 %v1959_v56  ;;  %v2043_v56 = vld [vmem:[#allocation6 + $0x30c] ss:$16 sps:$4 sm:$0xff]  }
 0x154   :  { %1425 = vmatpush1.bf16.msra.mxu0 %v1954_v57  ;;  %v2038_v57 = vld [vmem:[#allocation6 + $0x108] ss:$16 sps:$4 sm:$0xff]  }
 0x155   :  { %1466 = vmatpush1.bf16.msra.mxu1 %v1957_v58  ;;  %1426 = vmatprep.subr.bf16.mxu0 %v1962_v59  ;;  %v2041_v58 = vld [vmem:[#allocation6 + $0x308] ss:$16 sps:$4 sm:$0xff]   ;;  %v678_v59 = vld [vmem:[#allocation7] sm:$0xf] }
 0x156   :  { %1467 = vmatprep.subr.bf16.mxu1 %v1965_v60  ;;  %v683_v60 = vrot.slane %v678_v59, %v127_v6 }
 0x158   :  { %1427 = vmatpush1.bf16.msra.mxu0 %v1960_v61  ;;  %v687_v61 = vrot.slane %v678_v59, %v131_v9 }
 0x159   :  { %1468 = vmatpush1.bf16.msra.mxu1 %v1963_v62  ;;  %1428 = vmatprep.subr.bf16.mxu0 %v1968_v63 }
 0x15a   :  { %1469 = vmatprep.subr.bf16.mxu1 %v1971_v0 }
 0x15c   :  { %1429 = vmatpush1.bf16.msra.mxu0 %v1966_v1 }
 0x15d   :  { %1470 = vmatpush1.bf16.msra.mxu1 %v1969_v2  ;;  %1430 = vmatprep.subr.bf16.mxu0 %v1974_v3 }
 0x15e   :  { %1471 = vmatprep.subr.bf16.mxu1 %v1977_v4 }
 0x160   :  { %1431 = vmatpush1.bf16.msra.mxu0 %v1972_v5 }
 0x161   :  { %1472 = vmatpush1.bf16.msra.mxu1 %v1975_v8  ;;  %1432 = vmatprep.subr.bf16.mxu0 %v1980_v11 }
 0x162   :  { %1473 = vmatprep.subr.bf16.mxu1 %v1983_v12 }
 0x164   :  { %1433 = vmatpush1.bf16.msra.mxu0 %v1978_v13 }
 0x165   :  { %1474 = vmatpush1.bf16.msra.mxu1 %v1981_v14  ;;  %1434 = vmatprep.subr.bf16.mxu0 %v1986_v15 }
 0x166   :  { %1475 = vmatprep.subr.bf16.mxu1 %v1989_v16 }
 0x168   :  { %1435 = vmatpush1.bf16.msra.mxu0 %v1984_v17 }
 0x169   :  { %1476 = vmatpush1.bf16.msra.mxu1 %v1987_v18  ;;  %1436 = vmatprep.subr.bf16.mxu0 %v1992_v19 }
 0x16a   :  { %1477 = vmatprep.subr.bf16.mxu1 %v1995_v20 }
 0x16c   :  { %1437 = vmatpush1.bf16.msra.mxu0 %v1990_v21  ;;  %v691_v21 = vrot.slane %v678_v59, %v135_v7 }
 0x16d   :  { %1478 = vmatpush1.bf16.msra.mxu1 %v1993_v22  ;;  %1438 = vmatprep.subr.bf16.mxu0 %v1998_v23  ;;  %v695_v22 = vrot.slane %v678_v59, %v139_v10 }
 0x16e   :  { %1479 = vmatprep.subr.bf16.mxu1 %v2001_v24 }
 0x170   :  { %1439 = vmatpush2.bf16.msra.mxu0 %v1996_v25 }
 0x171   :  { %1480 = vmatpush2.bf16.msra.mxu1 %v1999_v26  ;;  %1440 = vmatprep.subr.bf16.mxu0 %v2004_v27 }
 0x172   :  { %1481 = vmatprep.subr.bf16.mxu1 %v2007_v28 }
 0x174   :  { %1441 = vmatpush2.bf16.msra.mxu0 %v2002_v29 }
 0x175   :  { %1482 = vmatpush2.bf16.msra.mxu1 %v2005_v30  ;;  %1442 = vmatprep.subr.bf16.mxu0 %v2010_v31 }
 0x176   :  { %1483 = vmatprep.subr.bf16.mxu1 %v2013_v32 }
 0x178   :  { %1443 = vmatpush2.bf16.msra.mxu0 %v2008_v33 }
 0x179   :  { %1484 = vmatpush2.bf16.msra.mxu1 %v2011_v34  ;;  %1444 = vmatprep.subr.bf16.mxu0 %v2016_v35 }
 0x17a   :  { %1485 = vmatprep.subr.bf16.mxu1 %v2019_v36 }
 0x17c   :  { %1445 = vmatpush2.bf16.msra.mxu0 %v2014_v37 }
 0x17d   :  { %1486 = vmatpush2.bf16.msra.mxu1 %v2017_v38  ;;  %1446 = vmatprep.subr.bf16.mxu0 %v2022_v40 }
 0x17e   :  { %1487 = vmatprep.subr.bf16.mxu1 %v2025_v41 }
 0x180   :  { %1447 = vmatpush2.bf16.msra.mxu0 %v2020_v42 }
 0x181   :  { %1488 = vmatpush2.bf16.msra.mxu1 %v2023_v43  ;;  %1448 = vmatprep.subr.bf16.mxu0 %v2028_v44 }
 0x182   :  { %1489 = vmatprep.subr.bf16.mxu1 %v2031_v45 }
 0x184   :  { %1449 = vmatpush2.bf16.msra.mxu0 %v2026_v46 }
 0x185   :  { %1490 = vmatpush2.bf16.msra.mxu1 %v2029_v48  ;;  %1450 = vmatprep.subr.bf16.mxu0 %v2034_v49 }
 0x186   :  { %1491 = vmatprep.subr.bf16.mxu1 %v2037_v50 }
 0x188   :  { %1451 = vmatpush2.bf16.msra.mxu0 %v2032_v52 }
 0x189   :  { %1492 = vmatpush2.bf16.msra.mxu1 %v2035_v53  ;;  %1452 = vmatprep.subr.bf16.mxu0 %v2040_v55 }
 0x18a   :  { %1493 = vmatprep.subr.bf16.mxu1 %v2043_v56 }
 0x18c   :  { %1453 = vmatpush2.bf16.msra.mxu0 %v2038_v57 }
 0x18d   :  { %1494 = vmatpush2.bf16.msra.mxu1 %v2041_v58 }
 0x18f   :  { %1455 = vmatmul.mubr.bf16.vlgmr.msra.gmra.mxu0 %v2233_v51 }
 0x190   :  { %1496 = vmatmul.mubr.bf16.vlgmr.msra.gmra.mxu1 %v2235_v54 }
 0x20f   :  { %v1374_v62 = vpop.f32.mrf.mxu0 }
 0x210   :  { %v1375_v63 = vadd.f32 %v1374_v62, %v683_v60  ;;  %v1415_v0 = vpop.f32.mrf.mxu1 }
 0x211   :  { %v1376_v1 = vpop.f32.mrf.mxu0 }
 0x212   :  { %v1416_v2 = vadd.f32 %v1415_v0, %v1375_v63  ;;  %v1377_v3 = vadd.f32 %v1376_v1, %v687_v61  ;;  %v1417_v4 = vpop.f32.mrf.mxu1 }
 0x213   :  { %v1378_v5 = vpop.f32.mrf.mxu0 }
 0x214   :  { %v1762_v8 = vmul.f32 -1.442695, %v1416_v2  ;;  %v1418_v11 = vadd.f32 %v1417_v4, %v1377_v3  ;;  %v1419_v51 = vpop.f32.mrf.mxu1 }
 0x215   :  { %v1379_v12 = vpop.f32.mrf.mxu0 }
 0x216   :  { %2060 = vpow2.f32 %v1762_v8  ;;  %v1763_v54 = vmul.f32 -1.442695, %v1418_v11  ;;  %v1420_v13 = vpop.f32.mrf.mxu1 }
 0x218   :  { %2062 = vpow2.f32 %v1763_v54 }
 0x223   :  { %v2061_v6 = vpop.eup %2060 }
 0x224   :  { %v1516_v14 = vadd.f32 1.0, %v2061_v6 }
 0x225   :  { %v2063_v15 = vpop.eup %2062 }
 0x226   :  { %2064 = vrcp.f32 %v1516_v14  ;;  %v1517_v9 = vadd.f32 1.0, %v2063_v15 }
 0x228   :  { %2066 = vrcp.f32 %v1517_v9 }
 0x233   :  { %v2065_v16 = vpop.eup %2064 }
 0x234   :  { %v1528_v18 = vmul.f32 %v2065_v16, %v1416_v2 }
 0x235   :  { %v2067_v17 = vpop.eup %2066 }
 0x236   :  { %v1529_v19 = vmul.f32 %v2067_v17, %v1418_v11 }
 0x238   :  { %v1766_v20 = vpack.c.bf16 %v1529_v19, %v1528_v18 }
 0x23a   :  { %v1548_v44 = vrot.slane %v1766_v20, %v2214_v47 }
 0x24f   :  { %v1456_v23 = vpop.f32.mrf.mxu0 }
 0x250   :  { %v1457_v24 = vadd.f32 %v1456_v23, %v691_v21  ;;  %v1497_v25 = vpop.f32.mrf.mxu1 }
 0x251   :  { %v1458_v26 = vpop.f32.mrf.mxu0 }
 0x252   :  { %v1498_v27 = vadd.f32 %v1497_v25, %v1457_v24  ;;  %v1459_v28 = vadd.f32 %v1458_v26, %v695_v22  ;;  %v1499_v29 = vpop.f32.mrf.mxu1 }
 0x253   :  { %v1460_v30 = vpop.f32.mrf.mxu0 }
 0x254   :  { %v1764_v31 = vmul.f32 -1.442695, %v1498_v27  ;;  %v1500_v32 = vadd.f32 %v1499_v29, %v1459_v28  ;;  %v1501_v33 = vpop.f32.mrf.mxu1 }
 0x255   :  { %v1461_v34 = vpop.f32.mrf.mxu0 }
 0x256   :  { %2068 = vpow2.f32 %v1764_v31  ;;  %v1765_v35 = vmul.f32 -1.442695, %v1500_v32  ;;  %v1502_v36 = vpop.f32.mrf.mxu1 }
 0x258   :  { %2070 = vpow2.f32 %v1765_v35 }
 0x263   :  { %v2069_v7 = vpop.eup %2068 }
 0x264   :  { %v1518_v37 = vadd.f32 1.0, %v2069_v7 }
 0x265   :  { %v2071_v39 = vpop.eup %2070 }
 0x266   :  { %2072 = vrcp.f32 %v1518_v37  ;;  %v1519_v10 = vadd.f32 1.0, %v2071_v39 }
 0x268   :  { %2074 = vrcp.f32 %v1519_v10 }
 0x273   :  { %v2073_v38 = vpop.eup %2072 }
 0x274   :  { %v1530_v41 = vmul.f32 %v2073_v38, %v1498_v27 }
 0x275   :  { %v2075_v40 = vpop.eup %2074 }
 0x276   :  { %v1531_v42 = vmul.f32 %v2075_v40, %v1500_v32 }
 0x278   :  { %v1767_v43 = vpack.c.bf16 %v1531_v42, %v1530_v41 }
 0x27a   :  { %v1555_v45 = vrot.slane %v1767_v43, %v2214_v47 }
 0x27c   :  { %v1556_v46 = vcombine.low %v1548_v44, %v1555_v45 }
 0x27e   :  { %1768 = vst.sshfl [vmem:[%s2259_s5] sm:$0x55 pattern:$0x73625140] %v1556_v46 }
 0x27f   :  { %1570 = vsyncpa [#allocation3], 1 }
 0x280   :  { %1571 = vsyncpa [#allocation5], 1 }
 0x281   :  { %1572 = vsyncpa [#allocation8], 1 }

// kernel: mhd_joint_processor_forward.5
= control target key start
LH: loop header
LB: loop body
LE: loop exit
PB: predicated region body
PF: predicated region fallthrough
CT: control target
= control target key end

     0   :  { %15 = vsyncpa [#allocation9], 0  ;;  %s3006_s0 = inlined_call_operand.vmem [shape: bf16[2,32,128], index: 0, kind: input, shape index: {}]   ;;  %s3007_s1 = inlined_call_operand.hbm [shape: bf16[128,128], index: 1, kind: input, shape index: {}]   ;;  %s3008_s2 = inlined_call_operand.hbm [shape: bf16[512,128], index: 2, kind: input, shape index: {}]   ;;  %s3009_s3 = inlined_call_operand.hbm [shape: bf16[512,256], index: 3, kind: input, shape index: {}]   ;;  %s3010_s4 = inlined_call_operand.hbm [shape: f32[1,128], index: 4, kind: input, shape index: {}]   ;;  %s3011_s5 = inlined_call_operand.hbm [shape: f32[1,128], index: 5, kind: input, shape index: {}]   ;;  %s3012_s6 = inlined_call_operand.hbm [shape: f32[1,128], index: 6, kind: input, shape index: {}]   ;;  %s3013_s7 = inlined_call_operand.hbm [shape: f32[1,128], index: 7, kind: input, shape index: {}]   ;;  %s3014_s8 = inlined_call_operand.hbm [shape: f32[1,256], index: 8, kind: input, shape index: {}]   ;;  %s3015_s9 = inlined_call_operand.hbm [shape: f32[1,256], index: 9, kind: input, shape index: {}]   ;;  %s3016_s10 = inlined_call_operand.vmem [shape: bf16[16,256], index: 10, kind: output, shape index: {}]  }
   0x1   :  { %16 = vsyncpa [#allocation11], 0 }
   0x2   :  { %17 = vsyncpa [#allocation14], 0 }
   0x3   :  { %18 = vsyncpa [#allocation17], 0 }
   0x4   :  { %19 = vsyncpa [#allocation20], 0  ;;  %s2627_s13 = smov [#allocation10]   ;;  %s2628_s15 = smov [#allocation13]  }
   0x5   :  { %s39_s14 = sshll.u32 %s2627_s13, 4  ;;  %s64_s16 = sshll.u32 %s2628_s15, 4  ;;  %s40_s14 = int_to_ptr.vmem [resolvable:$true] %s39_s14  ;;  %s65_s16 = int_to_ptr.vmem [resolvable:$true] %s64_s16 }
   0x6   :  { %s2445_s17 = scalar_lea.vmem %s40_s14, 4096  ;;  %p2450_p1 = scmp.lt.s32.totalorder %s40_s14, %s40_s14 }
   0x7   :  { %p2446_p0 = scmp.ne.s32.totalorder %s40_s14, %s2445_s17  ;;  %p2451_p2 = scmp.lt.s32.totalorder %s2445_s17, %s2445_s17 }
   0x9   :  { %p2452_p3 = por %p2451_p2, %p2450_p1 }
   0xb   :  { %p2453_p4 = pnand %p2452_p3, %p2446_p0 }
   0xd   :  { %2456 = shalt.err (!%p2453_p4)
}
   0xe   :  { %s2629_s18 = smov 64   ;;  %s2630_s19 = smov 4  }
   0xf   :  { %45 = dma.hbm_to_vmem [thread:$0]  %s3008_s2, 4096, %s40_s14, [#allocation11], %s2629_s18, %s2629_s18, %s2630_s19  }
  0x10   :  { %s2465_s22 = scalar_lea.vmem %s65_s16, 16  ;;  %s2469_s23 = scalar_lea.vmem %s65_s16, 32 }
  0x11   :  { %p2466_p5 = scmp.ne.s32.totalorder %s65_s16, %s2465_s22  ;;  %p2470_p6 = scmp.lt.s32.totalorder %s65_s16, %s65_s16 }
  0x12   :  { %p2471_p7 = scmp.lt.s32.totalorder %s2469_s23, %s2465_s22 }
  0x14   :  { %p2472_p8 = por %p2471_p7, %p2470_p6 }
  0x16   :  { %p2473_p9 = pnand %p2472_p8, %p2466_p5 }
  0x18   :  { %2476 = shalt.err (!%p2473_p9)
}
  0x19   :  { %67 = dma.hbm_to_vmem [thread:$0]  %s3010_s4, 16, %s65_s16, [#allocation14]  }
  0x1a   :  { %s2631_s26 = smov [#allocation16]   ;;  %s2632_s28 = smov [#allocation19]  }
  0x1b   :  { %s84_s27 = sshll.u32 %s2631_s26, 4  ;;  %s104_s29 = sshll.u32 %s2632_s28, 4  ;;  %s85_s27 = int_to_ptr.vmem [resolvable:$true] %s84_s27  ;;  %s105_s29 = int_to_ptr.vmem [resolvable:$true] %s104_s29 }
  0x1c   :  { %s2485_s30 = scalar_lea.vmem %s85_s27, 16  ;;  %s2489_s2 = scalar_lea.vmem %s85_s27, 32 }
  0x1d   :  { %p2486_p10 = scmp.ne.s32.totalorder %s85_s27, %s2485_s30  ;;  %p2490_p11 = scmp.lt.s32.totalorder %s85_s27, %s85_s27 }
  0x1e   :  { %p2491_p12 = scmp.lt.s32.totalorder %s2489_s2, %s2485_s30 }
  0x20   :  { %p2492_p13 = por %p2491_p12, %p2490_p11 }
  0x22   :  { %p2493_p0 = pnand %p2492_p13, %p2486_p10 }
  0x24   :  { %2496 = shalt.err (!%p2493_p0)
}
  0x25   :  { %87 = dma.hbm_to_vmem [thread:$0]  %s3012_s6, 16, %s85_s27, [#allocation17]  }
  0x26   :  { %s2505_s13 = scalar_lea.vmem %s105_s29, 32  ;;  %p2510_p2 = scmp.lt.s32.totalorder %s105_s29, %s105_s29 }
  0x27   :  { %p2506_p1 = scmp.ne.s32.totalorder %s105_s29, %s2505_s13  ;;  %p2511_p3 = scmp.lt.s32.totalorder %s2505_s13, %s2505_s13 }
  0x29   :  { %p2512_p4 = por %p2511_p3, %p2510_p2 }
  0x2b   :  { %p2513_p5 = pnand %p2512_p4, %p2506_p1 }
  0x2d   :  { %2516 = shalt.err (!%p2513_p5)
}
  0x2e   :  { %107 = dma.hbm_to_vmem [thread:$0]  %s3014_s8, 32, %s105_s29, [#allocation20]  }
  0x2f   :  { %s2633_s15 = smov [#allocation8]   ;;  %s2634_s17 = smov [#allocation12]  }
  0x30   :  { %s27_s16 = sshll.u32 %s2633_s15, 4  ;;  %s51_s20 = sshll.u32 %s2634_s17, 4  ;;  %s28_s16 = int_to_ptr.vmem [resolvable:$true] %s27_s16  ;;  %s52_s20 = int_to_ptr.vmem [resolvable:$true] %s51_s20 }
  0x31   :  { %s2525_s21 = scalar_lea.vmem %s28_s16, 1024  ;;  %p2530_p7 = scmp.lt.s32.totalorder %s28_s16, %s28_s16 }
  0x32   :  { %p2526_p6 = scmp.ne.s32.totalorder %s28_s16, %s2525_s21  ;;  %p2531_p8 = scmp.lt.s32.totalorder %s2525_s21, %s2525_s21 }
  0x34   :  { %p2532_p9 = por %p2531_p8, %p2530_p7 }
  0x36   :  { %p2533_p10 = pnand %p2532_p9, %p2526_p6 }
  0x38   :  { %2536 = shalt.err (!%p2533_p10)
}
  0x39   :  { %33 = dma.hbm_to_vmem [thread:$0]  %s3007_s1, 1024, %s28_s16, [#allocation9], %s2629_s18, %s2629_s18, %s2630_s19  }
  0x3a   :  { %s2545_s8 = scalar_lea.vmem %s52_s20, 8192  ;;  %p2550_p12 = scmp.lt.s32.totalorder %s52_s20, %s52_s20 }
  0x3b   :  { %p2546_p11 = scmp.ne.s32.totalorder %s52_s20, %s2545_s8  ;;  %p2551_p13 = scmp.lt.s32.totalorder %s2545_s8, %s2545_s8 }
  0x3d   :  { %p2552_p0 = por %p2551_p13, %p2550_p12 }
  0x3f   :  { %p2553_p1 = pnand %p2552_p0, %p2546_p11 }
  0x41   :  { %2556 = shalt.err (!%p2553_p1)
}
  0x42   :  { %s2635_s23 = smov 128   ;;  %s2636_s24 = smov 8  }
  0x43   :  { %57 = dma.hbm_to_vmem [thread:$0]  %s3009_s3, 8192, %s52_s20, [#allocation11], %s2635_s23, %s2635_s23, %s2636_s24  }
  0x44   :  { %s2637_s27 = smov [#allocation15]   ;;  %s2638_s29 = smov [#allocation18]  }
  0x45   :  { %s74_s28 = sshll.u32 %s2637_s27, 4  ;;  %s94_s30 = sshll.u32 %s2638_s29, 4  ;;  %s75_s28 = int_to_ptr.vmem [resolvable:$true] %s74_s28  ;;  %s95_s30 = int_to_ptr.vmem [resolvable:$true] %s94_s30 }
  0x46   :  { %s2565_s1 = scalar_lea.vmem %s75_s28, 16  ;;  %s2569_s18 = scalar_lea.vmem %s75_s28, 32 }
  0x47   :  { %p2566_p2 = scmp.ne.s32.totalorder %s75_s28, %s2565_s1  ;;  %p2570_p3 = scmp.lt.s32.totalorder %s75_s28, %s75_s28 }
  0x48   :  { %p2571_p4 = scmp.lt.s32.totalorder %s2569_s18, %s2565_s1 }
  0x4a   :  { %p2572_p5 = por %p2571_p4, %p2570_p3 }
  0x4c   :  { %p2573_p6 = pnand %p2572_p5, %p2566_p2 }
  0x4e   :  { %2576 = shalt.err (!%p2573_p6)
}
  0x4f   :  { %77 = dma.hbm_to_vmem [thread:$0]  %s3011_s5, 16, %s75_s28, [#allocation14]  }
  0x50   :  { %s2585_s11 = scalar_lea.vmem %s95_s30, 16  ;;  %s2589_s3 = scalar_lea.vmem %s95_s30, 32 }
  0x51   :  { %p2586_p7 = scmp.ne.s32.totalorder %s95_s30, %s2585_s11  ;;  %p2590_p8 = scmp.lt.s32.totalorder %s95_s30, %s95_s30 }
  0x52   :  { %p2591_p9 = scmp.lt.s32.totalorder %s2589_s3, %s2585_s11 }
  0x54   :  { %p2592_p10 = por %p2591_p9, %p2590_p8 }
  0x56   :  { %p2593_p11 = pnand %p2592_p10, %p2586_p7 }
  0x58   :  { %2596 = shalt.err (!%p2593_p11)
}
  0x59   :  { %97 = dma.hbm_to_vmem [thread:$0]  %s3013_s7, 16, %s95_s30, [#allocation17]  }
  0x5a   :  { %s2639_s4 = smov [#allocation21]  }
  0x5b   :  { %s114_s14 = sshll.u32 %s2639_s4, 4  ;;  %s115_s14 = int_to_ptr.vmem [resolvable:$true] %s114_s14 }
  0x5c   :  { %s2605_s15 = scalar_lea.vmem %s115_s14, 32  ;;  %p2610_p13 = scmp.lt.s32.totalorder %s115_s14, %s115_s14 }
  0x5d   :  { %p2606_p12 = scmp.ne.s32.totalorder %s115_s14, %s2605_s15  ;;  %p2611_p0 = scmp.lt.s32.totalorder %s2605_s15, %s2605_s15 }
  0x5f   :  { %p2612_p1 = por %p2611_p0, %p2610_p13 }
  0x61   :  { %p2613_p2 = pnand %p2612_p1, %p2606_p12 }
  0x63   :  { %2616 = shalt.err (!%p2613_p2)
}
  0x64   :  { %117 = dma.hbm_to_vmem [thread:$0]  %s3015_s9, 32, %s115_s14, [#allocation20]  }
  0x65   :  { %2617 = dma.done.wait [#allocation9], 1024  }
  0x66   :  { %2618 = vsyncadd [#allocation9], 4294966272 }
  0x67   :  { %2619 = dma.done.wait [#allocation11], 12288  }
  0x68   :  { %2620 = vsyncadd [#allocation11], 4294955008 }
  0x69   :  { %2621 = dma.done.wait [#allocation14], 32  }
  0x6a   :  { %2622 = vsyncadd [#allocation14], 4294967264 }
  0x6b   :  { %2623 = dma.done.wait [#allocation17], 32  }
  0x6c   :  { %2624 = vsyncadd [#allocation17], 4294967264 }
  0x6d   :  { %2625 = dma.done.wait [#allocation20], 64  }
  0x6e   :  { %2626 = vsyncadd [#allocation20], 4294967232  ;;  %v2640_v0 = vmov 0.0   ;;  %v2289_v1 = vld [vmem:[#allocation8 + $0x38] sm:$0xff]   ;;  %v2290_v2 = vld [vmem:[#allocation8 + $0x30] sm:$0xff]   ;;  %vm2641_vm0 = vmmov 0  }
  0x6f   :  { %402 = vst [vmem:[#allocation2] sm:$0xff] %v2640_v0  ;;  %404 = vst [vmem:[#allocation2 + $0x10] sm:$0xff] %v2640_v0  ;;  %2113 = vmatprep.subr.bf16.mxu1 %v2640_v0  ;;  %2089 = vmatprep.subr.bf16.mxu0 %v2289_v1  ;;  %v2291_v3 = vld [vmem:[#allocation8 + $0x28] sm:$0xff]   ;;  %v2292_v4 = vld [vmem:[#allocation8 + $0x20] sm:$0xff]  }
  0x70   :  { %407 = vst [vmem:[#allocation3 + $0x8] sm:$0x1] %v2640_v0  ;;  %409 = vst [vmem:[#allocation3 + $0x18] sm:$0x1] %v2640_v0  ;;  %2090 = vmatpush3.bf16.msra.mxu0 %v2289_v1  ;;  %v2297_v5 = vld [vmem:[%s3006_s0] sm:$0xff]   ;;  %v2293_v6 = vld [vmem:[#allocation8 + $0x18] sm:$0xff]   ;;  %2129 = vmatprep.mubr.msk.bf16.mxu1 %vm2641_vm0, %v2640_v0 }
  0x71   :  { %418 = vst [vmem:[#allocation6] sm:$0xff] %v2640_v0  ;;  %420 = vst [vmem:[#allocation6 + $0x10] sm:$0xff] %v2640_v0  ;;  %2091 = vmatprep.subr.bf16.mxu0 %v2290_v2  ;;  %2105 = vmatprep.mubr.bf16.mxu0 %v2297_v5  ;;  %v2294_v7 = vld [vmem:[#allocation8 + $0x10] sm:$0xff]   ;;  %v2295_v8 = vld [vmem:[#allocation8 + $0x8] sm:$0xff]  }
  0x72   :  { %423 = vst [vmem:[#allocation7 + $0x8] sm:$0x1] %v2640_v0  ;;  %425 = vst [vmem:[#allocation7 + $0x18] sm:$0x1] %v2640_v0  ;;  %v2296_v9 = vld [vmem:[#allocation8] sm:$0xff]   ;;  %v2298_v10 = vld [vmem:[%s3006_s0 + $0x8] sm:$0xff]  }
  0x73   :  { %v2299_v11 = vld [vmem:[%s3006_s0 + $0x10] sm:$0xff]   ;;  %v2300_v12 = vld [vmem:[%s3006_s0 + $0x18] sm:$0xff]   ;;  %v2763_v16 = vld [vmem:[#allocation10 + $0x68] sm:$0xff]  }
  0x74   :  { %2092 = vmatpush3.bf16.msra.mxu0 %v2290_v2  ;;  %v2753_v13 = vld [vmem:[#allocation10 + $0x78] sm:$0xff]   ;;  %v2757_v14 = vld [vmem:[#allocation10 + $0x70] sm:$0xff]   ;;  %v2771_v18 = vld [vmem:[#allocation10 + $0x60] sm:$0xff]  }
  0x75   :  { %2093 = vmatprep.subr.bf16.mxu0 %v2291_v3  ;;  %2114 = vmatpush3.bf16.msra.mxu1 %v2753_v13  ;;  %v2761_v15 = vld [vmem:[#allocation10 + $0x38] sm:$0xff]   ;;  %v2769_v17 = vld [vmem:[#allocation10 + $0x30] sm:$0xff]   ;;  %v2777_v19 = vld [vmem:[#allocation10 + $0x28] sm:$0xff]  }
  0x76   :  { %2115 = vmatprep.subr.bf16.mxu1 %v2640_v0  ;;  %v2779_v20 = vld [vmem:[#allocation10 + $0x58] sm:$0xff]   ;;  %v2785_v21 = vld [vmem:[#allocation10 + $0x20] sm:$0xff]   ;;  %v2787_v22 = vld [vmem:[#allocation10 + $0x50] sm:$0xff]  }
  0x77   :  { %v2793_v23 = vld [vmem:[#allocation10 + $0x18] sm:$0xff]   ;;  %v2795_v24 = vld [vmem:[#allocation10 + $0x48] sm:$0xff]   ;;  %v2801_v25 = vld [vmem:[#allocation10 + $0x10] sm:$0xff]  }
  0x78   :  { %2094 = vmatpush3.bf16.msra.mxu0 %v2291_v3  ;;  %v2803_v26 = vld [vmem:[#allocation10 + $0x40] sm:$0xff]   ;;  %v2808_v27 = vld [vmem:[#allocation10 + $0x8] sm:$0xff]  }
  0x79   :  { %2095 = vmatprep.subr.bf16.mxu0 %v2292_v4  ;;  %2116 = vmatpush3.bf16.msra.mxu1 %v2757_v14  ;;  %v2816_v28 = vld [vmem:[#allocation10] sm:$0xff]  }
  0x7a   :  { %2117 = vmatprep.subr.bf16.mxu1 %v2640_v0 }
  0x7c   :  { %2096 = vmatpush3.bf16.msra.mxu0 %v2292_v4 }
  0x7d   :  { %2097 = vmatprep.subr.bf16.mxu0 %v2293_v6  ;;  %2118 = vmatpush3.bf16.msra.mxu1 %v2763_v16 }
  0x7e   :  { %2119 = vmatprep.subr.bf16.mxu1 %v2640_v0 }
  0x80   :  { %2098 = vmatpush3.bf16.msra.mxu0 %v2293_v6 }
  0x81   :  { %2099 = vmatprep.subr.bf16.mxu0 %v2294_v7  ;;  %2120 = vmatpush3.bf16.msra.mxu1 %v2771_v18 }
  0x82   :  { %2121 = vmatprep.subr.bf16.mxu1 %v2640_v0 }
  0x84   :  { %2100 = vmatpush3.bf16.msra.mxu0 %v2294_v7 }
  0x85   :  { %2101 = vmatprep.subr.bf16.mxu0 %v2295_v8  ;;  %2122 = vmatpush3.bf16.msra.mxu1 %v2779_v20 }
  0x86   :  { %2123 = vmatprep.subr.bf16.mxu1 %v2640_v0 }
  0x88   :  { %2102 = vmatpush3.bf16.msra.mxu0 %v2295_v8 }
  0x89   :  { %2103 = vmatprep.subr.bf16.mxu0 %v2296_v9  ;;  %2124 = vmatpush3.bf16.msra.mxu1 %v2787_v22 }
  0x8a   :  { %2125 = vmatprep.subr.bf16.mxu1 %v2640_v0 }
  0x8c   :  { %2104 = vmatpush3.bf16.msra.mxu0 %v2296_v9 }
  0x8d   :  { %2133 = vmatprep.subr.bf16.mxu0 %v2640_v0  ;;  %2126 = vmatpush3.bf16.msra.mxu1 %v2795_v24 }
  0x8e   :  { %2127 = vmatprep.subr.bf16.mxu1 %v2640_v0 }
  0x8f   :  { %2106 = vmatmul.mubr.bf16.vlgmr.msra.gmra.mxu0 %v2298_v10 }
  0x90   :  { %2109 = vmatprep.mubr.bf16.mxu0 %v2299_v11  ;;  %2134 = vmatpush3.bf16.msra.mxu0 %v2761_v15 }
  0x91   :  { %2135 = vmatprep.subr.bf16.mxu0 %v2640_v0  ;;  %2128 = vmatpush3.bf16.msra.mxu1 %v2803_v26 }
  0x92   :  { %2153 = vmatprep.subr.bf16.mxu1 %v2640_v0 }
  0x94   :  { %2136 = vmatpush3.bf16.msra.mxu0 %v2769_v17 }
  0x95   :  { %2137 = vmatprep.subr.bf16.mxu0 %v2640_v0 }
  0x97   :  { %2110 = vmatmul.mubr.bf16.gmra.mxu0 %v2300_v12 }
  0x98   :  { %2138 = vmatpush3.bf16.msra.mxu0 %v2777_v19  ;;  %2149 = vmatprep.mubr.msk.bf16.mxu0 %vm2641_vm0, %v2640_v0 }
  0x99   :  { %2139 = vmatprep.subr.bf16.mxu0 %v2640_v0 }
  0x9c   :  { %2140 = vmatpush3.bf16.msra.mxu0 %v2785_v21 }
  0x9d   :  { %2141 = vmatprep.subr.bf16.mxu0 %v2640_v0 }
  0xa0   :  { %2142 = vmatpush3.bf16.msra.mxu0 %v2793_v23 }
  0xa1   :  { %2143 = vmatprep.subr.bf16.mxu0 %v2640_v0 }
  0xa4   :  { %2144 = vmatpush3.bf16.msra.mxu0 %v2801_v25 }
  0xa5   :  { %2145 = vmatprep.subr.bf16.mxu0 %v2640_v0 }
  0xa8   :  { %2146 = vmatpush3.bf16.msra.mxu0 %v2808_v27 }
  0xa9   :  { %2147 = vmatprep.subr.bf16.mxu0 %v2640_v0 }
  0xac   :  { %2148 = vmatpush3.bf16.msra.mxu0 %v2816_v28 }
  0xad   :  { %2173 = vmatprep.subr.bf16.mxu0 %v2640_v0 }
 0x14f   :  { %v2107_v29 = vpop.f32.mrf.mxu0 }
 0x150   :  { %v326_v37 = vmul.f32 %v2107_v29, %v2107_v29 }
 0x151   :  { %v276_v30 = vpop.f32.mrf.mxu0 }
 0x152   :  { %v324_v33 = vmul.f32 %v276_v30, %v276_v30 }
 0x153   :  { %v2108_v31 = vpop.f32.mrf.mxu0 }
 0x154   :  { %v327_v41 = vmul.f32 %v2108_v31, %v2108_v31 }
 0x155   :  { %v279_v32 = vpop.f32.mrf.mxu0 }
 0x156   :  { %v309_v34 = vadd.f32 %v279_v32, %v276_v30  ;;  %v325_v35 = vmul.f32 %v279_v32, %v279_v32 }
 0x157   :  { %v2111_v36 = vpop.f32.mrf.mxu0 }
 0x158   :  { %v310_v38 = vadd.f32 %v2107_v29, %v309_v34  ;;  %v332_v39 = vadd.f32 %v325_v35, %v324_v33  ;;  %v330_v52 = vmul.f32 %v2111_v36, %v2111_v36 }
 0x159   :  { %v292_v40 = vpop.f32.mrf.mxu0 }
 0x15a   :  { %v333_v42 = vadd.f32 %v332_v39, %v326_v37  ;;  %v311_v43 = vadd.f32 %v2108_v31, %v310_v38  ;;  %v328_v46 = vmul.f32 %v292_v40, %v292_v40  ;;  %v1881_v39 = vld [vmem:[#allocation13] ss:$0 sm:$0xff] }
 0x15b   :  { %v2112_v44 = vpop.f32.mrf.mxu0 }
 0x15c   :  { %v312_v45 = vadd.f32 %v311_v43, %v292_v40  ;;  %v334_v47 = vadd.f32 %v333_v42, %v327_v41  ;;  %v331_v55 = vmul.f32 %v2112_v44, %v2112_v44 }
 0x15d   :  { %v295_v48 = vpop.f32.mrf.mxu0 }
 0x15e   :  { %v335_v49 = vadd.f32 %v334_v47, %v328_v46  ;;  %v313_v50 = vadd.f32 %v312_v45, %v295_v48  ;;  %v329_v51 = vmul.f32 %v295_v48, %v295_v48 }
 0x160   :  { %v314_v53 = vadd.f32 %v2111_v36, %v313_v50  ;;  %v336_v54 = vadd.f32 %v335_v49, %v329_v51  ;;  %v1882_v51 = vld [vmem:[#allocation15] ss:$0 sm:$0xff] }
 0x162   :  { %v315_v56 = vadd.f32 %v2112_v44, %v314_v53  ;;  %v337_v57 = vadd.f32 %v336_v54, %v330_v52 }
 0x164   :  { %v316_v58 = vrot.slane %v315_v56, 4  ;;  %v338_v59 = vadd.f32 %v337_v57, %v331_v55 }
 0x166   :  { %v317_v60 = vadd.f32 %v316_v58, %v315_v56  ;;  %v339_v61 = vrot.slane %v338_v59, 4 }
 0x168   :  { %v318_v62 = vrot.slane %v317_v60, 2  ;;  %v340_v63 = vadd.f32 %v339_v61, %v338_v59 }
 0x16a   :  { %v319_v1 = vadd.f32 %v318_v62, %v317_v60  ;;  %v341_v2 = vrot.slane %v340_v63, 2 }
 0x16c   :  { %v320_v3 = vrot.slane %v319_v1, 1  ;;  %v342_v4 = vadd.f32 %v341_v2, %v340_v63 }
 0x16e   :  { %v321_v5 = vadd.f32 %v320_v3, %v319_v1  ;;  %v343_v6 = vrot.slane %v342_v4, 1 }
 0x170   :  { %v323_v7 = vmul.f32 0.015625, %v321_v5  ;;  %v344_v8 = vadd.f32 %v343_v6, %v342_v4 }
 0x172   :  { %v345_v9 = vmul.f32 0.015625, %v344_v8  ;;  %v346_v10 = vmul.f32 %v323_v7, %v323_v7  ;;  %v348_v33 = vsub.f32 %v276_v30, %v323_v7  ;;  %v349_v34 = vsub.f32 %v279_v32, %v323_v7 }
 0x173   :  { %v350_v35 = vsub.f32 %v2107_v29, %v323_v7  ;;  %v351_v37 = vsub.f32 %v2108_v31, %v323_v7  ;;  %v352_v41 = vsub.f32 %v292_v40, %v323_v7  ;;  %v353_v42 = vsub.f32 %v295_v48, %v323_v7 }
 0x174   :  { %v347_v11 = vsub.f32 %v345_v9, %v346_v10  ;;  %v354_v43 = vsub.f32 %v2111_v36, %v323_v7  ;;  %v355_v45 = vsub.f32 %v2112_v44, %v323_v7  ;;  %v2833_v9 = vld [vmem:[#allocation10 + $0xb8] sm:$0xff]  }
 0x176   :  { %v356_v12 = vadd.f32 1e-05, %v347_v11 }
 0x178   :  { %2429 = vrsqrt.f32 %v356_v12  ;;  %v2838_v12 = vld [vmem:[#allocation10 + $0xb0] sm:$0xff]  }
 0x185   :  { %v2430_v38 = vpop.eup %2429 }
 0x186   :  { %v358_v46 = vmul.f32 %v2430_v38, %v348_v33  ;;  %v359_v47 = vmul.f32 %v2430_v38, %v349_v34  ;;  %v360_v49 = vmul.f32 %v2430_v38, %v350_v35  ;;  %v361_v50 = vmul.f32 %v2430_v38, %v351_v37  ;;  %v2843_v35 = vld [vmem:[#allocation10 + $0xf8] sm:$0xff]   ;;  %v2846_v37 = vld [vmem:[#allocation10 + $0xa8] sm:$0xff]  }
 0x187   :  { %v362_v52 = vmul.f32 %v2430_v38, %v352_v41  ;;  %v363_v53 = vmul.f32 %v2430_v38, %v353_v42  ;;  %v364_v54 = vmul.f32 %v2430_v38, %v354_v43  ;;  %v365_v55 = vmul.f32 %v2430_v38, %v355_v45  ;;  %v2853_v41 = vld [vmem:[#allocation10 + $0xa0] sm:$0xff]   ;;  %v2860_v42 = vld [vmem:[#allocation10 + $0xe8] sm:$0xff]   ;;  %v2863_v43 = vld [vmem:[#allocation10 + $0x98] sm:$0xff]  }
 0x188   :  { %v372_v56 = vmul.f32 %v1881_v39, %v358_v46  ;;  %v373_v30 = vmul.f32 %v1881_v39, %v359_v47  ;;  %v374_v32 = vmul.f32 %v1881_v39, %v360_v49  ;;  %v375_v29 = vmul.f32 %v1881_v39, %v361_v50  ;;  %v2868_v45 = vld [vmem:[#allocation10 + $0xe0] sm:$0xff]   ;;  %v2871_v46 = vld [vmem:[#allocation10 + $0x90] sm:$0xff]   ;;  %v2876_v47 = vld [vmem:[#allocation10 + $0xd8] sm:$0xff]  }
 0x189   :  { %v376_v31 = vmul.f32 %v1881_v39, %v362_v52  ;;  %v377_v57 = vmul.f32 %v1881_v39, %v363_v53  ;;  %v378_v58 = vmul.f32 %v1881_v39, %v364_v54  ;;  %v379_v40 = vmul.f32 %v1881_v39, %v365_v55  ;;  %v2850_v39 = vld [vmem:[#allocation10 + $0xf0] sm:$0xff]   ;;  %v2879_v49 = vld [vmem:[#allocation10 + $0x88] sm:$0xff]   ;;  %v2898_v54 = vld [vmem:[#allocation10 + $0xc0] sm:$0xff]  }
 0x18a   :  { %v386_v48 = vadd.f32 %v1882_v51, %v372_v56  ;;  %v387_v36 = vadd.f32 %v1882_v51, %v373_v30  ;;  %v2821_v44 = vadd.f32 %v1882_v51, %v374_v32  ;;  %v2823_v59 = vadd.f32 %v1882_v51, %v375_v29  ;;  %v2884_v50 = vld [vmem:[#allocation10 + $0xd0] sm:$0xff]   ;;  %v2892_v52 = vld [vmem:[#allocation10 + $0xc8] sm:$0xff]  }
 0x18b   :  { %v390_v60 = vadd.f32 %v1882_v51, %v376_v31  ;;  %v391_v61 = vadd.f32 %v1882_v51, %v377_v57  ;;  %v2825_v62 = vadd.f32 %v1882_v51, %v378_v58  ;;  %v2827_v63 = vadd.f32 %v1882_v51, %v379_v40  ;;  %v2887_v51 = vld [vmem:[#allocation10 + $0x80] sm:$0xff]   ;;  %v2350_v57 = vld [vmem:[#allocation12 + $0x54] ss:$8 sps:$4 sm:$0xff]  }
 0x18c   :  { %v394_v1 = vmax.f32 %v386_v48, 0.0  ;;  %v396_v2 = vmax.f32 %v2821_v44, 0.0  ;;  %v397_v3 = vmax.f32 %v2823_v59, 0.0  ;;  %v395_v4 = vmax.f32 %v387_v36, 0.0  ;;  %v2342_v30 = vld [vmem:[#allocation12 + $0x60] ss:$8 sps:$4 sm:$0xff]  }
 0x18d   :  { %v398_v5 = vmax.f32 %v390_v60, 0.0  ;;  %v399_v6 = vmax.f32 %v391_v61, 0.0  ;;  %v400_v7 = vmax.f32 %v2825_v62, 0.0  ;;  %v401_v8 = vmax.f32 %v2827_v63, 0.0  ;;  %v2351_v32 = vld [vmem:[#allocation12 + $0xc0] ss:$8 sps:$4 sm:$0xff]  }
 0x18e   :  { %426 = vst [vmem:[#allocation2 + $0x1] sm:$0xff] %v394_v1  ;;  %428 = vst [vmem:[#allocation3] sm:$0xff] %v395_v4  ;;  %v2359_v58 = vld [vmem:[#allocation12 + $0xb4] ss:$8 sps:$4 sm:$0xff]   ;;  %v2348_v48 = vld [vmem:[#allocation12 + $0x50] ss:$8 sps:$4 sm:$0xff]  }
 0x18f   :  { %429 = vst [vmem:[#allocation3 + $0x10] sm:$0xff] %v399_v6  ;;  %427 = vst [vmem:[#allocation2 + $0x11] sm:$0xff] %v398_v5  ;;  %v1993_v10 = vpack.c.bf16 %v399_v6, %v395_v4  ;;  %v2835_v11 = vpack.c.bf16 %v398_v5, %v394_v1  ;;  %v1995_v53 = vpack.c.bf16 %v400_v7, %v396_v2  ;;  %v2357_v36 = vld [vmem:[#allocation12 + $0xb0] ss:$8 sps:$4 sm:$0xff]   ;;  %v2356_v60 = vld [vmem:[#allocation12 + $0x44] ss:$8 sps:$4 sm:$0xff]  }
 0x190   :  { %v1996_v55 = vpack.c.bf16 %v401_v8, %v397_v3  ;;  %v2365_v61 = vld [vmem:[#allocation12 + $0xa4] ss:$8 sps:$4 sm:$0xff]   ;;  %v2354_v62 = vld [vmem:[#allocation12 + $0x40] ss:$8 sps:$4 sm:$0xff]   ;;  %v2362_v1 = vld [vmem:[#allocation12 + $0x34] ss:$8 sps:$4 sm:$0xff]  }
 0x191   :  { %2130 = vmatmul.mubr.bf16.vlgmr.msra.gmra.mxu1 %v1993_v10  ;;  %v2363_v63 = vld [vmem:[#allocation12 + $0xa0] ss:$8 sps:$4 sm:$0xff]   ;;  %v2371_v2 = vld [vmem:[#allocation12 + $0x94] ss:$8 sps:$4 sm:$0xff]   ;;  %v2360_v3 = vld [vmem:[#allocation12 + $0x30] ss:$8 sps:$4 sm:$0xff]  }
 0x192   :  { %2154 = vmatpush3.bf16.msra.mxu1 %v2833_v9  ;;  %2169 = vmatprep.mubr.msk.bf16.mxu1 %vm2641_vm0, %v2640_v0  ;;  %v2369_v4 = vld [vmem:[#allocation12 + $0x90] ss:$8 sps:$4 sm:$0xff]   ;;  %v2368_v5 = vld [vmem:[#allocation12 + $0x24] ss:$8 sps:$4 sm:$0xff]   ;;  %v2366_v7 = vld [vmem:[#allocation12 + $0x20] ss:$8 sps:$4 sm:$0xff]  }
 0x193   :  { %2155 = vmatprep.subr.bf16.mxu1 %v2640_v0  ;;  %v2377_v6 = vld [vmem:[#allocation12 + $0x84] ss:$8 sps:$4 sm:$0xff]   ;;  %v2375_v8 = vld [vmem:[#allocation12 + $0x80] ss:$8 sps:$4 sm:$0xff]   ;;  %v2374_v10 = vld [vmem:[#allocation12 + $0x14] ss:$8 sps:$4 sm:$0xff]  }
 0x195   :  { %v498_v33 = vld [vmem:[#allocation2] sm:$0xff] }
 0x196   :  { %v499_v34 = vld [vmem:[#allocation2 + $0x10] sm:$0xff]  ;;  %2156 = vmatpush3.bf16.msra.mxu1 %v2838_v12 }
 0x197   :  { %v1994_v38 = vpack.c.bf16 %v499_v34, %v498_v33  ;;  %2157 = vmatprep.subr.bf16.mxu1 %v2640_v0  ;;  %v2383_v33 = vld [vmem:[#allocation12 + $0x174] ss:$8 sps:$4 sm:$0xff]   ;;  %v2378_v34 = vld [vmem:[#allocation12] ss:$8 sps:$4 sm:$0xff]  }
 0x199   :  { %2150 = vmatmul.mubr.bf16.vlgmr.msra.gmra.mxu0 %v1994_v38 }
 0x19a   :  { %2174 = vmatpush3.bf16.msra.mxu0 %v2843_v35  ;;  %2158 = vmatpush3.bf16.msra.mxu1 %v2846_v37 }
 0x19b   :  { %2175 = vmatprep.subr.bf16.mxu0 %v2640_v0  ;;  %2159 = vmatprep.subr.bf16.mxu1 %v2640_v0 }
 0x19c   :  { %2189 = vmatprep.mubr.msk.bf16.mxu0 %vm2641_vm0, %v2640_v0 }
 0x19e   :  { %2176 = vmatpush3.bf16.msra.mxu0 %v2850_v39  ;;  %2160 = vmatpush3.bf16.msra.mxu1 %v2853_v41 }
 0x19f   :  { %2177 = vmatprep.subr.bf16.mxu0 %v2640_v0  ;;  %2161 = vmatprep.subr.bf16.mxu1 %v2640_v0 }
 0x1a2   :  { %2178 = vmatpush3.bf16.msra.mxu0 %v2860_v42  ;;  %2162 = vmatpush3.bf16.msra.mxu1 %v2863_v43 }
 0x1a3   :  { %2179 = vmatprep.subr.bf16.mxu0 %v2640_v0  ;;  %2163 = vmatprep.subr.bf16.mxu1 %v2640_v0 }
 0x1a6   :  { %2180 = vmatpush3.bf16.msra.mxu0 %v2868_v45  ;;  %2164 = vmatpush3.bf16.msra.mxu1 %v2871_v46 }
 0x1a7   :  { %2181 = vmatprep.subr.bf16.mxu0 %v2640_v0  ;;  %2165 = vmatprep.subr.bf16.mxu1 %v2640_v0 }
 0x1aa   :  { %2182 = vmatpush3.bf16.msra.mxu0 %v2876_v47  ;;  %2166 = vmatpush3.bf16.msra.mxu1 %v2879_v49 }
 0x1ab   :  { %2183 = vmatprep.subr.bf16.mxu0 %v2640_v0  ;;  %2167 = vmatprep.subr.bf16.mxu1 %v2640_v0 }
 0x1ae   :  { %2184 = vmatpush3.bf16.msra.mxu0 %v2884_v50  ;;  %2168 = vmatpush3.bf16.msra.mxu1 %v2887_v51 }
 0x1af   :  { %2185 = vmatprep.subr.bf16.mxu0 %v2640_v0  ;;  %2193 = vmatprep.subr.bf16.mxu1 %v2640_v0 }
 0x1b1   :  { %2170 = vmatmul.mubr.bf16.vlgmr.msra.gmra.mxu1 %v1995_v53 }
 0x1b2   :  { %2186 = vmatpush3.bf16.msra.mxu0 %v2892_v52  ;;  %2194 = vmatpush3.bf16.msra.mxu1 %v2753_v13  ;;  %v1033_v13 = vld [vmem:[#allocation3 + $0x1] sm:$0xff] }
 0x1b3   :  { %2187 = vmatprep.subr.bf16.mxu0 %v2640_v0  ;;  %2195 = vmatprep.subr.bf16.mxu1 %v2640_v0 }
 0x1b4   :  { %2209 = vmatprep.mubr.msk.bf16.mxu1 %vm2641_vm0, %v2640_v0 }
 0x1b6   :  { %2188 = vmatpush3.bf16.msra.mxu0 %v2898_v54  ;;  %2196 = vmatpush3.bf16.msra.mxu1 %v2757_v14  ;;  %v1034_v14 = vld [vmem:[#allocation3 + $0x11] sm:$0xff] }
 0x1b7   :  { %2213 = vmatprep.subr.bf16.mxu0 %v2640_v0  ;;  %2197 = vmatprep.subr.bf16.mxu1 %v2640_v0 }
 0x1b9   :  { %2190 = vmatmul.mubr.bf16.vlgmr.msra.gmra.mxu0 %v1996_v55 }
 0x1ba   :  { %2214 = vmatpush3.bf16.msra.mxu0 %v2761_v15  ;;  %2198 = vmatpush3.bf16.msra.mxu1 %v2763_v16  ;;  %v1998_v15 = vpack.c.bf16 %v1034_v14, %v1033_v13  ;;  %v2335_v16 = vld [vmem:[#allocation12 + $0xf4] ss:$8 sps:$4 sm:$0xff]  }
 0x1bb   :  { %2215 = vmatprep.subr.bf16.mxu0 %v2640_v0  ;;  %2199 = vmatprep.subr.bf16.mxu1 %v2640_v0 }
 0x1bc   :  { %2229 = vmatprep.mubr.msk.bf16.mxu0 %vm2641_vm0, %v2640_v0 }
 0x1be   :  { %2216 = vmatpush3.bf16.msra.mxu0 %v2769_v17  ;;  %2200 = vmatpush3.bf16.msra.mxu1 %v2771_v18  ;;  %v2333_v17 = vld [vmem:[#allocation12 + $0xf0] ss:$8 sps:$4 sm:$0xff]   ;;  %v2341_v18 = vld [vmem:[#allocation12 + $0xe4] ss:$8 sps:$4 sm:$0xff]  }
 0x1bf   :  { %2217 = vmatprep.subr.bf16.mxu0 %v2640_v0  ;;  %2201 = vmatprep.subr.bf16.mxu1 %v2640_v0 }
 0x1c2   :  { %2218 = vmatpush3.bf16.msra.mxu0 %v2777_v19  ;;  %2202 = vmatpush3.bf16.msra.mxu1 %v2779_v20  ;;  %v2339_v20 = vld [vmem:[#allocation12 + $0xe0] ss:$8 sps:$4 sm:$0xff]  }
 0x1c3   :  { %2219 = vmatprep.subr.bf16.mxu0 %v2640_v0  ;;  %2203 = vmatprep.subr.bf16.mxu1 %v2640_v0 }
 0x1c6   :  { %2220 = vmatpush3.bf16.msra.mxu0 %v2785_v21  ;;  %2204 = vmatpush3.bf16.msra.mxu1 %v2787_v22  ;;  %v2338_v22 = vld [vmem:[#allocation12 + $0x74] ss:$8 sps:$4 sm:$0xff]  }
 0x1c7   :  { %2221 = vmatprep.subr.bf16.mxu0 %v2640_v0  ;;  %2205 = vmatprep.subr.bf16.mxu1 %v2640_v0 }
 0x1ca   :  { %2222 = vmatpush3.bf16.msra.mxu0 %v2793_v23  ;;  %2206 = vmatpush3.bf16.msra.mxu1 %v2795_v24  ;;  %v2347_v23 = vld [vmem:[#allocation12 + $0xd4] ss:$8 sps:$4 sm:$0xff]  }
 0x1cb   :  { %2223 = vmatprep.subr.bf16.mxu0 %v2640_v0  ;;  %2207 = vmatprep.subr.bf16.mxu1 %v2640_v0 }
 0x1ce   :  { %2224 = vmatpush3.bf16.msra.mxu0 %v2801_v25  ;;  %2208 = vmatpush3.bf16.msra.mxu1 %v2803_v26  ;;  %v2345_v25 = vld [vmem:[#allocation12 + $0xd0] ss:$8 sps:$4 sm:$0xff]  }
 0x1cf   :  { %2225 = vmatprep.subr.bf16.mxu0 %v2640_v0  ;;  %2233 = vmatprep.subr.bf16.mxu1 %v2640_v0 }
 0x1d1   :  { %2210 = vmatmul.mubr.bf16.vlgmr.msra.gmra.mxu1 %v1996_v55 }
 0x1d2   :  { %2226 = vmatpush3.bf16.msra.mxu0 %v2808_v27  ;;  %2234 = vmatpush3.bf16.msra.mxu1 %v2833_v9  ;;  %v2344_v27 = vld [vmem:[#allocation12 + $0x64] ss:$8 sps:$4 sm:$0xff]   ;;  %v2372_v9 = vld [vmem:[#allocation12 + $0x10] ss:$8 sps:$4 sm:$0xff]  }
 0x1d3   :  { %2227 = vmatprep.subr.bf16.mxu0 %v2640_v0  ;;  %2235 = vmatprep.subr.bf16.mxu1 %v2640_v0 }
 0x1d4   :  { %2249 = vmatprep.mubr.msk.bf16.mxu1 %vm2641_vm0, %v2640_v0 }
 0x1d6   :  { %2228 = vmatpush3.bf16.msra.mxu0 %v2816_v28  ;;  %2236 = vmatpush3.bf16.msra.mxu1 %v2838_v12  ;;  %v2353_v28 = vld [vmem:[#allocation12 + $0xc4] ss:$8 sps:$4 sm:$0xff]   ;;  %v2642_v12 = vmov 0  }
 0x1d7   :  { %2253 = vmatprep.subr.bf16.mxu0 %v2640_v0  ;;  %2237 = vmatprep.subr.bf16.mxu1 %v2640_v0 }
 0x1d9   :  { %2230 = vmatmul.mubr.bf16.vlgmr.msra.gmra.mxu0 %v1995_v53 }
 0x1da   :  { %2254 = vmatpush3.bf16.msra.mxu0 %v2843_v35  ;;  %2238 = vmatpush3.bf16.msra.mxu1 %v2846_v37  ;;  %v2386_v35 = vld [vmem:[#allocation12 + $0x1f4] ss:$8 sps:$4 sm:$0xff]  }
 0x1db   :  { %2255 = vmatprep.subr.bf16.mxu0 %v2640_v0  ;;  %2239 = vmatprep.subr.bf16.mxu1 %v2640_v0 }
 0x1dc   :  { %2269 = vmatprep.mubr.msk.bf16.mxu0 %vm2641_vm0, %v2640_v0 }
 0x1de   :  { %2256 = vmatpush3.bf16.msra.mxu0 %v2850_v39  ;;  %2240 = vmatpush3.bf16.msra.mxu1 %v2853_v41 }
 0x1df   :  { %2257 = vmatprep.subr.bf16.mxu0 %v2640_v0  ;;  %2241 = vmatprep.subr.bf16.mxu1 %v2640_v0 }
 0x1e2   :  { %2258 = vmatpush3.bf16.msra.mxu0 %v2860_v42  ;;  %2242 = vmatpush3.bf16.msra.mxu1 %v2863_v43 }
 0x1e3   :  { %2259 = vmatprep.subr.bf16.mxu0 %v2640_v0  ;;  %2243 = vmatprep.subr.bf16.mxu1 %v2640_v0 }
 0x1e6   :  { %2260 = vmatpush3.bf16.msra.mxu0 %v2868_v45  ;;  %2244 = vmatpush3.bf16.msra.mxu1 %v2871_v46 }
 0x1e7   :  { %2261 = vmatprep.subr.bf16.mxu0 %v2640_v0  ;;  %2245 = vmatprep.subr.bf16.mxu1 %v2640_v0 }
 0x1ea   :  { %2262 = vmatpush3.bf16.msra.mxu0 %v2876_v47  ;;  %2246 = vmatpush3.bf16.msra.mxu1 %v2879_v49 }
 0x1eb   :  { %2263 = vmatprep.subr.bf16.mxu0 %v2640_v0  ;;  %2247 = vmatprep.subr.bf16.mxu1 %v2640_v0 }
 0x1ee   :  { %2264 = vmatpush3.bf16.msra.mxu0 %v2884_v50  ;;  %2248 = vmatpush3.bf16.msra.mxu1 %v2887_v51 }
 0x1ef   :  { %2265 = vmatprep.subr.bf16.mxu0 %v2640_v0  ;;  %1311 = vmatprep.subr.bf16.mxu1 %v2335_v16 }
 0x1f1   :  { %2250 = vmatmul.mubr.bf16.vlgmr.msra.gmra.mxu1 %v2835_v11  ;;  %v2380_v11 = vld [vmem:[#allocation12 + $0x4] ss:$8 sps:$4 sm:$0xff]  }
 0x1f2   :  { %2266 = vmatpush3.bf16.msra.mxu0 %v2892_v52  ;;  %1312 = vmatpush1.bf16.msra.mxu1 %v2333_v17 }
 0x1f3   :  { %2267 = vmatprep.subr.bf16.mxu0 %v2640_v0  ;;  %1313 = vmatprep.subr.bf16.mxu1 %v2341_v18  ;;  %v2336_v0 = vld [vmem:[#allocation12 + $0x70] ss:$8 sps:$4 sm:$0xff]  }
 0x1f4   :  { %1343 = vmatprep.mubr.bf16.mxu1 %v2642_v12 }
 0x1f6   :  { %2268 = vmatpush3.bf16.msra.mxu0 %v2898_v54  ;;  %1314 = vmatpush1.bf16.msra.mxu1 %v2339_v20 }
 0x1f7   :  { %1440 = vmatprep.subr.bf16.mxu0 %v2338_v22  ;;  %1315 = vmatprep.subr.bf16.mxu1 %v2347_v23 }
 0x1f9   :  { %2270 = vmatmul.mubr.bf16.vlgmr.msra.gmra.mxu0 %v1998_v15 }
 0x1fa   :  { %1441 = vmatpush1.bf16.msra.mxu0 %v2336_v0  ;;  %1316 = vmatpush1.bf16.msra.mxu1 %v2345_v25 }
 0x1fb   :  { %1442 = vmatprep.subr.bf16.mxu0 %v2344_v27  ;;  %1317 = vmatprep.subr.bf16.mxu1 %v2353_v28 }
 0x1fc   :  { %1472 = vmatprep.mubr.bf16.mxu0 %v2642_v12 }
 0x1fe   :  { %1443 = vmatpush1.bf16.msra.mxu0 %v2342_v30  ;;  %1318 = vmatpush1.bf16.msra.mxu1 %v2351_v32 }
 0x1ff   :  { %1444 = vmatprep.subr.bf16.mxu0 %v2350_v57  ;;  %1319 = vmatprep.subr.bf16.mxu1 %v2359_v58 }
 0x202   :  { %1445 = vmatpush1.bf16.msra.mxu0 %v2348_v48  ;;  %1320 = vmatpush1.bf16.msra.mxu1 %v2357_v36 }
 0x203   :  { %1446 = vmatprep.subr.bf16.mxu0 %v2356_v60  ;;  %1321 = vmatprep.subr.bf16.mxu1 %v2365_v61 }
 0x206   :  { %1447 = vmatpush1.bf16.msra.mxu0 %v2354_v62  ;;  %1322 = vmatpush1.bf16.msra.mxu1 %v2363_v63 }
 0x207   :  { %1448 = vmatprep.subr.bf16.mxu0 %v2362_v1  ;;  %1323 = vmatprep.subr.bf16.mxu1 %v2371_v2 }
 0x20a   :  { %1449 = vmatpush1.bf16.msra.mxu0 %v2360_v3  ;;  %1324 = vmatpush1.bf16.msra.mxu1 %v2369_v4 }
 0x20b   :  { %1450 = vmatprep.subr.bf16.mxu0 %v2368_v5  ;;  %1325 = vmatprep.subr.bf16.mxu1 %v2377_v6 }
 0x20e   :  { %1451 = vmatpush1.bf16.msra.mxu0 %v2366_v7  ;;  %1326 = vmatpush1.bf16.msra.mxu1 %v2375_v8 }
 0x20f   :  { %1452 = vmatprep.subr.bf16.mxu0 %v2374_v10  ;;  %1573 = vmatprep.subr.bf16.mxu1 %v2383_v33 }
 0x212   :  { %1453 = vmatpush1.bf16.msra.mxu0 %v2372_v9 }
 0x213   :  { %1454 = vmatprep.subr.bf16.mxu0 %v2380_v11 }
 0x216   :  { %1455 = vmatpush1.bf16.msra.mxu0 %v2378_v34 }
 0x217   :  { %1710 = vmatprep.subr.bf16.mxu0 %v2386_v35 }
 0x251   :  { %v594_v19 = vpop.f32.mrf.mxu1 }
 0x253   :  { %v2131_v21 = vpop.f32.mrf.mxu1 }
 0x255   :  { %v597_v24 = vpop.f32.mrf.mxu1 }
 0x257   :  { %v2132_v26 = vpop.f32.mrf.mxu1 }
 0x259   :  { %v689_v56 = vpop.f32.mrf.mxu0 }
 0x25a   :  { %v690_v29 = vadd.f32 %v689_v56, %v594_v19 }
 0x25b   :  { %v2151_v31 = vpop.f32.mrf.mxu0 }
 0x25d   :  { %v692_v40 = vpop.f32.mrf.mxu0 }
 0x25e   :  { %v693_v44 = vadd.f32 %v692_v40, %v597_v24 }
 0x25f   :  { %v2152_v59 = vpop.f32.mrf.mxu0 }
 0x271   :  { %v788_v37 = vpop.f32.mrf.mxu1 }
 0x272   :  { %v795_v38 = vadd.f32 %v788_v37, %v690_v29 }
 0x273   :  { %v2171_v39 = vpop.f32.mrf.mxu1 }
 0x275   :  { %v791_v41 = vpop.f32.mrf.mxu1 }
 0x276   :  { %v796_v42 = vadd.f32 %v791_v41, %v693_v44  ;;  %v1921_v41 = vld [vmem:[#allocation16] ss:$0 sm:$0xff] }
 0x277   :  { %v2172_v43 = vpop.f32.mrf.mxu1 }
 0x279   :  { %v889_v45 = vpop.f32.mrf.mxu0 }
 0x27a   :  { %v896_v46 = vadd.f32 %v889_v45, %v795_v38 }
 0x27b   :  { %v2191_v47 = vpop.f32.mrf.mxu0 }
 0x27c   :  { %v1099_v52 = vmul.f32 %v896_v46, %v896_v46 }
 0x27d   :  { %v892_v49 = vpop.f32.mrf.mxu0 }
 0x27e   :  { %v897_v50 = vadd.f32 %v892_v49, %v796_v42  ;;  %v1922_v49 = vld [vmem:[#allocation18] ss:$0 sm:$0xff] }
 0x27f   :  { %v2192_v51 = vpop.f32.mrf.mxu0 }
 0x280   :  { %v1088_v53 = vadd.f32 %v897_v50, %v896_v46  ;;  %v1100_v54 = vmul.f32 %v897_v50, %v897_v50 }
 0x282   :  { %v1103_v55 = vadd.f32 %v1100_v54, %v1099_v52 }
 0x291   :  { %v932_v13 = vpop.f32.mrf.mxu1 }
 0x293   :  { %v2211_v14 = vpop.f32.mrf.mxu1 }
 0x295   :  { %v935_v15 = vpop.f32.mrf.mxu1 }
 0x297   :  { %v2212_v16 = vpop.f32.mrf.mxu1 }
 0x299   :  { %v973_v17 = vpop.f32.mrf.mxu0 }
 0x29a   :  { %v974_v24 = vadd.f32 %v973_v17, %v932_v13 }
 0x29b   :  { %v2231_v18 = vpop.f32.mrf.mxu0 }
 0x29c   :  { %v2381_v18 = vld [vmem:[#allocation12 + $0x170] ss:$8 sps:$4 sm:$0xff]  }
 0x29d   :  { %v976_v19 = vpop.f32.mrf.mxu0 }
 0x29e   :  { %v977_v27 = vadd.f32 %v976_v19, %v935_v15 }
 0x29f   :  { %v2232_v20 = vpop.f32.mrf.mxu0 }
 0x2a0   :  { %v2389_v20 = vld [vmem:[#allocation12 + $0x164] ss:$8 sps:$4 sm:$0xff]  }
 0x2b1   :  { %v1024_v21 = vpop.f32.mrf.mxu1 }
 0x2b2   :  { %v1031_v25 = vadd.f32 %v1024_v21, %v974_v24  ;;  %v2384_v24 = vld [vmem:[#allocation12 + $0x1f0] ss:$8 sps:$4 sm:$0xff]  }
 0x2b3   :  { %v2251_v22 = vpop.f32.mrf.mxu1 }
 0x2b4   :  { %v2387_v22 = vld [vmem:[#allocation12 + $0x160] ss:$8 sps:$4 sm:$0xff]  }
 0x2b5   :  { %v1027_v23 = vpop.f32.mrf.mxu1 }
 0x2b6   :  { %v1032_v32 = vadd.f32 %v1027_v23, %v977_v27  ;;  %v2395_v23 = vld [vmem:[#allocation12 + $0x154] ss:$8 sps:$4 sm:$0xff]  }
 0x2b7   :  { %v2252_v0 = vpop.f32.mrf.mxu1 }
 0x2b9   :  { %v1077_v26 = vpop.f32.mrf.mxu0 }
 0x2ba   :  { %v1084_v28 = vadd.f32 %v1077_v26, %v1031_v25  ;;  %v2393_v26 = vld [vmem:[#allocation12 + $0x150] ss:$8 sps:$4 sm:$0xff]  }
 0x2bb   :  { %v2271_v56 = vpop.f32.mrf.mxu0 }
 0x2bc   :  { %v1101_v30 = vmul.f32 %v1084_v28, %v1084_v28  ;;  %v1089_v31 = vadd.f32 %v1088_v53, %v1084_v28  ;;  %v2401_v56 = vld [vmem:[#allocation12 + $0x144] ss:$8 sps:$4 sm:$0xff]  }
 0x2bd   :  { %v1080_v29 = vpop.f32.mrf.mxu0 }
 0x2be   :  { %v1085_v57 = vadd.f32 %v1080_v29, %v1032_v32  ;;  %v1104_v40 = vadd.f32 %v1103_v55, %v1101_v30  ;;  %v2390_v30 = vld [vmem:[#allocation12 + $0x1e0] ss:$8 sps:$4 sm:$0xff]   ;;  %v2398_v29 = vld [vmem:[#allocation12 + $0x1d4] ss:$8 sps:$4 sm:$0xff]  }
 0x2bf   :  { %v2272_v58 = vpop.f32.mrf.mxu0  ;;  %v2399_v32 = vld [vmem:[#allocation12 + $0x140] ss:$8 sps:$4 sm:$0xff]  }
 0x2c0   :  { %v1090_v48 = vadd.f32 %v1089_v31, %v1085_v57  ;;  %v1102_v36 = vmul.f32 %v1085_v57, %v1085_v57  ;;  %v2407_v31 = vld [vmem:[#allocation12 + $0x134] ss:$8 sps:$4 sm:$0xff]   ;;  %v2405_v58 = vld [vmem:[#allocation12 + $0x130] ss:$8 sps:$4 sm:$0xff]  }
 0x2c2   :  { %v1091_v44 = vrot.slane %v1090_v48, 4  ;;  %v1105_v59 = vadd.f32 %v1104_v40, %v1102_v36  ;;  %v2404_v40 = vld [vmem:[#allocation12 + $0x1c4] ss:$8 sps:$4 sm:$0xff]   ;;  %v2402_v36 = vld [vmem:[#allocation12 + $0x1c0] ss:$8 sps:$4 sm:$0xff]  }
 0x2c4   :  { %v1092_v60 = vadd.f32 %v1091_v44, %v1090_v48  ;;  %v1106_v61 = vrot.slane %v1105_v59, 4  ;;  %v2413_v48 = vld [vmem:[#allocation12 + $0x124] ss:$8 sps:$4 sm:$0xff]   ;;  %v2411_v44 = vld [vmem:[#allocation12 + $0x120] ss:$8 sps:$4 sm:$0xff]  }
 0x2c6   :  { %v1093_v62 = vrot.slane %v1092_v60, 2  ;;  %v1107_v63 = vadd.f32 %v1106_v61, %v1105_v59  ;;  %v2410_v59 = vld [vmem:[#allocation12 + $0x1b4] ss:$8 sps:$4 sm:$0xff]   ;;  %v2408_v61 = vld [vmem:[#allocation12 + $0x1b0] ss:$8 sps:$4 sm:$0xff]  }
 0x2c8   :  { %v1094_v1 = vadd.f32 %v1093_v62, %v1092_v60  ;;  %v1108_v2 = vrot.slane %v1107_v63, 2  ;;  %v2419_v60 = vld [vmem:[#allocation12 + $0x114] ss:$8 sps:$4 sm:$0xff]   ;;  %v2416_v62 = vld [vmem:[#allocation12 + $0x1a4] ss:$8 sps:$4 sm:$0xff]  }
 0x2ca   :  { %v1095_v3 = vrot.slane %v1094_v1, 1  ;;  %v1109_v4 = vadd.f32 %v1108_v2, %v1107_v63  ;;  %v2425_v63 = vld [vmem:[#allocation12 + $0x104] ss:$8 sps:$4 sm:$0xff]   ;;  %v2423_v2 = vld [vmem:[#allocation12 + $0x100] ss:$8 sps:$4 sm:$0xff]  }
 0x2cc   :  { %v1096_v5 = vadd.f32 %v1095_v3, %v1094_v1  ;;  %v1110_v6 = vrot.slane %v1109_v4, 1  ;;  %v2414_v1 = vld [vmem:[#allocation12 + $0x1a0] ss:$8 sps:$4 sm:$0xff]   ;;  %v2422_v3 = vld [vmem:[#allocation12 + $0x194] ss:$8 sps:$4 sm:$0xff]  }
 0x2ce   :  { %v1098_v7 = vmul.f32 0.03125, %v1096_v5  ;;  %v1111_v8 = vadd.f32 %v1110_v6, %v1109_v4  ;;  %v2420_v4 = vld [vmem:[#allocation12 + $0x190] ss:$8 sps:$4 sm:$0xff]   ;;  %v2428_v5 = vld [vmem:[#allocation12 + $0x184] ss:$8 sps:$4 sm:$0xff]  }
 0x2cf   :  { %v2426_v6 = vld [vmem:[#allocation12 + $0x180] ss:$8 sps:$4 sm:$0xff]  }
 0x2d0   :  { %v1112_v9 = vmul.f32 0.03125, %v1111_v8  ;;  %v1113_v10 = vmul.f32 %v1098_v7, %v1098_v7  ;;  %v1115_v11 = vsub.f32 %v896_v46, %v1098_v7  ;;  %v1116_v33 = vsub.f32 %v897_v50, %v1098_v7 }
 0x2d1   :  { %v1117_v37 = vsub.f32 %v1084_v28, %v1098_v7  ;;  %v1118_v38 = vsub.f32 %v1085_v57, %v1098_v7  ;;  %v2392_v28 = vld [vmem:[#allocation12 + $0x1e4] ss:$8 sps:$4 sm:$0xff]   ;;  %v2396_v57 = vld [vmem:[#allocation12 + $0x1d0] ss:$8 sps:$4 sm:$0xff]  }
 0x2d2   :  { %v1114_v34 = vsub.f32 %v1112_v9, %v1113_v10 }
 0x2d4   :  { %v1119_v35 = vadd.f32 1e-05, %v1114_v34 }
 0x2d6   :  { %2431 = vrsqrt.f32 %v1119_v35 }
 0x2e3   :  { %v2432_v39 = vpop.eup %2431 }
 0x2e4   :  { %v1121_v42 = vmul.f32 %v2432_v39, %v1115_v11  ;;  %v1122_v43 = vmul.f32 %v2432_v39, %v1116_v33  ;;  %v1123_v45 = vmul.f32 %v2432_v39, %v1117_v37  ;;  %v1124_v47 = vmul.f32 %v2432_v39, %v1118_v38 }
 0x2e6   :  { %v1131_v51 = vmul.f32 %v1921_v41, %v1121_v42  ;;  %v1132_v52 = vmul.f32 %v1921_v41, %v1122_v43  ;;  %v1133_v53 = vmul.f32 %v1921_v41, %v1123_v45  ;;  %v1134_v54 = vmul.f32 %v1921_v41, %v1124_v47 }
 0x2e8   :  { %v1141_v55 = vadd.f32 %v1922_v49, %v1131_v51  ;;  %v1142_v13 = vadd.f32 %v1922_v49, %v1132_v52  ;;  %v1143_v46 = vadd.f32 %v1922_v49, %v1133_v53  ;;  %v1144_v50 = vadd.f32 %v1922_v49, %v1134_v54 }
 0x2ea   :  { %v1145_v14 = vmax.f32 %v1141_v55, 0.0  ;;  %v1146_v15 = vmax.f32 %v1142_v13, 0.0  ;;  %v1147_v16 = vmax.f32 %v1143_v46, 0.0  ;;  %v1148_v17 = vmax.f32 %v1144_v50, 0.0 }
 0x2ec   :  { %1149 = vst [vmem:[#allocation7] sm:$0xff] %v1145_v14  ;;  %1150 = vst [vmem:[#allocation7 + $0x10] sm:$0xff] %v1146_v15  ;;  %v1999_v19 = vpack.c.bf16 %v1146_v15, %v1145_v14  ;;  %v2001_v21 = vpack.c.bf16 %v1148_v17, %v1147_v16 }
 0x2ed   :  { %1151 = vst [vmem:[#allocation6 + $0x1] sm:$0xff] %v1147_v16  ;;  %1152 = vst [vmem:[#allocation6 + $0x11] sm:$0xff] %v1148_v17 }
 0x2ee   :  { %1344 = vmatmul.mubr.bf16.vlgmr.msra.gmra.mxu1 %v1999_v19 }
 0x2ef   :  { %1574 = vmatpush1.bf16.msra.mxu1 %v2381_v18  ;;  %1605 = vmatprep.mubr.bf16.mxu1 %v2642_v12 }
 0x2f0   :  { %1575 = vmatprep.subr.bf16.mxu1 %v2389_v20 }
 0x2f3   :  { %1576 = vmatpush1.bf16.msra.mxu1 %v2387_v22  ;;  %v1620_v7 = vld [vmem:[#allocation7 + $0x1] sm:$0xff]  ;;  %v1621_v8 = vld [vmem:[#allocation7 + $0x11] sm:$0xff] }
 0x2f4   :  { %v1217_v0 = vld [vmem:[#allocation6] sm:$0xff]  ;;  %v1218_v25 = vld [vmem:[#allocation6 + $0x10] sm:$0xff]  ;;  %1577 = vmatprep.subr.bf16.mxu1 %v2395_v23  ;;  %v2002_v9 = vpack.c.bf16 %v1621_v8, %v1620_v7 }
 0x2f5   :  { %v2000_v27 = vpack.c.bf16 %v1218_v25, %v1217_v0 }
 0x2f7   :  { %1473 = vmatmul.mubr.bf16.vlgmr.msra.gmra.mxu0 %v2000_v27  ;;  %1578 = vmatpush1.bf16.msra.mxu1 %v2393_v26 }
 0x2f8   :  { %1711 = vmatpush1.bf16.msra.mxu0 %v2384_v24  ;;  %1579 = vmatprep.subr.bf16.mxu1 %v2401_v56 }
 0x2f9   :  { %1712 = vmatprep.subr.bf16.mxu0 %v2392_v28  ;;  %1742 = vmatprep.mubr.bf16.mxu0 %v2642_v12  ;;  %v2417_v12 = vld [vmem:[#allocation12 + $0x110] ss:$8 sps:$4 sm:$0xff]  }
 0x2fb   :  { %1580 = vmatpush1.bf16.msra.mxu1 %v2399_v32 }
 0x2fc   :  { %1713 = vmatpush1.bf16.msra.mxu0 %v2390_v30  ;;  %1581 = vmatprep.subr.bf16.mxu1 %v2407_v31 }
 0x2fd   :  { %1714 = vmatprep.subr.bf16.mxu0 %v2398_v29 }
 0x2ff   :  { %1582 = vmatpush1.bf16.msra.mxu1 %v2405_v58 }
 0x300   :  { %1715 = vmatpush1.bf16.msra.mxu0 %v2396_v57  ;;  %1583 = vmatprep.subr.bf16.mxu1 %v2413_v48 }
 0x301   :  { %1716 = vmatprep.subr.bf16.mxu0 %v2404_v40 }
 0x303   :  { %1584 = vmatpush1.bf16.msra.mxu1 %v2411_v44 }
 0x304   :  { %1717 = vmatpush1.bf16.msra.mxu0 %v2402_v36  ;;  %1585 = vmatprep.subr.bf16.mxu1 %v2419_v60 }
 0x305   :  { %1718 = vmatprep.subr.bf16.mxu0 %v2410_v59 }
 0x307   :  { %1586 = vmatpush1.bf16.msra.mxu1 %v2417_v12 }
 0x308   :  { %1719 = vmatpush1.bf16.msra.mxu0 %v2408_v61  ;;  %1587 = vmatprep.subr.bf16.mxu1 %v2425_v63 }
 0x309   :  { %1720 = vmatprep.subr.bf16.mxu0 %v2416_v62 }
 0x30b   :  { %1588 = vmatpush1.bf16.msra.mxu1 %v2423_v2 }
 0x30c   :  { %1721 = vmatpush1.bf16.msra.mxu0 %v2414_v1 }
 0x30d   :  { %1722 = vmatprep.subr.bf16.mxu0 %v2422_v3 }
 0x30e   :  { %1606 = vmatmul.mubr.bf16.vlgmr.msra.gmra.mxu1 %v2001_v21 }
 0x310   :  { %1723 = vmatpush1.bf16.msra.mxu0 %v2420_v4 }
 0x311   :  { %1724 = vmatprep.subr.bf16.mxu0 %v2428_v5 }
 0x314   :  { %1725 = vmatpush1.bf16.msra.mxu0 %v2426_v6 }
 0x317   :  { %1743 = vmatmul.mubr.bf16.vlgmr.msra.gmra.mxu0 %v2002_v9 }
 0x3ae   :  { %v1345_v10 = vpop.f32.mrf.mxu1 }
 0x3b0   :  { %v1347_v11 = vpop.f32.mrf.mxu1 }
 0x3b2   :  { %v1349_v34 = vpop.f32.mrf.mxu1 }
 0x3b4   :  { %v1351_v37 = vpop.f32.mrf.mxu1 }
 0x3b7   :  { %v1474_v33 = vpop.f32.mrf.mxu0 }
 0x3b8   :  { %v1475_v45 = vadd.f32 %v1474_v33, %v1345_v10 }
 0x3b9   :  { %v1476_v35 = vpop.f32.mrf.mxu0 }
 0x3ba   :  { %v1477_v47 = vadd.f32 %v1476_v35, %v1347_v11 }
 0x3bb   :  { %v1478_v39 = vpop.f32.mrf.mxu0 }
 0x3bc   :  { %v1479_v51 = vadd.f32 %v1478_v39, %v1349_v34 }
 0x3bd   :  { %v1480_v42 = vpop.f32.mrf.mxu0 }
 0x3be   :  { %v1481_v13 = vadd.f32 %v1480_v42, %v1351_v37  ;;  %v1813_v37 = vlaneseq  ;;  %v1757_v42 = vld [vmem:[#allocation19] sm:$0x3] }
 0x3c0   :  { %v1814_v39 = vshrl.u32 %v1813_v37, 7 }
 0x3ce   :  { %v1607_v38 = vpop.f32.mrf.mxu1 }
 0x3cf   :  { %v1616_v52 = vadd.f32 %v1607_v38, %v1475_v45  ;;  %v1758_v45 = vld [vmem:[#allocation21] sm:$0x3] }
 0x3d0   :  { %v1609_v41 = vpop.f32.mrf.mxu1 }
 0x3d1   :  { %v1617_v53 = vadd.f32 %v1609_v41, %v1477_v47  ;;  %v1815_v41 = vsub.s32 0, %v1814_v39 }
 0x3d2   :  { %v1611_v43 = vpop.f32.mrf.mxu1 }
 0x3d3   :  { %v1618_v50 = vadd.f32 %v1611_v43, %v1479_v51  ;;  %v1819_v43 = vsub.s32 1, %v1814_v39  ;;  %v1816_v51 = vrot.slane %v1757_v42, %v1815_v41 }
 0x3d4   :  { %v1613_v55 = vpop.f32.mrf.mxu1 }
 0x3d5   :  { %v1619_v17 = vadd.f32 %v1613_v55, %v1481_v13  ;;  %v1831_v55 = vrot.slane %v1758_v45, %v1815_v41 }
 0x3d7   :  { %v1744_v49 = vpop.f32.mrf.mxu0 }
 0x3d8   :  { %v2982_v46 = vadd.f32 %v1744_v49, %v1616_v52 }
 0x3d9   :  { %v1746_v54 = vpop.f32.mrf.mxu0 }
 0x3da   :  { %v2984_v14 = vadd.f32 %v1746_v54, %v1617_v53  ;;  %v1776_v19 = vmul.f32 %v2982_v46, %v2982_v46 }
 0x3db   :  { %v1748_v15 = vpop.f32.mrf.mxu0 }
 0x3dc   :  { %v1755_v16 = vadd.f32 %v1748_v15, %v1618_v50  ;;  %v1777_v23 = vmul.f32 %v2984_v14, %v2984_v14  ;;  %v1820_v15 = vrot.slane %v1757_v42, %v1819_v43 }
 0x3dd   :  { %v1750_v18 = vpop.f32.mrf.mxu0 }
 0x3de   :  { %v1759_v20 = vadd.f32 %v1755_v16, %v2982_v46  ;;  %v1778_v21 = vmul.f32 %v1755_v16, %v1755_v16  ;;  %v2989_v22 = vadd.f32 %v1750_v18, %v1619_v17 }
 0x3e0   :  { %v1760_v24 = vrot.slane %v1759_v20, 4  ;;  %v1780_v0 = vadd.f32 %v1778_v21, %v1776_v19  ;;  %v1766_v25 = vadd.f32 %v2989_v22, %v2984_v14  ;;  %v1779_v26 = vmul.f32 %v2989_v22, %v2989_v22 }
 0x3e2   :  { %v1761_v27 = vadd.f32 %v1760_v24, %v1759_v20  ;;  %v1781_v28 = vrot.slane %v1780_v0, 4  ;;  %v1767_v56 = vrot.slane %v1766_v25, 4  ;;  %v1787_v30 = vadd.f32 %v1779_v26, %v1777_v23 }
 0x3e3   :  { %v1835_v23 = vrot.slane %v1758_v45, %v1819_v43 }
 0x3e4   :  { %v1762_v32 = vrot.slane %v1761_v27, 2  ;;  %v1782_v29 = vadd.f32 %v1781_v28, %v1780_v0  ;;  %v1768_v31 = vadd.f32 %v1767_v56, %v1766_v25  ;;  %v1788_v57 = vrot.slane %v1787_v30, 4 }
 0x3e6   :  { %v1763_v58 = vadd.f32 %v1762_v32, %v1761_v27  ;;  %v1783_v40 = vrot.slane %v1782_v29, 2  ;;  %v1769_v48 = vrot.slane %v1768_v31, 2  ;;  %v1789_v36 = vadd.f32 %v1788_v57, %v1787_v30 }
 0x3e8   :  { %v1764_v44 = vrot.slane %v1763_v58, 1  ;;  %v1784_v59 = vadd.f32 %v1783_v40, %v1782_v29  ;;  %v1770_v60 = vadd.f32 %v1769_v48, %v1768_v31  ;;  %v1790_v61 = vrot.slane %v1789_v36, 2 }
 0x3ea   :  { %v1765_v12 = vadd.f32 %v1764_v44, %v1763_v58  ;;  %v1785_v62 = vrot.slane %v1784_v59, 1  ;;  %v1771_v63 = vrot.slane %v1770_v60, 1  ;;  %v1791_v1 = vadd.f32 %v1790_v61, %v1789_v36 }
 0x3ec   :  { %v1774_v2 = vmul.f32 0.0625, %v1765_v12  ;;  %v1786_v3 = vadd.f32 %v1785_v62, %v1784_v59  ;;  %v1772_v4 = vadd.f32 %v1771_v63, %v1770_v60  ;;  %v1792_v5 = vrot.slane %v1791_v1, 1 }
 0x3ee   :  { %v1794_v6 = vmul.f32 0.0625, %v1786_v3  ;;  %v1796_v7 = vmul.f32 %v1774_v2, %v1774_v2  ;;  %v1775_v8 = vmul.f32 0.0625, %v1772_v4  ;;  %v1793_v9 = vadd.f32 %v1792_v5, %v1791_v1 }
 0x3ef   :  { %v1800_v47 = vsub.f32 %v2982_v46, %v1774_v2  ;;  %v1802_v49 = vsub.f32 %v1755_v16, %v1774_v2 }
 0x3f0   :  { %v1798_v10 = vsub.f32 %v1794_v6, %v1796_v7  ;;  %v1795_v11 = vmul.f32 0.0625, %v1793_v9  ;;  %v1797_v33 = vmul.f32 %v1775_v8, %v1775_v8  ;;  %v1801_v13 = vsub.f32 %v2984_v14, %v1775_v8 }
 0x3f1   :  { %v1803_v50 = vsub.f32 %v2989_v22, %v1775_v8 }
 0x3f2   :  { %v1804_v34 = vadd.f32 1e-05, %v1798_v10  ;;  %v1799_v35 = vsub.f32 %v1795_v11, %v1797_v33 }
 0x3f4   :  { %2433 = vrsqrt.f32 %v1804_v34  ;;  %v1805_v38 = vadd.f32 1e-05, %v1799_v35 }
 0x3f6   :  { %2435 = vrsqrt.f32 %v1805_v38 }
 0x401   :  { %v2434_v52 = vpop.eup %2433 }
 0x402   :  { %v1808_v53 = vmul.f32 %v2434_v52, %v1800_v47  ;;  %v1810_v54 = vmul.f32 %v2434_v52, %v1802_v49 }
 0x403   :  { %v2436_v17 = vpop.eup %2435 }
 0x404   :  { %v1823_v18 = vmul.f32 %v1816_v51, %v1808_v53  ;;  %v1825_v19 = vmul.f32 %v1816_v51, %v1810_v54  ;;  %v1809_v20 = vmul.f32 %v2436_v17, %v1801_v13  ;;  %v1811_v21 = vmul.f32 %v2436_v17, %v1803_v50 }
 0x406   :  { %v1838_v24 = vadd.f32 %v1831_v55, %v1823_v18  ;;  %v1840_v0 = vadd.f32 %v1831_v55, %v1825_v19  ;;  %v1824_v46 = vmul.f32 %v1820_v15, %v1809_v20  ;;  %v1826_v16 = vmul.f32 %v1820_v15, %v1811_v21 }
 0x408   :  { %v1839_v25 = vadd.f32 %v1835_v23, %v1824_v46  ;;  %v1841_v26 = vadd.f32 %v1835_v23, %v1826_v16  ;;  %v1842_v27 = vmax.f32 %v1838_v24, 0.0  ;;  %v1844_v28 = vmax.f32 %v1840_v0, 0.0 }
 0x40a   :  { %v1843_v56 = vmax.f32 %v1839_v25, 0.0  ;;  %v1845_v30 = vmax.f32 %v1841_v26, 0.0 }
 0x40c   :  { %v2003_v14 = vpack.c.bf16 %v1843_v56, %v1842_v27  ;;  %v2004_v32 = vpack.c.bf16 %v1845_v30, %v1844_v28 }
 0x40e   :  { %1858 = vst [vmem:[%s3016_s10] sm:$0xff] %v2003_v14  ;;  %1859 = vst [vmem:[%s3016_s10 + $0x8] sm:$0xff] %v2004_v32 }
 0x40f   :  { %1864 = vsyncpa [#allocation9], 1 }
 0x410   :  { %1865 = vsyncpa [#allocation11], 1 }
 0x411   :  { %1866 = vsyncpa [#allocation14], 1 }
 0x412   :  { %1867 = vsyncpa [#allocation17], 1 }
 0x413   :  { %1868 = vsyncpa [#allocation20], 1 }

// kernel: mhd_joint_processor_forward.4
= control target key start
LH: loop header
LB: loop body
LE: loop exit
PB: predicated region body
PF: predicated region fallthrough
CT: control target
= control target key end

     0   :  { %vm219_vm0 = vcmask 130048   ;;  %vm953_vm1 = vcmask 523264   ;;  %v6900_v28 = vmov 0.0   ;;  %vm955_vm2 = vcmask 516096   ;;  %s8873_s1 = inlined_call_operand.vmem [shape: bf16[16,64], index: 1, kind: input, shape index: {}]   ;;  %s8874_s0 = inlined_call_operand.vmem [shape: bf16[448,16], index: 0, kind: input, shape index: {}]   ;;  %s8875_s2 = inlined_call_operand.vmem [shape: bf16[1024,128], index: 2, kind: input, shape index: {}]   ;;  %s8876_s3 = inlined_call_operand.vmem [shape: bf16[128,128], index: 3, kind: output, shape index: {}]  }
   0x1   :  { %v6508_v0 = vld [vmem:[%s8873_s1] sm:$0xff]   ;;  %v6510_v2 = vld [vmem:[%s8874_s0 + $0x8] sm:$0xff]   ;;  %v6511_v3 = vld [vmem:[%s8874_s0 + $0x10] sm:$0xff]   ;;  %961 = vst.msk [vmem:[#allocation2 + $0x30] sm:$0xff] %vm953_vm1, %v6900_v28  ;;  %vm1100_vm3 = vcmask 522240  }
   0x2   :  { %v6509_v1 = vld [vmem:[%s8874_s0] sm:$0xff]   ;;  %6057 = vmatprep.subr.bf16.mxu0 %v6508_v0  ;;  %v6512_v4 = vld [vmem:[%s8874_s0 + $0x18] sm:$0xff]   ;;  %v6514_v6 = vld [vmem:[%s8874_s0 + $0x28] sm:$0xff]   ;;  %954 = vst.msk [vmem:[#allocation2] sm:$0xff] %vm953_vm1, %v6900_v28 }
   0x3   :  { %6058 = vmatpush3.bf16.msra.mxu0 %v6508_v0  ;;  %6059 = vmatprep.mubr.msk.bf16.mxu0 %vm219_vm0, %v6509_v1  ;;  %v6513_v5 = vld [vmem:[%s8874_s0 + $0x20] sm:$0xff]   ;;  %v6515_v7 = vld [vmem:[%s8874_s0 + $0x30] sm:$0xff]   ;;  %v6516_v8 = vld [vmem:[%s8874_s0 + $0x38] sm:$0xff]   ;;  %957 = vst.msk [vmem:[#allocation2 + $0x10] sm:$0xff] %vm953_vm1, %v6900_v28 }
   0x4   :  { %v6517_v9 = vld [vmem:[%s8874_s0 + $0x40] sm:$0xff]   ;;  %v6518_v10 = vld [vmem:[%s8874_s0 + $0x48] sm:$0xff]   ;;  %v6519_v11 = vld [vmem:[%s8874_s0 + $0x50] sm:$0xff]   ;;  %959 = vst.msk [vmem:[#allocation2 + $0x20] sm:$0xff] %vm953_vm1, %v6900_v28 }
   0x5   :  { %v6520_v12 = vld [vmem:[%s8874_s0 + $0x58] sm:$0xff]   ;;  %v6521_v13 = vld [vmem:[%s8874_s0 + $0x60] sm:$0xff]   ;;  %v6522_v14 = vld [vmem:[%s8874_s0 + $0x68] sm:$0xff]   ;;  %963 = vst.msk [vmem:[#allocation2 + $0x40] sm:$0xff] %vm953_vm1, %v6900_v28 }
   0x6   :  { %6060 = vmatmul.mubr.msk.bf16.vlgmr.msra.gmra.mxu0 %vm219_vm0, %v6510_v2  ;;  %v6523_v15 = vld [vmem:[%s8874_s0 + $0x70] sm:$0xff]   ;;  %v6524_v16 = vld [vmem:[%s8874_s0 + $0x78] sm:$0xff]   ;;  %v6525_v17 = vld [vmem:[%s8874_s0 + $0x80] sm:$0xff]   ;;  %965 = vst.msk [vmem:[#allocation2 + $0x50] sm:$0xff] %vm953_vm1, %v6900_v28 }
   0x7   :  { %6063 = vmatprep.mubr.msk.bf16.mxu0 %vm219_vm0, %v6511_v3  ;;  %v6526_v18 = vld [vmem:[%s8874_s0 + $0x88] sm:$0xff]   ;;  %v6527_v19 = vld [vmem:[%s8874_s0 + $0x90] sm:$0xff]   ;;  %v6528_v20 = vld [vmem:[%s8874_s0 + $0x98] sm:$0xff]   ;;  %967 = vst.msk [vmem:[#allocation2 + $0x60] sm:$0xff] %vm953_vm1, %v6900_v28 }
   0x8   :  { %v6529_v21 = vld [vmem:[%s8874_s0 + $0xa0] sm:$0xff]   ;;  %v6530_v22 = vld [vmem:[%s8874_s0 + $0xa8] sm:$0xff]   ;;  %v6531_v23 = vld [vmem:[%s8874_s0 + $0xb0] sm:$0xff]   ;;  %969 = vst.msk [vmem:[#allocation2 + $0x70] sm:$0xff] %vm953_vm1, %v6900_v28 }
   0x9   :  { %v6532_v24 = vld [vmem:[%s8874_s0 + $0xb8] sm:$0xff]   ;;  %v6533_v25 = vld [vmem:[%s8874_s0 + $0xc0] sm:$0xff]   ;;  %v6534_v26 = vld [vmem:[%s8874_s0 + $0xc8] sm:$0xff]   ;;  %971 = vst.msk [vmem:[#allocation2 + $0x80] sm:$0xff] %vm953_vm1, %v6900_v28 }
   0xa   :  { %v6535_v27 = vld [vmem:[%s8874_s0 + $0xd0] sm:$0xff]   ;;  %973 = vst.msk [vmem:[#allocation2 + $0x90] sm:$0xff] %vm953_vm1, %v6900_v28  ;;  %975 = vst.msk [vmem:[#allocation2 + $0xa0] sm:$0xff] %vm953_vm1, %v6900_v28  ;;  %v7179_v29 = vld [vmem:[%s8874_s0 + $0xd8] sm:$0xff]  }
   0xb   :  { %977 = vst.msk [vmem:[#allocation2 + $0xb0] sm:$0xff] %vm953_vm1, %v6900_v28  ;;  %979 = vst.msk [vmem:[#allocation2 + $0xc0] sm:$0xff] %vm953_vm1, %v6900_v28  ;;  %v6537_v30 = vld [vmem:[%s8875_s2 + $0x38] sm:$0xff]   ;;  %v6538_v31 = vld [vmem:[%s8875_s2 + $0x30] sm:$0xff]  }
   0xc   :  { %981 = vst.msk [vmem:[#allocation2 + $0xd0] sm:$0xff] %vm953_vm1, %v6900_v28  ;;  %983 = vst.msk [vmem:[#allocation2 + $0xe0] sm:$0xff] %vm953_vm1, %v6900_v28  ;;  %6115 = vmatprep.subr.bf16.mxu0 %v6537_v30  ;;  %6499 = vmatprep.subr.bf16.mxu1 %v6537_v30  ;;  %v6539_v32 = vld [vmem:[%s8875_s2 + $0x28] sm:$0xff]   ;;  %v6540_v33 = vld [vmem:[%s8875_s2 + $0x20] sm:$0xff]  }
   0xd   :  { %985 = vst.msk [vmem:[#allocation2 + $0xf0] sm:$0xff] %vm953_vm1, %v6900_v28  ;;  %987 = vst.msk [vmem:[#allocation2 + $0x100] sm:$0xff] %vm953_vm1, %v6900_v28  ;;  %6116 = vmatpush3.bf16.msra.mxu0 %v6537_v30  ;;  %6503 = vmatpush3.bf16.msra.mxu1 %v6537_v30  ;;  %v7342_v34 = vld [vmem:[%s8875_s2 + $0x98] sm:$0xff]  }
   0xe   :  { %6064 = vmatmul.mubr.msk.bf16.gmra.mxu0 %vm219_vm0, %v6512_v4  ;;  %989 = vst.msk [vmem:[#allocation2 + $0x110] sm:$0xff] %vm953_vm1, %v6900_v28  ;;  %991 = vst.msk [vmem:[#allocation3] sm:$0xff] %vm953_vm1, %v6900_v28  ;;  %6117 = vmatprep.subr.bf16.mxu0 %v6538_v31  ;;  %v6545_v35 = vld [vmem:[%s8875_s2 + $0x18] sm:$0xff]  }
   0xf   :  { %6067 = vmatprep.mubr.msk.bf16.mxu0 %vm219_vm0, %v6513_v5  ;;  %993 = vst.msk [vmem:[#allocation3 + $0x10] sm:$0xff] %vm953_vm1, %v6900_v28  ;;  %995 = vst.msk [vmem:[#allocation3 + $0x20] sm:$0xff] %vm953_vm1, %v6900_v28  ;;  %6500 = vmatprep.subr.bf16.mxu1 %v6538_v31 }
  0x10   :  { %997 = vst.msk [vmem:[#allocation3 + $0x30] sm:$0xff] %vm953_vm1, %v6900_v28  ;;  %999 = vst.msk [vmem:[#allocation3 + $0x40] sm:$0xff] %vm953_vm1, %v6900_v28 }
  0x11   :  { %1001 = vst.msk [vmem:[#allocation3 + $0x50] sm:$0xff] %vm953_vm1, %v6900_v28  ;;  %1003 = vst.msk [vmem:[#allocation3 + $0x60] sm:$0xff] %vm953_vm1, %v6900_v28  ;;  %6118 = vmatpush3.bf16.msra.mxu0 %v6538_v31  ;;  %6504 = vmatpush3.bf16.msra.mxu1 %v6538_v31 }
  0x12   :  { %1005 = vst.msk [vmem:[#allocation3 + $0x70] sm:$0xff] %vm953_vm1, %v6900_v28  ;;  %1007 = vst.msk [vmem:[#allocation3 + $0x80] sm:$0xff] %vm953_vm1, %v6900_v28  ;;  %6119 = vmatprep.subr.bf16.mxu0 %v6539_v32  ;;  %6501 = vmatprep.subr.bf16.mxu1 %v6539_v32 }
  0x13   :  { %1009 = vst.msk [vmem:[#allocation3 + $0x90] sm:$0xff] %vm953_vm1, %v6900_v28  ;;  %1011 = vst.msk [vmem:[#allocation3 + $0xa0] sm:$0xff] %vm953_vm1, %v6900_v28 }
  0x14   :  { %1013 = vst.msk [vmem:[#allocation3 + $0xb0] sm:$0xff] %vm953_vm1, %v6900_v28  ;;  %1015 = vst.msk [vmem:[#allocation3 + $0xc0] sm:$0xff] %vm953_vm1, %v6900_v28 }
  0x15   :  { %1017 = vst.msk [vmem:[#allocation3 + $0xd0] sm:$0xff] %vm953_vm1, %v6900_v28  ;;  %1019 = vst.msk [vmem:[#allocation3 + $0xe0] sm:$0xff] %vm953_vm1, %v6900_v28  ;;  %6120 = vmatpush3.bf16.msra.mxu0 %v6539_v32  ;;  %6505 = vmatpush3.bf16.msra.mxu1 %v6539_v32 }
  0x16   :  { %6068 = vmatmul.mubr.msk.bf16.gmra.mxu0 %vm219_vm0, %v6514_v6  ;;  %1021 = vst.msk [vmem:[#allocation3 + $0xf0] sm:$0xff] %vm953_vm1, %v6900_v28  ;;  %1023 = vst.msk [vmem:[#allocation3 + $0x100] sm:$0xff] %vm953_vm1, %v6900_v28  ;;  %6121 = vmatprep.subr.bf16.mxu0 %v6540_v33 }
  0x17   :  { %6071 = vmatprep.mubr.msk.bf16.mxu0 %vm219_vm0, %v6515_v7  ;;  %1025 = vst.msk [vmem:[#allocation3 + $0x110] sm:$0xff] %vm953_vm1, %v6900_v28  ;;  %1027 = vst.msk [vmem:[#allocation4] sm:$0xff] %vm953_vm1, %v6900_v28  ;;  %6502 = vmatprep.subr.bf16.mxu1 %v6540_v33 }
  0x18   :  { %1029 = vst.msk [vmem:[#allocation4 + $0x10] sm:$0xff] %vm953_vm1, %v6900_v28  ;;  %1031 = vst.msk [vmem:[#allocation4 + $0x20] sm:$0xff] %vm953_vm1, %v6900_v28 }
  0x19   :  { %1033 = vst.msk [vmem:[#allocation4 + $0x30] sm:$0xff] %vm953_vm1, %v6900_v28  ;;  %1035 = vst.msk [vmem:[#allocation4 + $0x40] sm:$0xff] %vm953_vm1, %v6900_v28  ;;  %6122 = vmatpush3.bf16.msra.mxu0 %v6540_v33  ;;  %6506 = vmatpush3.bf16.msra.mxu1 %v6540_v33 }
  0x1a   :  { %1037 = vst.msk [vmem:[#allocation4 + $0x50] sm:$0xff] %vm953_vm1, %v6900_v28  ;;  %1039 = vst.msk [vmem:[#allocation4 + $0x60] sm:$0xff] %vm953_vm1, %v6900_v28  ;;  %6211 = vmatprep.subr.bf16.mxu0 %v7342_v34  ;;  %6139 = vmatprep.subr.bf16.mxu1 %v6545_v35 }
  0x1b   :  { %1041 = vst.msk [vmem:[#allocation4 + $0x70] sm:$0xff] %vm953_vm1, %v6900_v28  ;;  %1043 = vst.msk [vmem:[#allocation4 + $0x80] sm:$0xff] %vm953_vm1, %v6900_v28 }
  0x1c   :  { %1045 = vst.msk [vmem:[#allocation4 + $0x90] sm:$0xff] %vm953_vm1, %v6900_v28  ;;  %1047 = vst.msk [vmem:[#allocation4 + $0xa0] sm:$0xff] %vm953_vm1, %v6900_v28 }
  0x1d   :  { %1049 = vst.msk [vmem:[#allocation4 + $0xb0] sm:$0xff] %vm953_vm1, %v6900_v28  ;;  %1051 = vst.msk [vmem:[#allocation4 + $0xc0] sm:$0xff] %vm953_vm1, %v6900_v28 }
  0x1e   :  { %6072 = vmatmul.mubr.msk.bf16.gmra.mxu0 %vm219_vm0, %v6516_v8  ;;  %1053 = vst.msk [vmem:[#allocation4 + $0xd0] sm:$0xff] %vm953_vm1, %v6900_v28  ;;  %1055 = vst.msk [vmem:[#allocation4 + $0xe0] sm:$0xff] %vm953_vm1, %v6900_v28 }
  0x1f   :  { %6075 = vmatprep.mubr.msk.bf16.mxu0 %vm219_vm0, %v6517_v9  ;;  %1057 = vst.msk [vmem:[#allocation4 + $0xf0] sm:$0xff] %vm953_vm1, %v6900_v28  ;;  %1059 = vst.msk [vmem:[#allocation4 + $0x100] sm:$0xff] %vm953_vm1, %v6900_v28 }
  0x20   :  { %1061 = vst.msk [vmem:[#allocation4 + $0x110] sm:$0xff] %vm953_vm1, %v6900_v28  ;;  %1063 = vst.msk [vmem:[#allocation5] sm:$0xff] %vm953_vm1, %v6900_v28 }
  0x21   :  { %1065 = vst.msk [vmem:[#allocation5 + $0x10] sm:$0xff] %vm953_vm1, %v6900_v28  ;;  %1067 = vst.msk [vmem:[#allocation5 + $0x20] sm:$0xff] %vm953_vm1, %v6900_v28 }
  0x22   :  { %1069 = vst.msk [vmem:[#allocation5 + $0x30] sm:$0xff] %vm953_vm1, %v6900_v28  ;;  %1071 = vst.msk [vmem:[#allocation5 + $0x40] sm:$0xff] %vm953_vm1, %v6900_v28 }
  0x23   :  { %1073 = vst.msk [vmem:[#allocation5 + $0x50] sm:$0xff] %vm953_vm1, %v6900_v28  ;;  %1075 = vst.msk [vmem:[#allocation5 + $0x60] sm:$0xff] %vm953_vm1, %v6900_v28 }
  0x24   :  { %1077 = vst.msk [vmem:[#allocation5 + $0x70] sm:$0xff] %vm953_vm1, %v6900_v28  ;;  %1079 = vst.msk [vmem:[#allocation5 + $0x80] sm:$0xff] %vm953_vm1, %v6900_v28 }
  0x25   :  { %1081 = vst.msk [vmem:[#allocation5 + $0x90] sm:$0xff] %vm953_vm1, %v6900_v28  ;;  %1083 = vst.msk [vmem:[#allocation5 + $0xa0] sm:$0xff] %vm953_vm1, %v6900_v28 }
  0x26   :  { %6076 = vmatmul.mubr.msk.bf16.gmra.mxu0 %vm219_vm0, %v6518_v10  ;;  %1085 = vst.msk [vmem:[#allocation5 + $0xb0] sm:$0xff] %vm953_vm1, %v6900_v28  ;;  %1087 = vst.msk [vmem:[#allocation5 + $0xc0] sm:$0xff] %vm953_vm1, %v6900_v28 }
  0x27   :  { %6079 = vmatprep.mubr.msk.bf16.mxu0 %vm219_vm0, %v6519_v11  ;;  %1089 = vst.msk [vmem:[#allocation5 + $0xd0] sm:$0xff] %vm953_vm1, %v6900_v28  ;;  %1091 = vst.msk [vmem:[#allocation5 + $0xe0] sm:$0xff] %vm953_vm1, %v6900_v28 }
  0x28   :  { %1093 = vst.msk [vmem:[#allocation5 + $0xf0] sm:$0xff] %vm953_vm1, %v6900_v28  ;;  %1095 = vst.msk [vmem:[#allocation5 + $0x100] sm:$0xff] %vm953_vm1, %v6900_v28 }
  0x29   :  { %1097 = vst.msk [vmem:[#allocation5 + $0x110] sm:$0xff] %vm953_vm1, %v6900_v28 }
  0x2a   :  { %1028 = vst.msk [vmem:[#allocation4 + $0x8] sm:$0x1] %vm955_vm2, %v6900_v28  ;;  %1030 = vst.msk [vmem:[#allocation4 + $0x18] sm:$0x1] %vm955_vm2, %v6900_v28 }
  0x2b   :  { %956 = vst.msk [vmem:[#allocation2 + $0x8] sm:$0x1] %vm955_vm2, %v6900_v28  ;;  %958 = vst.msk [vmem:[#allocation2 + $0x18] sm:$0x1] %vm955_vm2, %v6900_v28 }
  0x2c   :  { %960 = vst.msk [vmem:[#allocation2 + $0x28] sm:$0x1] %vm955_vm2, %v6900_v28  ;;  %962 = vst.msk [vmem:[#allocation2 + $0x38] sm:$0x1] %vm955_vm2, %v6900_v28 }
  0x2d   :  { %964 = vst.msk [vmem:[#allocation2 + $0x48] sm:$0x1] %vm955_vm2, %v6900_v28  ;;  %966 = vst.msk [vmem:[#allocation2 + $0x58] sm:$0x1] %vm955_vm2, %v6900_v28 }
  0x2e   :  { %6080 = vmatmul.mubr.msk.bf16.gmra.mxu0 %vm219_vm0, %v6520_v12  ;;  %968 = vst.msk [vmem:[#allocation2 + $0x68] sm:$0x1] %vm955_vm2, %v6900_v28  ;;  %970 = vst.msk [vmem:[#allocation2 + $0x78] sm:$0x1] %vm955_vm2, %v6900_v28 }
  0x2f   :  { %6083 = vmatprep.mubr.msk.bf16.mxu0 %vm219_vm0, %v6521_v13  ;;  %972 = vst.msk [vmem:[#allocation2 + $0x88] sm:$0x1] %vm955_vm2, %v6900_v28  ;;  %974 = vst.msk [vmem:[#allocation2 + $0x98] sm:$0x1] %vm955_vm2, %v6900_v28 }
  0x30   :  { %976 = vst.msk [vmem:[#allocation2 + $0xa8] sm:$0x1] %vm955_vm2, %v6900_v28  ;;  %978 = vst.msk [vmem:[#allocation2 + $0xb8] sm:$0x1] %vm955_vm2, %v6900_v28 }
  0x31   :  { %980 = vst.msk [vmem:[#allocation2 + $0xc8] sm:$0x1] %vm955_vm2, %v6900_v28  ;;  %982 = vst.msk [vmem:[#allocation2 + $0xd8] sm:$0x1] %vm955_vm2, %v6900_v28 }
  0x32   :  { %984 = vst.msk [vmem:[#allocation2 + $0xe8] sm:$0x1] %vm955_vm2, %v6900_v28  ;;  %986 = vst.msk [vmem:[#allocation2 + $0xf8] sm:$0x1] %vm955_vm2, %v6900_v28 }
  0x33   :  { %988 = vst.msk [vmem:[#allocation2 + $0x108] sm:$0x1] %vm955_vm2, %v6900_v28  ;;  %990 = vst.msk [vmem:[#allocation2 + $0x118] sm:$0x1] %vm955_vm2, %v6900_v28 }
  0x34   :  { %992 = vst.msk [vmem:[#allocation3 + $0x8] sm:$0x1] %vm955_vm2, %v6900_v28  ;;  %994 = vst.msk [vmem:[#allocation3 + $0x18] sm:$0x1] %vm955_vm2, %v6900_v28 }
  0x35   :  { %996 = vst.msk [vmem:[#allocation3 + $0x28] sm:$0x1] %vm955_vm2, %v6900_v28  ;;  %998 = vst.msk [vmem:[#allocation3 + $0x38] sm:$0x1] %vm955_vm2, %v6900_v28 }
  0x36   :  { %6084 = vmatmul.mubr.msk.bf16.gmra.mxu0 %vm219_vm0, %v6522_v14  ;;  %1000 = vst.msk [vmem:[#allocation3 + $0x48] sm:$0x1] %vm955_vm2, %v6900_v28  ;;  %1002 = vst.msk [vmem:[#allocation3 + $0x58] sm:$0x1] %vm955_vm2, %v6900_v28 }
  0x37   :  { %6087 = vmatprep.mubr.msk.bf16.mxu0 %vm219_vm0, %v6523_v15  ;;  %1004 = vst.msk [vmem:[#allocation3 + $0x68] sm:$0x1] %vm955_vm2, %v6900_v28  ;;  %1006 = vst.msk [vmem:[#allocation3 + $0x78] sm:$0x1] %vm955_vm2, %v6900_v28 }
  0x38   :  { %1008 = vst.msk [vmem:[#allocation3 + $0x88] sm:$0x1] %vm955_vm2, %v6900_v28  ;;  %1010 = vst.msk [vmem:[#allocation3 + $0x98] sm:$0x1] %vm955_vm2, %v6900_v28 }
  0x39   :  { %1012 = vst.msk [vmem:[#allocation3 + $0xa8] sm:$0x1] %vm955_vm2, %v6900_v28  ;;  %1014 = vst.msk [vmem:[#allocation3 + $0xb8] sm:$0x1] %vm955_vm2, %v6900_v28 }
  0x3a   :  { %1016 = vst.msk [vmem:[#allocation3 + $0xc8] sm:$0x1] %vm955_vm2, %v6900_v28  ;;  %1018 = vst.msk [vmem:[#allocation3 + $0xd8] sm:$0x1] %vm955_vm2, %v6900_v28 }
  0x3b   :  { %1020 = vst.msk [vmem:[#allocation3 + $0xe8] sm:$0x1] %vm955_vm2, %v6900_v28  ;;  %1022 = vst.msk [vmem:[#allocation3 + $0xf8] sm:$0x1] %vm955_vm2, %v6900_v28 }
  0x3c   :  { %1024 = vst.msk [vmem:[#allocation3 + $0x108] sm:$0x1] %vm955_vm2, %v6900_v28  ;;  %1026 = vst.msk [vmem:[#allocation3 + $0x118] sm:$0x1] %vm955_vm2, %v6900_v28 }
  0x3d   :  { %1032 = vst.msk [vmem:[#allocation4 + $0x28] sm:$0x1] %vm955_vm2, %v6900_v28  ;;  %1034 = vst.msk [vmem:[#allocation4 + $0x38] sm:$0x1] %vm955_vm2, %v6900_v28 }
  0x3e   :  { %6088 = vmatmul.mubr.msk.bf16.gmra.mxu0 %vm219_vm0, %v6524_v16  ;;  %1036 = vst.msk [vmem:[#allocation4 + $0x48] sm:$0x1] %vm955_vm2, %v6900_v28  ;;  %1038 = vst.msk [vmem:[#allocation4 + $0x58] sm:$0x1] %vm955_vm2, %v6900_v28 }
  0x3f   :  { %6091 = vmatprep.mubr.msk.bf16.mxu0 %vm219_vm0, %v6525_v17  ;;  %1040 = vst.msk [vmem:[#allocation4 + $0x68] sm:$0x1] %vm955_vm2, %v6900_v28  ;;  %1042 = vst.msk [vmem:[#allocation4 + $0x78] sm:$0x1] %vm955_vm2, %v6900_v28 }
  0x40   :  { %1044 = vst.msk [vmem:[#allocation4 + $0x88] sm:$0x1] %vm955_vm2, %v6900_v28  ;;  %1046 = vst.msk [vmem:[#allocation4 + $0x98] sm:$0x1] %vm955_vm2, %v6900_v28 }
  0x41   :  { %1048 = vst.msk [vmem:[#allocation4 + $0xa8] sm:$0x1] %vm955_vm2, %v6900_v28  ;;  %1050 = vst.msk [vmem:[#allocation4 + $0xb8] sm:$0x1] %vm955_vm2, %v6900_v28 }
  0x42   :  { %1052 = vst.msk [vmem:[#allocation4 + $0xc8] sm:$0x1] %vm955_vm2, %v6900_v28  ;;  %1054 = vst.msk [vmem:[#allocation4 + $0xd8] sm:$0x1] %vm955_vm2, %v6900_v28 }
  0x43   :  { %1056 = vst.msk [vmem:[#allocation4 + $0xe8] sm:$0x1] %vm955_vm2, %v6900_v28  ;;  %1058 = vst.msk [vmem:[#allocation4 + $0xf8] sm:$0x1] %vm955_vm2, %v6900_v28 }
  0x44   :  { %1060 = vst.msk [vmem:[#allocation4 + $0x108] sm:$0x1] %vm955_vm2, %v6900_v28  ;;  %1062 = vst.msk [vmem:[#allocation4 + $0x118] sm:$0x1] %vm955_vm2, %v6900_v28 }
  0x45   :  { %1064 = vst.msk [vmem:[#allocation5 + $0x8] sm:$0x1] %vm955_vm2, %v6900_v28  ;;  %1066 = vst.msk [vmem:[#allocation5 + $0x18] sm:$0x1] %vm955_vm2, %v6900_v28 }
  0x46   :  { %6092 = vmatmul.mubr.msk.bf16.gmra.mxu0 %vm219_vm0, %v6526_v18  ;;  %1068 = vst.msk [vmem:[#allocation5 + $0x28] sm:$0x1] %vm955_vm2, %v6900_v28  ;;  %1070 = vst.msk [vmem:[#allocation5 + $0x38] sm:$0x1] %vm955_vm2, %v6900_v28 }
  0x47   :  { %6095 = vmatprep.mubr.msk.bf16.mxu0 %vm219_vm0, %v6527_v19  ;;  %1072 = vst.msk [vmem:[#allocation5 + $0x48] sm:$0x1] %vm955_vm2, %v6900_v28  ;;  %1074 = vst.msk [vmem:[#allocation5 + $0x58] sm:$0x1] %vm955_vm2, %v6900_v28 }
  0x48   :  { %1076 = vst.msk [vmem:[#allocation5 + $0x68] sm:$0x1] %vm955_vm2, %v6900_v28  ;;  %1078 = vst.msk [vmem:[#allocation5 + $0x78] sm:$0x1] %vm955_vm2, %v6900_v28 }
  0x49   :  { %1080 = vst.msk [vmem:[#allocation5 + $0x88] sm:$0x1] %vm955_vm2, %v6900_v28  ;;  %1082 = vst.msk [vmem:[#allocation5 + $0x98] sm:$0x1] %vm955_vm2, %v6900_v28 }
  0x4a   :  { %1084 = vst.msk [vmem:[#allocation5 + $0xa8] sm:$0x1] %vm955_vm2, %v6900_v28  ;;  %1086 = vst.msk [vmem:[#allocation5 + $0xb8] sm:$0x1] %vm955_vm2, %v6900_v28 }
  0x4b   :  { %1088 = vst.msk [vmem:[#allocation5 + $0xc8] sm:$0x1] %vm955_vm2, %v6900_v28  ;;  %1090 = vst.msk [vmem:[#allocation5 + $0xd8] sm:$0x1] %vm955_vm2, %v6900_v28 }
  0x4c   :  { %1092 = vst.msk [vmem:[#allocation5 + $0xe8] sm:$0x1] %vm955_vm2, %v6900_v28  ;;  %1094 = vst.msk [vmem:[#allocation5 + $0xf8] sm:$0x1] %vm955_vm2, %v6900_v28 }
  0x4d   :  { %1096 = vst.msk [vmem:[#allocation5 + $0x108] sm:$0x1] %vm955_vm2, %v6900_v28  ;;  %1098 = vst.msk [vmem:[#allocation5 + $0x118] sm:$0x1] %vm955_vm2, %v6900_v28 }
  0x4e   :  { %6096 = vmatmul.mubr.msk.bf16.gmra.mxu0 %vm219_vm0, %v6528_v20 }
  0x4f   :  { %6099 = vmatprep.mubr.msk.bf16.mxu0 %vm219_vm0, %v6529_v21 }
  0x56   :  { %6100 = vmatmul.mubr.msk.bf16.gmra.mxu0 %vm219_vm0, %v6530_v22 }
  0x57   :  { %6103 = vmatprep.mubr.msk.bf16.mxu0 %vm219_vm0, %v6531_v23 }
  0x5e   :  { %6104 = vmatmul.mubr.msk.bf16.gmra.mxu0 %vm219_vm0, %v6532_v24 }
  0x5f   :  { %6107 = vmatprep.mubr.msk.bf16.mxu0 %vm219_vm0, %v6533_v25 }
  0x66   :  { %6108 = vmatmul.mubr.msk.bf16.gmra.mxu0 %vm219_vm0, %v6534_v26 }
  0x67   :  { %6111 = vmatprep.mubr.msk.bf16.mxu0 %vm219_vm0, %v6535_v27 }
  0x6e   :  { %6112 = vmatmul.mubr.msk.bf16.gmra.mxu0 %vm219_vm0, %v7179_v29 }
  0xc6   :  { %v7348_v36 = vpop.f32.mrf.mxu0 }
  0xc7   :  { %v5239_v37 = vmul.f32 -1.442695, %v7348_v36 }
  0xc8   :  { %v7351_v38 = vpop.f32.mrf.mxu0 }
  0xc9   :  { %6601 = vpow2.f32 %v5239_v37  ;;  %v5237_v39 = vmul.f32 -1.442695, %v7351_v38 }
  0xca   :  { %v7354_v40 = vpop.f32.mrf.mxu0 }
  0xcb   :  { %6603 = vpow2.f32 %v5237_v39  ;;  %v5240_v41 = vmul.f32 -1.442695, %v7354_v40 }
  0xcc   :  { %v7357_v42 = vpop.f32.mrf.mxu0 }
  0xcd   :  { %6605 = vpow2.f32 %v5240_v41  ;;  %v5238_v43 = vmul.f32 -1.442695, %v7357_v42 }
  0xce   :  { %v7360_v44 = vpop.f32.mrf.mxu0 }
  0xcf   :  { %6607 = vpow2.f32 %v5238_v43  ;;  %v5243_v45 = vmul.f32 -1.442695, %v7360_v44 }
  0xd0   :  { %v7363_v46 = vpop.f32.mrf.mxu0 }
  0xd1   :  { %6609 = vpow2.f32 %v5243_v45  ;;  %v5241_v47 = vmul.f32 -1.442695, %v7363_v46 }
  0xd2   :  { %v7366_v48 = vpop.f32.mrf.mxu0 }
  0xd3   :  { %6611 = vpow2.f32 %v5241_v47  ;;  %v5244_v49 = vmul.f32 -1.442695, %v7366_v48 }
  0xd4   :  { %v7369_v50 = vpop.f32.mrf.mxu0 }
  0xd5   :  { %6613 = vpow2.f32 %v5244_v49  ;;  %v5242_v51 = vmul.f32 -1.442695, %v7369_v50 }
  0xd6   :  { %v6602_v52 = vpop.eup %6601  ;;  %v7372_v53 = vpop.f32.mrf.mxu0 }
  0xd7   :  { %v731_v54 = vadd.f32 1.0, %v6602_v52  ;;  %6615 = vpow2.f32 %v5242_v51  ;;  %v5247_v55 = vmul.f32 -1.442695, %v7372_v53 }
  0xd8   :  { %v6604_v56 = vpop.eup %6603  ;;  %v7375_v57 = vpop.f32.mrf.mxu0 }
  0xd9   :  { %6617 = vrcp.f32 %v731_v54  ;;  %v729_v58 = vadd.f32 1.0, %v6604_v56  ;;  %v5245_v59 = vmul.f32 -1.442695, %v7375_v57 }
  0xda   :  { %v6606_v60 = vpop.eup %6605  ;;  %6619 = vpow2.f32 %v5247_v55  ;;  %v7378_v61 = vpop.f32.mrf.mxu0 }
  0xdb   :  { %6621 = vrcp.f32 %v729_v58  ;;  %v732_v62 = vadd.f32 1.0, %v6606_v60  ;;  %v5248_v63 = vmul.f32 -1.442695, %v7378_v61 }
  0xdc   :  { %v6608_v0 = vpop.eup %6607  ;;  %6623 = vpow2.f32 %v5245_v59  ;;  %v7381_v1 = vpop.f32.mrf.mxu0 }
  0xdd   :  { %6625 = vrcp.f32 %v732_v62  ;;  %v730_v2 = vadd.f32 1.0, %v6608_v0  ;;  %v5246_v3 = vmul.f32 -1.442695, %v7381_v1 }
  0xde   :  { %v6610_v4 = vpop.eup %6609  ;;  %6627 = vpow2.f32 %v5248_v63  ;;  %v7384_v5 = vpop.f32.mrf.mxu0 }
  0xdf   :  { %6629 = vrcp.f32 %v730_v2  ;;  %v735_v6 = vadd.f32 1.0, %v6610_v4  ;;  %v5251_v7 = vmul.f32 -1.442695, %v7384_v5 }
  0xe0   :  { %v6612_v8 = vpop.eup %6611  ;;  %6631 = vpow2.f32 %v5246_v3  ;;  %v7387_v9 = vpop.f32.mrf.mxu0 }
  0xe1   :  { %6633 = vrcp.f32 %v735_v6  ;;  %v733_v10 = vadd.f32 1.0, %v6612_v8  ;;  %v5249_v11 = vmul.f32 -1.442695, %v7387_v9 }
  0xe2   :  { %v6614_v12 = vpop.eup %6613  ;;  %6635 = vpow2.f32 %v5251_v7  ;;  %v7390_v13 = vpop.f32.mrf.mxu0 }
  0xe3   :  { %6637 = vrcp.f32 %v733_v10  ;;  %v736_v14 = vadd.f32 1.0, %v6614_v12  ;;  %v5252_v15 = vmul.f32 -1.442695, %v7390_v13 }
  0xe4   :  { %v6616_v16 = vpop.eup %6615  ;;  %6639 = vpow2.f32 %v5249_v11  ;;  %v7393_v17 = vpop.f32.mrf.mxu0 }
  0xe5   :  { %6641 = vrcp.f32 %v736_v14  ;;  %v734_v18 = vadd.f32 1.0, %v6616_v16  ;;  %v5250_v19 = vmul.f32 -1.442695, %v7393_v17 }
  0xe6   :  { %v6618_v20 = vpop.eup %6617  ;;  %6643 = vpow2.f32 %v5252_v15  ;;  %v7396_v21 = vpop.f32.mrf.mxu0 }
  0xe7   :  { %v6620_v22 = vpop.eup %6619  ;;  %v899_v23 = vmul.f32 %v6618_v20, %v7348_v36  ;;  %6645 = vrcp.f32 %v734_v18  ;;  %v5255_v24 = vmul.f32 -1.442695, %v7396_v21 }
  0xe8   :  { %v6622_v25 = vpop.eup %6621  ;;  %v739_v26 = vadd.f32 1.0, %v6620_v22  ;;  %6647 = vpow2.f32 %v5250_v19  ;;  %v7400_v27 = vpop.f32.mrf.mxu0 }
  0xe9   :  { %v6624_v28 = vpop.eup %6623  ;;  %1103 = vst.msk [vmem:[#allocation2 + $0x31] sm:$0x7f] %vm1100_vm3, %v899_v23  ;;  %v897_v29 = vmul.f32 %v6622_v25, %v7351_v38  ;;  %6649 = vpow2.f32 %v5255_v24  ;;  %v5253_v30 = vmul.f32 -1.442695, %v7400_v27 }
  0xea   :  { %v6626_v31 = vpop.eup %6625  ;;  %6651 = vrcp.f32 %v739_v26  ;;  %v737_v32 = vadd.f32 1.0, %v6624_v28  ;;  %v7405_v33 = vpop.f32.mrf.mxu0 }
  0xeb   :  { %v6628_v35 = vpop.eup %6627  ;;  %1101 = vst.msk [vmem:[#allocation2 + $0x11] sm:$0x7f] %vm1100_vm3, %v897_v29  ;;  %v900_v36 = vmul.f32 %v6626_v31, %v7354_v40  ;;  %6653 = vpow2.f32 %v5253_v30  ;;  %v5256_v37 = vmul.f32 -1.442695, %v7405_v33  ;;  %v1318_v29 = vld [vmem:[#allocation3] sm:$0xff] }
  0xec   :  { %v6630_v39 = vpop.eup %6629  ;;  %6655 = vrcp.f32 %v737_v32  ;;  %v740_v41 = vadd.f32 1.0, %v6628_v35  ;;  %v7410_v38 = vpop.f32.mrf.mxu0 }
  0xed   :  { %v6632_v43 = vpop.eup %6631  ;;  %1104 = vst.msk [vmem:[#allocation2 + $0x41] sm:$0x7f] %vm1100_vm3, %v900_v36  ;;  %v898_v45 = vmul.f32 %v6630_v39, %v7357_v42  ;;  %6657 = vpow2.f32 %v5256_v37  ;;  %v5254_v47 = vmul.f32 -1.442695, %v7410_v38 }
  0xee   :  { %v6634_v49 = vpop.eup %6633  ;;  %6659 = vrcp.f32 %v740_v41  ;;  %v738_v51 = vadd.f32 1.0, %v6632_v43  ;;  %v7415_v40 = vpop.f32.mrf.mxu0 }
  0xef   :  { %v6636_v52 = vpop.eup %6635  ;;  %1102 = vst.msk [vmem:[#allocation2 + $0x21] sm:$0x7f] %vm1100_vm3, %v898_v45  ;;  %v903_v54 = vmul.f32 %v6634_v49, %v7360_v44  ;;  %6661 = vpow2.f32 %v5254_v47  ;;  %v5259_v55 = vmul.f32 -1.442695, %v7415_v40 }
  0xf0   :  { %v6638_v56 = vpop.eup %6637  ;;  %6663 = vrcp.f32 %v738_v51  ;;  %v743_v58 = vadd.f32 1.0, %v6636_v52  ;;  %v7420_v42 = vpop.f32.mrf.mxu0 }
  0xf1   :  { %v6640_v59 = vpop.eup %6639  ;;  %1107 = vst.msk [vmem:[#allocation2 + $0x71] sm:$0x7f] %vm1100_vm3, %v903_v54  ;;  %v901_v60 = vmul.f32 %v6638_v56, %v7363_v46  ;;  %6665 = vpow2.f32 %v5259_v55  ;;  %v5257_v62 = vmul.f32 -1.442695, %v7420_v42 }
  0xf2   :  { %v6642_v63 = vpop.eup %6641  ;;  %6667 = vrcp.f32 %v743_v58  ;;  %v741_v0 = vadd.f32 1.0, %v6640_v59  ;;  %v7425_v44 = vpop.f32.mrf.mxu0 }
  0xf3   :  { %v6644_v2 = vpop.eup %6643  ;;  %1105 = vst.msk [vmem:[#allocation2 + $0x51] sm:$0x7f] %vm1100_vm3, %v901_v60  ;;  %v904_v3 = vmul.f32 %v6642_v63, %v7366_v48  ;;  %6669 = vpow2.f32 %v5257_v62  ;;  %v5260_v4 = vmul.f32 -1.442695, %v7425_v44 }
  0xf4   :  { %v6646_v6 = vpop.eup %6645  ;;  %6671 = vrcp.f32 %v741_v0  ;;  %v744_v7 = vadd.f32 1.0, %v6644_v2  ;;  %v7430_v46 = vpop.f32.mrf.mxu0 }
  0xf5   :  { %v6648_v8 = vpop.eup %6647  ;;  %1116 = vst.msk [vmem:[#allocation3 + $0x10] sm:$0x7f] %vm1100_vm3, %v904_v3  ;;  %v902_v10 = vmul.f32 %v6646_v6, %v7369_v50  ;;  %6673 = vpow2.f32 %v5260_v4  ;;  %v5258_v11 = vmul.f32 -1.442695, %v7430_v46 }
  0xf6   :  { %v6650_v12 = vpop.eup %6649  ;;  %6675 = vrcp.f32 %v744_v7  ;;  %v742_v14 = vadd.f32 1.0, %v6648_v8  ;;  %v7435_v48 = vpop.f32.mrf.mxu0 }
  0xf7   :  { %v6652_v15 = vpop.eup %6651  ;;  %1106 = vst.msk [vmem:[#allocation2 + $0x61] sm:$0x7f] %vm1100_vm3, %v902_v10  ;;  %v747_v16 = vadd.f32 1.0, %v6650_v12  ;;  %6677 = vpow2.f32 %v5258_v11  ;;  %v5263_v18 = vmul.f32 -1.442695, %v7435_v48 }
  0xf8   :  { %v6654_v19 = vpop.eup %6653  ;;  %v907_v20 = vmul.f32 %v6652_v15, %v7372_v53  ;;  %6679 = vrcp.f32 %v742_v14  ;;  %v7440_v50 = vpop.f32.mrf.mxu0 }
  0xf9   :  { %v6656_v22 = vpop.eup %6655  ;;  %6681 = vrcp.f32 %v747_v16  ;;  %v745_v23 = vadd.f32 1.0, %v6654_v19  ;;  %v5261_v24 = vmul.f32 -1.442695, %v7440_v50 }
  0xfa   :  { %v6658_v25 = vpop.eup %6657  ;;  %1119 = vst.msk [vmem:[#allocation3 + $0x40] sm:$0x7f] %vm1100_vm3, %v907_v20  ;;  %v905_v26 = vmul.f32 %v6656_v22, %v7375_v57  ;;  %6683 = vpow2.f32 %v5263_v18  ;;  %v7445_v28 = vpop.f32.mrf.mxu0 }
  0xfb   :  { %v6660_v30 = vpop.eup %6659  ;;  %6685 = vrcp.f32 %v745_v23  ;;  %v748_v53 = vadd.f32 1.0, %v6658_v25  ;;  %v5264_v31 = vmul.f32 -1.442695, %v7445_v28 }
  0xfc   :  { %v6662_v32 = vpop.eup %6661  ;;  %1117 = vst.msk [vmem:[#allocation3 + $0x20] sm:$0x7f] %vm1100_vm3, %v905_v26  ;;  %v908_v35 = vmul.f32 %v6660_v30, %v7378_v61  ;;  %6687 = vpow2.f32 %v5261_v24  ;;  %v7450_v36 = vpop.f32.mrf.mxu0  ;;  %v1319_v37 = vld [vmem:[#allocation3 + $0x10] sm:$0xff] }
  0xfd   :  { %v6664_v39 = vpop.eup %6663  ;;  %6689 = vrcp.f32 %v748_v53  ;;  %v746_v57 = vadd.f32 1.0, %v6662_v32  ;;  %v5262_v41 = vmul.f32 -1.442695, %v7450_v36  ;;  %v5645_v43 = vpack.c.bf16 %v1319_v37, %v1318_v29  ;;  %v7469_v3 = vld [vmem:[#allocation3 + $0x11] sm:$0xff] }
  0xfe   :  { %v6666_v45 = vpop.eup %6665  ;;  %1120 = vst.msk [vmem:[#allocation3 + $0x50] sm:$0x7f] %vm1100_vm3, %v908_v35  ;;  %v906_v47 = vmul.f32 %v6664_v39, %v7381_v1  ;;  %6691 = vpow2.f32 %v5264_v31  ;;  %v7455_v49 = vpop.f32.mrf.mxu0  ;;  %8896 = vst [vmem:[#allocation6_spill] sm:$0xff] %v7469_v3  ;;  %v6562_v3 = vld [vmem:[%s8875_s2 + $0x100] sm:$0xff]  }
  0xff   :  { %v6668_v51 = vpop.eup %6667  ;;  %6693 = vrcp.f32 %v746_v57  ;;  %v751_v61 = vadd.f32 1.0, %v6666_v45  ;;  %v5267_v52 = vmul.f32 -1.442695, %v7455_v49  ;;  %6123 = vmatprep.mubr.msk.bf16.mxu0 %vm953_vm1, %v5645_v43 }
 0x100   :  { %v6670_v54 = vpop.eup %6669  ;;  %1118 = vst.msk [vmem:[#allocation3 + $0x30] sm:$0x7f] %vm1100_vm3, %v906_v47  ;;  %v911_v55 = vmul.f32 %v6668_v51, %v7384_v5  ;;  %6695 = vpow2.f32 %v5262_v41  ;;  %v7461_v56 = vpop.f32.mrf.mxu0 }
 0x101   :  { %v6672_v58 = vpop.eup %6671  ;;  %6697 = vrcp.f32 %v751_v61  ;;  %v749_v1 = vadd.f32 1.0, %v6670_v54  ;;  %v5265_v59 = vmul.f32 -1.442695, %v7461_v56  ;;  %v1322_v30 = vld [vmem:[#allocation3 + $0x40] sm:$0xff] }
 0x102   :  { %v6674_v60 = vpop.eup %6673  ;;  %1130 = vst.msk [vmem:[#allocation4 + $0x1] sm:$0x7f] %vm1100_vm3, %v911_v55  ;;  %v909_v62 = vmul.f32 %v6672_v58, %v7387_v9  ;;  %6699 = vpow2.f32 %v5267_v52  ;;  %v7466_v63 = vpop.f32.mrf.mxu0  ;;  %v7497_v37 = vld [vmem:[#allocation3 + $0x41] sm:$0xff]  ;;  %v1294_v58 = vld [vmem:[#allocation2 + $0x90] sm:$0xff] }
 0x103   :  { %v6676_v0 = vpop.eup %6675  ;;  %6701 = vrcp.f32 %v749_v1  ;;  %v752_v2 = vadd.f32 1.0, %v6674_v60  ;;  %v5268_v5 = vmul.f32 -1.442695, %v7466_v63  ;;  %v7471_v4 = vld [vmem:[#allocation3 + $0x21] sm:$0xff]  ;;  %8899 = vst [vmem:[#allocation9_spill] sm:$0xff] %v7497_v37 }
 0x104   :  { %8897 = vst [vmem:[#allocation7_spill] sm:$0xff] %v7471_v4  ;;  %v6678_v6 = vpop.eup %6677  ;;  %1121 = vst.msk [vmem:[#allocation3 + $0x60] sm:$0x7f] %vm1100_vm3, %v909_v62  ;;  %v912_v7 = vmul.f32 %v6676_v0, %v7390_v13  ;;  %6703 = vpow2.f32 %v5265_v59  ;;  %v7475_v8 = vpop.f32.mrf.mxu0  ;;  %v1320_v22 = vld [vmem:[#allocation3 + $0x20] sm:$0xff] }
 0x105   :  { %v6680_v10 = vpop.eup %6679  ;;  %6705 = vrcp.f32 %v752_v2  ;;  %v750_v11 = vadd.f32 1.0, %v6678_v6  ;;  %v5266_v12 = vmul.f32 -1.442695, %v7475_v8  ;;  %v1323_v13 = vld [vmem:[#allocation3 + $0x50] sm:$0xff]  ;;  %v7920_v4 = vld [vmem:[#allocation2 + $0x21] sm:$0xff] }
 0x106   :  { %v6682_v14 = vpop.eup %6681  ;;  %1131 = vst.msk [vmem:[#allocation4 + $0x11] sm:$0x7f] %vm1100_vm3, %v912_v7  ;;  %v910_v15 = vmul.f32 %v6680_v10, %v7393_v17  ;;  %6707 = vpow2.f32 %v5268_v5  ;;  %v7482_v16 = vpop.f32.mrf.mxu0  ;;  %v5647_v35 = vpack.c.bf16 %v1323_v13, %v1322_v30  ;;  %v7509_v51 = vld [vmem:[#allocation3 + $0x51] sm:$0xff] }
 0x107   :  { %v6684_v18 = vpop.eup %6683  ;;  %v915_v19 = vmul.f32 %v6682_v14, %v7396_v21  ;;  %6709 = vrcp.f32 %v750_v11  ;;  %v5271_v20 = vmul.f32 -1.442695, %v7482_v16  ;;  %v1321_v23 = vld [vmem:[#allocation3 + $0x30] sm:$0xff]  ;;  %8900 = vst [vmem:[#allocation10_spill] sm:$0xff] %v7509_v51  ;;  %v6561_v51 = vld [vmem:[%s8875_s2 + $0x108] sm:$0xff]  }
 0x108   :  { %v7486_v24 = vld [vmem:[#allocation3 + $0x31] sm:$0xff]  ;;  %v6686_v25 = vpop.eup %6685  ;;  %1122 = vst.msk [vmem:[#allocation3 + $0x70] sm:$0x7f] %vm1100_vm3, %v910_v15  ;;  %v755_v26 = vadd.f32 1.0, %v6684_v18  ;;  %6711 = vpow2.f32 %v5266_v12  ;;  %v7489_v17 = vpop.f32.mrf.mxu0  ;;  %v5646_v29 = vpack.c.bf16 %v1321_v23, %v1320_v22  ;;  %v6544_v18 = vld [vmem:[%s8875_s2 + $0x80] sm:$0xff]  }
 0x109   :  { %8898 = vst [vmem:[#allocation8_spill] sm:$0xff] %v7486_v24  ;;  %v6542_v21 = vld [vmem:[%s8875_s2 + $0x90] sm:$0xff]   ;;  %v6688_v53 = vpop.eup %6687  ;;  %1134 = vst.msk [vmem:[#allocation4 + $0x41] sm:$0x7f] %vm1100_vm3, %v915_v19  ;;  %v913_v31 = vmul.f32 %v6686_v25, %v7400_v27  ;;  %6713 = vpow2.f32 %v5271_v20  ;;  %v5269_v32 = vmul.f32 -1.442695, %v7489_v17 }
 0x10a   :  { %v6690_v39 = vpop.eup %6689  ;;  %6715 = vrcp.f32 %v755_v26  ;;  %v753_v57 = vadd.f32 1.0, %v6688_v53  ;;  %6124 = vmatmul.mubr.msk.bf16.vlgmr.msra.gmra.mxu0 %vm953_vm1, %v5646_v29  ;;  %v7500_v41 = vpop.f32.mrf.mxu0  ;;  %v2186_v13 = vld [vmem:[#allocation4] sm:$0xff]  ;;  %v7903_v24 = vld [vmem:[#allocation2 + $0x11] sm:$0xff] }
 0x10b   :  { %v6692_v45 = vpop.eup %6691  ;;  %1132 = vst.msk [vmem:[#allocation4 + $0x21] sm:$0x7f] %vm1100_vm3, %v913_v31  ;;  %v916_v27 = vmul.f32 %v6690_v39, %v7405_v33  ;;  %6717 = vpow2.f32 %v5269_v32  ;;  %v5272_v47 = vmul.f32 -1.442695, %v7500_v41  ;;  %6127 = vmatprep.mubr.msk.bf16.mxu0 %vm953_vm1, %v5647_v35  ;;  %6212 = vmatpush3.bf16.msra.mxu0 %v7342_v34  ;;  %v7511_v61 = vld [vmem:[#allocation3 + $0x61] sm:$0xff]  ;;  %v6550_v32 = vld [vmem:[%s8875_s2 + $0xd8] sm:$0xff]  }
 0x10c   :  { %8901 = vst [vmem:[#allocation11_spill] sm:$0xff] %v7511_v61  ;;  %v6694_v52 = vpop.eup %6693  ;;  %6719 = vrcp.f32 %v753_v57  ;;  %v756_v54 = vadd.f32 1.0, %v6692_v45  ;;  %v7513_v55 = vpop.f32.mrf.mxu0  ;;  %6213 = vmatprep.subr.bf16.mxu0 %v6542_v21  ;;  %v6543_v33 = vld [vmem:[%s8875_s2 + $0x88] sm:$0xff]   ;;  %v1324_v10 = vld [vmem:[#allocation3 + $0x60] sm:$0xff] }
 0x10d   :  { %v6696_v1 = vpop.eup %6695  ;;  %1135 = vst.msk [vmem:[#allocation4 + $0x51] sm:$0x7f] %vm1100_vm3, %v916_v27  ;;  %v914_v34 = vmul.f32 %v6694_v52, %v7410_v38  ;;  %6721 = vpow2.f32 %v5272_v47  ;;  %v5270_v59 = vmul.f32 -1.442695, %v7513_v55  ;;  %v2187_v2 = vld [vmem:[#allocation4 + $0x10] sm:$0xff]  ;;  %v1720_v61 = vld [vmem:[#allocation2 + $0x1] sm:$0xff] }
 0x10e   :  { %v6698_v60 = vpop.eup %6697  ;;  %6723 = vrcp.f32 %v756_v54  ;;  %v754_v62 = vadd.f32 1.0, %v6696_v1  ;;  %v7523_v0 = vpop.f32.mrf.mxu0  ;;  %v5677_v22 = vpack.c.bf16 %v2187_v2, %v2186_v13  ;;  %v2653_v9 = vld [vmem:[#allocation4 + $0x11] sm:$0xff] }
 0x10f   :  { %v6700_v5 = vpop.eup %6699  ;;  %1133 = vst.msk [vmem:[#allocation4 + $0x31] sm:$0x7f] %vm1100_vm3, %v914_v34  ;;  %v919_v6 = vmul.f32 %v6698_v60, %v7415_v40  ;;  %6725 = vpow2.f32 %v5270_v59  ;;  %v5275_v7 = vmul.f32 -1.442695, %v7523_v0  ;;  %6214 = vmatpush3.bf16.msra.mxu0 %v6542_v21  ;;  %v1325_v38 = vld [vmem:[#allocation3 + $0x70] sm:$0xff] }
 0x110   :  { %v6702_v11 = vpop.eup %6701  ;;  %6727 = vrcp.f32 %v754_v62  ;;  %v759_v12 = vadd.f32 1.0, %v6700_v5  ;;  %v7528_v14 = vpop.f32.mrf.mxu0  ;;  %v5648_v15 = vpack.c.bf16 %v1325_v38, %v1324_v10  ;;  %6215 = vmatprep.subr.bf16.mxu0 %v6543_v33  ;;  %v2190_v60 = vld [vmem:[#allocation4 + $0x40] sm:$0xff] }
 0x111   :  { %v6704_v19 = vpop.eup %6703  ;;  %1145 = vst.msk [vmem:[#allocation5 + $0x10] sm:$0x7f] %vm1100_vm3, %v919_v6  ;;  %v917_v40 = vmul.f32 %v6702_v11, %v7420_v42  ;;  %6729 = vpow2.f32 %v5275_v7  ;;  %v5273_v20 = vmul.f32 -1.442695, %v7528_v14  ;;  %v6551_v7 = vld [vmem:[%s8875_s2 + $0xd0] sm:$0xff]   ;;  %v7563_v10 = vld [vmem:[#allocation4 + $0x41] sm:$0xff] }
 0x112   :  { %v6706_v23 = vpop.eup %6705  ;;  %6731 = vrcp.f32 %v759_v12  ;;  %v757_v25 = vadd.f32 1.0, %v6704_v19  ;;  %6128 = vmatmul.mubr.msk.bf16.gmra.mxu0 %vm953_vm1, %v5648_v15  ;;  %v7537_v26 = vpop.f32.mrf.mxu0  ;;  %v2188_v52 = vld [vmem:[#allocation4 + $0x20] sm:$0xff]  ;;  %v7898_v15 = vld [vmem:[#allocation4 + $0x71] sm:$0xff] }
 0x113   :  { %v6708_v29 = vpop.eup %6707  ;;  %1136 = vst.msk [vmem:[#allocation4 + $0x61] sm:$0x7f] %vm1100_vm3, %v917_v40  ;;  %v920_v30 = vmul.f32 %v6706_v23, %v7425_v44  ;;  %6733 = vpow2.f32 %v5273_v20  ;;  %v5276_v21 = vmul.f32 -1.442695, %v7537_v26  ;;  %6216 = vmatpush3.bf16.msra.mxu0 %v6543_v33  ;;  %6219 = vmatprep.mubr.msk.bf16.mxu0 %vm953_vm1, %v5677_v22  ;;  %v2193_v23 = vld [vmem:[#allocation4 + $0x70] sm:$0xff] }
 0x114   :  { %v6710_v42 = vpop.eup %6709  ;;  %6735 = vrcp.f32 %v757_v25  ;;  %v760_v53 = vadd.f32 1.0, %v6708_v29  ;;  %v7543_v31 = vpop.f32.mrf.mxu0  ;;  %6217 = vmatprep.subr.bf16.mxu0 %v6544_v18  ;;  %v2191_v57 = vld [vmem:[#allocation4 + $0x50] sm:$0xff] }
 0x115   :  { %v6712_v35 = vpop.eup %6711  ;;  %1146 = vst.msk [vmem:[#allocation5 + $0x20] sm:$0x7f] %vm1100_vm3, %v920_v30  ;;  %v918_v44 = vmul.f32 %v6710_v42, %v7430_v46  ;;  %6737 = vpow2.f32 %v5276_v21  ;;  %v5274_v39 = vmul.f32 -1.442695, %v7543_v31  ;;  %v5679_v6 = vpack.c.bf16 %v2191_v57, %v2190_v60  ;;  %v7584_v21 = vld [vmem:[#allocation4 + $0x51] sm:$0xff] }
 0x116   :  { %v6714_v45 = vpop.eup %6713  ;;  %6739 = vrcp.f32 %v760_v53  ;;  %v758_v27 = vadd.f32 1.0, %v6712_v35  ;;  %v7551_v47 = vpop.f32.mrf.mxu0  ;;  %v2189_v54 = vld [vmem:[#allocation4 + $0x30] sm:$0xff] }
 0x117   :  { %v7553_v33 = vld [vmem:[#allocation4 + $0x31] sm:$0xff]  ;;  %v6716_v1 = vpop.eup %6715  ;;  %1144 = vst.msk [vmem:[#allocation5] sm:$0x7f] %vm1100_vm3, %v918_v44  ;;  %v763_v34 = vadd.f32 1.0, %v6714_v45  ;;  %6741 = vpow2.f32 %v5274_v39  ;;  %v5279_v46 = vmul.f32 -1.442695, %v7551_v47  ;;  %6218 = vmatpush3.bf16.msra.mxu0 %v6544_v18  ;;  %v5678_v59 = vpack.c.bf16 %v2189_v54, %v2188_v52 }
 0x118   :  { %v6718_v62 = vpop.eup %6717  ;;  %v923_v2 = vmul.f32 %v6716_v1, %v7435_v48  ;;  %6743 = vrcp.f32 %v758_v27  ;;  %v7558_v5 = vpop.f32.mrf.mxu0  ;;  %6259 = vmatprep.subr.bf16.mxu0 %v6550_v32  ;;  %v7591_v57 = vld [vmem:[#allocation5 + $0x10] sm:$0xff] }
 0x119   :  { %v6720_v38 = vpop.eup %6719  ;;  %6745 = vrcp.f32 %v763_v34  ;;  %v761_v11 = vadd.f32 1.0, %v6718_v62  ;;  %v5277_v12 = vmul.f32 -1.442695, %v7558_v5  ;;  %v7593_v45 = vld [vmem:[#allocation5 + $0x11] sm:$0xff] }
 0x11a   :  { %v6722_v48 = vpop.eup %6721  ;;  %1149 = vst.msk [vmem:[#allocation5 + $0x50] sm:$0x7f] %vm1100_vm3, %v923_v2  ;;  %v921_v13 = vmul.f32 %v6720_v38, %v7440_v50  ;;  %6747 = vpow2.f32 %v5279_v46  ;;  %6220 = vmatmul.mubr.msk.bf16.vlgmr.msra.gmra.mxu0 %vm953_vm1, %v5678_v59  ;;  %v7571_v18 = vpop.f32.mrf.mxu0  ;;  %v7573_v19 = vld [vmem:[#allocation4 + $0x61] sm:$0xff]  ;;  %8903 = vst [vmem:[#allocation13_spill] sm:$0xff] %v7593_v45 }
 0x11b   :  { %v6724_v40 = vpop.eup %6723  ;;  %6749 = vrcp.f32 %v761_v11  ;;  %v764_v20 = vadd.f32 1.0, %v6722_v48  ;;  %v5280_v22 = vmul.f32 -1.442695, %v7571_v18  ;;  %6223 = vmatprep.mubr.msk.bf16.mxu0 %vm953_vm1, %v5679_v6  ;;  %6260 = vmatpush3.bf16.msra.mxu0 %v6550_v32  ;;  %v6553_v50 = vld [vmem:[%s8875_s2 + $0xc8] sm:$0xff]   ;;  %v2192_v39 = vld [vmem:[#allocation4 + $0x60] sm:$0xff] }
 0x11c   :  { %v6726_v25 = vpop.eup %6725  ;;  %1147 = vst.msk [vmem:[#allocation5 + $0x30] sm:$0x7f] %vm1100_vm3, %v921_v13  ;;  %v924_v29 = vmul.f32 %v6724_v40, %v7445_v28  ;;  %6751 = vpow2.f32 %v5277_v12  ;;  %v7582_v30 = vpop.f32.mrf.mxu0  ;;  %6261 = vmatprep.subr.bf16.mxu0 %v6551_v7  ;;  %v7586_v42 = vld [vmem:[#allocation5 + $0x20] sm:$0xff]  ;;  %v5680_v6 = vpack.c.bf16 %v2193_v23, %v2192_v39 }
 0x11d   :  { %v7588_v53 = vld [vmem:[#allocation5 + $0x21] sm:$0xff]  ;;  %v6728_v32 = vpop.eup %6727  ;;  %6753 = vrcp.f32 %v764_v20  ;;  %v762_v35 = vadd.f32 1.0, %v6726_v25  ;;  %v5278_v44 = vmul.f32 -1.442695, %v7582_v30 }
 0x11e   :  { %8902 = vst [vmem:[#allocation12_spill] sm:$0xff] %v7588_v53  ;;  %v6730_v27 = vpop.eup %6729  ;;  %1150 = vst.msk [vmem:[#allocation5 + $0x60] sm:$0x7f] %vm1100_vm3, %v924_v29  ;;  %v922_v52 = vmul.f32 %v6728_v32, %v7450_v36  ;;  %6755 = vpow2.f32 %v5280_v22  ;;  %v7599_v54 = vpop.f32.mrf.mxu0  ;;  %v6554_v38 = vld [vmem:[%s8875_s2 + $0xc0] sm:$0xff]   ;;  %v5695_v53 = vpack.c.bf16 %v7584_v21, %v7563_v10 }
 0x11f   :  { %v6732_v46 = vpop.eup %6731  ;;  %6757 = vrcp.f32 %v762_v35  ;;  %v767_v59 = vadd.f32 1.0, %v6730_v27  ;;  %v5283_v60 = vmul.f32 -1.442695, %v7599_v54  ;;  %6262 = vmatpush3.bf16.msra.mxu0 %v6551_v7  ;;  %v7871_v28 = vld [vmem:[#allocation4 + $0x21] sm:$0xff] }
 0x120   :  { %v6734_v62 = vpop.eup %6733  ;;  %1148 = vst.msk [vmem:[#allocation5 + $0x40] sm:$0x7f] %vm1100_vm3, %v922_v52  ;;  %v927_v36 = vmul.f32 %v6732_v46, %v7455_v49  ;;  %6759 = vpow2.f32 %v5278_v44  ;;  %v7608_v2 = vpop.f32.mrf.mxu0  ;;  %6263 = vmatprep.subr.bf16.mxu0 %v6553_v50 }
 0x121   :  { %v6736_v11 = vpop.eup %6735  ;;  %6761 = vrcp.f32 %v767_v59  ;;  %v765_v12 = vadd.f32 1.0, %v6734_v62  ;;  %v5281_v48 = vmul.f32 -1.442695, %v7608_v2  ;;  %v7636_v52 = vld [vmem:[#allocation5 + $0x50] sm:$0xff] }
 0x122   :  { %v6738_v7 = vpop.eup %6737  ;;  %1110 = vst.msk [vmem:[#allocation2 + $0xc1] sm:$0x7f] %vm1100_vm3, %v927_v36  ;;  %v925_v13 = vmul.f32 %v6736_v11, %v7461_v56  ;;  %6763 = vpow2.f32 %v5283_v60  ;;  %6224 = vmatmul.mubr.msk.bf16.gmra.mxu0 %vm953_vm1, %v5680_v6  ;;  %v7617_v49 = vpop.f32.mrf.mxu0  ;;  %v7627_v56 = vld [vmem:[%s8875_s2 + $0x118] sm:$0xff]  }
 0x123   :  { %v6740_v40 = vpop.eup %6739  ;;  %6765 = vrcp.f32 %v765_v12  ;;  %v768_v20 = vadd.f32 1.0, %v6738_v7  ;;  %v5284_v22 = vmul.f32 -1.442695, %v7617_v49  ;;  %6264 = vmatpush3.bf16.msra.mxu0 %v6553_v50 }
 0x124   :  { %v6742_v23 = vpop.eup %6741  ;;  %1108 = vst.msk [vmem:[#allocation2 + $0xa1] sm:$0x7f] %vm1100_vm3, %v925_v13  ;;  %v928_v25 = vmul.f32 %v6740_v40, %v7466_v63  ;;  %6767 = vpow2.f32 %v5281_v48  ;;  %v7622_v29 = vpop.f32.mrf.mxu0  ;;  %6265 = vmatprep.subr.bf16.mxu0 %v6554_v38  ;;  %v7657_v40 = vld [vmem:[#allocation5 + $0x31] sm:$0xff] }
 0x125   :  { %v6744_v32 = vpop.eup %6743  ;;  %6769 = vrcp.f32 %v768_v20  ;;  %v766_v35 = vadd.f32 1.0, %v6742_v23  ;;  %v5282_v44 = vmul.f32 -1.442695, %v7622_v29  ;;  %v7630_v50 = vld [vmem:[#allocation5 + $0x60] sm:$0xff]  ;;  %v7659_v20 = vld [vmem:[#allocation5 + $0x51] sm:$0xff] }
 0x126   :  { %v6746_v39 = vpop.eup %6745  ;;  %1111 = vst.msk [vmem:[#allocation2 + $0xd1] sm:$0x7f] %vm1100_vm3, %v928_v25  ;;  %v926_v63 = vmul.f32 %v6744_v32, %v7475_v8  ;;  %6771 = vpow2.f32 %v5284_v22  ;;  %v7634_v27 = vpop.f32.mrf.mxu0  ;;  %v7644_v6 = vld [vmem:[#allocation5 + $0x61] sm:$0xff]  ;;  %v7743_v22 = vld [vmem:[#allocation2 + $0x10] sm:$0xff] }
 0x127   :  { %v6748_v46 = vpop.eup %6747  ;;  %v931_v59 = vmul.f32 %v6746_v39, %v7482_v16  ;;  %6773 = vrcp.f32 %v766_v35  ;;  %v5287_v60 = vmul.f32 -1.442695, %v7634_v27  ;;  %6266 = vmatpush3.bf16.msra.mxu0 %v6554_v38  ;;  %v7640_v62 = vld [vmem:[#allocation5 + $0x40] sm:$0xff]  ;;  %8905 = vst [vmem:[#allocation15_spill] sm:$0xff] %v7644_v6  ;;  %v7652_v16 = vld [vmem:[#allocation5 + $0x30] sm:$0xff] }
 0x128   :  { %v7642_v36 = vld [vmem:[#allocation5 + $0x41] sm:$0xff]  ;;  %v6750_v11 = vpop.eup %6749  ;;  %1109 = vst.msk [vmem:[#allocation2 + $0xb1] sm:$0x7f] %vm1100_vm3, %v926_v63  ;;  %v771_v12 = vadd.f32 1.0, %v6748_v46  ;;  %6775 = vpow2.f32 %v5282_v44  ;;  %v7649_v48 = vpop.f32.mrf.mxu0  ;;  %6307 = vmatprep.subr.bf16.mxu0 %v7627_v56  ;;  %v6559_v6 = vld [vmem:[%s8875_s2 + $0x110] sm:$0xff]  }
 0x129   :  { %8904 = vst [vmem:[#allocation14_spill] sm:$0xff] %v7642_v36  ;;  %v6752_v38 = vpop.eup %6751  ;;  %1114 = vst.msk [vmem:[#allocation2 + $0x101] sm:$0x7f] %vm1100_vm3, %v931_v59  ;;  %v929_v7 = vmul.f32 %v6750_v11, %v7489_v17  ;;  %6777 = vpow2.f32 %v5287_v60  ;;  %v5285_v13 = vmul.f32 -1.442695, %v7649_v48  ;;  %v1286_v8 = vld [vmem:[#allocation2] sm:$0xff] }
 0x12a   :  { %v6754_v23 = vpop.eup %6753  ;;  %6779 = vrcp.f32 %v771_v12  ;;  %v769_v25 = vadd.f32 1.0, %v6752_v38  ;;  %v7663_v32 = vpop.f32.mrf.mxu0 }
 0x12b   :  { %v6756_v44 = vpop.eup %6755  ;;  %1112 = vst.msk [vmem:[#allocation2 + $0xe1] sm:$0x7f] %vm1100_vm3, %v929_v7  ;;  %v932_v39 = vmul.f32 %v6754_v23, %v7500_v41  ;;  %6781 = vpow2.f32 %v5285_v13  ;;  %v5288_v63 = vmul.f32 -1.442695, %v7663_v32  ;;  %v7825_v43 = vld [vmem:[#allocation2 + $0xa0] sm:$0xff] }
 0x12c   :  { %v6758_v46 = vpop.eup %6757  ;;  %6783 = vrcp.f32 %v769_v25  ;;  %v772_v59 = vadd.f32 1.0, %v6756_v44  ;;  %v7672_v60 = vpop.f32.mrf.mxu0 }
 0x12d   :  { %v6760_v11 = vpop.eup %6759  ;;  %1123 = vst.msk [vmem:[#allocation3 + $0xa0] sm:$0x7f] %vm1100_vm3, %v932_v39  ;;  %v930_v12 = vmul.f32 %v6758_v46, %v7513_v55  ;;  %6785 = vpow2.f32 %v5288_v63  ;;  %v5286_v38 = vmul.f32 -1.442695, %v7672_v60  ;;  %v7881_v36 = vld [vmem:[#allocation2 + $0xd0] sm:$0xff] }
 0x12e   :  { %v6762_v17 = vpop.eup %6761  ;;  %6787 = vrcp.f32 %v772_v59  ;;  %v770_v7 = vadd.f32 1.0, %v6760_v11  ;;  %v7677_v41 = vpop.f32.mrf.mxu0 }
 0x12f   :  { %v6764_v13 = vpop.eup %6763  ;;  %1113 = vst.msk [vmem:[#allocation2 + $0xf1] sm:$0x7f] %vm1100_vm3, %v930_v12  ;;  %v935_v23 = vmul.f32 %v6762_v17, %v7523_v0  ;;  %6789 = vpow2.f32 %v5286_v38  ;;  %v5291_v25 = vmul.f32 -1.442695, %v7677_v41  ;;  %v1326_v0 = vld [vmem:[#allocation3 + $0x90] sm:$0xff] }
 0x130   :  { %v6766_v44 = vpop.eup %6765  ;;  %6791 = vrcp.f32 %v770_v7  ;;  %v775_v39 = vadd.f32 1.0, %v6764_v13  ;;  %v7682_v55 = vpop.f32.mrf.mxu0 }
 0x131   :  { %v6768_v63 = vpop.eup %6767  ;;  %1126 = vst.msk [vmem:[#allocation3 + $0xd0] sm:$0x7f] %vm1100_vm3, %v935_v23  ;;  %v933_v46 = vmul.f32 %v6766_v44, %v7528_v14  ;;  %6793 = vpow2.f32 %v5291_v25  ;;  %v5289_v59 = vmul.f32 -1.442695, %v7682_v55 }
 0x132   :  { %v6770_v11 = vpop.eup %6769  ;;  %6795 = vrcp.f32 %v775_v39  ;;  %v773_v12 = vadd.f32 1.0, %v6768_v63  ;;  %v7687_v17 = vpop.f32.mrf.mxu0 }
 0x133   :  { %v6772_v38 = vpop.eup %6771  ;;  %1124 = vst.msk [vmem:[#allocation3 + $0xb0] sm:$0x7f] %vm1100_vm3, %v933_v46  ;;  %v936_v7 = vmul.f32 %v6770_v11, %v7537_v26  ;;  %6797 = vpow2.f32 %v5289_v59  ;;  %v5292_v13 = vmul.f32 -1.442695, %v7687_v17 }
 0x134   :  { %v6774_v23 = vpop.eup %6773  ;;  %6799 = vrcp.f32 %v773_v12  ;;  %v776_v14 = vadd.f32 1.0, %v6772_v38  ;;  %v1327_v25 = vld [vmem:[#allocation3 + $0xa0] sm:$0xff]  ;;  %v7692_v44 = vpop.f32.mrf.mxu0 }
 0x135   :  { %v6776_v35 = vpop.eup %6775  ;;  %1127 = vst.msk [vmem:[#allocation3 + $0xe0] sm:$0x7f] %vm1100_vm3, %v936_v7  ;;  %v934_v39 = vmul.f32 %v6774_v23, %v7543_v31  ;;  %v5649_v63 = vpack.c.bf16 %v1327_v25, %v1326_v0  ;;  %6801 = vpow2.f32 %v5292_v13  ;;  %v5290_v46 = vmul.f32 -1.442695, %v7692_v44 }
 0x136   :  { %v6778_v34 = vpop.eup %6777  ;;  %6803 = vrcp.f32 %v776_v14  ;;  %v774_v26 = vadd.f32 1.0, %v6776_v35  ;;  %v7702_v35 = vld [vmem:[#allocation3 + $0xa1] sm:$0xff] }
 0x137   :  { %v6780_v59 = vpop.eup %6779  ;;  %1125 = vst.msk [vmem:[#allocation3 + $0xc0] sm:$0x7f] %vm1100_vm3, %v934_v39  ;;  %v779_v11 = vadd.f32 1.0, %v6778_v34  ;;  %6131 = vmatprep.mubr.msk.bf16.mxu1 %vm953_vm1, %v5649_v63  ;;  %6805 = vpow2.f32 %v5290_v46 }
 0x138   :  { %v6782_v12 = vpop.eup %6781  ;;  %v939_v38 = vmul.f32 %v6780_v59, %v7551_v47  ;;  %6807 = vrcp.f32 %v774_v26 }
 0x139   :  { %v6784_v7 = vpop.eup %6783  ;;  %6809 = vrcp.f32 %v779_v11  ;;  %v777_v31 = vadd.f32 1.0, %v6782_v12 }
 0x13a   :  { %v6786_v0 = vpop.eup %6785  ;;  %1137 = vst.msk [vmem:[#allocation4 + $0x91] sm:$0x7f] %vm1100_vm3, %v939_v38  ;;  %v937_v13 = vmul.f32 %v6784_v7, %v7558_v5  ;;  %v7704_v23 = vld [vmem:[#allocation3 + $0xb1] sm:$0xff] }
 0x13b   :  { %v6788_v34 = vpop.eup %6787  ;;  %6811 = vrcp.f32 %v777_v31  ;;  %v780_v14 = vadd.f32 1.0, %v6786_v0  ;;  %v1328_v11 = vld [vmem:[#allocation3 + $0xb0] sm:$0xff] }
 0x13c   :  { %v6790_v47 = vpop.eup %6789  ;;  %1128 = vst.msk [vmem:[#allocation3 + $0xf0] sm:$0x7f] %vm1100_vm3, %v937_v13  ;;  %v940_v39 = vmul.f32 %v6788_v34, %v7571_v18  ;;  %v1331_v46 = vld [vmem:[#allocation3 + $0xe0] sm:$0xff]  ;;  %v1330_v0 = vld [vmem:[#allocation3 + $0xd0] sm:$0xff] }
 0x13d   :  { %v6792_v63 = vpop.eup %6791  ;;  %6813 = vrcp.f32 %v780_v14  ;;  %v778_v26 = vadd.f32 1.0, %v6790_v47  ;;  %v6546_v18 = vld [vmem:[%s8875_s2 + $0x10] sm:$0xff]   ;;  %v5651_v47 = vpack.c.bf16 %v1331_v46, %v1330_v0  ;;  %v6547_v46 = vld [vmem:[%s8875_s2 + $0x8] sm:$0xff]  }
 0x13e   :  { %v6794_v5 = vpop.eup %6793  ;;  %1138 = vst.msk [vmem:[#allocation4 + $0xa1] sm:$0x7f] %vm1100_vm3, %v940_v39  ;;  %v938_v59 = vmul.f32 %v6792_v63, %v7582_v30  ;;  %v1329_v12 = vld [vmem:[#allocation3 + $0xc0] sm:$0xff]  ;;  %v7717_v34 = vld [vmem:[#allocation3 + $0xd1] sm:$0xff] }
 0x13f   :  { %v7712_v38 = vld [vmem:[#allocation3 + $0xc1] sm:$0xff]  ;;  %v6796_v7 = vpop.eup %6795  ;;  %v5650_v31 = vpack.c.bf16 %v1329_v12, %v1328_v11  ;;  %6815 = vrcp.f32 %v778_v26  ;;  %v783_v13 = vadd.f32 1.0, %v6794_v5  ;;  %v6889_v5 = vld [vmem:[%s8875_s2 + $0x18] sm:$0xff]  }
 0x140   :  { %v6798_v14 = vpop.eup %6797  ;;  %1129 = vst.msk [vmem:[#allocation3 + $0x100] sm:$0x7f] %vm1100_vm3, %v938_v59  ;;  %v943_v30 = vmul.f32 %v6796_v7, %v7599_v54  ;;  %v7733_v7 = vld [vmem:[#allocation3 + $0xe1] sm:$0xff] }
 0x141   :  { %v6800_v63 = vpop.eup %6799  ;;  %6132 = vmatmul.mubr.msk.bf16.vlgmr.msra.gmra.mxu1 %vm953_vm1, %v5650_v31  ;;  %6817 = vrcp.f32 %v783_v13  ;;  %v781_v11 = vadd.f32 1.0, %v6798_v14 }
 0x142   :  { %v6802_v12 = vpop.eup %6801  ;;  %1141 = vst.msk [vmem:[#allocation4 + $0xd1] sm:$0x7f] %vm1100_vm3, %v943_v30  ;;  %v941_v26 = vmul.f32 %v6800_v63, %v7608_v2  ;;  %6140 = vmatpush3.bf16.msra.mxu1 %v6889_v5  ;;  %6135 = vmatprep.mubr.msk.bf16.mxu1 %vm953_vm1, %v5651_v47  ;;  %v2194_v30 = vld [vmem:[#allocation4 + $0x90] sm:$0xff] }
 0x143   :  { %v6804_v54 = vpop.eup %6803  ;;  %6141 = vmatprep.subr.bf16.mxu1 %v6546_v18  ;;  %6819 = vrcp.f32 %v781_v11  ;;  %v784_v59 = vadd.f32 1.0, %v6802_v12  ;;  %v7735_v31 = vld [vmem:[#allocation3 + $0xf1] sm:$0xff] }
 0x144   :  { %v6806_v2 = vpop.eup %6805  ;;  %1139 = vst.msk [vmem:[#allocation4 + $0xb1] sm:$0x7f] %vm1100_vm3, %v941_v26  ;;  %v944_v0 = vmul.f32 %v6804_v54, %v7617_v49  ;;  %v1332_v26 = vld [vmem:[#allocation3 + $0xf0] sm:$0xff] }
 0x145   :  { %v6808_v14 = vpop.eup %6807  ;;  %v2195_v47 = vld [vmem:[#allocation4 + $0xa0] sm:$0xff]  ;;  %6821 = vrcp.f32 %v784_v59  ;;  %v782_v63 = vadd.f32 1.0, %v6806_v2 }
 0x146   :  { %v6810_v5 = vpop.eup %6809  ;;  %1142 = vst.msk [vmem:[#allocation4 + $0xe1] sm:$0x7f] %vm1100_vm3, %v944_v0  ;;  %v942_v11 = vmul.f32 %v6808_v14, %v7622_v29  ;;  %6142 = vmatpush3.bf16.msra.mxu1 %v6546_v18  ;;  %v5681_v12 = vpack.c.bf16 %v2195_v47, %v2194_v30  ;;  %v6548_v29 = vld [vmem:[%s8875_s2] sm:$0xff]  }
 0x147   :  { %v947_v49 = vmul.f32 %v6810_v5, %v7634_v27  ;;  %6143 = vmatprep.subr.bf16.mxu1 %v6547_v46  ;;  %v1333_v54 = vld [vmem:[#allocation3 + $0x100] sm:$0xff]  ;;  %6823 = vrcp.f32 %v782_v63  ;;  %v5653_v27 = vpack.c.bf16 %v7743_v22, %v1286_v8 }
 0x148   :  { %v6812_v1 = vpop.eup %6811  ;;  %1140 = vst.msk [vmem:[#allocation4 + $0xc1] sm:$0x7f] %vm1100_vm3, %v942_v11  ;;  %6227 = vmatprep.mubr.msk.bf16.mxu0 %vm953_vm1, %v5681_v12  ;;  %v5652_v59 = vpack.c.bf16 %v1333_v54, %v1332_v26  ;;  %v7758_v14 = vld [vmem:[#allocation4 + $0xa1] sm:$0xff]  ;;  %v7771_v12 = vld [vmem:[#allocation2 + $0x30] sm:$0xff] }
 0x149   :  { %1152 = vst.msk [vmem:[#allocation5 + $0xa0] sm:$0x7f] %vm1100_vm3, %v947_v49  ;;  %v945_v18 = vmul.f32 %v6812_v1, %v7649_v48  ;;  %8906 = vst [vmem:[#allocation16_spill] sm:$0xff] %v7758_v14  ;;  %v6549_v1 = vld [vmem:[%s8875_s2 + $0x58] sm:$0xff]   ;;  %v7765_v8 = vld [vmem:[#allocation2 + $0x20] sm:$0xff] }
 0x14a   :  { %v6814_v2 = vpop.eup %6813  ;;  %6136 = vmatmul.mubr.msk.bf16.gmra.mxu1 %vm953_vm1, %v5652_v59  ;;  %v2198_v63 = vld [vmem:[#allocation4 + $0xd0] sm:$0xff]  ;;  %v7869_v48 = vld [vmem:[#allocation2 + $0xc0] sm:$0xff] }
 0x14b   :  { %1143 = vst.msk [vmem:[#allocation4 + $0xf1] sm:$0x7f] %vm1100_vm3, %v945_v18  ;;  %6144 = vmatpush3.bf16.msra.mxu1 %v6547_v46  ;;  %6147 = vmatprep.mubr.msk.bf16.mxu1 %vm953_vm1, %v5653_v27  ;;  %v948_v0 = vmul.f32 %v6814_v2, %v7663_v32  ;;  %v7760_v30 = vld [vmem:[#allocation4 + $0xb1] sm:$0xff] }
 0x14c   :  { %8907 = vst [vmem:[#allocation17_spill] sm:$0xff] %v7760_v30  ;;  %v6816_v47 = vpop.eup %6815  ;;  %6145 = vmatprep.subr.bf16.mxu1 %v6548_v29  ;;  %v2196_v46 = vld [vmem:[#allocation4 + $0xb0] sm:$0xff] }
 0x14d   :  { %v2199_v5 = vld [vmem:[#allocation4 + $0xe0] sm:$0xff]  ;;  %1153 = vst.msk [vmem:[#allocation5 + $0xb0] sm:$0x7f] %vm1100_vm3, %v948_v0  ;;  %v946_v32 = vmul.f32 %v6816_v47, %v7672_v60  ;;  %v7773_v49 = vld [vmem:[#allocation2 + $0x50] sm:$0xff]  ;;  %v5654_v60 = vpack.c.bf16 %v7771_v12, %v7765_v8 }
 0x14e   :  { %v6818_v11 = vpop.eup %6817  ;;  %v7779_v18 = vld [vmem:[#allocation4 + $0xd1] sm:$0xff]  ;;  %v7783_v0 = vld [vmem:[#allocation2 + $0x40] sm:$0xff]  ;;  %v5683_v47 = vpack.c.bf16 %v2199_v5, %v2198_v63 }
 0x14f   :  { %6146 = vmatpush3.bf16.msra.mxu1 %v6548_v29  ;;  %v2197_v26 = vld [vmem:[#allocation4 + $0xc0] sm:$0xff]  ;;  %1151 = vst.msk [vmem:[#allocation5 + $0x90] sm:$0x7f] %vm1100_vm3, %v946_v32  ;;  %v951_v54 = vmul.f32 %v6818_v11, %v7677_v41  ;;  %8909 = vst [vmem:[#allocation19_spill] sm:$0xff] %v7779_v18  ;;  %v6552_v29 = vld [vmem:[%s8875_s2 + $0x50] sm:$0xff]   ;;  %v5655_v32 = vpack.c.bf16 %v7773_v49, %v7783_v0 }
 0x150   :  { %v7777_v59 = vld [vmem:[#allocation4 + $0xc1] sm:$0xff]  ;;  %v6820_v27 = vpop.eup %6819  ;;  %6163 = vmatprep.subr.bf16.mxu1 %v6549_v1  ;;  %v5682_v2 = vpack.c.bf16 %v2197_v26, %v2196_v46  ;;  %v7827_v41 = vld [vmem:[#allocation2 + $0x70] sm:$0xff] }
 0x151   :  { %8908 = vst [vmem:[#allocation18_spill] sm:$0xff] %v7777_v59  ;;  %1156 = vst.msk [vmem:[#allocation5 + $0xe0] sm:$0x7f] %vm1100_vm3, %v951_v54  ;;  %v949_v11 = vmul.f32 %v6820_v27, %v7682_v55  ;;  %v2201_v46 = vld [vmem:[#allocation4 + $0x100] sm:$0xff] }
 0x152   :  { %v6822_v13 = vpop.eup %6821  ;;  %6148 = vmatmul.mubr.msk.bf16.vlgmr.msra.gmra.mxu1 %vm953_vm1, %v5654_v60  ;;  %6228 = vmatmul.mubr.msk.bf16.gmra.mxu0 %vm953_vm1, %v5682_v2  ;;  %v7796_v26 = vld [vmem:[#allocation5 + $0xa0] sm:$0xff]  ;;  %v2200_v63 = vld [vmem:[#allocation4 + $0xf0] sm:$0xff]  ;;  %v6555_v60 = vld [vmem:[%s8875_s2 + $0x48] sm:$0xff]  }
 0x153   :  { %v7798_v39 = vld [vmem:[#allocation5 + $0xa1] sm:$0xff]  ;;  %6164 = vmatpush3.bf16.msra.mxu1 %v6549_v1  ;;  %6151 = vmatprep.mubr.msk.bf16.mxu1 %vm953_vm1, %v5655_v32  ;;  %1154 = vst.msk [vmem:[#allocation5 + $0xc0] sm:$0x7f] %vm1100_vm3, %v949_v11  ;;  %v952_v5 = vmul.f32 %v6822_v13, %v7687_v17  ;;  %v7805_v55 = vld [vmem:[#allocation4 + $0xf1] sm:$0xff]  ;;  %v5684_v25 = vpack.c.bf16 %v2201_v46, %v2200_v63 }
 0x154   :  { %v7803_v54 = vld [vmem:[#allocation4 + $0xe1] sm:$0xff]  ;;  %8911 = vst [vmem:[#allocation21_spill] sm:$0xff] %v7805_v55  ;;  %v6824_v27 = vpop.eup %6823  ;;  %6165 = vmatprep.subr.bf16.mxu1 %v6552_v29  ;;  %6231 = vmatprep.mubr.msk.bf16.mxu0 %vm953_vm1, %v5683_v47  ;;  %v7811_v1 = vld [vmem:[#allocation5 + $0xb0] sm:$0xff] }
 0x155   :  { %8910 = vst [vmem:[#allocation20_spill] sm:$0xff] %v7803_v54  ;;  %v7813_v2 = vld [vmem:[#allocation5 + $0xb1] sm:$0xff]  ;;  %v7817_v17 = vld [vmem:[#allocation2 + $0x60] sm:$0xff]  ;;  %1157 = vst.msk [vmem:[#allocation5 + $0xf0] sm:$0x7f] %vm1100_vm3, %v952_v5  ;;  %v950_v13 = vmul.f32 %v6824_v27, %v7692_v44  ;;  %v5657_v27 = vpack.c.bf16 %v7825_v43, %v1294_v58 }
 0x156   :  { %v5656_v5 = vpack.c.bf16 %v7827_v41, %v7817_v17  ;;  %v2652_v44 = vld [vmem:[#allocation4 + $0x1] sm:$0xff] }
 0x157   :  { %6166 = vmatpush3.bf16.msra.mxu1 %v6552_v29  ;;  %1155 = vst.msk [vmem:[#allocation5 + $0xd0] sm:$0x7f] %vm1100_vm3, %v950_v13  ;;  %v5693_v47 = vpack.c.bf16 %v2653_v9, %v2652_v44  ;;  %v6556_v46 = vld [vmem:[%s8875_s2 + $0x40] sm:$0xff]   ;;  %v7847_v9 = vld [vmem:[%s8875_s2 + $0x78] sm:$0xff]  }
 0x158   :  { %6167 = vmatprep.subr.bf16.mxu1 %v6555_v60  ;;  %v7838_v63 = vld [vmem:[#allocation5 + $0xe0] sm:$0xff] }
 0x159   :  { %v7840_v29 = vld [vmem:[#allocation5 + $0xe1] sm:$0xff] }
 0x15a   :  { %6152 = vmatmul.mubr.msk.bf16.gmra.mxu1 %vm953_vm1, %v5656_v5  ;;  %6232 = vmatmul.mubr.msk.bf16.gmra.mxu0 %vm953_vm1, %v5684_v25  ;;  %v7853_v5 = vld [vmem:[#allocation2 + $0xb0] sm:$0xff]  ;;  %v7855_v25 = vld [vmem:[#allocation2 + $0xe0] sm:$0xff] }
 0x15b   :  { %6155 = vmatprep.mubr.msk.bf16.mxu1 %vm953_vm1, %v5657_v27  ;;  %6267 = vmatprep.mubr.msk.bf16.mxu0 %vm953_vm1, %v5693_v47  ;;  %v7857_v44 = vld [vmem:[#allocation5 + $0xc0] sm:$0xff]  ;;  %v5658_v47 = vpack.c.bf16 %v7869_v48, %v7853_v5  ;;  %v5659_v45 = vpack.c.bf16 %v7855_v25, %v7881_v36 }
 0x15c   :  { %6168 = vmatpush3.bf16.msra.mxu1 %v6555_v60  ;;  %v7849_v58 = vld [vmem:[#allocation5 + $0xf0] sm:$0xff]  ;;  %v7865_v11 = vld [vmem:[#allocation5 + $0xc1] sm:$0xff]  ;;  %v5694_v60 = vpack.c.bf16 %v7553_v33, %v7871_v28 }
 0x15d   :  { %v7851_v13 = vld [vmem:[#allocation5 + $0xf1] sm:$0xff]  ;;  %6169 = vmatprep.subr.bf16.mxu1 %v6556_v46 }
 0x15e   :  { %8912 = vst [vmem:[#allocation22_spill] sm:$0xff] %v7851_v13  ;;  %v7863_v27 = vld [vmem:[#allocation5 + $0xd0] sm:$0xff]  ;;  %v6564_v13 = vld [vmem:[%s8875_s2 + $0x60] sm:$0xff]  }
 0x15f   :  { %v7867_v32 = vld [vmem:[#allocation5 + $0xd1] sm:$0xff] }
 0x160   :  { %6170 = vmatpush3.bf16.msra.mxu1 %v6556_v46  ;;  %v7896_v46 = vld [vmem:[#allocation2 + $0xf0] sm:$0xff] }
 0x161   :  { %6187 = vmatprep.subr.bf16.mxu1 %v7847_v9 }
 0x162   :  { %6156 = vmatmul.mubr.msk.bf16.gmra.mxu1 %vm953_vm1, %v5658_v47  ;;  %6268 = vmatmul.mubr.msk.bf16.vlgmr.msra.gmra.mxu0 %vm953_vm1, %v5694_v60  ;;  %v7905_v47 = vld [vmem:[#allocation2 + $0x100] sm:$0xff]  ;;  %v5661_v60 = vpack.c.bf16 %v7903_v24, %v1720_v61  ;;  %v6566_v61 = vld [vmem:[%s8875_s2 + $0x158] sm:$0xff]  }
 0x163   :  { %6159 = vmatprep.mubr.msk.bf16.mxu1 %vm953_vm1, %v5659_v45  ;;  %6271 = vmatprep.mubr.msk.bf16.mxu0 %vm953_vm1, %v5695_v53  ;;  %v5660_v45 = vpack.c.bf16 %v7905_v47, %v7896_v46  ;;  %v5696_v53 = vpack.c.bf16 %v7898_v15, %v7573_v19 }
 0x164   :  { %6308 = vmatpush3.bf16.msra.mxu0 %v7627_v56  ;;  %v2660_v56 = vld [vmem:[#allocation4 + $0x91] sm:$0xff] }
 0x165   :  { %6309 = vmatprep.subr.bf16.mxu0 %v6559_v6  ;;  %v5697_v37 = vpack.c.bf16 %v7758_v14, %v2660_v56  ;;  %v7927_v56 = vld [vmem:[#allocation2 + $0x51] sm:$0xff]  ;;  %v2667_v14 = vld [vmem:[#allocation4 + $0x101] sm:$0xff] }
 0x168   :  { %6310 = vmatpush3.bf16.msra.mxu0 %v6559_v6  ;;  %v5698_v6 = vpack.c.bf16 %v7777_v59, %v7760_v30  ;;  %v1728_v30 = vld [vmem:[#allocation2 + $0x91] sm:$0xff] }
 0x169   :  { %6311 = vmatprep.subr.bf16.mxu0 %v6561_v51 }
 0x16a   :  { %6160 = vmatmul.mubr.msk.bf16.gmra.mxu1 %vm953_vm1, %v5660_v45  ;;  %6272 = vmatmul.mubr.msk.bf16.gmra.mxu0 %vm953_vm1, %v5696_v53  ;;  %v7929_v45 = vld [vmem:[#allocation2 + $0x31] sm:$0xff] }
 0x16b   :  { %6171 = vmatprep.mubr.msk.bf16.mxu1 %vm953_vm1, %v5661_v60  ;;  %6275 = vmatprep.mubr.msk.bf16.mxu0 %vm953_vm1, %v5697_v37  ;;  %v5662_v53 = vpack.c.bf16 %v7929_v45, %v7920_v4  ;;  %v7933_v60 = vld [vmem:[#allocation2 + $0x41] sm:$0xff]  ;;  %v6560_v37 = vld [vmem:[%s8875_s2 + $0x70] sm:$0xff]  }
 0x16c   :  { %6312 = vmatpush3.bf16.msra.mxu0 %v6561_v51  ;;  %v5699_v51 = vpack.c.bf16 %v7803_v54, %v7779_v18  ;;  %v5663_v59 = vpack.c.bf16 %v7927_v56, %v7933_v60  ;;  %v7950_v54 = vld [vmem:[#allocation2 + $0x61] sm:$0xff]  ;;  %v5700_v18 = vpack.c.bf16 %v2667_v14, %v7805_v55  ;;  %v7969_v14 = vld [vmem:[#allocation2 + $0xb1] sm:$0xff] }
 0x16d   :  { %6313 = vmatprep.subr.bf16.mxu0 %v6562_v3  ;;  %v6570_v55 = vld [vmem:[%s8875_s2 + $0x140] sm:$0xff]  }
 0x170   :  { %6314 = vmatpush3.bf16.msra.mxu0 %v6562_v3  ;;  %v6563_v3 = vld [vmem:[%s8875_s2 + $0x68] sm:$0xff]  }
 0x171   :  { %6355 = vmatprep.subr.bf16.mxu0 %v6566_v61 }
 0x172   :  { %6172 = vmatmul.mubr.msk.bf16.vlgmr.msra.gmra.mxu1 %vm953_vm1, %v5662_v53  ;;  %6276 = vmatmul.mubr.msk.bf16.gmra.mxu0 %vm953_vm1, %v5698_v6  ;;  %v7953_v53 = vld [vmem:[#allocation2 + $0xa1] sm:$0xff]  ;;  %v7955_v6 = vld [vmem:[#allocation2 + $0x71] sm:$0xff] }
 0x173   :  { %6188 = vmatpush3.bf16.msra.mxu1 %v7847_v9  ;;  %6175 = vmatprep.mubr.msk.bf16.mxu1 %vm953_vm1, %v5663_v59  ;;  %v5664_v59 = vpack.c.bf16 %v7955_v6, %v7950_v54  ;;  %v5665_v9 = vpack.c.bf16 %v7953_v53, %v1728_v30  ;;  %v7974_v30 = vld [vmem:[#allocation2 + $0xe1] sm:$0xff] }
 0x174   :  { %6189 = vmatprep.subr.bf16.mxu1 %v6560_v37  ;;  %6279 = vmatprep.mubr.msk.bf16.mxu0 %vm953_vm1, %v5699_v51  ;;  %v5709_v51 = vpack.c.bf16 %v7765_v8, %v7743_v22  ;;  %v6565_v22 = vld [vmem:[%s8875_s2 + $0xb8] sm:$0xff]   ;;  %v7976_v8 = vld [vmem:[#allocation2 + $0xc1] sm:$0xff] }
 0x177   :  { %6190 = vmatpush3.bf16.msra.mxu1 %v6560_v37  ;;  %v5666_v37 = vpack.c.bf16 %v7976_v8, %v7969_v14 }
 0x178   :  { %6191 = vmatprep.subr.bf16.mxu1 %v6563_v3 }
 0x17a   :  { %6176 = vmatmul.mubr.msk.bf16.gmra.mxu1 %vm953_vm1, %v5664_v59  ;;  %6280 = vmatmul.mubr.msk.bf16.gmra.mxu0 %vm953_vm1, %v5700_v18  ;;  %v5710_v18 = vpack.c.bf16 %v7783_v0, %v7771_v12  ;;  %v7982_v59 = vld [vmem:[#allocation2 + $0xd1] sm:$0xff]  ;;  %v3125_v0 = vld [vmem:[#allocation2 + $0x80] sm:$0xff] }
 0x17b   :  { %6179 = vmatprep.mubr.msk.bf16.mxu1 %vm953_vm1, %v5665_v9  ;;  %6315 = vmatprep.mubr.msk.bf16.mxu0 %vm953_vm1, %v5709_v51  ;;  %v5711_v9 = vpack.c.bf16 %v7817_v17, %v7773_v49  ;;  %v6567_v51 = vld [vmem:[%s8875_s2 + $0x150] sm:$0xff]   ;;  %v6569_v49 = vld [vmem:[%s8875_s2 + $0x148] sm:$0xff]  }
 0x17c   :  { %6192 = vmatpush3.bf16.msra.mxu1 %v6563_v3  ;;  %v5667_v3 = vpack.c.bf16 %v7974_v30, %v7982_v59  ;;  %v7995_v12 = vld [vmem:[#allocation2 + $0xf1] sm:$0xff]  ;;  %v1953_v17 = vld [vmem:[#allocation3 + $0x1] sm:$0xff] }
 0x17d   :  { %6193 = vmatprep.subr.bf16.mxu1 %v6564_v13 }
 0x180   :  { %6194 = vmatpush3.bf16.msra.mxu1 %v6564_v13  ;;  %v8000_v13 = vld [vmem:[#allocation2 + $0x101] sm:$0xff] }
 0x181   :  { %6235 = vmatprep.subr.bf16.mxu1 %v6565_v22 }
 0x182   :  { %6180 = vmatmul.mubr.msk.bf16.gmra.mxu1 %vm953_vm1, %v5666_v37  ;;  %6316 = vmatmul.mubr.msk.bf16.vlgmr.msra.gmra.mxu0 %vm953_vm1, %v5710_v18  ;;  %v5668_v37 = vpack.c.bf16 %v8000_v13, %v7995_v12  ;;  %v5712_v18 = vpack.c.bf16 %v3125_v0, %v7827_v41  ;;  %v6574_v41 = vld [vmem:[%s8875_s2 + $0x198] sm:$0xff]   ;;  %v5714_v0 = vpack.c.bf16 %v7881_v36, %v7869_v48  ;;  %v6571_v36 = vld [vmem:[%s8875_s2 + $0xa8] sm:$0xff]  }
 0x183   :  { %6183 = vmatprep.mubr.msk.bf16.mxu1 %vm953_vm1, %v5667_v3  ;;  %6319 = vmatprep.mubr.msk.bf16.mxu0 %vm953_vm1, %v5711_v9  ;;  %v6890_v3 = vld [vmem:[#allocation3 + $0x11] sm:$0xff] }
 0x184   :  { %6356 = vmatpush3.bf16.msra.mxu0 %v6566_v61  ;;  %v5669_v9 = vpack.c.bf16 %v6890_v3, %v1953_v17  ;;  %v5713_v61 = vpack.c.bf16 %v7853_v5, %v7825_v43  ;;  %v6891_v43 = vld [vmem:[#allocation3 + $0x21] sm:$0xff]  ;;  %v6892_v5 = vld [vmem:[#allocation3 + $0x31] sm:$0xff] }
 0x185   :  { %6357 = vmatprep.subr.bf16.mxu0 %v6567_v51  ;;  %v6568_v17 = vld [vmem:[%s8875_s2 + $0xb0] sm:$0xff]  }
 0x186   :  { %v8031_v48 = vld [vmem:[#allocation3 + $0x71] sm:$0xff] }
 0x188   :  { %6358 = vmatpush3.bf16.msra.mxu0 %v6567_v51  ;;  %v5670_v51 = vpack.c.bf16 %v6892_v5, %v6891_v43  ;;  %v6572_v5 = vld [vmem:[%s8875_s2 + $0xa0] sm:$0xff]  }
 0x189   :  { %6359 = vmatprep.subr.bf16.mxu0 %v6569_v49 }
 0x18a   :  { %6184 = vmatmul.mubr.msk.bf16.gmra.mxu1 %vm953_vm1, %v5668_v37  ;;  %6320 = vmatmul.mubr.msk.bf16.gmra.mxu0 %vm953_vm1, %v5712_v18  ;;  %v6893_v37 = vld [vmem:[#allocation3 + $0x41] sm:$0xff]  ;;  %v6894_v18 = vld [vmem:[#allocation3 + $0x51] sm:$0xff] }
 0x18b   :  { %6195 = vmatprep.mubr.msk.bf16.mxu1 %vm953_vm1, %v5669_v9  ;;  %6323 = vmatprep.mubr.msk.bf16.mxu0 %vm953_vm1, %v5713_v61  ;;  %v5671_v3 = vpack.c.bf16 %v6894_v18, %v6893_v37  ;;  %v1961_v9 = vld [vmem:[#allocation3 + $0x91] sm:$0xff]  ;;  %v6895_v61 = vld [vmem:[#allocation3 + $0x61] sm:$0xff] }
 0x18c   :  { %6360 = vmatpush3.bf16.msra.mxu0 %v6569_v49  ;;  %v5715_v49 = vpack.c.bf16 %v7896_v46, %v7855_v25  ;;  %v5672_v43 = vpack.c.bf16 %v8031_v48, %v6895_v61  ;;  %v5673_v46 = vpack.c.bf16 %v7702_v35, %v1961_v9  ;;  %v5731_v9 = vpack.c.bf16 %v7995_v12, %v7974_v30  ;;  %v3599_v61 = vld [vmem:[#allocation2 + $0x111] sm:$0xff] }
 0x18d   :  { %6361 = vmatprep.subr.bf16.mxu0 %v6570_v55  ;;  %v5732_v30 = vpack.c.bf16 %v3599_v61, %v8000_v13  ;;  %v4051_v12 = vld [vmem:[#allocation4 + $0x10] sm:$0xff]  ;;  %v6581_v13 = vld [vmem:[%s8875_s2 + $0x138] sm:$0xff]  }
 0x190   :  { %6362 = vmatpush3.bf16.msra.mxu0 %v6570_v55  ;;  %v3133_v55 = vld [vmem:[#allocation2 + $0x110] sm:$0xff] }
 0x191   :  { %6403 = vmatprep.subr.bf16.mxu0 %v6574_v41  ;;  %v5716_v25 = vpack.c.bf16 %v3133_v55, %v7905_v47  ;;  %v6573_v47 = vld [vmem:[%s8875_s2 + $0xf8] sm:$0xff]   ;;  %v5687_v55 = vpack.c.bf16 %v7636_v52, %v7640_v62 }
 0x192   :  { %6196 = vmatmul.mubr.msk.bf16.vlgmr.msra.gmra.mxu1 %vm953_vm1, %v5670_v51  ;;  %6324 = vmatmul.mubr.msk.bf16.gmra.mxu0 %vm953_vm1, %v5714_v0  ;;  %v5675_v51 = vpack.c.bf16 %v7733_v7, %v7717_v34  ;;  %v5727_v0 = vpack.c.bf16 %v7950_v54, %v7927_v56  ;;  %v6577_v54 = vld [vmem:[%s8875_s2 + $0x188] sm:$0xff]   ;;  %v2419_v56 = vld [vmem:[#allocation5] sm:$0xff] }
 0x193   :  { %6236 = vmatpush3.bf16.msra.mxu1 %v6565_v22  ;;  %6199 = vmatprep.mubr.msk.bf16.mxu1 %vm953_vm1, %v5671_v3  ;;  %v5725_v22 = vpack.c.bf16 %v7920_v4, %v7903_v24  ;;  %v5674_v4 = vpack.c.bf16 %v7712_v38, %v7704_v23  ;;  %v5726_v24 = vpack.c.bf16 %v7933_v60, %v7929_v45  ;;  %v8063_v45 = vld [vmem:[#allocation3 + $0x101] sm:$0xff] }
 0x194   :  { %6327 = vmatprep.mubr.msk.bf16.mxu0 %vm953_vm1, %v5715_v49  ;;  %6237 = vmatprep.subr.bf16.mxu1 %v6568_v17  ;;  %v3591_v60 = vld [vmem:[#allocation2 + $0x81] sm:$0xff]  ;;  %v5676_v37 = vpack.c.bf16 %v8063_v45, %v7735_v31  ;;  %v5685_v3 = vpack.c.bf16 %v7591_v57, %v2419_v56 }
 0x195   :  { %v5728_v18 = vpack.c.bf16 %v3591_v60, %v7955_v6  ;;  %v6578_v49 = vld [vmem:[%s8875_s2 + $0x180] sm:$0xff]   ;;  %v6582_v6 = vld [vmem:[%s8875_s2 + $0x1d8] sm:$0xff]   ;;  %v4055_v60 = vld [vmem:[#allocation4 + $0x50] sm:$0xff] }
 0x197   :  { %6238 = vmatpush3.bf16.msra.mxu1 %v6568_v17  ;;  %v6575_v17 = vld [vmem:[%s8875_s2 + $0x190] sm:$0xff]  }
 0x198   :  { %6239 = vmatprep.subr.bf16.mxu1 %v6571_v36 }
 0x19a   :  { %6200 = vmatmul.mubr.msk.bf16.gmra.mxu1 %vm953_vm1, %v5672_v43  ;;  %6328 = vmatmul.mubr.msk.bf16.gmra.mxu0 %vm953_vm1, %v5716_v25  ;;  %v2427_v43 = vld [vmem:[#allocation5 + $0x90] sm:$0xff]  ;;  %v4052_v25 = vld [vmem:[#allocation4 + $0x20] sm:$0xff] }
 0x19b   :  { %6203 = vmatprep.mubr.msk.bf16.mxu1 %vm953_vm1, %v5673_v46  ;;  %6363 = vmatprep.mubr.msk.bf16.mxu0 %vm953_vm1, %v5725_v22  ;;  %v5689_v22 = vpack.c.bf16 %v7796_v26, %v2427_v43 }
 0x19c   :  { %6240 = vmatpush3.bf16.msra.mxu1 %v6571_v36  ;;  %v6576_v36 = vld [vmem:[%s8875_s2 + $0xf0] sm:$0xff]  }
 0x19d   :  { %6241 = vmatprep.subr.bf16.mxu1 %v6572_v5 }
 0x1a0   :  { %6242 = vmatpush3.bf16.msra.mxu1 %v6572_v5  ;;  %v5741_v5 = vpack.c.bf16 %v4052_v25, %v4051_v12  ;;  %v4061_v25 = vld [vmem:[#allocation4 + $0xc0] sm:$0xff]  ;;  %v4064_v12 = vld [vmem:[#allocation4 + $0xf0] sm:$0xff] }
 0x1a1   :  { %6283 = vmatprep.subr.bf16.mxu1 %v6573_v47 }
 0x1a2   :  { %6204 = vmatmul.mubr.msk.bf16.gmra.mxu1 %vm953_vm1, %v5674_v4  ;;  %6364 = vmatmul.mubr.msk.bf16.vlgmr.msra.gmra.mxu0 %vm953_vm1, %v5726_v24  ;;  %v4053_v4 = vld [vmem:[#allocation4 + $0x30] sm:$0xff]  ;;  %v4056_v24 = vld [vmem:[#allocation4 + $0x60] sm:$0xff] }
 0x1a3   :  { %6207 = vmatprep.mubr.msk.bf16.mxu1 %vm953_vm1, %v5675_v51  ;;  %6367 = vmatprep.mubr.msk.bf16.mxu0 %vm953_vm1, %v5727_v0  ;;  %v4054_v51 = vld [vmem:[#allocation4 + $0x40] sm:$0xff]  ;;  %v5690_v0 = vpack.c.bf16 %v7857_v44, %v7811_v1  ;;  %v5743_v56 = vpack.c.bf16 %v4056_v24, %v4055_v60  ;;  %v4066_v60 = vld [vmem:[#allocation4 + $0x110] sm:$0xff] }
 0x1a4   :  { %6404 = vmatpush3.bf16.msra.mxu0 %v6574_v41  ;;  %v5729_v41 = vpack.c.bf16 %v7969_v14, %v7953_v53  ;;  %v5686_v53 = vpack.c.bf16 %v7652_v16, %v7586_v42  ;;  %v5730_v14 = vpack.c.bf16 %v7982_v59, %v7976_v8  ;;  %v6579_v8 = vld [vmem:[%s8875_s2 + $0xe8] sm:$0xff]   ;;  %v8102_v59 = vld [vmem:[#allocation5 + $0x70] sm:$0xff] }
 0x1a5   :  { %6405 = vmatprep.subr.bf16.mxu0 %v6575_v17  ;;  %v5688_v46 = vpack.c.bf16 %v8102_v59, %v7630_v50  ;;  %v6898_v24 = vld [vmem:[#allocation5 + $0x41] sm:$0xff] }
 0x1a8   :  { %6406 = vmatpush3.bf16.msra.mxu0 %v6575_v17  ;;  %v5742_v17 = vpack.c.bf16 %v4054_v51, %v4053_v4  ;;  %v6584_v4 = vld [vmem:[%s8875_s2 + $0x130] sm:$0xff]   ;;  %v5703_v51 = vpack.c.bf16 %v7659_v20, %v6898_v24 }
 0x1a9   :  { %6407 = vmatprep.subr.bf16.mxu0 %v6577_v54  ;;  %v3351_v24 = vld [vmem:[#allocation3 + $0x10] sm:$0xff] }
 0x1aa   :  { %6208 = vmatmul.mubr.msk.bf16.gmra.mxu1 %vm953_vm1, %v5676_v37  ;;  %6368 = vmatmul.mubr.msk.bf16.gmra.mxu0 %vm953_vm1, %v5728_v18  ;;  %v6583_v37 = vld [vmem:[%s8875_s2 + $0x1d0] sm:$0xff]  }
 0x1ab   :  { %6243 = vmatprep.mubr.msk.bf16.mxu1 %vm953_vm1, %v5685_v3  ;;  %6371 = vmatprep.mubr.msk.bf16.mxu0 %vm953_vm1, %v5729_v41  ;;  %v4057_v18 = vld [vmem:[#allocation4 + $0x70] sm:$0xff]  ;;  %v4058_v3 = vld [vmem:[#allocation4 + $0x80] sm:$0xff] }
 0x1ac   :  { %6408 = vmatpush3.bf16.msra.mxu0 %v6577_v54  ;;  %v5691_v54 = vpack.c.bf16 %v7838_v63, %v7863_v27  ;;  %v8129_v41 = vld [vmem:[#allocation5 + $0x100] sm:$0xff] }
 0x1ad   :  { %6409 = vmatprep.subr.bf16.mxu0 %v6578_v49 }
 0x1b0   :  { %6410 = vmatpush3.bf16.msra.mxu0 %v6578_v49  ;;  %v6585_v49 = vld [vmem:[%s8875_s2 + $0x1c8] sm:$0xff]  }
 0x1b1   :  { %6451 = vmatprep.subr.bf16.mxu0 %v6582_v6 }
 0x1b2   :  { %6244 = vmatmul.mubr.msk.bf16.vlgmr.msra.gmra.mxu1 %vm953_vm1, %v5686_v53  ;;  %6372 = vmatmul.mubr.msk.bf16.gmra.mxu0 %vm953_vm1, %v5730_v14  ;;  %v5744_v53 = vpack.c.bf16 %v4058_v3, %v4057_v18  ;;  %v2885_v14 = vld [vmem:[#allocation5 + $0x1] sm:$0xff]  ;;  %v2893_v3 = vld [vmem:[#allocation5 + $0x91] sm:$0xff] }
 0x1b3   :  { %6284 = vmatpush3.bf16.msra.mxu1 %v6573_v47  ;;  %6247 = vmatprep.mubr.msk.bf16.mxu1 %vm953_vm1, %v5687_v55  ;;  %v6580_v47 = vld [vmem:[%s8875_s2 + $0xe0] sm:$0xff]   ;;  %v5692_v55 = vpack.c.bf16 %v8129_v41, %v7849_v58 }
 0x1b4   :  { %6375 = vmatprep.mubr.msk.bf16.mxu0 %vm953_vm1, %v5731_v9  ;;  %6285 = vmatprep.subr.bf16.mxu1 %v6576_v36  ;;  %v4059_v9 = vld [vmem:[#allocation4 + $0xa0] sm:$0xff] }
 0x1b7   :  { %6286 = vmatpush3.bf16.msra.mxu1 %v6576_v36  ;;  %v4060_v36 = vld [vmem:[#allocation4 + $0xb0] sm:$0xff] }
 0x1b8   :  { %6287 = vmatprep.subr.bf16.mxu1 %v6579_v8  ;;  %v5745_v43 = vpack.c.bf16 %v4060_v36, %v4059_v9  ;;  %v5705_v36 = vpack.c.bf16 %v7798_v39, %v2893_v3  ;;  %v6588_v9 = vld [vmem:[%s8875_s2 + $0x120] sm:$0xff]  }
 0x1ba   :  { %6248 = vmatmul.mubr.msk.bf16.gmra.mxu1 %vm953_vm1, %v5688_v46  ;;  %6376 = vmatmul.mubr.msk.bf16.gmra.mxu0 %vm953_vm1, %v5732_v30  ;;  %v4062_v46 = vld [vmem:[#allocation4 + $0xd0] sm:$0xff]  ;;  %v4063_v30 = vld [vmem:[#allocation4 + $0xe0] sm:$0xff] }
 0x1bb   :  { %6251 = vmatprep.mubr.msk.bf16.mxu1 %vm953_vm1, %v5689_v22  ;;  %6411 = vmatprep.mubr.msk.bf16.mxu0 %vm953_vm1, %v5741_v5  ;;  %v6897_v22 = vld [vmem:[#allocation5 + $0x21] sm:$0xff] }
 0x1bc   :  { %6288 = vmatpush3.bf16.msra.mxu1 %v6579_v8  ;;  %v6896_v8 = vld [vmem:[#allocation5 + $0x11] sm:$0xff]  ;;  %v5702_v5 = vpack.c.bf16 %v7657_v40, %v6897_v22  ;;  %v8194_v22 = vld [vmem:[#allocation5 + $0x101] sm:$0xff] }
 0x1bd   :  { %6289 = vmatprep.subr.bf16.mxu1 %v6580_v47  ;;  %v5701_v61 = vpack.c.bf16 %v6896_v8, %v2885_v14  ;;  %v4518_v14 = vld [vmem:[#allocation4 + $0x11] sm:$0xff]  ;;  %8915 = vst [vmem:[#allocation23_spill] sm:$0xff] %v8194_v22 }
 0x1c0   :  { %6290 = vmatpush3.bf16.msra.mxu1 %v6580_v47  ;;  %v5746_v47 = vpack.c.bf16 %v4062_v46, %v4061_v25  ;;  %v8913_v25 = vpack.c.bf16 %v7563_v10, %v7553_v33  ;;  %v8914_v46 = vpack.c.bf16 %v7573_v19, %v7584_v21  ;;  %v8916_v33 = vld [vmem:[#allocation22_spill] sm:$0xff]  ;;  %v8917_v19 = vld [vmem:[#allocation17_spill] sm:$0xff]  ;;  %v8918_v21 = vld [vmem:[#allocation16_spill] sm:$0xff] }
 0x1c1   :  { %6331 = vmatprep.subr.bf16.mxu1 %v6581_v13  ;;  %v5708_v10 = vpack.c.bf16 %v8194_v22, %v8916_v33 }
 0x1c2   :  { %6252 = vmatmul.mubr.msk.bf16.gmra.mxu1 %vm953_vm1, %v5690_v0  ;;  %6412 = vmatmul.mubr.msk.bf16.vlgmr.msra.gmra.mxu0 %vm953_vm1, %v5742_v17  ;;  %v5747_v0 = vpack.c.bf16 %v4064_v12, %v4063_v30  ;;  %v4065_v17 = vld [vmem:[#allocation4 + $0x100] sm:$0xff] }
 0x1c3   :  { %6255 = vmatprep.mubr.msk.bf16.mxu1 %vm953_vm1, %v5691_v54  ;;  %6415 = vmatprep.mubr.msk.bf16.mxu0 %vm953_vm1, %v5743_v56  ;;  %v6587_v56 = vld [vmem:[%s8875_s2 + $0x128] sm:$0xff]   ;;  %v5748_v18 = vpack.c.bf16 %v4066_v60, %v4065_v17  ;;  %v3353_v17 = vld [vmem:[#allocation3 + $0x30] sm:$0xff]  ;;  %v3356_v60 = vld [vmem:[#allocation3 + $0x60] sm:$0xff] }
 0x1c4   :  { %6452 = vmatpush3.bf16.msra.mxu0 %v6582_v6  ;;  %v6586_v6 = vld [vmem:[%s8875_s2 + $0x1c0] sm:$0xff]  }
 0x1c5   :  { %6453 = vmatprep.subr.bf16.mxu0 %v6583_v37  ;;  %v4525_v30 = vld [vmem:[#allocation4 + $0x81] sm:$0xff] }
 0x1c8   :  { %6454 = vmatpush3.bf16.msra.mxu0 %v6583_v37  ;;  %v8157_v37 = vld [vmem:[#allocation5 + $0x71] sm:$0xff] }
 0x1c9   :  { %6455 = vmatprep.subr.bf16.mxu0 %v6585_v49 }
 0x1ca   :  { %6256 = vmatmul.mubr.msk.bf16.gmra.mxu1 %vm953_vm1, %v5692_v55  ;;  %6416 = vmatmul.mubr.msk.bf16.gmra.mxu0 %vm953_vm1, %v5744_v53  ;;  %v8151_v54 = vpop.f32.mrf.mxu0  ;;  %v5757_v55 = vpack.c.bf16 %v7871_v28, %v4518_v14  ;;  %v6589_v28 = vld [vmem:[%s8875_s2 + $0x178] sm:$0xff]  }
 0x1cb   :  { %6291 = vmatprep.mubr.msk.bf16.mxu1 %vm953_vm1, %v5701_v61  ;;  %6419 = vmatprep.mubr.msk.bf16.mxu0 %vm953_vm1, %v5745_v43  ;;  %v5706_v43 = vpack.c.bf16 %v7865_v11, %v7813_v2 }
 0x1cc   :  { %6456 = vmatpush3.bf16.msra.mxu0 %v6585_v49  ;;  %v8159_v49 = vpop.f32.mrf.mxu0 }
 0x1cd   :  { %6457 = vmatprep.subr.bf16.mxu0 %v6586_v6 }
 0x1ce   :  { %v8171_v8 = vpop.f32.mrf.mxu0 }
 0x1d0   :  { %6458 = vmatpush3.bf16.msra.mxu0 %v6586_v6  ;;  %v8176_v61 = vpop.f32.mrf.mxu0  ;;  %v5707_v6 = vpack.c.bf16 %v7840_v29, %v7867_v32 }
 0x1d2   :  { %6292 = vmatmul.mubr.msk.bf16.vlgmr.msra.gmra.mxu1 %vm953_vm1, %v5702_v5  ;;  %6420 = vmatmul.mubr.msk.bf16.gmra.mxu0 %vm953_vm1, %v5746_v47  ;;  %v8192_v12 = vpop.f32.mrf.mxu0  ;;  %v5760_v5 = vpack.c.bf16 %v4525_v30, %v7898_v15  ;;  %v3352_v47 = vld [vmem:[#allocation3 + $0x20] sm:$0xff]  ;;  %v8925_v30 = vld [vmem:[#allocation20_spill] sm:$0xff] }
 0x1d3   :  { %6332 = vmatpush3.bf16.msra.mxu1 %v6581_v13  ;;  %6295 = vmatprep.mubr.msk.bf16.mxu1 %vm953_vm1, %v5703_v51  ;;  %v6899_v13 = vld [vmem:[#allocation5 + $0x61] sm:$0xff]  ;;  %v5717_v51 = vpack.c.bf16 %v3352_v47, %v3351_v24 }
 0x1d4   :  { %6423 = vmatprep.mubr.msk.bf16.mxu0 %vm953_vm1, %v5747_v0  ;;  %6333 = vmatprep.subr.bf16.mxu1 %v6584_v4  ;;  %v5704_v53 = vpack.c.bf16 %v8157_v37, %v6899_v13  ;;  %v8919_v0 = vpack.c.bf16 %v8917_v19, %v8918_v21  ;;  %v3355_v13 = vld [vmem:[#allocation3 + $0x50] sm:$0xff]  ;;  %v6591_v47 = vld [vmem:[%s8875_s2 + $0x168] sm:$0xff]   ;;  %v3358_v24 = vld [vmem:[#allocation3 + $0x80] sm:$0xff] }
 0x1d5   :  { %v5719_v14 = vpack.c.bf16 %v3356_v60, %v3355_v13  ;;  %v3361_v13 = vld [vmem:[#allocation3 + $0xc0] sm:$0xff] }
 0x1d7   :  { %6334 = vmatpush3.bf16.msra.mxu1 %v6584_v4  ;;  %v8197_v4 = vpop.f32.mrf.mxu0 }
 0x1d8   :  { %6335 = vmatprep.subr.bf16.mxu1 %v6587_v56 }
 0x1d9   :  { %v8208_v15 = vpop.f32.mrf.mxu0 }
 0x1da   :  { %6296 = vmatmul.mubr.msk.bf16.gmra.mxu1 %vm953_vm1, %v5704_v53  ;;  %6424 = vmatmul.mubr.msk.bf16.gmra.mxu0 %vm953_vm1, %v5748_v18  ;;  %v6590_v53 = vld [vmem:[%s8875_s2 + $0x170] sm:$0xff]  }
 0x1db   :  { %6299 = vmatprep.mubr.msk.bf16.mxu1 %vm953_vm1, %v5705_v36  ;;  %6459 = vmatprep.mubr.msk.bf16.mxu0 %vm953_vm1, %v5757_v55  ;;  %v8210_v18 = vpop.f32.mrf.mxu0  ;;  %v8920_v36 = vld [vmem:[#allocation19_spill] sm:$0xff]  ;;  %v8921_v55 = vld [vmem:[#allocation18_spill] sm:$0xff] }
 0x1dc   :  { %6336 = vmatpush3.bf16.msra.mxu1 %v6587_v56  ;;  %v3354_v56 = vld [vmem:[#allocation3 + $0x40] sm:$0xff] }
 0x1dd   :  { %6337 = vmatprep.subr.bf16.mxu1 %v6588_v9  ;;  %v5718_v3 = vpack.c.bf16 %v3354_v56, %v3353_v17  ;;  %v6592_v17 = vld [vmem:[%s8875_s2 + $0x160] sm:$0xff]  }
 0x1e0   :  { %6338 = vmatpush3.bf16.msra.mxu1 %v6588_v9  ;;  %v8922_v9 = vpack.c.bf16 %v8920_v36, %v8921_v55 }
 0x1e1   :  { %6379 = vmatprep.subr.bf16.mxu1 %v6589_v28 }
 0x1e2   :  { %6300 = vmatmul.mubr.msk.bf16.gmra.mxu1 %vm953_vm1, %v5706_v43  ;;  %6460 = vmatmul.mubr.msk.bf16.vlgmr.msra.gmra.mxu0 %vm953_vm1, %v8913_v25  ;;  %v4532_v43 = vld [vmem:[#allocation4 + $0x101] sm:$0xff]  ;;  %v8221_v25 = vpop.f32.mrf.mxu0 }
 0x1e3   :  { %6303 = vmatprep.mubr.msk.bf16.mxu1 %vm953_vm1, %v5707_v6  ;;  %6463 = vmatprep.mubr.msk.bf16.mxu0 %vm953_vm1, %v8914_v46  ;;  %v4533_v6 = vld [vmem:[#allocation4 + $0x111] sm:$0xff]  ;;  %8923 = vst [vmem:[#allocation22_spill] sm:$0xff] %v8221_v25 }
 0x1e4   :  { %v8924_v46 = vld [vmem:[#allocation21_spill] sm:$0xff]  ;;  %v8230_v19 = vpop.f32.mrf.mxu0 }
 0x1e5   :  { %8927 = vst [vmem:[#allocation17_spill] sm:$0xff] %v8230_v19  ;;  %v3832_v19 = vld [vmem:[#allocation3 + $0x111] sm:$0xff] }
 0x1e6   :  { %v8238_v56 = vpop.f32.mrf.mxu0 }
 0x1e7   :  { %8928 = vst [vmem:[#allocation16_spill] sm:$0xff] %v8238_v56 }
 0x1e8   :  { %v8243_v36 = vpop.f32.mrf.mxu0 }
 0x1e9   :  { %8929 = vst [vmem:[#allocation19_spill] sm:$0xff] %v8243_v36  ;;  %v3824_v36 = vld [vmem:[#allocation3 + $0x81] sm:$0xff] }
 0x1ea   :  { %6304 = vmatmul.mubr.msk.bf16.gmra.mxu1 %vm953_vm1, %v5708_v10  ;;  %6464 = vmatmul.mubr.msk.bf16.gmra.mxu0 %vm953_vm1, %v5760_v5  ;;  %v8926_v5 = vpack.c.bf16 %v8924_v46, %v8925_v30  ;;  %v3357_v10 = vld [vmem:[#allocation3 + $0x70] sm:$0xff]  ;;  %v8247_v30 = vpop.f32.mrf.mxu0 }
 0x1eb   :  { %6339 = vmatprep.mubr.msk.bf16.mxu1 %vm953_vm1, %v5717_v51  ;;  %6467 = vmatprep.mubr.msk.bf16.mxu0 %vm953_vm1, %v8919_v0  ;;  %v3360_v51 = vld [vmem:[#allocation3 + $0xb0] sm:$0xff]  ;;  %v5720_v21 = vpack.c.bf16 %v3358_v24, %v3357_v10  ;;  %v3359_v0 = vld [vmem:[#allocation3 + $0xa0] sm:$0xff]  ;;  %8930 = vst [vmem:[#allocation18_spill] sm:$0xff] %v8247_v30 }
 0x1ec   :  { %v5721_v60 = vpack.c.bf16 %v3360_v51, %v3359_v0  ;;  %v3366_v10 = vld [vmem:[#allocation3 + $0x110] sm:$0xff]  ;;  %v8249_v51 = vpop.f32.mrf.mxu0  ;;  %v8932_v0 = vld [vmem:[#allocation7_spill] sm:$0xff] }
 0x1ed   :  { %8931 = vst [vmem:[#allocation21_spill] sm:$0xff] %v8249_v51 }
 0x1f2   :  { %6340 = vmatmul.mubr.msk.bf16.vlgmr.msra.gmra.mxu1 %vm953_vm1, %v5718_v3  ;;  %6468 = vmatmul.mubr.msk.bf16.gmra.mxu0 %vm953_vm1, %v8922_v9  ;;  %v6593_v3 = vld [vmem:[%s8875_s2 + $0x1b8] sm:$0xff]   ;;  %v3363_v9 = vld [vmem:[#allocation3 + $0xe0] sm:$0xff] }
 0x1f3   :  { %6380 = vmatpush3.bf16.msra.mxu1 %v6589_v28  ;;  %6343 = vmatprep.mubr.msk.bf16.mxu1 %vm953_vm1, %v5719_v14  ;;  %v5764_v28 = vpack.c.bf16 %v4533_v6, %v4532_v43  ;;  %v3362_v14 = vld [vmem:[#allocation3 + $0xd0] sm:$0xff] }
 0x1f4   :  { %6471 = vmatprep.mubr.msk.bf16.mxu0 %vm953_vm1, %v8926_v5  ;;  %6381 = vmatprep.subr.bf16.mxu1 %v6590_v53  ;;  %v5722_v55 = vpack.c.bf16 %v3362_v14, %v3361_v13  ;;  %v8256_v13 = vpop.f32.mrf.mxu0 }
 0x1f5   :  { %8935 = vst [vmem:[#allocation20_spill] sm:$0xff] %v8256_v13  ;;  %v8942_v13 = vld [vmem:[#allocation10_spill] sm:$0xff] }
 0x1f7   :  { %6382 = vmatpush3.bf16.msra.mxu1 %v6590_v53  ;;  %v3364_v53 = vld [vmem:[#allocation3 + $0xf0] sm:$0xff] }
 0x1f8   :  { %6383 = vmatprep.subr.bf16.mxu1 %v6591_v47  ;;  %v5723_v6 = vpack.c.bf16 %v3364_v53, %v3363_v9 }
 0x1fa   :  { %6344 = vmatmul.mubr.msk.bf16.gmra.mxu1 %vm953_vm1, %v5720_v21  ;;  %6472 = vmatmul.mubr.msk.bf16.gmra.mxu0 %vm953_vm1, %v5764_v28 }
 0x1fb   :  { %6347 = vmatprep.mubr.msk.bf16.mxu1 %vm953_vm1, %v5721_v60  ;;  %6384 = vmatpush3.bf16.msra.mxu1 %v6591_v47  ;;  %v3365_v47 = vld [vmem:[#allocation3 + $0x100] sm:$0xff] }
 0x1fc   :  { %6385 = vmatprep.subr.bf16.mxu1 %v6592_v17  ;;  %v5724_v28 = vpack.c.bf16 %v3366_v10, %v3365_v47 }
 0x1ff   :  { %6386 = vmatpush3.bf16.msra.mxu1 %v6592_v17  ;;  %v8933_v17 = vld [vmem:[#allocation6_spill] sm:$0xff] }
 0x200   :  { %6427 = vmatprep.subr.bf16.mxu1 %v6593_v3  ;;  %v8934_v60 = vpack.c.bf16 %v8932_v0, %v8933_v17  ;;  %v8939_v0 = vld [vmem:[#allocation8_spill] sm:$0xff] }
 0x201   :  { %v6133_v43 = vpop.f32.mrf.mxu1 }
 0x202   :  { %6348 = vmatmul.mubr.msk.bf16.gmra.mxu1 %vm953_vm1, %v5722_v55  ;;  %v8260_v55 = vpop.f32.mrf.mxu0 }
 0x203   :  { %6351 = vmatprep.mubr.msk.bf16.mxu1 %vm953_vm1, %v5723_v6  ;;  %v1504_v46 = vpop.f32.mrf.mxu1  ;;  %8936 = vst [vmem:[#allocation7_spill] sm:$0xff] %v8260_v55  ;;  %v6594_v6 = vld [vmem:[%s8875_s2 + $0x1b0] sm:$0xff]  }
 0x205   :  { %v6134_v5 = vpop.f32.mrf.mxu1 }
 0x207   :  { %v1507_v24 = vpop.f32.mrf.mxu1 }
 0x20a   :  { %v6137_v21 = vpop.f32.mrf.mxu1  ;;  %6352 = vmatmul.mubr.msk.bf16.gmra.mxu1 %vm953_vm1, %v5724_v28  ;;  %v8938_v28 = vld [vmem:[#allocation9_spill] sm:$0xff] }
 0x20b   :  { %6387 = vmatprep.mubr.msk.bf16.mxu1 %vm953_vm1, %v8934_v60  ;;  %v8940_v17 = vpack.c.bf16 %v8938_v28, %v8939_v0  ;;  %v8941_v60 = vld [vmem:[#allocation11_spill] sm:$0xff]  ;;  %v6596_v0 = vld [vmem:[%s8875_s2 + $0x1a0] sm:$0xff]  }
 0x20c   :  { %v1520_v53 = vpop.f32.mrf.mxu1  ;;  %v8943_v51 = vpack.c.bf16 %v8941_v60, %v8942_v13 }
 0x20e   :  { %v8258_v14 = vpop.f32.mrf.mxu1 }
 0x210   :  { %v8262_v9 = vpop.f32.mrf.mxu1 }
 0x212   :  { %v8267_v47 = vpop.f32.mrf.mxu1  ;;  %v8269_v10 = vpop.f32.mrf.mxu0  ;;  %6388 = vmatmul.mubr.msk.bf16.vlgmr.msra.gmra.mxu1 %vm953_vm1, %v8940_v17 }
 0x213   :  { %8937 = vst [vmem:[#allocation6_spill] sm:$0xff] %v8269_v10  ;;  %6428 = vmatpush3.bf16.msra.mxu1 %v6593_v3  ;;  %6391 = vmatprep.mubr.msk.bf16.mxu1 %vm953_vm1, %v8943_v51  ;;  %v6595_v10 = vld [vmem:[%s8875_s2 + $0x1a8] sm:$0xff]   ;;  %v5736_v51 = vpack.c.bf16 %v3824_v36, %v8031_v48  ;;  %v6597_v36 = vld [vmem:[%s8875_s2 + $0x1f8] sm:$0xff]  }
 0x214   :  { %v8279_v55 = vpop.f32.mrf.mxu1  ;;  %v8281_v30 = vpop.f32.mrf.mxu0  ;;  %6429 = vmatprep.subr.bf16.mxu1 %v6594_v6 }
 0x215   :  { %8944 = vst [vmem:[#allocation9_spill] sm:$0xff] %v8281_v30  ;;  %v8954_v30 = vpack.c.bf16 %v7735_v31, %v7733_v7 }
 0x216   :  { %v8286_v56 = vpop.f32.mrf.mxu1  ;;  %v8288_v28 = vpop.f32.mrf.mxu0 }
 0x217   :  { %8945 = vst [vmem:[#allocation8_spill] sm:$0xff] %v8288_v28  ;;  %6430 = vmatpush3.bf16.msra.mxu1 %v6594_v6  ;;  %v8948_v6 = vpack.c.bf16 %v7704_v23, %v7702_v35 }
 0x218   :  { %v8290_v3 = vpop.f32.mrf.mxu1  ;;  %v8292_v13 = vpop.f32.mrf.mxu0  ;;  %6431 = vmatprep.subr.bf16.mxu1 %v6595_v10 }
 0x219   :  { %8946 = vst [vmem:[#allocation11_spill] sm:$0xff] %v8292_v13 }
 0x21a   :  { %v8298_v17 = vpop.f32.mrf.mxu1  ;;  %v8300_v60 = vpop.f32.mrf.mxu0  ;;  %6392 = vmatmul.mubr.msk.bf16.gmra.mxu1 %vm953_vm1, %v5736_v51 }
 0x21b   :  { %8947 = vst [vmem:[#allocation10_spill] sm:$0xff] %v8300_v60  ;;  %6395 = vmatprep.mubr.msk.bf16.mxu1 %vm953_vm1, %v8948_v6  ;;  %6432 = vmatpush3.bf16.msra.mxu1 %v6595_v10  ;;  %v8953_v6 = vpack.c.bf16 %v7717_v34, %v7712_v38 }
 0x21c   :  { %v8307_v13 = vpop.f32.mrf.mxu1  ;;  %v8309_v48 = vpop.f32.mrf.mxu0  ;;  %6433 = vmatprep.subr.bf16.mxu1 %v6596_v0 }
 0x21d   :  { %8949 = vst [vmem:[#allocation24_spill] sm:$0xff] %v8309_v48 }
 0x21e   :  { %v8314_v28 = vpop.f32.mrf.mxu1  ;;  %v8316_v60 = vpop.f32.mrf.mxu0 }
 0x21f   :  { %8950 = vst [vmem:[#allocation25_spill] sm:$0xff] %v8316_v60  ;;  %6434 = vmatpush3.bf16.msra.mxu1 %v6596_v0 }
 0x220   :  { %v8318_v51 = vpop.f32.mrf.mxu1  ;;  %v8320_v35 = vpop.f32.mrf.mxu0  ;;  %6475 = vmatprep.subr.bf16.mxu1 %v6597_v36 }
 0x221   :  { %8951 = vst [vmem:[#allocation26_spill] sm:$0xff] %v8320_v35 }
 0x222   :  { %v6157_v23 = vpop.f32.mrf.mxu1  ;;  %v8322_v10 = vpop.f32.mrf.mxu0  ;;  %6396 = vmatmul.mubr.msk.bf16.gmra.mxu1 %vm953_vm1, %v8953_v6 }
 0x223   :  { %8952 = vst [vmem:[#allocation27_spill] sm:$0xff] %v8322_v10  ;;  %v8328_v48 = vadd.f32 %v6157_v23, %v6133_v43  ;;  %6399 = vmatprep.mubr.msk.bf16.mxu1 %vm953_vm1, %v8954_v30  ;;  %v5740_v43 = vpack.c.bf16 %v3832_v19, %v8063_v45  ;;  %v8955_v30 = vpack.c.bf16 %v7586_v42, %v7591_v57  ;;  %v6598_v42 = vld [vmem:[%s8875_s2 + $0x1f0] sm:$0xff]  }
 0x224   :  { %v1689_v0 = vpop.f32.mrf.mxu1  ;;  %v8334_v60 = vpop.f32.mrf.mxu0  ;;  %v1666_v57 = vadd.f32 %v8267_v47, %v8151_v54  ;;  %v8957_v54 = vpack.c.bf16 %v7630_v50, %v7636_v52  ;;  %v1661_v52 = vadd.f32 %v8290_v3, %v8176_v61  ;;  %v1674_v61 = vadd.f32 %v8307_v13, %v8197_v4 }
 0x225   :  { %v8336_v35 = vadd.f32 %v1689_v0, %v1504_v46  ;;  %v1677_v4 = vadd.f32 %v8318_v51, %v8210_v18  ;;  %v4300_v18 = vld [vmem:[#allocation5 + $0x110] sm:$0xff] }
 0x226   :  { %v6158_v25 = vpop.f32.mrf.mxu1  ;;  %v8338_v10 = vpop.f32.mrf.mxu0 }
 0x227   :  { %v8340_v22 = vadd.f32 %v6158_v25, %v6134_v5 }
 0x228   :  { %v1692_v38 = vpop.f32.mrf.mxu1  ;;  %v8342_v34 = vpop.f32.mrf.mxu0 }
 0x229   :  { %v8345_v23 = vadd.f32 %v1692_v38, %v1507_v24 }
 0x22a   :  { %v6161_v7 = vpop.f32.mrf.mxu1  ;;  %v8347_v31 = vpop.f32.mrf.mxu0  ;;  %6400 = vmatmul.mubr.msk.bf16.gmra.mxu1 %vm953_vm1, %v5740_v43 }
 0x22b   :  { %v8350_v46 = vadd.f32 %v6161_v7, %v6137_v21  ;;  %6435 = vmatprep.mubr.msk.bf16.mxu1 %vm953_vm1, %v8955_v30  ;;  %v1658_v7 = vadd.f32 %v8279_v55, %v8159_v49 }
 0x22c   :  { %v1705_v25 = vpop.f32.mrf.mxu1  ;;  %v8356_v5 = vpop.f32.mrf.mxu0 }
 0x22d   :  { %v8358_v6 = vadd.f32 %v1705_v25, %v1520_v53 }
 0x22e   :  { %v6162_v45 = vpop.f32.mrf.mxu1  ;;  %v8360_v19 = vpop.f32.mrf.mxu0 }
 0x22f   :  { %v8363_v24 = vadd.f32 %v6162_v45, %v8258_v14  ;;  %v8956_v14 = vpack.c.bf16 %v7640_v62, %v7652_v16  ;;  %v6599_v62 = vld [vmem:[%s8875_s2 + $0x1e8] sm:$0xff]   ;;  %v1669_v16 = vadd.f32 %v8286_v56, %v8171_v8  ;;  %v6600_v8 = vld [vmem:[%s8875_s2 + $0x1e0] sm:$0xff]   ;;  %v1682_v56 = vadd.f32 %v8298_v17, %v8192_v12 }
 0x230   :  { %v1708_v0 = vpop.f32.mrf.mxu1  ;;  %v8365_v38 = vpop.f32.mrf.mxu0  ;;  %v1685_v17 = vadd.f32 %v8314_v28, %v8208_v15  ;;  %v8960_v28 = vpack.c.bf16 %v7849_v58, %v7838_v63 }
 0x231   :  { %v8373_v21 = vadd.f32 %v1708_v0, %v8262_v9  ;;  %v4292_v9 = vld [vmem:[#allocation5 + $0x80] sm:$0xff] }
 0x232   :  { %v6173_v53 = vpop.f32.mrf.mxu1  ;;  %v8375_v43 = vpop.f32.mrf.mxu0  ;;  %6436 = vmatmul.mubr.msk.bf16.vlgmr.msra.gmra.mxu1 %vm953_vm1, %v8956_v14  ;;  %v5752_v50 = vpack.c.bf16 %v4292_v9, %v8102_v59 }
 0x233   :  { %v8383_v30 = vadd.f32 %v6173_v53, %v1666_v57  ;;  %6476 = vmatpush3.bf16.msra.mxu1 %v6597_v36  ;;  %6439 = vmatprep.mubr.msk.bf16.mxu1 %vm953_vm1, %v8957_v54 }
 0x234   :  { %v1874_v47 = vpop.f32.mrf.mxu1  ;;  %v8389_v25 = vpop.f32.mrf.mxu0  ;;  %6477 = vmatprep.subr.bf16.mxu1 %v6598_v42 }
 0x235   :  { %v8396_v49 = vadd.f32 %v1874_v47, %v1658_v7 }
 0x236   :  { %v6174_v55 = vpop.f32.mrf.mxu1  ;;  %v8398_v36 = vpop.f32.mrf.mxu0 }
 0x237   :  { %v8403_v45 = vadd.f32 %v6174_v55, %v1669_v16  ;;  %6478 = vmatpush3.bf16.msra.mxu1 %v6598_v42  ;;  %v8958_v42 = vpack.c.bf16 %v7811_v1, %v7796_v26 }
 0x238   :  { %v1877_v0 = vpop.f32.mrf.mxu1  ;;  %v8405_v57 = vpop.f32.mrf.mxu0  ;;  %6479 = vmatprep.subr.bf16.mxu1 %v6599_v62 }
 0x239   :  { %v8412_v53 = vadd.f32 %v1877_v0, %v1661_v52 }
 0x23a   :  { %v6177_v59 = vpop.f32.mrf.mxu1  ;;  %v8414_v14 = vpop.f32.mrf.mxu0  ;;  %6440 = vmatmul.mubr.msk.bf16.gmra.mxu1 %vm953_vm1, %v5752_v50  ;;  %v8959_v50 = vpack.c.bf16 %v7863_v27, %v7857_v44  ;;  %v5756_v44 = vpack.c.bf16 %v4300_v18, %v8129_v41 }
 0x23b   :  { %v8419_v3 = vadd.f32 %v6177_v59, %v1682_v56  ;;  %6443 = vmatprep.mubr.msk.bf16.mxu1 %vm953_vm1, %v8958_v42  ;;  %6480 = vmatpush3.bf16.msra.mxu1 %v6599_v62 }
 0x23c   :  { %v1890_v7 = vpop.f32.mrf.mxu1  ;;  %v8425_v12 = vpop.f32.mrf.mxu0  ;;  %6481 = vmatprep.subr.bf16.mxu1 %v6600_v8 }
 0x23d   :  { %v1941_v54 = vadd.f32 %v1890_v7, %v1674_v61  ;;  %v8962_v7 = vld [vmem:[#allocation13_spill] sm:$0xff] }
 0x23e   :  { %v6178_v9 = vpop.f32.mrf.mxu1  ;;  %v8429_v47 = vpop.f32.mrf.mxu0 }
 0x23f   :  { %v1944_v13 = vadd.f32 %v6178_v9, %v1685_v17  ;;  %6482 = vmatpush3.bf16.msra.mxu1 %v6600_v8 }
 0x240   :  { %v1893_v26 = vpop.f32.mrf.mxu1  ;;  %v8433_v1 = vpop.f32.mrf.mxu0 }
 0x241   :  { %v1942_v62 = vadd.f32 %v1893_v26, %v1677_v4 }
 0x242   :  { %v6181_v16 = vpop.f32.mrf.mxu1  ;;  %v8435_v55 = vpop.f32.mrf.mxu0  ;;  %6444 = vmatmul.mubr.msk.bf16.gmra.mxu1 %vm953_vm1, %v8959_v50 }
 0x243   :  { %v1947_v15 = vadd.f32 %v6181_v16, %v8328_v48  ;;  %6447 = vmatprep.mubr.msk.bf16.mxu1 %vm953_vm1, %v8960_v28 }
 0x244   :  { %v1906_v51 = vpop.f32.mrf.mxu1  ;;  %v8446_v52 = vpop.f32.mrf.mxu0 }
 0x245   :  { %v1945_v0 = vadd.f32 %v1906_v51, %v8336_v35  ;;  %v8961_v35 = vld [vmem:[#allocation12_spill] sm:$0xff]  ;;  %v8964_v51 = vld [vmem:[#allocation14_spill] sm:$0xff] }
 0x246   :  { %v6182_v8 = vpop.f32.mrf.mxu1  ;;  %v8449_v56 = vpop.f32.mrf.mxu0  ;;  %v8963_v17 = vpack.c.bf16 %v8961_v35, %v8962_v7 }
 0x247   :  { %v1948_v27 = vadd.f32 %v6182_v8, %v8340_v22  ;;  %v8965_v8 = vpack.c.bf16 %v8964_v51, %v7657_v40 }
 0x248   :  { %v1909_v59 = vpop.f32.mrf.mxu1  ;;  %v8453_v48 = vpop.f32.mrf.mxu0 }
 0x249   :  { %v1946_v63 = vadd.f32 %v1909_v59, %v8345_v23 }
 0x24a   :  { %v6185_v58 = vpop.f32.mrf.mxu1  ;;  %v8456_v61 = vpop.f32.mrf.mxu0  ;;  %6448 = vmatmul.mubr.msk.bf16.gmra.mxu1 %vm953_vm1, %v5756_v44  ;;  %v8966_v44 = vld [vmem:[#allocation15_spill] sm:$0xff] }
 0x24b   :  { %v1951_v42 = vadd.f32 %v6185_v58, %v8350_v46  ;;  %6483 = vmatprep.mubr.msk.bf16.mxu1 %vm953_vm1, %v8963_v17  ;;  %v8967_v59 = vpack.c.bf16 %v8966_v44, %v7659_v20 }
 0x24c   :  { %v1922_v41 = vpop.f32.mrf.mxu1  ;;  %v8464_v9 = vpop.f32.mrf.mxu0 }
 0x24d   :  { %v1949_v22 = vadd.f32 %v1922_v41, %v8358_v6 }
 0x24e   :  { %v6186_v4 = vpop.f32.mrf.mxu1  ;;  %v8467_v26 = vpop.f32.mrf.mxu0 }
 0x24f   :  { %v1952_v23 = vadd.f32 %v6186_v4, %v8363_v24  ;;  %v4758_v24 = vld [vmem:[#allocation5 + $0x81] sm:$0xff] }
 0x250   :  { %v1925_v16 = vpop.f32.mrf.mxu1  ;;  %v8470_v50 = vpop.f32.mrf.mxu0  ;;  %v5768_v17 = vpack.c.bf16 %v4758_v24, %v8157_v37 }
 0x251   :  { %v1950_v46 = vadd.f32 %v1925_v16, %v8373_v21 }
 0x252   :  { %v6197_v28 = vpop.f32.mrf.mxu1  ;;  %v8473_v18 = vpop.f32.mrf.mxu0  ;;  %6484 = vmatmul.mubr.msk.bf16.vlgmr.msra.gmra.mxu1 %vm953_vm1, %v8965_v8 }
 0x253   :  { %v2172_v6 = vadd.f32 %v6197_v28, %v8383_v30  ;;  %6487 = vmatprep.mubr.msk.bf16.mxu1 %vm953_vm1, %v8967_v59 }
 0x254   :  { %v2107_v58 = vpop.f32.mrf.mxu1  ;;  %v8485_v21 = vpop.f32.mrf.mxu0 }
 0x255   :  { %v2170_v35 = vadd.f32 %v2107_v58, %v8396_v49  ;;  %v8968_v49 = vpack.c.bf16 %v7813_v2, %v7798_v39  ;;  %v8969_v58 = vpack.c.bf16 %v7867_v32, %v7865_v11  ;;  %v8970_v39 = vpack.c.bf16 %v8916_v33, %v7840_v29  ;;  %v4766_v2 = vld [vmem:[#allocation5 + $0x111] sm:$0xff] }
 0x256   :  { %v6198_v7 = vpop.f32.mrf.mxu1  ;;  %v8489_v4 = vpop.f32.mrf.mxu0 }
 0x257   :  { %v2173_v40 = vadd.f32 %v6198_v7, %v8403_v45 }
 0x258   :  { %v2110_v41 = vpop.f32.mrf.mxu1  ;;  %v8498_v51 = vpop.f32.mrf.mxu0 }
 0x259   :  { %v2171_v30 = vadd.f32 %v2110_v41, %v8412_v53  ;;  %v8972_v41 = vld [vmem:[#allocation23_spill] sm:$0xff] }
 0x25a   :  { %v6201_v16 = vpop.f32.mrf.mxu1  ;;  %6488 = vmatmul.mubr.msk.bf16.gmra.mxu1 %vm953_vm1, %v5768_v17  ;;  %v8500_v59 = vpop.f32.mrf.mxu0 }
 0x25b   :  { %v2176_v20 = vadd.f32 %v6201_v16, %v8419_v3  ;;  %6491 = vmatprep.mubr.msk.bf16.mxu1 %vm953_vm1, %v8968_v49 }
 0x25c   :  { %v2123_v28 = vpop.f32.mrf.mxu1  ;;  %v8510_v7 = vpop.f32.mrf.mxu0 }
 0x25d   :  { %v2174_v37 = vadd.f32 %v2123_v28, %v1941_v54  ;;  %8971 = vst [vmem:[#allocation12_spill] sm:$0xff] %v8510_v7 }
 0x25e   :  { %v6202_v45 = vpop.f32.mrf.mxu1  ;;  %v8513_v28 = vpop.f32.mrf.mxu0 }
 0x25f   :  { %v2177_v8 = vadd.f32 %v6202_v45, %v1944_v13  ;;  %8973 = vst [vmem:[#allocation13_spill] sm:$0xff] %v8513_v28 }
 0x260   :  { %v2126_v44 = vpop.f32.mrf.mxu1  ;;  %v8516_v33 = vpop.f32.mrf.mxu0 }
 0x261   :  { %v2175_v53 = vadd.f32 %v2126_v44, %v1942_v62  ;;  %v5772_v62 = vpack.c.bf16 %v4766_v2, %v8972_v41  ;;  %8974 = vst [vmem:[#allocation14_spill] sm:$0xff] %v8516_v33  ;;  %v8976_v2 = vld [vmem:[#allocation22_spill] sm:$0xff]  ;;  %v8977_v41 = vld [vmem:[#allocation17_spill] sm:$0xff] }
 0x262   :  { %v6205_v24 = vpop.f32.mrf.mxu1  ;;  %6492 = vmatmul.mubr.msk.bf16.gmra.mxu1 %vm953_vm1, %v8969_v58 }
 0x263   :  { %v2180_v3 = vadd.f32 %v6205_v24, %v1947_v15  ;;  %6495 = vmatprep.mubr.msk.bf16.mxu1 %vm953_vm1, %v8970_v39 }
 0x264   :  { %v2139_v54 = vpop.f32.mrf.mxu1 }
 0x265   :  { %v2178_v13 = vadd.f32 %v2139_v54, %v1945_v0  ;;  %v8518_v0 = vpop.f32.mrf.mxu0 }
 0x266   :  { %v6206_v17 = vpop.f32.mrf.mxu1  ;;  %8975 = vst [vmem:[#allocation15_spill] sm:$0xff] %v8518_v0 }
 0x267   :  { %v2181_v16 = vadd.f32 %v6206_v17, %v1948_v27  ;;  %v2405_v27 = vadd.f32 %v8976_v2, %v2172_v6  ;;  %v8522_v28 = vpop.f32.mrf.mxu0 }
 0x268   :  { %v2142_v49 = vpop.f32.mrf.mxu1  ;;  %8978 = vst [vmem:[#allocation23_spill] sm:$0xff] %v8522_v28 }
 0x269   :  { %v2179_v32 = vadd.f32 %v2142_v49, %v1946_v63  ;;  %v2403_v63 = vadd.f32 %v8977_v41, %v2170_v35  ;;  %v8526_v7 = vpop.f32.mrf.mxu0 }
 0x26a   :  { %v6209_v11 = vpop.f32.mrf.mxu1  ;;  %6496 = vmatmul.mubr.msk.bf16.gmra.mxu1 %vm953_vm1, %v5772_v62  ;;  %v8979_v62 = vld [vmem:[#allocation16_spill] sm:$0xff]  ;;  %8981 = vst [vmem:[#allocation22_spill] sm:$0xff] %v8526_v7 }
 0x26b   :  { %v2184_v15 = vadd.f32 %v6209_v11, %v1951_v42  ;;  %v2406_v11 = vadd.f32 %v8979_v62, %v2173_v40  ;;  %v8530_v0 = vpop.f32.mrf.mxu0 }
 0x26c   :  { %v2155_v29 = vpop.f32.mrf.mxu1  ;;  %8984 = vst [vmem:[#allocation17_spill] sm:$0xff] %v8530_v0 }
 0x26d   :  { %v2182_v45 = vadd.f32 %v2155_v29, %v1949_v22  ;;  %v8980_v29 = vld [vmem:[#allocation19_spill] sm:$0xff]  ;;  %v8534_v28 = vpop.f32.mrf.mxu0 }
 0x26e   :  { %v6210_v44 = vpop.f32.mrf.mxu1  ;;  %8987 = vst [vmem:[#allocation16_spill] sm:$0xff] %v8534_v28 }
 0x26f   :  { %v2185_v24 = vadd.f32 %v6210_v44, %v1952_v23  ;;  %v2404_v23 = vadd.f32 %v8980_v29, %v2171_v30  ;;  %v8538_v7 = vpop.f32.mrf.mxu0 }
 0x270   :  { %v2158_v58 = vpop.f32.mrf.mxu1  ;;  %8990 = vst [vmem:[#allocation19_spill] sm:$0xff] %v8538_v7 }
 0x271   :  { %v2183_v39 = vadd.f32 %v2158_v58, %v1950_v46  ;;  %v8982_v58 = vld [vmem:[#allocation18_spill] sm:$0xff]  ;;  %v8542_v0 = vpop.f32.mrf.mxu0 }
 0x272   :  { %v6245_v54 = vpop.f32.mrf.mxu1  ;;  %v2409_v6 = vadd.f32 %v8982_v58, %v2176_v20 }
 0x273   :  { %v2638_v17 = vadd.f32 %v6245_v54, %v2405_v27  ;;  %v8983_v54 = vld [vmem:[#allocation21_spill] sm:$0xff]  ;;  %v8546_v28 = vpop.f32.mrf.mxu0 }
 0x274   :  { %v2573_v49 = vpop.f32.mrf.mxu1  ;;  %v2407_v35 = vadd.f32 %v8983_v54, %v2174_v37 }
 0x275   :  { %v2636_v42 = vadd.f32 %v2573_v49, %v2403_v63  ;;  %v8985_v49 = vld [vmem:[#allocation20_spill] sm:$0xff]  ;;  %v8550_v7 = vpop.f32.mrf.mxu0 }
 0x276   :  { %v6246_v33 = vpop.f32.mrf.mxu1  ;;  %v2410_v40 = vadd.f32 %v8985_v49, %v2177_v8 }
 0x277   :  { %v2639_v22 = vadd.f32 %v6246_v33, %v2406_v11  ;;  %v8986_v11 = vld [vmem:[#allocation7_spill] sm:$0xff] }
 0x278   :  { %v2576_v44 = vpop.f32.mrf.mxu1  ;;  %v2408_v30 = vadd.f32 %v8986_v11, %v2175_v53 }
 0x279   :  { %v2637_v46 = vadd.f32 %v2576_v44, %v2404_v23  ;;  %v8988_v44 = vld [vmem:[#allocation6_spill] sm:$0xff] }
 0x27a   :  { %v6249_v2 = vpop.f32.mrf.mxu1  ;;  %v2413_v20 = vadd.f32 %v8988_v44, %v2180_v3 }
 0x27b   :  { %v2642_v27 = vadd.f32 %v6249_v2, %v2409_v6  ;;  %v8989_v2 = vld [vmem:[#allocation9_spill] sm:$0xff] }
 0x27c   :  { %v2589_v41 = vpop.f32.mrf.mxu1  ;;  %v2411_v37 = vadd.f32 %v8989_v2, %v2178_v13 }
 0x27d   :  { %v2640_v63 = vadd.f32 %v2589_v41, %v2407_v35  ;;  %v8991_v41 = vld [vmem:[#allocation8_spill] sm:$0xff] }
 0x27e   :  { %v6250_v62 = vpop.f32.mrf.mxu1  ;;  %v2414_v8 = vadd.f32 %v8991_v41, %v2181_v16 }
 0x27f   :  { %v2643_v33 = vadd.f32 %v6250_v62, %v2410_v40  ;;  %v8992_v62 = vld [vmem:[#allocation11_spill] sm:$0xff] }
 0x280   :  { %v2592_v29 = vpop.f32.mrf.mxu1  ;;  %v2412_v53 = vadd.f32 %v8992_v62, %v2179_v32 }
 0x281   :  { %v2641_v23 = vadd.f32 %v2592_v29, %v2408_v30  ;;  %v8993_v29 = vld [vmem:[#allocation10_spill] sm:$0xff] }
 0x282   :  { %v6253_v58 = vpop.f32.mrf.mxu1  ;;  %v2417_v3 = vadd.f32 %v8993_v29, %v2184_v15 }
 0x283   :  { %v2646_v6 = vadd.f32 %v6253_v58, %v2413_v20  ;;  %v8994_v58 = vld [vmem:[#allocation24_spill] sm:$0xff] }
 0x284   :  { %v2605_v54 = vpop.f32.mrf.mxu1  ;;  %v2415_v13 = vadd.f32 %v8994_v58, %v2182_v45  ;;  %v2869_v45 = vadd.f32 %v8334_v60, %v2636_v42  ;;  %v8554_v58 = vpop.f32.mrf.mxu0  ;;  %v2873_v60 = vadd.f32 %v8356_v5, %v2640_v63 }
 0x285   :  { %v2644_v35 = vadd.f32 %v2605_v54, %v2411_v37  ;;  %v8995_v54 = vld [vmem:[#allocation25_spill] sm:$0xff] }
 0x286   :  { %v6254_v49 = vpop.f32.mrf.mxu1  ;;  %v2418_v16 = vadd.f32 %v8995_v54, %v2185_v24  ;;  %v2872_v24 = vadd.f32 %v8338_v10, %v2639_v22  ;;  %v2876_v10 = vadd.f32 %v8360_v19, %v2643_v33 }
 0x287   :  { %v2647_v40 = vadd.f32 %v6254_v49, %v2414_v8  ;;  %v8996_v49 = vld [vmem:[#allocation26_spill] sm:$0xff]  ;;  %v2877_v5 = vadd.f32 %v8389_v25, %v2644_v35 }
 0x288   :  { %v2608_v11 = vpop.f32.mrf.mxu1  ;;  %v2416_v32 = vadd.f32 %v8996_v49, %v2183_v39  ;;  %v2870_v39 = vadd.f32 %v8342_v34, %v2637_v46  ;;  %v2874_v34 = vadd.f32 %v8365_v38, %v2641_v23 }
 0x289   :  { %v2645_v30 = vadd.f32 %v2608_v11, %v2412_v53  ;;  %v8997_v11 = vld [vmem:[#allocation27_spill] sm:$0xff]  ;;  %v2880_v19 = vadd.f32 %v8398_v36, %v2647_v40 }
 0x28a   :  { %v6257_v44 = vpop.f32.mrf.mxu1  ;;  %v2871_v15 = vadd.f32 %v8997_v11, %v2638_v17  ;;  %v2875_v17 = vadd.f32 %v8347_v31, %v2642_v27  ;;  %v2879_v31 = vadd.f32 %v8375_v43, %v2646_v6 }
 0x28b   :  { %v2650_v20 = vadd.f32 %v6257_v44, %v2417_v3  ;;  %v2878_v38 = vadd.f32 %v8405_v57, %v2645_v30 }
 0x28c   :  { %v2621_v2 = vpop.f32.mrf.mxu1 }
 0x28d   :  { %v2648_v37 = vadd.f32 %v2621_v2, %v2415_v13  ;;  %v2883_v43 = vadd.f32 %v8414_v14, %v2650_v20 }
 0x28e   :  { %v6258_v41 = vpop.f32.mrf.mxu1 }
 0x28f   :  { %v2651_v8 = vadd.f32 %v6258_v41, %v2418_v16  ;;  %v8558_v41 = vpop.f32.mrf.mxu0  ;;  %v2881_v25 = vadd.f32 %v8425_v12, %v2648_v37 }
 0x290   :  { %v2624_v62 = vpop.f32.mrf.mxu1 }
 0x291   :  { %v2649_v53 = vadd.f32 %v2624_v62, %v2416_v32  ;;  %v8562_v11 = vpop.f32.mrf.mxu0  ;;  %v2884_v36 = vadd.f32 %v8429_v47, %v2651_v8 }
 0x292   :  { %v6293_v29 = vpop.f32.mrf.mxu1 }
 0x293   :  { %v3104_v3 = vadd.f32 %v6293_v29, %v2871_v15  ;;  %v2882_v57 = vadd.f32 %v8433_v1, %v2649_v53 }
 0x294   :  { %v3039_v44 = vpop.f32.mrf.mxu1 }
 0x295   :  { %v3102_v13 = vadd.f32 %v3039_v44, %v2869_v45  ;;  %v8566_v45 = vpop.f32.mrf.mxu0  ;;  %v3337_v14 = vadd.f32 %v8435_v55, %v3104_v3 }
 0x296   :  { %v6294_v2 = vpop.f32.mrf.mxu1  ;;  %8998 = vst [vmem:[#allocation18_spill] sm:$0xff] %v8566_v45 }
 0x297   :  { %v3105_v54 = vadd.f32 %v6294_v2, %v2872_v24  ;;  %v8570_v2 = vpop.f32.mrf.mxu0  ;;  %v3335_v12 = vadd.f32 %v8446_v52, %v3102_v13 }
 0x298   :  { %v3042_v16 = vpop.f32.mrf.mxu1  ;;  %8999 = vst [vmem:[#allocation21_spill] sm:$0xff] %v8570_v2 }
 0x299   :  { %v3103_v49 = vadd.f32 %v3042_v16, %v2870_v39  ;;  %v3338_v47 = vadd.f32 %v8449_v56, %v3105_v54 }
 0x29a   :  { %v6297_v32 = vpop.f32.mrf.mxu1 }
 0x29b   :  { %v3108_v62 = vadd.f32 %v6297_v32, %v2875_v17  ;;  %v8574_v17 = vpop.f32.mrf.mxu0  ;;  %v3336_v53 = vadd.f32 %v8453_v48, %v3103_v49 }
 0x29c   :  { %v3055_v42 = vpop.f32.mrf.mxu1  ;;  %9000 = vst [vmem:[#allocation20_spill] sm:$0xff] %v8574_v17 }
 0x29d   :  { %v3106_v15 = vadd.f32 %v3055_v42, %v2873_v60  ;;  %v8578_v42 = vpop.f32.mrf.mxu0  ;;  %v3341_v3 = vadd.f32 %v8456_v61, %v3108_v62 }
 0x29e   :  { %v6298_v22 = vpop.f32.mrf.mxu1  ;;  %9001 = vst [vmem:[#allocation7_spill] sm:$0xff] %v8578_v42 }
 0x29f   :  { %v3109_v29 = vadd.f32 %v6298_v22, %v2876_v10 }
 0x2a0   :  { %v3058_v46 = vpop.f32.mrf.mxu1 }
 0x2a1   :  { %v3107_v44 = vadd.f32 %v3058_v46, %v2874_v34  ;;  %v8582_v34 = vpop.f32.mrf.mxu0  ;;  %v3342_v54 = vadd.f32 %v8467_v26, %v3109_v29 }
 0x2a2   :  { %v6301_v27 = vpop.f32.mrf.mxu1 }
 0x2a3   :  { %v3112_v24 = vadd.f32 %v6301_v27, %v2879_v31  ;;  %v8588_v27 = vpop.f32.mrf.mxu0 }
 0x2a4   :  { %v3071_v63 = vpop.f32.mrf.mxu1 }
 0x2a5   :  { %v3110_v39 = vadd.f32 %v3071_v63, %v2877_v5  ;;  %v3345_v62 = vadd.f32 %v8473_v18, %v3112_v24 }
 0x2a6   :  { %v6302_v33 = vpop.f32.mrf.mxu1 }
 0x2a7   :  { %v3113_v16 = vadd.f32 %v6302_v33, %v2880_v19  ;;  %v8596_v19 = vpop.f32.mrf.mxu0  ;;  %v3339_v33 = vadd.f32 %v8464_v9, %v3106_v15 }
 0x2a8   :  { %v3074_v23 = vpop.f32.mrf.mxu1 }
 0x2a9   :  { %v3111_v32 = vadd.f32 %v3074_v23, %v2878_v38  ;;  %v8604_v23 = vpop.f32.mrf.mxu0  ;;  %v3346_v29 = vadd.f32 %v8489_v4, %v3113_v16  ;;  %v9005_v16 = vld [vmem:[#allocation13_spill] sm:$0xff] }
 0x2aa   :  { %v6305_v6 = vpop.f32.mrf.mxu1 }
 0x2ab   :  { %v3116_v60 = vadd.f32 %v6305_v6, %v2883_v43  ;;  %v3340_v43 = vadd.f32 %v8470_v50, %v3107_v44 }
 0x2ac   :  { %v3087_v35 = vpop.f32.mrf.mxu1 }
 0x2ad   :  { %v3114_v10 = vadd.f32 %v3087_v35, %v2881_v25  ;;  %v8612_v25 = vpop.f32.mrf.mxu0  ;;  %v3343_v35 = vadd.f32 %v8485_v21, %v3110_v39  ;;  %v3349_v24 = vadd.f32 %v8500_v59, %v3116_v60 }
 0x2ae   :  { %v6306_v40 = vpop.f32.mrf.mxu1 }
 0x2af   :  { %v3117_v22 = vadd.f32 %v6306_v40, %v2884_v36  ;;  %v8620_v40 = vpop.f32.mrf.mxu0 }
 0x2b0   :  { %v3090_v30 = vpop.f32.mrf.mxu1 }
 0x2b1   :  { %v3115_v46 = vadd.f32 %v3090_v30, %v2882_v57  ;;  %v3344_v57 = vadd.f32 %v8498_v51, %v3111_v32 }
 0x2b2   :  { %v6341_v20 = vpop.f32.mrf.mxu1 }
 0x2b3   :  { %v8585_v31 = vadd.f32 %v6341_v20, %v3337_v14  ;;  %v8628_v14 = vpop.f32.mrf.mxu0  ;;  %v9003_v20 = vld [vmem:[#allocation12_spill] sm:$0xff] }
 0x2b4   :  { %v3505_v37 = vpop.f32.mrf.mxu1 }
 0x2b5   :  { %v8590_v5 = vadd.f32 %v3505_v37, %v3335_v12  ;;  %v3347_v12 = vadd.f32 %v9003_v20, %v3114_v10 }
 0x2b6   :  { %v6342_v8 = vpop.f32.mrf.mxu1 }
 0x2b7   :  { %v8593_v1 = vadd.f32 %v6342_v8, %v3338_v47  ;;  %v8636_v47 = vpop.f32.mrf.mxu0  ;;  %v3350_v8 = vadd.f32 %v9005_v16, %v3117_v22 }
 0x2b8   :  { %v3508_v63 = vpop.f32.mrf.mxu1 }
 0x2b9   :  { %v8598_v55 = vadd.f32 %v3508_v63, %v3336_v53  ;;  %v9007_v53 = vld [vmem:[#allocation14_spill] sm:$0xff] }
 0x2ba   :  { %v6345_v52 = vpop.f32.mrf.mxu1  ;;  %v3348_v63 = vadd.f32 %v9007_v53, %v3115_v46 }
 0x2bb   :  { %v8601_v13 = vadd.f32 %v6345_v52, %v3341_v3  ;;  %v8644_v52 = vpop.f32.mrf.mxu0 }
 0x2bc   :  { %v3521_v38 = vpop.f32.mrf.mxu1  ;;  %9008 = vst [vmem:[#allocation11_spill] sm:$0xff] %v8644_v52 }
 0x2bd   :  { %v8606_v56 = vadd.f32 %v3521_v38, %v3339_v33  ;;  %v8648_v10 = vpop.f32.mrf.mxu0 }
 0x2be   :  { %v6346_v48 = vpop.f32.mrf.mxu1  ;;  %9010 = vst [vmem:[#allocation24_spill] sm:$0xff] %v8648_v10 }
 0x2bf   :  { %v8609_v49 = vadd.f32 %v6346_v48, %v3342_v54  ;;  %v8650_v48 = vpop.f32.mrf.mxu0 }
 0x2c0   :  { %v3524_v6 = vpop.f32.mrf.mxu1  ;;  %9011 = vst [vmem:[#allocation25_spill] sm:$0xff] %v8650_v48 }
 0x2c1   :  { %v8614_v61 = vadd.f32 %v3524_v6, %v3340_v43  ;;  %v8652_v6 = vpop.f32.mrf.mxu0 }
 0x2c2   :  { %v6349_v9 = vpop.f32.mrf.mxu1  ;;  %9012 = vst [vmem:[#allocation26_spill] sm:$0xff] %v8652_v6 }
 0x2c3   :  { %v8617_v15 = vadd.f32 %v6349_v9, %v3345_v62  ;;  %v8656_v46 = vpop.f32.mrf.mxu0 }
 0x2c4   :  { %v3537_v36 = vpop.f32.mrf.mxu1  ;;  %9013 = vst [vmem:[#allocation27_spill] sm:$0xff] %v8656_v46 }
 0x2c5   :  { %v8622_v26 = vadd.f32 %v3537_v36, %v3343_v35 }
 0x2c6   :  { %v6350_v50 = vpop.f32.mrf.mxu1 }
 0x2c7   :  { %v8625_v44 = vadd.f32 %v6350_v50, %v3346_v29  ;;  %v8662_v29 = vpop.f32.mrf.mxu0 }
 0x2c8   :  { %v3540_v30 = vpop.f32.mrf.mxu1  ;;  %9014 = vst [vmem:[#allocation12_spill] sm:$0xff] %v8662_v29 }
 0x2c9   :  { %v8630_v18 = vadd.f32 %v3540_v30, %v3344_v57  ;;  %v8668_v30 = vpop.f32.mrf.mxu0 }
 0x2ca   :  { %v6353_v21 = vpop.f32.mrf.mxu1  ;;  %9016 = vst [vmem:[#allocation14_spill] sm:$0xff] %v8668_v30 }
 0x2cb   :  { %v8633_v39 = vadd.f32 %v6353_v21, %v3349_v24  ;;  %v8674_v20 = vpop.f32.mrf.mxu0 }
 0x2cc   :  { %v3553_v37 = vpop.f32.mrf.mxu1  ;;  %9019 = vst [vmem:[#allocation30_spill] sm:$0xff] %v8674_v20 }
 0x2cd   :  { %9002 = vst [vmem:[#allocation6_spill] sm:$0xff] %v8633_v39  ;;  %v8638_v4 = vadd.f32 %v3553_v37, %v3347_v12  ;;  %v6461_v16 = vpop.f32.mrf.mxu0 }
 0x2ce   :  { %v6354_v51 = vpop.f32.mrf.mxu1 }
 0x2cf   :  { %9004 = vst [vmem:[#allocation9_spill] sm:$0xff] %v8638_v4  ;;  %v8641_v32 = vadd.f32 %v6354_v51, %v3350_v8  ;;  %v4672_v53 = vpop.f32.mrf.mxu0  ;;  %v9026_v4 = vld [vmem:[#allocation23_spill] sm:$0xff] }
 0x2d0   :  { %v3556_v3 = vpop.f32.mrf.mxu1 }
 0x2d1   :  { %9006 = vst [vmem:[#allocation8_spill] sm:$0xff] %v8641_v32  ;;  %v8646_v59 = vadd.f32 %v3556_v3, %v3348_v63  ;;  %v6462_v29 = vpop.f32.mrf.mxu0  ;;  %v9025_v32 = vld [vmem:[#allocation15_spill] sm:$0xff] }
 0x2d2   :  { %v6389_v60 = vpop.f32.mrf.mxu1 }
 0x2d3   :  { %9009 = vst [vmem:[#allocation10_spill] sm:$0xff] %v8646_v59  ;;  %v4675_v30 = vpop.f32.mrf.mxu0 }
 0x2d4   :  { %v3971_v33 = vpop.f32.mrf.mxu1 }
 0x2d5   :  { %v8684_v17 = vpop.f32.mrf.mxu0 }
 0x2d6   :  { %v6390_v38 = vpop.f32.mrf.mxu1 }
 0x2d8   :  { %v3974_v54 = vpop.f32.mrf.mxu1 }
 0x2da   :  { %v6393_v43 = vpop.f32.mrf.mxu1 }
 0x2dc   :  { %v3987_v22 = vpop.f32.mrf.mxu1 }
 0x2de   :  { %v6394_v62 = vpop.f32.mrf.mxu1 }
 0x2e0   :  { %v8654_v9 = vpop.f32.mrf.mxu1 }
 0x2e2   :  { %v8658_v35 = vpop.f32.mrf.mxu1 }
 0x2e4   :  { %v8660_v36 = vpop.f32.mrf.mxu1 }
 0x2e6   :  { %v8664_v50 = vpop.f32.mrf.mxu1 }
 0x2e8   :  { %v8666_v57 = vpop.f32.mrf.mxu1 }
 0x2e9   :  { %9015 = vst [vmem:[#allocation13_spill] sm:$0xff] %v8666_v57 }
 0x2ea   :  { %v8670_v24 = vpop.f32.mrf.mxu1 }
 0x2eb   :  { %9017 = vst [vmem:[#allocation28_spill] sm:$0xff] %v8670_v24  ;;  %v3801_v24 = vadd.f32 %v9026_v4, %v8590_v5  ;;  %v9030_v4 = vld [vmem:[#allocation16_spill] sm:$0xff] }
 0x2ec   :  { %v8672_v21 = vpop.f32.mrf.mxu1 }
 0x2ed   :  { %9018 = vst [vmem:[#allocation29_spill] sm:$0xff] %v8672_v21  ;;  %v3803_v21 = vadd.f32 %v9025_v32, %v8585_v31  ;;  %v4034_v39 = vadd.f32 %v3971_v33, %v3801_v24 }
 0x2ee   :  { %v8676_v12 = vpop.f32.mrf.mxu1 }
 0x2ef   :  { %9020 = vst [vmem:[#allocation31_spill] sm:$0xff] %v8676_v12  ;;  %v4036_v2 = vadd.f32 %v6389_v60, %v3803_v21  ;;  %v4268_v24 = vadd.f32 %v8588_v27, %v4034_v39 }
 0x2f0   :  { %v8678_v37 = vpop.f32.mrf.mxu1 }
 0x2f1   :  { %9021 = vst [vmem:[#allocation32_spill] sm:$0xff] %v8678_v37  ;;  %v8690_v37 = vpop.f32.mrf.mxu0  ;;  %v4270_v32 = vadd.f32 %v8582_v34, %v4036_v2 }
 0x2f2   :  { %v6437_v8 = vpop.f32.mrf.mxu1  ;;  %9024 = vst [vmem:[#allocation35_spill] sm:$0xff] %v8690_v37 }
 0x2f3   :  { %v8700_v45 = vpop.f32.mrf.mxu0  ;;  %v4504_v33 = vadd.f32 %v6437_v8, %v4270_v32 }
 0x2f4   :  { %v4439_v51 = vpop.f32.mrf.mxu1 }
 0x2f5   :  { %v8711_v5 = vpop.f32.mrf.mxu0  ;;  %v4737_v39 = vadd.f32 %v6461_v16, %v4504_v33 }
 0x2f6   :  { %v6438_v63 = vpop.f32.mrf.mxu1 }
 0x2f8   :  { %v4442_v3 = vpop.f32.mrf.mxu1 }
 0x2fa   :  { %v6441_v46 = vpop.f32.mrf.mxu1 }
 0x2fc   :  { %v4455_v42 = vpop.f32.mrf.mxu1 }
 0x2fe   :  { %v8680_v59 = vpop.f32.mrf.mxu1 }
 0x300   :  { %v8682_v6 = vpop.f32.mrf.mxu1 }
 0x302   :  { %v8686_v20 = vpop.f32.mrf.mxu1 }
 0x303   :  { %9022 = vst [vmem:[#allocation33_spill] sm:$0xff] %v8686_v20  ;;  %v9028_v20 = vld [vmem:[#allocation22_spill] sm:$0xff] }
 0x304   :  { %v8688_v12 = vpop.f32.mrf.mxu1  ;;  %v3804_v57 = vadd.f32 %v9028_v20, %v8593_v1  ;;  %v9031_v1 = vld [vmem:[#allocation19_spill] sm:$0xff] }
 0x305   :  { %9023 = vst [vmem:[#allocation34_spill] sm:$0xff] %v8688_v12  ;;  %v9029_v12 = vld [vmem:[#allocation17_spill] sm:$0xff]  ;;  %v3805_v20 = vadd.f32 %v9031_v1, %v8606_v56  ;;  %v3806_v56 = vadd.f32 %v8546_v28, %v8614_v61  ;;  %v9033_v1 = vld [vmem:[#allocation35_spill] sm:$0xff] }
 0x306   :  { %v8694_v48 = vpop.f32.mrf.mxu1  ;;  %v3802_v37 = vadd.f32 %v9029_v12, %v8598_v55  ;;  %v4037_v31 = vadd.f32 %v6390_v38, %v3804_v57  ;;  %v4502_v38 = vadd.f32 %v4439_v51, %v4268_v24 }
 0x307   :  { %v4038_v34 = vadd.f32 %v3987_v22, %v3805_v20 }
 0x308   :  { %v8698_v10 = vpop.f32.mrf.mxu1  ;;  %v4035_v60 = vadd.f32 %v3974_v54, %v3802_v37  ;;  %v4271_v2 = vadd.f32 %v8596_v19, %v4037_v31  ;;  %v3808_v54 = vadd.f32 %v8542_v0, %v8609_v49  ;;  %v4735_v51 = vadd.f32 %v4672_v53, %v4502_v38 }
 0x309   :  { %9027 = vst [vmem:[#allocation15_spill] sm:$0xff] %v8698_v10  ;;  %v3807_v10 = vadd.f32 %v9030_v4, %v8601_v13  ;;  %v8726_v13 = vpop.f32.mrf.mxu0  ;;  %v4039_v0 = vadd.f32 %v8654_v9, %v3806_v56  ;;  %v4272_v49 = vadd.f32 %v8620_v40, %v4038_v34  ;;  %v3809_v53 = vadd.f32 %v8554_v58, %v8622_v26  ;;  %v9037_v34 = vld [vmem:[#allocation24_spill] sm:$0xff] }
 0x30a   :  { %v8706_v52 = vpop.f32.mrf.mxu1  ;;  %v4269_v57 = vadd.f32 %v8604_v23, %v4035_v60  ;;  %v4505_v27 = vadd.f32 %v6438_v63, %v4271_v2  ;;  %v4041_v8 = vadd.f32 %v6394_v62, %v3808_v54  ;;  %v3811_v23 = vadd.f32 %v8550_v7, %v8617_v15  ;;  %v9036_v2 = vld [vmem:[#allocation18_spill] sm:$0xff]  ;;  %v9039_v56 = vld [vmem:[#allocation28_spill] sm:$0xff] }
 0x30b   :  { %v4040_v12 = vadd.f32 %v6393_v43, %v3807_v10  ;;  %v8737_v16 = vpop.f32.mrf.mxu0  ;;  %v4506_v15 = vadd.f32 %v4455_v42, %v4272_v49  ;;  %v4273_v60 = vadd.f32 %v8636_v47, %v4039_v0  ;;  %v9042_v0 = vld [vmem:[#allocation25_spill] sm:$0xff] }
 0x30c   :  { %v8709_v21 = vpop.f32.mrf.mxu1  ;;  %v4503_v10 = vadd.f32 %v4442_v3, %v4269_v57  ;;  %v4738_v3 = vadd.f32 %v6462_v29, %v4505_v27  ;;  %v4275_v9 = vadd.f32 %v8628_v14, %v4041_v8  ;;  %v3812_v29 = vadd.f32 %v8558_v41, %v8625_v44  ;;  %v9032_v44 = vld [vmem:[#allocation11_spill] sm:$0xff]  ;;  %v9038_v57 = vld [vmem:[#allocation33_spill] sm:$0xff] }
 0x30d   :  { %v4274_v19 = vadd.f32 %v8612_v25, %v4040_v12  ;;  %v4044_v25 = vadd.f32 %v8658_v35, %v3811_v23  ;;  %v6470_v26 = vpop.f32.mrf.mxu0  ;;  %v4507_v41 = vadd.f32 %v8682_v6, %v4273_v60  ;;  %v4739_v20 = vadd.f32 %v9033_v1, %v4506_v15  ;;  %v9034_v12 = vld [vmem:[#allocation13_spill] sm:$0xff] }
 0x30e   :  { %v8718_v55 = vpop.f32.mrf.mxu1  ;;  %v4736_v7 = vadd.f32 %v4675_v30, %v4503_v10  ;;  %v4509_v35 = vadd.f32 %v8680_v59, %v4275_v9  ;;  %v4045_v4 = vadd.f32 %v8664_v50, %v3812_v29 }
 0x30f   :  { %v4508_v62 = vadd.f32 %v6441_v46, %v4274_v19  ;;  %v4042_v46 = vadd.f32 %v8660_v36, %v3809_v53  ;;  %v3810_v36 = vadd.f32 %v8562_v11, %v8630_v18  ;;  %v4278_v59 = vadd.f32 %v9032_v44, %v4044_v25  ;;  %v4707_v6 = vpop.f32.mrf.mxu0  ;;  %v9041_v19 = vld [vmem:[#allocation21_spill] sm:$0xff] }
 0x310   :  { %v8724_v37 = vpop.f32.mrf.mxu1  ;;  %v4742_v18 = vadd.f32 %v8700_v45, %v4509_v35  ;;  %v4279_v23 = vadd.f32 %v9042_v0, %v4045_v4  ;;  %v9044_v53 = vld [vmem:[#allocation29_spill] sm:$0xff]  ;;  %v9049_v4 = vld [vmem:[#allocation10_spill] sm:$0xff]  ;;  %v9051_v44 = vld [vmem:[#allocation15_spill] sm:$0xff] }
 0x311   :  { %v4741_v30 = vadd.f32 %v8684_v17, %v4508_v62  ;;  %v4043_v38 = vadd.f32 %v9034_v12, %v3810_v36  ;;  %v9035_v17 = vld [vmem:[#allocation6_spill] sm:$0xff]  ;;  %v4276_v54 = vadd.f32 %v9037_v34, %v4042_v46  ;;  %v4512_v27 = vadd.f32 %v9038_v57, %v4278_v59  ;;  %v9050_v36 = vld [vmem:[#allocation7_spill] sm:$0xff]  ;;  %v9054_v34 = vld [vmem:[#allocation12_spill] sm:$0xff] }
 0x312   :  { %v6485_v43 = vpop.f32.mrf.mxu1  ;;  %v3815_v50 = vadd.f32 %v9036_v2, %v9035_v17  ;;  %v9043_v62 = vld [vmem:[#allocation34_spill] sm:$0xff] }
 0x313   :  { %v8731_v22 = vadd.f32 %v6485_v43, %v4737_v39  ;;  %v9040_v43 = vld [vmem:[#allocation9_spill] sm:$0xff]  ;;  %v4510_v45 = vadd.f32 %v9043_v62, %v4276_v54  ;;  %v9047_v46 = vld [vmem:[#allocation26_spill] sm:$0xff] }
 0x314   :  { %v4905_v63 = vpop.f32.mrf.mxu1  ;;  %v4048_v10 = vadd.f32 %v9039_v56, %v3815_v50  ;;  %v4277_v29 = vadd.f32 %v9047_v46, %v4043_v38 }
 0x315   :  { %v5615_v28 = vmul.f32 -1.442695, %v8731_v22  ;;  %v8740_v61 = vadd.f32 %v4905_v63, %v4735_v51  ;;  %v3813_v51 = vadd.f32 %v9041_v19, %v9040_v43  ;;  %v4740_v63 = vadd.f32 %v8711_v5, %v4507_v41  ;;  %v9055_v43 = vld [vmem:[#allocation14_spill] sm:$0xff] }
 0x316   :  { %v6486_v31 = vpop.f32.mrf.mxu1  ;;  %v3814_v41 = vadd.f32 %v9050_v36, %v9049_v4  ;;  %v4511_v59 = vadd.f32 %v9051_v44, %v4277_v29  ;;  %v4743_v38 = vadd.f32 %v8737_v16, %v4510_v45  ;;  %v9056_v45 = vld [vmem:[#allocation30_spill] sm:$0xff] }
 0x317   :  { %6825 = vpow2.f32 %v5615_v28  ;;  %v5613_v40 = vmul.f32 -1.442695, %v8740_v61  ;;  %v8747_v32 = vadd.f32 %v6486_v31, %v4738_v3  ;;  %v6473_v28 = vpop.f32.mrf.mxu0  ;;  %v4046_v9 = vadd.f32 %v9044_v53, %v3813_v51  ;;  %v9045_v31 = vld [vmem:[#allocation8_spill] sm:$0xff] }
 0x318   :  { %v4908_v58 = vpop.f32.mrf.mxu1  ;;  %v4744_v51 = vadd.f32 %v4707_v6, %v4511_v59 }
 0x319   :  { %6827 = vpow2.f32 %v5613_v40  ;;  %v5616_v14 = vmul.f32 -1.442695, %v8747_v32  ;;  %v8755_v42 = vadd.f32 %v4908_v58, %v4736_v7  ;;  %v9046_v7 = vld [vmem:[#allocation20_spill] sm:$0xff]  ;;  %v4513_v40 = vadd.f32 %v8694_v48, %v4279_v23  ;;  %v4720_v1 = vpop.f32.mrf.mxu0 }
 0x31a   :  { %v6489_v33 = vpop.f32.mrf.mxu1  ;;  %v3816_v15 = vadd.f32 %v9046_v7, %v9045_v31  ;;  %v4745_v58 = vadd.f32 %v8726_v13, %v4512_v27  ;;  %v9053_v13 = vld [vmem:[#allocation32_spill] sm:$0xff]  ;;  %v4280_v54 = vadd.f32 %v9054_v34, %v4046_v9 }
 0x31b   :  { %6829 = vpow2.f32 %v5616_v14  ;;  %v5614_v47 = vmul.f32 -1.442695, %v8755_v42  ;;  %v8764_v24 = vadd.f32 %v6489_v33, %v4741_v30  ;;  %v9048_v14 = vld [vmem:[#allocation31_spill] sm:$0xff]  ;;  %v4047_v2 = vadd.f32 %v9053_v13, %v3814_v41  ;;  %v6474_v0 = vpop.f32.mrf.mxu0 }
 0x31c   :  { %v4921_v11 = vpop.f32.mrf.mxu1  ;;  %v4049_v30 = vadd.f32 %v9048_v14, %v3816_v15  ;;  %v9052_v33 = vld [vmem:[#allocation27_spill] sm:$0xff] }
 0x31d   :  { %6831 = vpow2.f32 %v5614_v47  ;;  %v5619_v39 = vmul.f32 -1.442695, %v8764_v24  ;;  %v8774_v8 = vadd.f32 %v4921_v11, %v4739_v20  ;;  %v4282_v47 = vadd.f32 %v9052_v33, %v4048_v10  ;;  %v4723_v46 = vpop.f32.mrf.mxu0 }
 0x31e   :  { %v6490_v49 = vpop.f32.mrf.mxu1  ;;  %v4514_v10 = vadd.f32 %v8709_v21, %v4280_v54  ;;  %v4283_v16 = vadd.f32 %v9055_v43, %v4049_v30 }
 0x31f   :  { %6833 = vpow2.f32 %v5619_v39  ;;  %v5617_v3 = vmul.f32 -1.442695, %v8774_v8  ;;  %v8783_v25 = vadd.f32 %v6490_v49, %v4742_v18  ;;  %v4516_v50 = vadd.f32 %v8706_v52, %v4282_v47 }
 0x320   :  { %v4924_v35 = vpop.f32.mrf.mxu1  ;;  %v4746_v18 = vadd.f32 %v6470_v26, %v4513_v40  ;;  %v4517_v62 = vadd.f32 %v8718_v55, %v4283_v16  ;;  %v4747_v7 = vadd.f32 %v4720_v1, %v4514_v10 }
 0x321   :  { %6835 = vpow2.f32 %v5617_v3  ;;  %v5620_v5 = vmul.f32 -1.442695, %v8783_v25  ;;  %v8791_v60 = vadd.f32 %v4924_v35, %v4740_v63  ;;  %v4749_v63 = vadd.f32 %v6473_v28, %v4516_v50 }
 0x322   :  { %v6493_v48 = vpop.f32.mrf.mxu1  ;;  %v4281_v3 = vadd.f32 %v9056_v45, %v4047_v2 }
 0x323   :  { %6837 = vpow2.f32 %v5620_v5  ;;  %v5618_v20 = vmul.f32 -1.442695, %v8791_v60  ;;  %v8800_v12 = vadd.f32 %v6493_v48, %v4745_v58  ;;  %v4750_v5 = vadd.f32 %v6474_v0, %v4517_v62 }
 0x324   :  { %v6826_v17 = vpop.eup %6825  ;;  %v4937_v11 = vpop.f32.mrf.mxu1  ;;  %v4515_v15 = vadd.f32 %v8724_v37, %v4281_v3 }
 0x325   :  { %v5034_v57 = vadd.f32 1.0, %v6826_v17  ;;  %6839 = vpow2.f32 %v5618_v20  ;;  %v5623_v27 = vmul.f32 -1.442695, %v8800_v12  ;;  %v8807_v39 = vadd.f32 %v4937_v11, %v4743_v38 }
 0x326   :  { %v6828_v56 = vpop.eup %6827  ;;  %v6494_v19 = vpop.f32.mrf.mxu1  ;;  %v4748_v36 = vadd.f32 %v4723_v46, %v4515_v15 }
 0x327   :  { %6841 = vrcp.f32 %v5034_v57  ;;  %v5032_v52 = vadd.f32 1.0, %v6828_v56  ;;  %v5621_v23 = vmul.f32 -1.442695, %v8807_v39  ;;  %v8812_v49 = vadd.f32 %v6494_v19, %v4746_v18 }
 0x328   :  { %v6830_v26 = vpop.eup %6829  ;;  %6843 = vpow2.f32 %v5623_v27  ;;  %v4940_v53 = vpop.f32.mrf.mxu1 }
 0x329   :  { %6845 = vrcp.f32 %v5032_v52  ;;  %v5035_v21 = vadd.f32 1.0, %v6830_v26  ;;  %v5624_v9 = vmul.f32 -1.442695, %v8812_v49  ;;  %v8817_v6 = vadd.f32 %v4940_v53, %v4744_v51 }
 0x32a   :  { %v6832_v31 = vpop.eup %6831  ;;  %6847 = vpow2.f32 %v5621_v23  ;;  %v6497_v40 = vpop.f32.mrf.mxu1 }
 0x32b   :  { %6849 = vrcp.f32 %v5035_v21  ;;  %v5033_v28 = vadd.f32 1.0, %v6832_v31  ;;  %v5622_v55 = vmul.f32 -1.442695, %v8817_v6  ;;  %v8821_v29 = vadd.f32 %v6497_v40, %v4749_v63 }
 0x32c   :  { %v6834_v35 = vpop.eup %6833  ;;  %6851 = vpow2.f32 %v5624_v9  ;;  %v4953_v58 = vpop.f32.mrf.mxu1 }
 0x32d   :  { %6853 = vrcp.f32 %v5033_v28  ;;  %v5038_v14 = vadd.f32 1.0, %v6834_v35  ;;  %v5627_v30 = vmul.f32 -1.442695, %v8821_v29  ;;  %v8824_v4 = vadd.f32 %v4953_v58, %v4747_v7 }
 0x32e   :  { %v6836_v37 = vpop.eup %6835  ;;  %6855 = vpow2.f32 %v5622_v55  ;;  %v6498_v41 = vpop.f32.mrf.mxu1 }
 0x32f   :  { %6857 = vrcp.f32 %v5038_v14  ;;  %v5036_v44 = vadd.f32 1.0, %v6836_v37  ;;  %v5625_v59 = vmul.f32 -1.442695, %v8824_v4  ;;  %v8827_v33 = vadd.f32 %v6498_v41, %v4750_v5 }
 0x330   :  { %v6838_v47 = vpop.eup %6837  ;;  %6859 = vpow2.f32 %v5627_v30  ;;  %v4956_v48 = vpop.f32.mrf.mxu1 }
 0x331   :  { %6861 = vrcp.f32 %v5036_v44  ;;  %v5039_v1 = vadd.f32 1.0, %v6838_v47  ;;  %v5628_v20 = vmul.f32 -1.442695, %v8827_v33  ;;  %v8830_v38 = vadd.f32 %v4956_v48, %v4748_v36 }
 0x332   :  { %v6840_v17 = vpop.eup %6839  ;;  %6863 = vpow2.f32 %v5625_v59 }
 0x333   :  { %6865 = vrcp.f32 %v5039_v1  ;;  %v5037_v13 = vadd.f32 1.0, %v6840_v17  ;;  %v5626_v2 = vmul.f32 -1.442695, %v8830_v38 }
 0x334   :  { %v6842_v50 = vpop.eup %6841  ;;  %6867 = vpow2.f32 %v5628_v20 }
 0x335   :  { %v6844_v34 = vpop.eup %6843  ;;  %6869 = vrcp.f32 %v5037_v13  ;;  %v5082_v10 = vmul.f32 %v6842_v50, %v8731_v22 }
 0x336   :  { %v6846_v54 = vpop.eup %6845  ;;  %v5042_v11 = vadd.f32 1.0, %v6844_v34  ;;  %6871 = vpow2.f32 %v5626_v2 }
 0x337   :  { %v6848_v18 = vpop.eup %6847  ;;  %v5080_v0 = vmul.f32 %v6846_v54, %v8740_v61 }
 0x338   :  { %v6850_v57 = vpop.eup %6849  ;;  %v5040_v27 = vadd.f32 1.0, %v6848_v18  ;;  %6873 = vrcp.f32 %v5042_v11 }
 0x339   :  { %v6852_v56 = vpop.eup %6851  ;;  %v5083_v43 = vmul.f32 %v6850_v57, %v8747_v32 }
 0x33a   :  { %v6854_v16 = vpop.eup %6853  ;;  %v5043_v19 = vadd.f32 1.0, %v6852_v56  ;;  %6875 = vrcp.f32 %v5040_v27 }
 0x33b   :  { %v6856_v51 = vpop.eup %6855  ;;  %v5797_v52 = vpack.c.bf16 %v5083_v43, %v5082_v10  ;;  %v5081_v23 = vmul.f32 %v6854_v16, %v8755_v42 }
 0x33c   :  { %v6858_v26 = vpop.eup %6857  ;;  %6877 = vrcp.f32 %v5043_v19  ;;  %v5041_v63 = vadd.f32 1.0, %v6856_v51 }
 0x33d   :  { %v6860_v62 = vpop.eup %6859  ;;  %5829 = vst [vmem:[%s8876_s3 + $0x8] sm:$0xff] %v5797_v52   ;;  %v5792_v22 = vpack.c.bf16 %v5081_v23, %v5080_v0  ;;  %v5086_v21 = vmul.f32 %v6858_v26, %v8764_v24 }
 0x33e   :  { %v6862_v32 = vpop.eup %6861  ;;  %6879 = vrcp.f32 %v5041_v63  ;;  %v5046_v45 = vadd.f32 1.0, %v6860_v62 }
 0x33f   :  { %v6864_v3 = vpop.eup %6863  ;;  %5793 = vst [vmem:[%s8876_s3] sm:$0xff] %v5792_v22   ;;  %v5084_v40 = vmul.f32 %v6862_v32, %v8774_v8 }
 0x340   :  { %v6866_v61 = vpop.eup %6865  ;;  %v5044_v42 = vadd.f32 1.0, %v6864_v3  ;;  %6881 = vrcp.f32 %v5046_v45 }
 0x341   :  { %v6868_v53 = vpop.eup %6867  ;;  %v5087_v9 = vmul.f32 %v6866_v61, %v8783_v25 }
 0x342   :  { %v6870_v31 = vpop.eup %6869  ;;  %v5047_v7 = vadd.f32 1.0, %v6868_v53  ;;  %6883 = vrcp.f32 %v5044_v42 }
 0x343   :  { %v6872_v15 = vpop.eup %6871  ;;  %v5807_v46 = vpack.c.bf16 %v5087_v9, %v5086_v21  ;;  %v5085_v28 = vmul.f32 %v6870_v31, %v8791_v60 }
 0x344   :  { %6885 = vrcp.f32 %v5047_v7  ;;  %v5045_v55 = vadd.f32 1.0, %v6872_v15 }
 0x345   :  { %5831 = vst [vmem:[%s8876_s3 + $0x18] sm:$0xff] %v5807_v46   ;;  %v5802_v35 = vpack.c.bf16 %v5085_v28, %v5084_v40  ;;  %v6874_v24 = vpop.eup %6873 }
 0x346   :  { %6887 = vrcp.f32 %v5045_v55  ;;  %v5090_v8 = vmul.f32 %v6874_v24, %v8800_v12 }
 0x347   :  { %5830 = vst [vmem:[%s8876_s3 + $0x10] sm:$0xff] %v5802_v35   ;;  %v6876_v25 = vpop.eup %6875 }
 0x348   :  { %v5088_v14 = vmul.f32 %v6876_v25, %v8807_v39 }
 0x349   :  { %v6878_v5 = vpop.eup %6877 }
 0x34a   :  { %v5091_v60 = vmul.f32 %v6878_v5, %v8812_v49 }
 0x34b   :  { %v6880_v58 = vpop.eup %6879 }
 0x34c   :  { %v5817_v30 = vpack.c.bf16 %v5091_v60, %v5090_v8  ;;  %v5089_v37 = vmul.f32 %v6880_v58, %v8817_v6 }
 0x34d   :  { %v6882_v41 = vpop.eup %6881 }
 0x34e   :  { %5833 = vst [vmem:[%s8876_s3 + $0x28] sm:$0xff] %v5817_v30   ;;  %v5812_v36 = vpack.c.bf16 %v5089_v37, %v5088_v14  ;;  %v5094_v49 = vmul.f32 %v6882_v41, %v8821_v29 }
 0x34f   :  { %v6884_v44 = vpop.eup %6883 }
 0x350   :  { %5832 = vst [vmem:[%s8876_s3 + $0x20] sm:$0xff] %v5812_v36   ;;  %v5092_v47 = vmul.f32 %v6884_v44, %v8824_v4 }
 0x351   :  { %v6886_v12 = vpop.eup %6885 }
 0x352   :  { %v5095_v59 = vmul.f32 %v6886_v12, %v8827_v33 }
 0x353   :  { %v6888_v39 = vpop.eup %6887 }
 0x354   :  { %v5827_v6 = vpack.c.bf16 %v5095_v59, %v5094_v49  ;;  %v5093_v48 = vmul.f32 %v6888_v39, %v8830_v38 }
 0x356   :  { %5835 = vst [vmem:[%s8876_s3 + $0x38] sm:$0xff] %v5827_v6   ;;  %v5822_v1 = vpack.c.bf16 %v5093_v48, %v5092_v47 }
 0x358   :  { %5834 = vst [vmem:[%s8876_s3 + $0x30] sm:$0xff] %v5822_v1  }

// kernel: mhd_joint_processor_forward.7
= control target key start
LH: loop header
LB: loop body
LE: loop exit
PB: predicated region body
PF: predicated region fallthrough
CT: control target
= control target key end

     0   :  { %v1330_v28 = vlaneseq  ;;  %v10109_v36 = vmov 1966171168   ;;  %s12380_s0 = inlined_call_operand.vmem [shape: bf16[2,8192], index: 0, kind: input, shape index: {}]   ;;  %s12381_s1 = inlined_call_operand.vmem [shape: bf16[2,2048], index: 1, kind: input, shape index: {}]   ;;  %s12382_s2 = inlined_call_operand.vmem [shape: bf16[2,512], index: 2, kind: input, shape index: {}]   ;;  %s12383_s3 = inlined_call_operand.vmem [shape: bf16[2,10], index: 3, kind: input, shape index: {}]   ;;  %s12384_s4 = inlined_call_operand.vmem [shape: bf16[8192,64], index: 4, kind: input, shape index: {}]   ;;  %s12385_s5 = inlined_call_operand.vmem [shape: bf16[2048,64], index: 5, kind: input, shape index: {}]   ;;  %s12386_s6 = inlined_call_operand.vmem [shape: bf16[512,64], index: 6, kind: input, shape index: {}]   ;;  %s12387_s7 = inlined_call_operand.vmem [shape: bf16[10,64], index: 7, kind: input, shape index: {}]   ;;  %s12388_s8 = inlined_call_operand.vmem [shape: f32[1,64], index: 8, kind: input, shape index: {}]   ;;  %s12389_s9 = inlined_call_operand.hbm [shape: f32[2,64], index: 9, kind: output, shape index: {}]  }
   0x1   :  { %v9404_v0 = vld [vmem:[%s12385_s5 + $0x78] sm:$0xff]   ;;  %v9408_v4 = vld [vmem:[%s12385_s5 + $0x70] sm:$0xff]   ;;  %v9412_v8 = vld [vmem:[%s12385_s5 + $0x68] sm:$0xff]   ;;  %v1328_v37 = vunpack.c.l.s4 %v10109_v36 }
   0x2   :  { %v9405_v1 = vld [vmem:[%s12385_s5 + $0xf8] sm:$0xff]   ;;  %8468 = vmatprep.subr.bf16.mxu0 %v9404_v0  ;;  %v9409_v5 = vld [vmem:[%s12385_s5 + $0xf0] sm:$0xff]   ;;  %v9413_v9 = vld [vmem:[%s12385_s5 + $0xe8] sm:$0xff]   ;;  %v1331_v33 = vshrl.u32 %v1330_v28, 7 }
   0x3   :  { %v9406_v2 = vld [vmem:[%s12385_s5 + $0x38] sm:$0xff]   ;;  %8490 = vmatprep.subr.bf16.mxu1 %v9405_v1  ;;  %v9410_v6 = vld [vmem:[%s12385_s5 + $0x30] sm:$0xff]   ;;  %v9414_v10 = vld [vmem:[%s12385_s5 + $0x28] sm:$0xff]   ;;  %v1329_v40 = vunpack.c.0.s8 %v1328_v37 }
   0x4   :  { %v9407_v3 = vld [vmem:[%s12385_s5 + $0xb8] sm:$0xff]   ;;  %8469 = vmatpush3.bf16.msra.mxu0 %v9406_v2  ;;  %v9411_v7 = vld [vmem:[%s12385_s5 + $0xb0] sm:$0xff]   ;;  %v9415_v11 = vld [vmem:[%s12385_s5 + $0xa8] sm:$0xff]  }
   0x5   :  { %8491 = vmatpush3.bf16.msra.mxu1 %v9407_v3  ;;  %8470 = vmatprep.subr.bf16.mxu0 %v9408_v4  ;;  %v9416_v12 = vld [vmem:[%s12385_s5 + $0x60] sm:$0xff]   ;;  %v9420_v16 = vld [vmem:[%s12385_s5 + $0x58] sm:$0xff]   ;;  %v9424_v20 = vld [vmem:[%s12385_s5 + $0x50] sm:$0xff]   ;;  %v10268_v41 = vsub.s32 %v1329_v40, %v1331_v33 }
   0x6   :  { %8492 = vmatprep.subr.bf16.mxu1 %v9409_v5  ;;  %v9417_v13 = vld [vmem:[%s12385_s5 + $0xe0] sm:$0xff]   ;;  %v9421_v17 = vld [vmem:[%s12385_s5 + $0xd8] sm:$0xff]   ;;  %v9425_v21 = vld [vmem:[%s12385_s5 + $0xd0] sm:$0xff]  }
   0x7   :  { %v9418_v14 = vld [vmem:[%s12385_s5 + $0x20] sm:$0xff]   ;;  %v9422_v18 = vld [vmem:[%s12385_s5 + $0x18] sm:$0xff]   ;;  %v9426_v22 = vld [vmem:[%s12385_s5 + $0x10] sm:$0xff]  }
   0x8   :  { %8471 = vmatpush3.bf16.msra.mxu0 %v9410_v6  ;;  %v9419_v15 = vld [vmem:[%s12385_s5 + $0xa0] sm:$0xff]   ;;  %v9423_v19 = vld [vmem:[%s12385_s5 + $0x98] sm:$0xff]   ;;  %v9427_v23 = vld [vmem:[%s12385_s5 + $0x90] sm:$0xff]  }
   0x9   :  { %8493 = vmatpush3.bf16.msra.mxu1 %v9411_v7  ;;  %8472 = vmatprep.subr.bf16.mxu0 %v9412_v8  ;;  %v9428_v24 = vld [vmem:[%s12385_s5 + $0x48] sm:$0xff]   ;;  %v9432_v29 = vld [vmem:[%s12385_s5 + $0x40] sm:$0xff]   ;;  %v9437_v35 = vld [vmem:[%s12385_s5 + $0x178] sm:$0xff]  }
   0xa   :  { %8494 = vmatprep.subr.bf16.mxu1 %v9413_v9  ;;  %v9429_v25 = vld [vmem:[%s12385_s5 + $0xc8] sm:$0xff]   ;;  %v9433_v30 = vld [vmem:[%s12385_s5 + $0xc0] sm:$0xff]   ;;  %v9438_v38 = vld [vmem:[%s12385_s5 + $0x1f8] sm:$0xff]  }
   0xb   :  { %v9430_v26 = vld [vmem:[%s12385_s5 + $0x8] sm:$0xff]   ;;  %v9434_v31 = vld [vmem:[%s12385_s5] sm:$0xff]   ;;  %v9439_v47 = vld [vmem:[%s12385_s5 + $0x138] sm:$0xff]  }
   0xc   :  { %8473 = vmatpush3.bf16.msra.mxu0 %v9414_v10  ;;  %v9431_v27 = vld [vmem:[%s12385_s5 + $0x88] sm:$0xff]   ;;  %v9435_v32 = vld [vmem:[%s12385_s5 + $0x80] sm:$0xff]   ;;  %v9440_v49 = vld [vmem:[%s12385_s5 + $0x1b8] sm:$0xff]  }
   0xd   :  { %8495 = vmatpush3.bf16.msra.mxu1 %v9415_v11  ;;  %8474 = vmatprep.subr.bf16.mxu0 %v9416_v12  ;;  %v1066_v34 = vld [vmem:[%s12381_s1] sm:$0xff]  ;;  %v9441_v52 = vld [vmem:[%s12385_s5 + $0x170] sm:$0xff]   ;;  %v9445_v58 = vld [vmem:[%s12385_s5 + $0x168] sm:$0xff]  }
   0xe   :  { %8496 = vmatprep.subr.bf16.mxu1 %v9417_v13  ;;  %v1326_v39 = vcombine.high %v1066_v34, %v1066_v34  ;;  %v1333_v42 = vrot.slane %v1066_v34, %v10268_v41  ;;  %v9442_v54 = vld [vmem:[%s12385_s5 + $0x1f0] sm:$0xff]   ;;  %v9446_v59 = vld [vmem:[%s12385_s5 + $0x1e8] sm:$0xff]   ;;  %v9449_v62 = vld [vmem:[%s12385_s5 + $0x160] sm:$0xff]  }
   0xf   :  { %v9443_v55 = vld [vmem:[%s12385_s5 + $0x130] sm:$0xff]   ;;  %v9447_v60 = vld [vmem:[%s12385_s5 + $0x128] sm:$0xff]   ;;  %v9450_v63 = vld [vmem:[%s12385_s5 + $0x1e0] sm:$0xff]  }
  0x10   :  { %8475 = vmatpush3.bf16.msra.mxu0 %v9418_v14  ;;  %v10272_v43 = vrot.slane %v1326_v39, %v10268_v41  ;;  %v1341_v44 = vcombine.high %v1333_v42, %v1333_v42  ;;  %v1349_v45 = vrot.slane %v1333_v42, %v10268_v41  ;;  %v9444_v57 = vld [vmem:[%s12385_s5 + $0x1b0] sm:$0xff]   ;;  %v9448_v61 = vld [vmem:[%s12385_s5 + $0x1a8] sm:$0xff]   ;;  %v9451_v0 = vld [vmem:[%s12385_s5 + $0x120] sm:$0xff]  }
  0x11   :  { %8497 = vmatpush3.bf16.msra.mxu1 %v9419_v15  ;;  %8476 = vmatprep.subr.bf16.mxu0 %v9420_v16  ;;  %v9452_v1 = vld [vmem:[%s12385_s5 + $0x1a0] sm:$0xff]   ;;  %v9453_v2 = vld [vmem:[%s12385_s5 + $0x158] sm:$0xff]   ;;  %v9457_v6 = vld [vmem:[%s12385_s5 + $0x150] sm:$0xff]  }
  0x12   :  { %8498 = vmatprep.subr.bf16.mxu1 %v9421_v17  ;;  %v1342_v46 = vcombine.high %v10272_v43, %v10272_v43  ;;  %v1363_v48 = vrot.slane %v1341_v44, %v10268_v41  ;;  %v1371_v51 = vcombine.high %v1349_v45, %v1349_v45  ;;  %v9454_v3 = vld [vmem:[%s12385_s5 + $0x1d8] sm:$0xff]   ;;  %v9458_v7 = vld [vmem:[%s12385_s5 + $0x1d0] sm:$0xff]   ;;  %v9461_v10 = vld [vmem:[%s12385_s5 + $0x148] sm:$0xff]  }
  0x13   :  { %v9455_v4 = vld [vmem:[%s12385_s5 + $0x118] sm:$0xff]   ;;  %v9459_v8 = vld [vmem:[%s12385_s5 + $0x110] sm:$0xff]   ;;  %v9462_v11 = vld [vmem:[%s12385_s5 + $0x1c8] sm:$0xff]  }
  0x14   :  { %8477 = vmatpush3.bf16.msra.mxu0 %v9422_v18  ;;  %v1370_v50 = vrot.slane %v1342_v46, %v10268_v41  ;;  %2240 = vmatprep.mubr.bf16.mxu0 %v1363_v48  ;;  %v1373_v53 = vcombine.high %v1363_v48, %v1363_v48  ;;  %v9456_v5 = vld [vmem:[%s12385_s5 + $0x198] sm:$0xff]   ;;  %v9460_v9 = vld [vmem:[%s12385_s5 + $0x190] sm:$0xff]   ;;  %v9463_v12 = vld [vmem:[%s12385_s5 + $0x108] sm:$0xff]   ;;  %v1356_v18 = vrot.slane %v10272_v43, %v10268_v41 }
  0x15   :  { %8499 = vmatpush3.bf16.msra.mxu1 %v9423_v19  ;;  %8478 = vmatprep.subr.bf16.mxu0 %v9424_v20  ;;  %v9464_v13 = vld [vmem:[%s12385_s5 + $0x188] sm:$0xff]   ;;  %v9465_v14 = vld [vmem:[%s12385_s5 + $0x140] sm:$0xff]   ;;  %v9469_v19 = vld [vmem:[%s12385_s5 + $0x278] sm:$0xff]  }
  0x16   :  { %8500 = vmatprep.subr.bf16.mxu1 %v9425_v21  ;;  %v1374_v56 = vcombine.high %v1370_v50, %v1370_v50  ;;  %2280 = vmatprep.mubr.bf16.mxu1 %v1373_v53  ;;  %v9466_v15 = vld [vmem:[%s12385_s5 + $0x1c0] sm:$0xff]   ;;  %v9470_v20 = vld [vmem:[%s12385_s5 + $0x2f8] sm:$0xff]   ;;  %v9477_v28 = vld [vmem:[%s12385_s5 + $0x268] sm:$0xff]  }
  0x17   :  { %v9467_v16 = vld [vmem:[%s12385_s5 + $0x100] sm:$0xff]   ;;  %v9471_v21 = vld [vmem:[%s12385_s5 + $0x238] sm:$0xff]   ;;  %v9489_v40 = vld [vmem:[%s12385_s5 + $0x250] sm:$0xff]  }
  0x18   :  { %8479 = vmatpush3.bf16.msra.mxu0 %v9426_v22  ;;  %v9468_v17 = vld [vmem:[%s12385_s5 + $0x180] sm:$0xff]   ;;  %v9472_v22 = vld [vmem:[%s12385_s5 + $0x2b8] sm:$0xff]   ;;  %v9490_v42 = vld [vmem:[%s12385_s5 + $0x2d0] sm:$0xff]  }
  0x19   :  { %8501 = vmatpush3.bf16.msra.mxu1 %v9427_v23  ;;  %8480 = vmatprep.subr.bf16.mxu0 %v9428_v24  ;;  %v1372_v23 = vcombine.high %v1356_v18, %v1356_v18  ;;  %v9473_v24 = vld [vmem:[%s12385_s5 + $0x270] sm:$0xff]   ;;  %v9482_v33 = vld [vmem:[%s12385_s5 + $0x2e0] sm:$0xff]   ;;  %v9485_v36 = vld [vmem:[%s12385_s5 + $0x258] sm:$0xff]  }
  0x1a   :  { %8502 = vmatprep.subr.bf16.mxu1 %v9429_v25  ;;  %v9474_v25 = vld [vmem:[%s12385_s5 + $0x2f0] sm:$0xff]   ;;  %v9483_v34 = vld [vmem:[%s12385_s5 + $0x220] sm:$0xff]   ;;  %v9486_v37 = vld [vmem:[%s12385_s5 + $0x2d8] sm:$0xff]  }
  0x1b   :  { %v9488_v39 = vld [vmem:[%s12385_s5 + $0x298] sm:$0xff]   ;;  %v9491_v43 = vld [vmem:[%s12385_s5 + $0x210] sm:$0xff]   ;;  %v1067_v46 = vld [vmem:[%s12381_s1 + $0x8] sm:$0xff] }
  0x1c   :  { %8481 = vmatpush3.bf16.msra.mxu0 %v9430_v26  ;;  %v9475_v26 = vld [vmem:[%s12385_s5 + $0x230] sm:$0xff]   ;;  %v1382_v48 = vrot.slane %v1067_v46, %v10268_v41 }
  0x1d   :  { %8503 = vmatpush3.bf16.msra.mxu1 %v9431_v27  ;;  %8482 = vmatprep.subr.bf16.mxu0 %v9432_v29  ;;  %v9476_v27 = vld [vmem:[%s12385_s5 + $0x2b0] sm:$0xff]   ;;  %v9478_v29 = vld [vmem:[%s12385_s5 + $0x2e8] sm:$0xff]  }
  0x1e   :  { %8504 = vmatprep.subr.bf16.mxu1 %v9433_v30  ;;  %v9479_v30 = vld [vmem:[%s12385_s5 + $0x228] sm:$0xff]   ;;  %v9492_v44 = vld [vmem:[%s12385_s5 + $0x290] sm:$0xff]  }
  0x20   :  { %8483 = vmatpush3.bf16.msra.mxu0 %v9434_v31  ;;  %v9480_v31 = vld [vmem:[%s12385_s5 + $0x2a8] sm:$0xff]  }
  0x21   :  { %8505 = vmatpush3.bf16.msra.mxu1 %v9435_v32  ;;  %8512 = vmatprep.subr.bf16.mxu0 %v9437_v35  ;;  %v9481_v32 = vld [vmem:[%s12385_s5 + $0x260] sm:$0xff]  }
  0x22   :  { %8534 = vmatprep.subr.bf16.mxu1 %v9438_v38  ;;  %v9484_v35 = vld [vmem:[%s12385_s5 + $0x2a0] sm:$0xff]   ;;  %v9487_v38 = vld [vmem:[%s12385_s5 + $0x218] sm:$0xff]  }
  0x23   :  { %2241 = vmatmul.mubr.bf16.vlgmr.msra.gmra.mxu0 %v1349_v45  ;;  %v9493_v45 = vld [vmem:[%s12385_s5 + $0x248] sm:$0xff]  }
  0x24   :  { %8513 = vmatpush3.bf16.msra.mxu0 %v9439_v47  ;;  %2281 = vmatmul.mubr.bf16.vlgmr.msra.gmra.mxu1 %v1371_v51  ;;  %v9494_v47 = vld [vmem:[%s12385_s5 + $0x2c8] sm:$0xff]  }
  0x25   :  { %8514 = vmatprep.subr.bf16.mxu0 %v9441_v52  ;;  %8535 = vmatpush3.bf16.msra.mxu1 %v9440_v49  ;;  %v1375_v49 = vcombine.high %v1067_v46, %v1067_v46  ;;  %v9496_v51 = vld [vmem:[%s12385_s5 + $0x288] sm:$0xff]   ;;  %v1390_v52 = vcombine.high %v1382_v48, %v1382_v48 }
  0x26   :  { %2320 = vmatprep.mubr.bf16.mxu0 %v1370_v50  ;;  %8536 = vmatprep.subr.bf16.mxu1 %v9442_v54  ;;  %v9495_v50 = vld [vmem:[%s12385_s5 + $0x208] sm:$0xff]   ;;  %v9497_v54 = vld [vmem:[%s12385_s5 + $0x240] sm:$0xff]  }
  0x27   :  { %2360 = vmatprep.mubr.bf16.mxu1 %v1374_v56  ;;  %v10460_v53 = vrot.slane %v1375_v49, %v10268_v41  ;;  %v1412_v56 = vrot.slane %v1390_v52, %v10268_v41  ;;  %v9544_v46 = vld [vmem:[%s12384_s4 + $0x28] sm:$0xff]   ;;  %v9547_v49 = vld [vmem:[%s12384_s4 + $0xe0] sm:$0xff]   ;;  %v9550_v52 = vld [vmem:[%s12384_s4 + $0x58] sm:$0xff]  }
  0x28   :  { %8515 = vmatpush3.bf16.msra.mxu0 %v9443_v55  ;;  %v9498_v55 = vld [vmem:[%s12385_s5 + $0x2c0] sm:$0xff]  }
  0x29   :  { %8516 = vmatprep.subr.bf16.mxu0 %v9445_v58  ;;  %8537 = vmatpush3.bf16.msra.mxu1 %v9444_v57  ;;  %v1391_v57 = vcombine.high %v10460_v53, %v10460_v53  ;;  %v9499_v58 = vld [vmem:[%s12385_s5 + $0x200] sm:$0xff]  }
  0x2a   :  { %8538 = vmatprep.subr.bf16.mxu1 %v9446_v59  ;;  %v9500_v59 = vld [vmem:[%s12385_s5 + $0x280] sm:$0xff]  }
  0x2c   :  { %8517 = vmatpush3.bf16.msra.mxu0 %v9447_v60  ;;  %v1422_v60 = vcombine.high %v1412_v56, %v1412_v56 }
  0x2d   :  { %8518 = vmatprep.subr.bf16.mxu0 %v9449_v62  ;;  %8539 = vmatpush3.bf16.msra.mxu1 %v9448_v61  ;;  %v1398_v61 = vrot.slane %v1382_v48, %v10268_v41  ;;  %v9501_v62 = vld [vmem:[%s12385_s5 + $0x378] sm:$0xff]   ;;  %v9546_v48 = vld [vmem:[%s12384_s4 + $0x60] sm:$0xff]  }
  0x2e   :  { %8540 = vmatprep.subr.bf16.mxu1 %v9450_v63  ;;  %v9502_v63 = vld [vmem:[%s12385_s5 + $0x3f8] sm:$0xff]  }
  0x30   :  { %8519 = vmatpush3.bf16.msra.mxu0 %v9451_v0  ;;  %v1419_v0 = vrot.slane %v1391_v57, %v10268_v41  ;;  %v9555_v57 = vld [vmem:[%s12384_s4 + $0xd0] sm:$0xff]  }
  0x31   :  { %8520 = vmatprep.subr.bf16.mxu0 %v9453_v2  ;;  %8541 = vmatpush3.bf16.msra.mxu1 %v9452_v1  ;;  %v9503_v1 = vld [vmem:[%s12385_s5 + $0x338] sm:$0xff]  }
  0x32   :  { %8542 = vmatprep.subr.bf16.mxu1 %v9454_v3  ;;  %v9504_v2 = vld [vmem:[%s12385_s5 + $0x3b8] sm:$0xff]   ;;  %v1420_v3 = vcombine.high %v1398_v61, %v1398_v61 }
  0x34   :  { %8521 = vmatpush3.bf16.msra.mxu0 %v9455_v4  ;;  %v9505_v4 = vld [vmem:[%s12385_s5 + $0x370] sm:$0xff]  }
  0x35   :  { %8522 = vmatprep.subr.bf16.mxu0 %v9457_v6  ;;  %8543 = vmatpush3.bf16.msra.mxu1 %v9456_v5  ;;  %v9506_v5 = vld [vmem:[%s12385_s5 + $0x3f0] sm:$0xff]   ;;  %v1423_v6 = vcombine.high %v1419_v0, %v1419_v0 }
  0x36   :  { %8544 = vmatprep.subr.bf16.mxu1 %v9458_v7  ;;  %v9507_v7 = vld [vmem:[%s12385_s5 + $0x330] sm:$0xff]  }
  0x38   :  { %8523 = vmatpush3.bf16.msra.mxu0 %v9459_v8  ;;  %v9508_v8 = vld [vmem:[%s12385_s5 + $0x3b0] sm:$0xff]  }
  0x39   :  { %8524 = vmatprep.subr.bf16.mxu0 %v9461_v10  ;;  %8545 = vmatpush3.bf16.msra.mxu1 %v9460_v9  ;;  %v9509_v9 = vld [vmem:[%s12385_s5 + $0x368] sm:$0xff]  }
  0x3a   :  { %8546 = vmatprep.subr.bf16.mxu1 %v9462_v11  ;;  %v9510_v10 = vld [vmem:[%s12385_s5 + $0x3e8] sm:$0xff]  }
  0x3b   :  { %v9511_v11 = vld [vmem:[%s12385_s5 + $0x328] sm:$0xff]  }
  0x3c   :  { %8525 = vmatpush3.bf16.msra.mxu0 %v9463_v12  ;;  %v9512_v12 = vld [vmem:[%s12385_s5 + $0x3a8] sm:$0xff]  }
  0x3d   :  { %8526 = vmatprep.subr.bf16.mxu0 %v9465_v14  ;;  %8547 = vmatpush3.bf16.msra.mxu1 %v9464_v13  ;;  %v9513_v13 = vld [vmem:[%s12385_s5 + $0x360] sm:$0xff]  }
  0x3e   :  { %8548 = vmatprep.subr.bf16.mxu1 %v9466_v15  ;;  %v9514_v14 = vld [vmem:[%s12385_s5 + $0x3e0] sm:$0xff]  }
  0x3f   :  { %v9515_v15 = vld [vmem:[%s12385_s5 + $0x320] sm:$0xff]  }
  0x40   :  { %8527 = vmatpush3.bf16.msra.mxu0 %v9467_v16  ;;  %v9516_v16 = vld [vmem:[%s12385_s5 + $0x3a0] sm:$0xff]  }
  0x41   :  { %8556 = vmatprep.subr.bf16.mxu0 %v9469_v19  ;;  %8549 = vmatpush3.bf16.msra.mxu1 %v9468_v17  ;;  %v9517_v17 = vld [vmem:[%s12385_s5 + $0x358] sm:$0xff]  }
  0x42   :  { %8578 = vmatprep.subr.bf16.mxu1 %v9470_v20  ;;  %v9519_v19 = vld [vmem:[%s12385_s5 + $0x318] sm:$0xff]  }
  0x43   :  { %2321 = vmatmul.mubr.bf16.vlgmr.msra.gmra.mxu0 %v1356_v18  ;;  %v9518_v18 = vld [vmem:[%s12385_s5 + $0x3d8] sm:$0xff]  }
  0x44   :  { %8557 = vmatpush3.bf16.msra.mxu0 %v9471_v21  ;;  %2361 = vmatmul.mubr.bf16.vlgmr.msra.gmra.mxu1 %v1372_v23  ;;  %v9520_v20 = vld [vmem:[%s12385_s5 + $0x398] sm:$0xff]   ;;  %v9521_v21 = vld [vmem:[%s12385_s5 + $0x350] sm:$0xff]  }
  0x45   :  { %8558 = vmatprep.subr.bf16.mxu0 %v9473_v24  ;;  %8579 = vmatpush3.bf16.msra.mxu1 %v9472_v22  ;;  %v9522_v22 = vld [vmem:[%s12385_s5 + $0x3d0] sm:$0xff]  }
  0x46   :  { %8580 = vmatprep.subr.bf16.mxu1 %v9474_v25  ;;  %2400 = vmatprep.mubr.bf16.mxu0 %v1412_v56  ;;  %v9523_v23 = vld [vmem:[%s12385_s5 + $0x310] sm:$0xff]   ;;  %v9525_v25 = vld [vmem:[%s12385_s5 + $0x348] sm:$0xff]  }
  0x47   :  { %2440 = vmatprep.mubr.bf16.mxu1 %v1422_v60  ;;  %v9524_v24 = vld [vmem:[%s12385_s5 + $0x390] sm:$0xff]   ;;  %v9558_v60 = vld [vmem:[%s12384_s4 + $0x48] sm:$0xff]  }
  0x48   :  { %8559 = vmatpush3.bf16.msra.mxu0 %v9475_v26  ;;  %v9526_v26 = vld [vmem:[%s12385_s5 + $0x3c8] sm:$0xff]   ;;  %v9554_v56 = vld [vmem:[%s12384_s4 + $0x50] sm:$0xff]  }
  0x49   :  { %8560 = vmatprep.subr.bf16.mxu0 %v9477_v28  ;;  %8581 = vmatpush3.bf16.msra.mxu1 %v9476_v27  ;;  %v9527_v27 = vld [vmem:[%s12385_s5 + $0x308] sm:$0xff]  }
  0x4a   :  { %8582 = vmatprep.subr.bf16.mxu1 %v9478_v29  ;;  %v9528_v28 = vld [vmem:[%s12385_s5 + $0x388] sm:$0xff]   ;;  %v9529_v29 = vld [vmem:[%s12385_s5 + $0x340] sm:$0xff]  }
  0x4c   :  { %8561 = vmatpush3.bf16.msra.mxu0 %v9479_v30  ;;  %v9530_v30 = vld [vmem:[%s12385_s5 + $0x3c0] sm:$0xff]  }
  0x4d   :  { %8562 = vmatprep.subr.bf16.mxu0 %v9481_v32  ;;  %8583 = vmatpush3.bf16.msra.mxu1 %v9480_v31  ;;  %v9531_v31 = vld [vmem:[%s12385_s5 + $0x300] sm:$0xff]  }
  0x4e   :  { %8584 = vmatprep.subr.bf16.mxu1 %v9482_v33  ;;  %v9532_v32 = vld [vmem:[%s12385_s5 + $0x380] sm:$0xff]   ;;  %v1405_v33 = vrot.slane %v10460_v53, %v10268_v41  ;;  %v9551_v53 = vld [vmem:[%s12384_s4 + $0xd8] sm:$0xff]  }
  0x50   :  { %8563 = vmatpush3.bf16.msra.mxu0 %v9483_v34  ;;  %v9534_v34 = vld [vmem:[%s12384_s4 + $0x78] sm:$0xff]  }
  0x51   :  { %8564 = vmatprep.subr.bf16.mxu0 %v9485_v36  ;;  %8585 = vmatpush3.bf16.msra.mxu1 %v9484_v35  ;;  %v9535_v35 = vld [vmem:[%s12384_s4 + $0xf8] sm:$0xff]  }
  0x52   :  { %8586 = vmatprep.subr.bf16.mxu1 %v9486_v37  ;;  %v9536_v36 = vld [vmem:[%s12384_s4 + $0x38] sm:$0xff]  }
  0x53   :  { %v9537_v37 = vld [vmem:[%s12384_s4 + $0xb8] sm:$0xff]  }
  0x54   :  { %8565 = vmatpush3.bf16.msra.mxu0 %v9487_v38  ;;  %v1421_v38 = vcombine.high %v1405_v33, %v1405_v33 }
  0x55   :  { %8566 = vmatprep.subr.bf16.mxu0 %v9489_v40  ;;  %8587 = vmatpush3.bf16.msra.mxu1 %v9488_v39  ;;  %v9538_v39 = vld [vmem:[%s12384_s4 + $0x70] sm:$0xff]  }
  0x56   :  { %8588 = vmatprep.subr.bf16.mxu1 %v9490_v42  ;;  %v9539_v40 = vld [vmem:[%s12384_s4 + $0xf0] sm:$0xff]  }
  0x57   :  { %v9540_v42 = vld [vmem:[%s12384_s4 + $0x30] sm:$0xff]  }
  0x58   :  { %8567 = vmatpush3.bf16.msra.mxu0 %v9491_v43  ;;  %v9541_v43 = vld [vmem:[%s12384_s4 + $0xb0] sm:$0xff]  }
  0x59   :  { %8568 = vmatprep.subr.bf16.mxu0 %v9493_v45  ;;  %8589 = vmatpush3.bf16.msra.mxu1 %v9492_v44  ;;  %v9542_v44 = vld [vmem:[%s12384_s4 + $0x68] sm:$0xff]  }
  0x5a   :  { %8590 = vmatprep.subr.bf16.mxu1 %v9494_v47  ;;  %v9543_v45 = vld [vmem:[%s12384_s4 + $0xe8] sm:$0xff]  }
  0x5b   :  { %v9545_v47 = vld [vmem:[%s12384_s4 + $0xa8] sm:$0xff]  }
  0x5c   :  { %8569 = vmatpush3.bf16.msra.mxu0 %v9495_v50  ;;  %v9548_v50 = vld [vmem:[%s12384_s4 + $0x20] sm:$0xff]  }
  0x5d   :  { %8570 = vmatprep.subr.bf16.mxu0 %v9497_v54  ;;  %8591 = vmatpush3.bf16.msra.mxu1 %v9496_v51  ;;  %v9549_v51 = vld [vmem:[%s12384_s4 + $0xa0] sm:$0xff]   ;;  %v9552_v54 = vld [vmem:[%s12384_s4 + $0x18] sm:$0xff]  }
  0x5e   :  { %8592 = vmatprep.subr.bf16.mxu1 %v9498_v55  ;;  %v9553_v55 = vld [vmem:[%s12384_s4 + $0x98] sm:$0xff]  }
  0x60   :  { %8571 = vmatpush3.bf16.msra.mxu0 %v9499_v58  ;;  %v9556_v58 = vld [vmem:[%s12384_s4 + $0x10] sm:$0xff]  }
  0x61   :  { %8600 = vmatprep.subr.bf16.mxu0 %v9501_v62  ;;  %8593 = vmatpush3.bf16.msra.mxu1 %v9500_v59  ;;  %v9557_v59 = vld [vmem:[%s12384_s4 + $0x90] sm:$0xff]   ;;  %v9559_v62 = vld [vmem:[%s12384_s4 + $0xc8] sm:$0xff]  }
  0x62   :  { %8622 = vmatprep.subr.bf16.mxu1 %v9502_v63 }
  0x63   :  { %2401 = vmatmul.mubr.bf16.vlgmr.msra.gmra.mxu0 %v1398_v61  ;;  %v34_v61 = vld [vmem:[%s12380_s0] sm:$0xff] }
  0x64   :  { %8601 = vmatpush3.bf16.msra.mxu0 %v9503_v1  ;;  %2480 = vmatprep.mubr.bf16.mxu0 %v1419_v0  ;;  %v2543_v63 = vrot.slane %v34_v61, %v10268_v41  ;;  %v2536_v0 = vcombine.high %v34_v61, %v34_v61  ;;  %v9560_v1 = vld [vmem:[%s12384_s4 + $0x8] sm:$0xff]  }
  0x65   :  { %2441 = vmatmul.mubr.bf16.vlgmr.msra.gmra.mxu1 %v1420_v3  ;;  %8602 = vmatprep.subr.bf16.mxu0 %v9505_v4  ;;  %v9609_v61 = vld [vmem:[%s12384_s4 + $0x228] sm:$0xff]  }
  0x66   :  { %8623 = vmatpush3.bf16.msra.mxu1 %v9504_v2  ;;  %2520 = vmatprep.mubr.bf16.mxu1 %v1423_v6  ;;  %v9561_v2 = vld [vmem:[%s12384_s4 + $0x88] sm:$0xff]   ;;  %v2551_v3 = vcombine.high %v2543_v63, %v2543_v63  ;;  %v10666_v4 = vrot.slane %v2536_v0, %v10268_v41  ;;  %v9563_v6 = vld [vmem:[%s12384_s4 + $0xc0] sm:$0xff]  }
  0x67   :  { %8624 = vmatprep.subr.bf16.mxu1 %v9506_v5  ;;  %v9562_v5 = vld [vmem:[%s12384_s4 + $0x40] sm:$0xff]  }
  0x68   :  { %8603 = vmatpush3.bf16.msra.mxu0 %v9507_v7  ;;  %v2573_v7 = vrot.slane %v2551_v3, %v10268_v41  ;;  %v9612_v0 = vld [vmem:[%s12384_s4 + $0x2e0] sm:$0xff]   ;;  %v9615_v3 = vld [vmem:[%s12384_s4 + $0x258] sm:$0xff]  }
  0x69   :  { %8604 = vmatprep.subr.bf16.mxu0 %v9509_v9  ;;  %v9564_v9 = vld [vmem:[%s12384_s4] sm:$0xff]  }
  0x6a   :  { %8625 = vmatpush3.bf16.msra.mxu1 %v9508_v8  ;;  %v2552_v8 = vcombine.high %v10666_v4, %v10666_v4 }
  0x6b   :  { %8626 = vmatprep.subr.bf16.mxu1 %v9510_v10  ;;  %v9565_v10 = vld [vmem:[%s12384_s4 + $0x80] sm:$0xff]  }
  0x6c   :  { %8605 = vmatpush3.bf16.msra.mxu0 %v9511_v11  ;;  %v2583_v11 = vcombine.high %v2573_v7, %v2573_v7 }
  0x6d   :  { %8606 = vmatprep.subr.bf16.mxu0 %v9513_v13  ;;  %v9566_v13 = vld [vmem:[%s12384_s4 + $0x178] sm:$0xff]  }
  0x6e   :  { %8627 = vmatpush3.bf16.msra.mxu1 %v9512_v12  ;;  %v2559_v12 = vrot.slane %v2543_v63, %v10268_v41  ;;  %v9611_v63 = vld [vmem:[%s12384_s4 + $0x260] sm:$0xff]  }
  0x6f   :  { %8628 = vmatprep.subr.bf16.mxu1 %v9514_v14  ;;  %v9567_v14 = vld [vmem:[%s12384_s4 + $0x1f8] sm:$0xff]  }
  0x70   :  { %8607 = vmatpush3.bf16.msra.mxu0 %v9515_v15  ;;  %v2580_v15 = vrot.slane %v2552_v8, %v10268_v41  ;;  %v9620_v8 = vld [vmem:[%s12384_s4 + $0x2d0] sm:$0xff]  }
  0x71   :  { %8608 = vmatprep.subr.bf16.mxu0 %v9517_v17  ;;  %v9569_v17 = vld [vmem:[%s12384_s4 + $0x1b8] sm:$0xff]  }
  0x72   :  { %8629 = vmatpush3.bf16.msra.mxu1 %v9516_v16  ;;  %v9568_v16 = vld [vmem:[%s12384_s4 + $0x138] sm:$0xff]  }
  0x73   :  { %8630 = vmatprep.subr.bf16.mxu1 %v9518_v18  ;;  %v2581_v18 = vcombine.high %v2559_v12, %v2559_v12 }
  0x74   :  { %8609 = vmatpush3.bf16.msra.mxu0 %v9519_v19  ;;  %v9570_v19 = vld [vmem:[%s12384_s4 + $0x170] sm:$0xff]  }
  0x75   :  { %8610 = vmatprep.subr.bf16.mxu0 %v9521_v21  ;;  %v2584_v21 = vcombine.high %v2580_v15, %v2580_v15 }
  0x76   :  { %8631 = vmatpush3.bf16.msra.mxu1 %v9520_v20  ;;  %v9571_v20 = vld [vmem:[%s12384_s4 + $0x1f0] sm:$0xff]  }
  0x77   :  { %8632 = vmatprep.subr.bf16.mxu1 %v9522_v22  ;;  %v9572_v22 = vld [vmem:[%s12384_s4 + $0x130] sm:$0xff]  }
  0x78   :  { %8611 = vmatpush3.bf16.msra.mxu0 %v9523_v23  ;;  %v9573_v23 = vld [vmem:[%s12384_s4 + $0x1b0] sm:$0xff]  }
  0x79   :  { %8612 = vmatprep.subr.bf16.mxu0 %v9525_v25  ;;  %v9575_v25 = vld [vmem:[%s12384_s4 + $0x1e8] sm:$0xff]  }
  0x7a   :  { %8633 = vmatpush3.bf16.msra.mxu1 %v9524_v24  ;;  %v9574_v24 = vld [vmem:[%s12384_s4 + $0x168] sm:$0xff]  }
  0x7b   :  { %8634 = vmatprep.subr.bf16.mxu1 %v9526_v26  ;;  %v9576_v26 = vld [vmem:[%s12384_s4 + $0x128] sm:$0xff]  }
  0x7c   :  { %8613 = vmatpush3.bf16.msra.mxu0 %v9527_v27  ;;  %v9577_v27 = vld [vmem:[%s12384_s4 + $0x1a8] sm:$0xff]  }
  0x7d   :  { %8614 = vmatprep.subr.bf16.mxu0 %v9529_v29  ;;  %v9579_v29 = vld [vmem:[%s12384_s4 + $0x1e0] sm:$0xff]  }
  0x7e   :  { %8635 = vmatpush3.bf16.msra.mxu1 %v9528_v28  ;;  %v9578_v28 = vld [vmem:[%s12384_s4 + $0x160] sm:$0xff]  }
  0x7f   :  { %8636 = vmatprep.subr.bf16.mxu1 %v9530_v30  ;;  %v9580_v30 = vld [vmem:[%s12384_s4 + $0x120] sm:$0xff]  }
  0x80   :  { %8615 = vmatpush3.bf16.msra.mxu0 %v9531_v31  ;;  %v9581_v31 = vld [vmem:[%s12384_s4 + $0x1a0] sm:$0xff]  }
  0x81   :  { %8644 = vmatprep.subr.bf16.mxu0 %v9534_v34  ;;  %v9584_v34 = vld [vmem:[%s12384_s4 + $0x118] sm:$0xff]  }
  0x82   :  { %8637 = vmatpush3.bf16.msra.mxu1 %v9532_v32  ;;  %v9582_v32 = vld [vmem:[%s12384_s4 + $0x158] sm:$0xff]  }
  0x83   :  { %2481 = vmatmul.mubr.bf16.vlgmr.msra.gmra.mxu0 %v1405_v33  ;;  %8666 = vmatprep.subr.bf16.mxu1 %v9535_v35  ;;  %v9583_v33 = vld [vmem:[%s12384_s4 + $0x1d8] sm:$0xff]  }
  0x84   :  { %8645 = vmatpush3.bf16.msra.mxu0 %v9536_v36  ;;  %6096 = vmatprep.mubr.bf16.mxu0 %v2573_v7  ;;  %v9585_v35 = vld [vmem:[%s12384_s4 + $0x198] sm:$0xff]   ;;  %v9586_v36 = vld [vmem:[%s12384_s4 + $0x150] sm:$0xff]  }
  0x85   :  { %2521 = vmatmul.mubr.bf16.vlgmr.msra.gmra.mxu1 %v1421_v38  ;;  %8646 = vmatprep.subr.bf16.mxu0 %v9538_v39  ;;  %v9588_v38 = vld [vmem:[%s12384_s4 + $0x110] sm:$0xff]  }
  0x86   :  { %8667 = vmatpush3.bf16.msra.mxu1 %v9537_v37  ;;  %6136 = vmatprep.mubr.bf16.mxu1 %v2583_v11  ;;  %v9587_v37 = vld [vmem:[%s12384_s4 + $0x1d0] sm:$0xff]   ;;  %v9623_v11 = vld [vmem:[%s12384_s4 + $0x248] sm:$0xff]  }
  0x87   :  { %8668 = vmatprep.subr.bf16.mxu1 %v9539_v40  ;;  %v9589_v39 = vld [vmem:[%s12384_s4 + $0x190] sm:$0xff]   ;;  %v9590_v40 = vld [vmem:[%s12384_s4 + $0x148] sm:$0xff]  }
  0x88   :  { %8647 = vmatpush3.bf16.msra.mxu0 %v9540_v42  ;;  %v9591_v42 = vld [vmem:[%s12384_s4 + $0x1c8] sm:$0xff]   ;;  %v9619_v7 = vld [vmem:[%s12384_s4 + $0x250] sm:$0xff]  }
  0x89   :  { %8648 = vmatprep.subr.bf16.mxu0 %v9542_v44  ;;  %v9593_v44 = vld [vmem:[%s12384_s4 + $0x188] sm:$0xff]  }
  0x8a   :  { %8669 = vmatpush3.bf16.msra.mxu1 %v9541_v43  ;;  %v9592_v43 = vld [vmem:[%s12384_s4 + $0x108] sm:$0xff]  }
  0x8b   :  { %8670 = vmatprep.subr.bf16.mxu1 %v9543_v45  ;;  %v9594_v45 = vld [vmem:[%s12384_s4 + $0x140] sm:$0xff]  }
  0x8c   :  { %8649 = vmatpush3.bf16.msra.mxu0 %v9544_v46  ;;  %v9595_v46 = vld [vmem:[%s12384_s4 + $0x1c0] sm:$0xff]  }
  0x8d   :  { %8650 = vmatprep.subr.bf16.mxu0 %v9546_v48  ;;  %v9597_v48 = vld [vmem:[%s12384_s4 + $0x180] sm:$0xff]  }
  0x8e   :  { %8671 = vmatpush3.bf16.msra.mxu1 %v9545_v47  ;;  %v9596_v47 = vld [vmem:[%s12384_s4 + $0x100] sm:$0xff]  }
  0x8f   :  { %8672 = vmatprep.subr.bf16.mxu1 %v9547_v49  ;;  %v2566_v49 = vrot.slane %v10666_v4, %v10268_v41  ;;  %v9616_v4 = vld [vmem:[%s12384_s4 + $0x2d8] sm:$0xff]  }
  0x90   :  { %8651 = vmatpush3.bf16.msra.mxu0 %v9548_v50  ;;  %v9599_v50 = vld [vmem:[%s12384_s4 + $0x278] sm:$0xff]  }
  0x91   :  { %8652 = vmatprep.subr.bf16.mxu0 %v9550_v52  ;;  %v9601_v52 = vld [vmem:[%s12384_s4 + $0x238] sm:$0xff]  }
  0x92   :  { %8673 = vmatpush3.bf16.msra.mxu1 %v9549_v51  ;;  %v9600_v51 = vld [vmem:[%s12384_s4 + $0x2f8] sm:$0xff]  }
  0x93   :  { %8674 = vmatprep.subr.bf16.mxu1 %v9551_v53  ;;  %v9602_v53 = vld [vmem:[%s12384_s4 + $0x2b8] sm:$0xff]  }
  0x94   :  { %8653 = vmatpush3.bf16.msra.mxu0 %v9552_v54  ;;  %v2582_v54 = vcombine.high %v2566_v49, %v2566_v49 }
  0x95   :  { %8654 = vmatprep.subr.bf16.mxu0 %v9554_v56  ;;  %v9604_v56 = vld [vmem:[%s12384_s4 + $0x2f0] sm:$0xff]  }
  0x96   :  { %8675 = vmatpush3.bf16.msra.mxu1 %v9553_v55  ;;  %v9603_v55 = vld [vmem:[%s12384_s4 + $0x270] sm:$0xff]  }
  0x97   :  { %8676 = vmatprep.subr.bf16.mxu1 %v9555_v57  ;;  %v9605_v57 = vld [vmem:[%s12384_s4 + $0x230] sm:$0xff]  }
  0x98   :  { %8655 = vmatpush3.bf16.msra.mxu0 %v9556_v58  ;;  %v9606_v58 = vld [vmem:[%s12384_s4 + $0x2b0] sm:$0xff]  }
  0x99   :  { %8656 = vmatprep.subr.bf16.mxu0 %v9558_v60  ;;  %v9608_v60 = vld [vmem:[%s12384_s4 + $0x2e8] sm:$0xff]  }
  0x9a   :  { %8677 = vmatpush3.bf16.msra.mxu1 %v9557_v59  ;;  %v9607_v59 = vld [vmem:[%s12384_s4 + $0x268] sm:$0xff]  }
  0x9b   :  { %8678 = vmatprep.subr.bf16.mxu1 %v9559_v62  ;;  %v9610_v62 = vld [vmem:[%s12384_s4 + $0x2a8] sm:$0xff]  }
  0x9c   :  { %8657 = vmatpush3.bf16.msra.mxu0 %v9560_v1  ;;  %v9613_v1 = vld [vmem:[%s12384_s4 + $0x220] sm:$0xff]  }
  0x9d   :  { %8658 = vmatprep.subr.bf16.mxu0 %v9562_v5  ;;  %v9617_v5 = vld [vmem:[%s12384_s4 + $0x218] sm:$0xff]  }
  0x9e   :  { %8679 = vmatpush3.bf16.msra.mxu1 %v9561_v2  ;;  %v9614_v2 = vld [vmem:[%s12384_s4 + $0x2a0] sm:$0xff]  }
  0x9f   :  { %8680 = vmatprep.subr.bf16.mxu1 %v9563_v6  ;;  %v9618_v6 = vld [vmem:[%s12384_s4 + $0x298] sm:$0xff]  }
  0xa0   :  { %8659 = vmatpush3.bf16.msra.mxu0 %v9564_v9  ;;  %v9621_v9 = vld [vmem:[%s12384_s4 + $0x210] sm:$0xff]  }
  0xa1   :  { %8688 = vmatprep.subr.bf16.mxu0 %v9566_v13  ;;  %v35_v13 = vld [vmem:[%s12380_s0 + $0x8] sm:$0xff] }
  0xa2   :  { %8681 = vmatpush3.bf16.msra.mxu1 %v9565_v10  ;;  %v9622_v10 = vld [vmem:[%s12384_s4 + $0x290] sm:$0xff]  }
  0xa3   :  { %6097 = vmatmul.mubr.bf16.vlgmr.msra.gmra.mxu0 %v2559_v12  ;;  %8710 = vmatprep.subr.bf16.mxu1 %v9567_v14  ;;  %v9624_v12 = vld [vmem:[%s12384_s4 + $0x2c8] sm:$0xff]  }
  0xa4   :  { %8689 = vmatpush3.bf16.msra.mxu0 %v9568_v16  ;;  %6176 = vmatprep.mubr.bf16.mxu0 %v2580_v15  ;;  %v9625_v14 = vld [vmem:[%s12384_s4 + $0x208] sm:$0xff]   ;;  %v2592_v15 = vrot.slane %v35_v13, %v10268_v41  ;;  %v2585_v16 = vcombine.high %v35_v13, %v35_v13  ;;  %v9665_v13 = vld [vmem:[%s12384_s4 + $0x4f8] sm:$0xff]  }
  0xa5   :  { %6137 = vmatmul.mubr.bf16.vlgmr.msra.gmra.mxu1 %v2581_v18  ;;  %8690 = vmatprep.subr.bf16.mxu0 %v9570_v19  ;;  %v9627_v18 = vld [vmem:[%s12384_s4 + $0x240] sm:$0xff]  }
  0xa6   :  { %8711 = vmatpush3.bf16.msra.mxu1 %v9569_v17  ;;  %6216 = vmatprep.mubr.bf16.mxu1 %v2584_v21  ;;  %v9626_v17 = vld [vmem:[%s12384_s4 + $0x288] sm:$0xff]   ;;  %v2600_v19 = vcombine.high %v2592_v15, %v2592_v15  ;;  %v9628_v21 = vld [vmem:[%s12384_s4 + $0x2c0] sm:$0xff]  }
  0xa7   :  { %8712 = vmatprep.subr.bf16.mxu1 %v9571_v20  ;;  %v10875_v20 = vrot.slane %v2585_v16, %v10268_v41 }
  0xa8   :  { %8691 = vmatpush3.bf16.msra.mxu0 %v9572_v22  ;;  %v9629_v22 = vld [vmem:[%s12384_s4 + $0x200] sm:$0xff]  }
  0xa9   :  { %8692 = vmatprep.subr.bf16.mxu0 %v9574_v24  ;;  %v2601_v24 = vcombine.high %v10875_v20, %v10875_v20 }
  0xaa   :  { %8713 = vmatpush3.bf16.msra.mxu1 %v9573_v23  ;;  %v2622_v23 = vrot.slane %v2600_v19, %v10268_v41 }
  0xab   :  { %8714 = vmatprep.subr.bf16.mxu1 %v9575_v25  ;;  %v9630_v25 = vld [vmem:[%s12384_s4 + $0x280] sm:$0xff]  }
  0xac   :  { %8693 = vmatpush3.bf16.msra.mxu0 %v9576_v26  ;;  %v2632_v26 = vcombine.high %v2622_v23, %v2622_v23 }
  0xad   :  { %8694 = vmatprep.subr.bf16.mxu0 %v9578_v28  ;;  %v9631_v28 = vld [vmem:[%s12384_s4 + $0x378] sm:$0xff]  }
  0xae   :  { %8715 = vmatpush3.bf16.msra.mxu1 %v9577_v27  ;;  %v2608_v27 = vrot.slane %v2592_v15, %v10268_v41  ;;  %v9667_v15 = vld [vmem:[%s12384_s4 + $0x4b8] sm:$0xff]  }
  0xaf   :  { %8716 = vmatprep.subr.bf16.mxu1 %v9579_v29  ;;  %v9632_v29 = vld [vmem:[%s12384_s4 + $0x3f8] sm:$0xff]  }
  0xb0   :  { %8695 = vmatpush3.bf16.msra.mxu0 %v9580_v30  ;;  %v2629_v30 = vrot.slane %v2601_v24, %v10268_v41  ;;  %v9672_v24 = vld [vmem:[%s12384_s4 + $0x468] sm:$0xff]  }
  0xb1   :  { %8696 = vmatprep.subr.bf16.mxu0 %v9582_v32  ;;  %v9634_v32 = vld [vmem:[%s12384_s4 + $0x3b8] sm:$0xff]  }
  0xb2   :  { %8717 = vmatpush3.bf16.msra.mxu1 %v9581_v31  ;;  %v9633_v31 = vld [vmem:[%s12384_s4 + $0x338] sm:$0xff]  }
  0xb3   :  { %8718 = vmatprep.subr.bf16.mxu1 %v9583_v33  ;;  %v2630_v33 = vcombine.high %v2608_v27, %v2608_v27 }
  0xb4   :  { %8697 = vmatpush3.bf16.msra.mxu0 %v9584_v34  ;;  %v9635_v34 = vld [vmem:[%s12384_s4 + $0x370] sm:$0xff]  }
  0xb5   :  { %8698 = vmatprep.subr.bf16.mxu0 %v9586_v36  ;;  %v2633_v36 = vcombine.high %v2629_v30, %v2629_v30 }
  0xb6   :  { %8719 = vmatpush3.bf16.msra.mxu1 %v9585_v35  ;;  %v9636_v35 = vld [vmem:[%s12384_s4 + $0x3f0] sm:$0xff]  }
  0xb7   :  { %8720 = vmatprep.subr.bf16.mxu1 %v9587_v37 }
  0xb8   :  { %8699 = vmatpush3.bf16.msra.mxu0 %v9588_v38  ;;  %v9637_v38 = vld [vmem:[%s12384_s4 + $0x330] sm:$0xff]  }
  0xb9   :  { %8700 = vmatprep.subr.bf16.mxu0 %v9590_v40 }
  0xba   :  { %8721 = vmatpush3.bf16.msra.mxu1 %v9589_v39  ;;  %v9638_v39 = vld [vmem:[%s12384_s4 + $0x3b0] sm:$0xff]  }
  0xbb   :  { %8722 = vmatprep.subr.bf16.mxu1 %v9591_v42 }
  0xbc   :  { %8701 = vmatpush3.bf16.msra.mxu0 %v9592_v43  ;;  %v9639_v43 = vld [vmem:[%s12384_s4 + $0x368] sm:$0xff]  }
  0xbd   :  { %8702 = vmatprep.subr.bf16.mxu0 %v9594_v45  ;;  %v9640_v45 = vld [vmem:[%s12384_s4 + $0x3e8] sm:$0xff]  }
  0xbe   :  { %8723 = vmatpush3.bf16.msra.mxu1 %v9593_v44 }
  0xbf   :  { %8724 = vmatprep.subr.bf16.mxu1 %v9595_v46 }
  0xc0   :  { %8703 = vmatpush3.bf16.msra.mxu0 %v9596_v47 }
  0xc1   :  { %8732 = vmatprep.subr.bf16.mxu0 %v9599_v50  ;;  %v9642_v50 = vld [vmem:[%s12384_s4 + $0x3a8] sm:$0xff]  }
  0xc2   :  { %8725 = vmatpush3.bf16.msra.mxu1 %v9597_v48  ;;  %v9641_v48 = vld [vmem:[%s12384_s4 + $0x328] sm:$0xff]  }
  0xc3   :  { %6177 = vmatmul.mubr.bf16.vlgmr.msra.gmra.mxu0 %v2566_v49  ;;  %8754 = vmatprep.subr.bf16.mxu1 %v9600_v51 }
  0xc4   :  { %8733 = vmatpush3.bf16.msra.mxu0 %v9601_v52  ;;  %6256 = vmatprep.mubr.bf16.mxu0 %v2622_v23 }
  0xc5   :  { %6217 = vmatmul.mubr.bf16.vlgmr.msra.gmra.mxu1 %v2582_v54  ;;  %8734 = vmatprep.subr.bf16.mxu0 %v9603_v55  ;;  %v9644_v55 = vld [vmem:[%s12384_s4 + $0x3e0] sm:$0xff]  }
  0xc6   :  { %8755 = vmatpush3.bf16.msra.mxu1 %v9602_v53  ;;  %6296 = vmatprep.mubr.bf16.mxu1 %v2632_v26  ;;  %v9643_v53 = vld [vmem:[%s12384_s4 + $0x360] sm:$0xff]   ;;  %v9673_v26 = vld [vmem:[%s12384_s4 + $0x4e8] sm:$0xff]  }
  0xc7   :  { %8756 = vmatprep.subr.bf16.mxu1 %v9604_v56 }
  0xc8   :  { %8735 = vmatpush3.bf16.msra.mxu0 %v9605_v57  ;;  %v9645_v57 = vld [vmem:[%s12384_s4 + $0x320] sm:$0xff]  }
  0xc9   :  { %8736 = vmatprep.subr.bf16.mxu0 %v9607_v59  ;;  %v9647_v59 = vld [vmem:[%s12384_s4 + $0x358] sm:$0xff]  }
  0xca   :  { %8757 = vmatpush3.bf16.msra.mxu1 %v9606_v58  ;;  %v9646_v58 = vld [vmem:[%s12384_s4 + $0x3a0] sm:$0xff]  }
  0xcb   :  { %8758 = vmatprep.subr.bf16.mxu1 %v9608_v60  ;;  %v9648_v60 = vld [vmem:[%s12384_s4 + $0x3d8] sm:$0xff]  }
  0xcc   :  { %8737 = vmatpush3.bf16.msra.mxu0 %v9609_v61  ;;  %v9649_v61 = vld [vmem:[%s12384_s4 + $0x318] sm:$0xff]  }
  0xcd   :  { %8738 = vmatprep.subr.bf16.mxu0 %v9611_v63  ;;  %v9651_v63 = vld [vmem:[%s12384_s4 + $0x350] sm:$0xff]  }
  0xce   :  { %8759 = vmatpush3.bf16.msra.mxu1 %v9610_v62  ;;  %v9650_v62 = vld [vmem:[%s12384_s4 + $0x398] sm:$0xff]  }
  0xcf   :  { %8760 = vmatprep.subr.bf16.mxu1 %v9612_v0  ;;  %v9652_v0 = vld [vmem:[%s12384_s4 + $0x3d0] sm:$0xff]  }
  0xd0   :  { %8739 = vmatpush3.bf16.msra.mxu0 %v9613_v1  ;;  %v9653_v1 = vld [vmem:[%s12384_s4 + $0x310] sm:$0xff]  }
  0xd1   :  { %8740 = vmatprep.subr.bf16.mxu0 %v9615_v3  ;;  %v9655_v3 = vld [vmem:[%s12384_s4 + $0x348] sm:$0xff]  }
  0xd2   :  { %8761 = vmatpush3.bf16.msra.mxu1 %v9614_v2  ;;  %v9654_v2 = vld [vmem:[%s12384_s4 + $0x390] sm:$0xff]  }
  0xd3   :  { %8762 = vmatprep.subr.bf16.mxu1 %v9616_v4  ;;  %v9656_v4 = vld [vmem:[%s12384_s4 + $0x3c8] sm:$0xff]  }
  0xd4   :  { %8741 = vmatpush3.bf16.msra.mxu0 %v9617_v5  ;;  %v9657_v5 = vld [vmem:[%s12384_s4 + $0x308] sm:$0xff]  }
  0xd5   :  { %8742 = vmatprep.subr.bf16.mxu0 %v9619_v7  ;;  %v9659_v7 = vld [vmem:[%s12384_s4 + $0x340] sm:$0xff]  }
  0xd6   :  { %8763 = vmatpush3.bf16.msra.mxu1 %v9618_v6  ;;  %v9658_v6 = vld [vmem:[%s12384_s4 + $0x388] sm:$0xff]  }
  0xd7   :  { %8764 = vmatprep.subr.bf16.mxu1 %v9620_v8  ;;  %v9660_v8 = vld [vmem:[%s12384_s4 + $0x3c0] sm:$0xff]  }
  0xd8   :  { %8743 = vmatpush3.bf16.msra.mxu0 %v9621_v9  ;;  %v9661_v9 = vld [vmem:[%s12384_s4 + $0x300] sm:$0xff]  }
  0xd9   :  { %8744 = vmatprep.subr.bf16.mxu0 %v9623_v11  ;;  %v2615_v11 = vrot.slane %v10875_v20, %v10268_v41  ;;  %v9670_v20 = vld [vmem:[%s12384_s4 + $0x430] sm:$0xff]  }
  0xda   :  { %8765 = vmatpush3.bf16.msra.mxu1 %v9622_v10  ;;  %v9662_v10 = vld [vmem:[%s12384_s4 + $0x380] sm:$0xff]  }
  0xdb   :  { %8766 = vmatprep.subr.bf16.mxu1 %v9624_v12  ;;  %v9664_v12 = vld [vmem:[%s12384_s4 + $0x478] sm:$0xff]   ;;  %v2631_v16 = vcombine.high %v2615_v11, %v2615_v11 }
  0xdc   :  { %8745 = vmatpush3.bf16.msra.mxu0 %v9625_v14  ;;  %v9666_v14 = vld [vmem:[%s12384_s4 + $0x438] sm:$0xff]  }
  0xdd   :  { %8746 = vmatprep.subr.bf16.mxu0 %v9627_v18  ;;  %v9669_v18 = vld [vmem:[%s12384_s4 + $0x4f0] sm:$0xff]  }
  0xde   :  { %8767 = vmatpush3.bf16.msra.mxu1 %v9626_v17  ;;  %v9668_v17 = vld [vmem:[%s12384_s4 + $0x470] sm:$0xff]  }
  0xdf   :  { %8768 = vmatprep.subr.bf16.mxu1 %v9628_v21  ;;  %v9671_v21 = vld [vmem:[%s12384_s4 + $0x4b0] sm:$0xff]  }
  0xe0   :  { %8747 = vmatpush3.bf16.msra.mxu0 %v9629_v22 }
  0xe1   :  { %8776 = vmatprep.subr.bf16.mxu0 %v9631_v28 }
  0xe2   :  { %8769 = vmatpush3.bf16.msra.mxu1 %v9630_v25 }
  0xe3   :  { %v8484_v37 = vpop.f32.mrf.mxu0  ;;  %6257 = vmatmul.mubr.bf16.vlgmr.msra.gmra.mxu0 %v2608_v27  ;;  %8798 = vmatprep.subr.bf16.mxu1 %v9632_v29  ;;  %v9674_v29 = vld [vmem:[%s12384_s4 + $0x428] sm:$0xff]  }
  0xe4   :  { %8777 = vmatpush3.bf16.msra.mxu0 %v9633_v31  ;;  %6336 = vmatprep.mubr.bf16.mxu0 %v2629_v30  ;;  %v8506_v40 = vpop.f32.mrf.mxu1 }
  0xe5   :  { %6297 = vmatmul.mubr.bf16.vlgmr.msra.gmra.mxu1 %v2630_v33  ;;  %v8485_v42 = vpop.f32.mrf.mxu0  ;;  %8778 = vmatprep.subr.bf16.mxu0 %v9635_v34 }
  0xe6   :  { %8799 = vmatpush3.bf16.msra.mxu1 %v9634_v32  ;;  %v8486_v44 = vadd.f32 %v8485_v42, %v8484_v37  ;;  %6376 = vmatprep.mubr.bf16.mxu1 %v2633_v36  ;;  %v8507_v46 = vpop.f32.mrf.mxu1  ;;  %v9675_v32 = vld [vmem:[%s12384_s4 + $0x4a8] sm:$0xff]   ;;  %v9677_v37 = vld [vmem:[%s12384_s4 + $0x4e0] sm:$0xff]   ;;  %v9680_v42 = vld [vmem:[%s12384_s4 + $0x458] sm:$0xff]  }
  0xe7   :  { %v8487_v47 = vpop.f32.mrf.mxu0  ;;  %8800 = vmatprep.subr.bf16.mxu1 %v9636_v35  ;;  %v8508_v49 = vadd.f32 %v8507_v46, %v8506_v40  ;;  %v9676_v35 = vld [vmem:[%s12384_s4 + $0x460] sm:$0xff]   ;;  %v9684_v46 = vld [vmem:[%s12384_s4 + $0x450] sm:$0xff]  }
  0xe8   :  { %8779 = vmatpush3.bf16.msra.mxu0 %v9637_v38  ;;  %v8509_v51 = vpop.f32.mrf.mxu1  ;;  %v9679_v40 = vld [vmem:[%s12384_s4 + $0x4a0] sm:$0xff]   ;;  %v9685_v47 = vld [vmem:[%s12384_s4 + $0x4d0] sm:$0xff]  }
  0xe9   :  { %v8488_v52 = vpop.f32.mrf.mxu0  ;;  %8780 = vmatprep.subr.bf16.mxu0 %v9639_v43  ;;  %v10930_v54 = vadd.f32 %v8508_v49, %v8486_v44  ;;  %v9681_v43 = vld [vmem:[%s12384_s4 + $0x4d8] sm:$0xff]   ;;  %v9687_v49 = vld [vmem:[%s12384_s4 + $0x490] sm:$0xff]   ;;  %v9689_v51 = vld [vmem:[%s12384_s4 + $0x4c8] sm:$0xff]  }
  0xea   :  { %8801 = vmatpush3.bf16.msra.mxu1 %v9638_v39  ;;  %v8510_v56 = vpop.f32.mrf.mxu1  ;;  %v9678_v39 = vld [vmem:[%s12384_s4 + $0x420] sm:$0xff]   ;;  %v9682_v44 = vld [vmem:[%s12384_s4 + $0x418] sm:$0xff]   ;;  %v36_v52 = vld [vmem:[%s12380_s0 + $0x10] sm:$0xff] }
  0xeb   :  { %8802 = vmatprep.subr.bf16.mxu1 %v9640_v45  ;;  %v9683_v45 = vld [vmem:[%s12384_s4 + $0x498] sm:$0xff]   ;;  %v9691_v56 = vld [vmem:[%s12384_s4 + $0x488] sm:$0xff]  }
  0xec   :  { %8781 = vmatpush3.bf16.msra.mxu0 %v9641_v48  ;;  %v9686_v48 = vld [vmem:[%s12384_s4 + $0x410] sm:$0xff]  }
  0xed   :  { %8782 = vmatprep.subr.bf16.mxu0 %v9643_v53  ;;  %v9690_v53 = vld [vmem:[%s12384_s4 + $0x408] sm:$0xff]  }
  0xee   :  { %8803 = vmatpush3.bf16.msra.mxu1 %v9642_v50  ;;  %v9688_v50 = vld [vmem:[%s12384_s4 + $0x448] sm:$0xff]  }
  0xef   :  { %8804 = vmatprep.subr.bf16.mxu1 %v9644_v55  ;;  %v2634_v55 = vcombine.high %v36_v52, %v36_v52 }
  0xf0   :  { %8783 = vmatpush3.bf16.msra.mxu0 %v9645_v57  ;;  %v9692_v57 = vld [vmem:[%s12384_s4 + $0x440] sm:$0xff]  }
  0xf1   :  { %8784 = vmatprep.subr.bf16.mxu0 %v9647_v59  ;;  %v11086_v59 = vrot.slane %v2634_v55, %v10268_v41  ;;  %v9732_v55 = vld [vmem:[%s12384_s4 + $0x6b8] sm:$0xff]  }
  0xf2   :  { %8805 = vmatpush3.bf16.msra.mxu1 %v9646_v58 }
  0xf3   :  { %8806 = vmatprep.subr.bf16.mxu1 %v9648_v60  ;;  %v9693_v60 = vld [vmem:[%s12384_s4 + $0x4c0] sm:$0xff]  }
  0xf4   :  { %8785 = vmatpush3.bf16.msra.mxu0 %v9649_v61  ;;  %v9694_v61 = vld [vmem:[%s12384_s4 + $0x400] sm:$0xff]  }
  0xf5   :  { %8786 = vmatprep.subr.bf16.mxu0 %v9651_v63  ;;  %v2650_v63 = vcombine.high %v11086_v59, %v11086_v59 }
  0xf6   :  { %8807 = vmatpush3.bf16.msra.mxu1 %v9650_v62 }
  0xf7   :  { %8808 = vmatprep.subr.bf16.mxu1 %v9652_v0  ;;  %v9695_v0 = vld [vmem:[%s12384_s4 + $0x480] sm:$0xff]  }
  0xf8   :  { %8787 = vmatpush3.bf16.msra.mxu0 %v9653_v1 }
  0xf9   :  { %8788 = vmatprep.subr.bf16.mxu0 %v9655_v3  ;;  %v9696_v3 = vld [vmem:[%s12384_s4 + $0x578] sm:$0xff]  }
  0xfa   :  { %8809 = vmatpush3.bf16.msra.mxu1 %v9654_v2 }
  0xfb   :  { %8810 = vmatprep.subr.bf16.mxu1 %v9656_v4  ;;  %v9697_v4 = vld [vmem:[%s12384_s4 + $0x5f8] sm:$0xff]  }
  0xfc   :  { %8789 = vmatpush3.bf16.msra.mxu0 %v9657_v5  ;;  %v2678_v5 = vrot.slane %v2650_v63, %v10268_v41 }
  0xfd   :  { %8790 = vmatprep.subr.bf16.mxu0 %v9659_v7  ;;  %v9699_v7 = vld [vmem:[%s12384_s4 + $0x5b8] sm:$0xff]  }
  0xfe   :  { %8811 = vmatpush3.bf16.msra.mxu1 %v9658_v6  ;;  %v9698_v6 = vld [vmem:[%s12384_s4 + $0x538] sm:$0xff]  }
  0xff   :  { %8812 = vmatprep.subr.bf16.mxu1 %v9660_v8 }
 0x100   :  { %8791 = vmatpush3.bf16.msra.mxu0 %v9661_v9  ;;  %v9700_v9 = vld [vmem:[%s12384_s4 + $0x570] sm:$0xff]  }
 0x101   :  { %8820 = vmatprep.subr.bf16.mxu0 %v9664_v12 }
 0x102   :  { %8813 = vmatpush3.bf16.msra.mxu1 %v9662_v10  ;;  %v9701_v10 = vld [vmem:[%s12384_s4 + $0x5f0] sm:$0xff]  }
 0x103   :  { %v8528_v19 = vpop.f32.mrf.mxu0  ;;  %6337 = vmatmul.mubr.bf16.vlgmr.msra.gmra.mxu0 %v2615_v11  ;;  %8842 = vmatprep.subr.bf16.mxu1 %v9665_v13  ;;  %v2682_v11 = vcombine.high %v2678_v5, %v2678_v5  ;;  %v9702_v13 = vld [vmem:[%s12384_s4 + $0x530] sm:$0xff]  }
 0x104   :  { %8821 = vmatpush3.bf16.msra.mxu0 %v9666_v14  ;;  %v8550_v22 = vpop.f32.mrf.mxu1  ;;  %v9703_v14 = vld [vmem:[%s12384_s4 + $0x5b0] sm:$0xff]  }
 0x105   :  { %6377 = vmatmul.mubr.bf16.vlgmr.msra.gmra.mxu1 %v2631_v16  ;;  %v8529_v23 = vpop.f32.mrf.mxu0  ;;  %8822 = vmatprep.subr.bf16.mxu0 %v9668_v17  ;;  %v9704_v17 = vld [vmem:[%s12384_s4 + $0x568] sm:$0xff]  }
 0x106   :  { %8843 = vmatpush3.bf16.msra.mxu1 %v9667_v15  ;;  %v8530_v25 = vadd.f32 %v8529_v23, %v8528_v19  ;;  %v8551_v27 = vpop.f32.mrf.mxu1  ;;  %v9705_v19 = vld [vmem:[%s12384_s4 + $0x5e8] sm:$0xff]  }
 0x107   :  { %v8531_v28 = vpop.f32.mrf.mxu0  ;;  %8844 = vmatprep.subr.bf16.mxu1 %v9669_v18  ;;  %v8552_v31 = vadd.f32 %v8551_v27, %v8550_v22  ;;  %v9706_v22 = vld [vmem:[%s12384_s4 + $0x528] sm:$0xff]  }
 0x108   :  { %v2323_v30 = vadd.f32 %v8530_v25, %v10930_v54  ;;  %8823 = vmatpush3.bf16.msra.mxu0 %v9670_v20  ;;  %v8553_v33 = vpop.f32.mrf.mxu1  ;;  %v2641_v54 = vrot.slane %v36_v52, %v10268_v41  ;;  %v9707_v25 = vld [vmem:[%s12384_s4 + $0x5a8] sm:$0xff]   ;;  %v9708_v28 = vld [vmem:[%s12384_s4 + $0x560] sm:$0xff]   ;;  %v9729_v52 = vld [vmem:[%s12384_s4 + $0x678] sm:$0xff]  }
 0x109   :  { %v8532_v34 = vpop.f32.mrf.mxu0  ;;  %8824 = vmatprep.subr.bf16.mxu0 %v9672_v24  ;;  %v9711_v33 = vld [vmem:[%s12384_s4 + $0x5a0] sm:$0xff]  }
 0x10a   :  { %v11031_v36 = vadd.f32 %v8552_v31, %v2323_v30  ;;  %8845 = vmatpush3.bf16.msra.mxu1 %v9671_v21  ;;  %v8554_v38 = vpop.f32.mrf.mxu1  ;;  %v2649_v58 = vcombine.high %v2641_v54, %v2641_v54  ;;  %v2657_v2 = vrot.slane %v2641_v54, %v10268_v41  ;;  %v9709_v30 = vld [vmem:[%s12384_s4 + $0x5e0] sm:$0xff]   ;;  %v9712_v34 = vld [vmem:[%s12384_s4 + $0x558] sm:$0xff]  }
 0x10b   :  { %8846 = vmatprep.subr.bf16.mxu1 %v9673_v26  ;;  %v9716_v38 = vld [vmem:[%s12384_s4 + $0x550] sm:$0xff]   ;;  %v9731_v54 = vld [vmem:[%s12384_s4 + $0x638] sm:$0xff]  }
 0x10c   :  { %8825 = vmatpush3.bf16.msra.mxu0 %v9674_v29  ;;  %v2671_v62 = vrot.slane %v2649_v58, %v10268_v41  ;;  %v2679_v8 = vcombine.high %v2657_v2, %v2657_v2  ;;  %v9734_v58 = vld [vmem:[%s12384_s4 + $0x6f0] sm:$0xff]  }
 0x10d   :  { %8826 = vmatprep.subr.bf16.mxu0 %v9676_v35  ;;  %v9713_v35 = vld [vmem:[%s12384_s4 + $0x5d8] sm:$0xff]  }
 0x10e   :  { %8847 = vmatpush3.bf16.msra.mxu1 %v9675_v32  ;;  %6416 = vmatprep.mubr.bf16.mxu0 %v2671_v62  ;;  %v2681_v1 = vcombine.high %v2671_v62, %v2671_v62  ;;  %v9710_v32 = vld [vmem:[%s12384_s4 + $0x520] sm:$0xff]  }
 0x10f   :  { %8848 = vmatprep.subr.bf16.mxu1 %v9677_v37  ;;  %v9715_v37 = vld [vmem:[%s12384_s4 + $0x598] sm:$0xff]  }
 0x110   :  { %8827 = vmatpush3.bf16.msra.mxu0 %v9678_v39  ;;  %6456 = vmatprep.mubr.bf16.mxu1 %v2681_v1  ;;  %v9717_v39 = vld [vmem:[%s12384_s4 + $0x5d0] sm:$0xff]  }
 0x111   :  { %8828 = vmatprep.subr.bf16.mxu0 %v9680_v42  ;;  %v9719_v42 = vld [vmem:[%s12384_s4 + $0x590] sm:$0xff]  }
 0x112   :  { %8849 = vmatpush3.bf16.msra.mxu1 %v9679_v40  ;;  %v9718_v40 = vld [vmem:[%s12384_s4 + $0x510] sm:$0xff]  }
 0x113   :  { %8850 = vmatprep.subr.bf16.mxu1 %v9681_v43  ;;  %v9720_v43 = vld [vmem:[%s12384_s4 + $0x548] sm:$0xff]  }
 0x114   :  { %8829 = vmatpush3.bf16.msra.mxu0 %v9682_v44  ;;  %v9721_v44 = vld [vmem:[%s12384_s4 + $0x5c8] sm:$0xff]  }
 0x115   :  { %8830 = vmatprep.subr.bf16.mxu0 %v9684_v46  ;;  %v9723_v46 = vld [vmem:[%s12384_s4 + $0x588] sm:$0xff]  }
 0x116   :  { %8851 = vmatpush3.bf16.msra.mxu1 %v9683_v45  ;;  %v9722_v45 = vld [vmem:[%s12384_s4 + $0x508] sm:$0xff]  }
 0x117   :  { %8852 = vmatprep.subr.bf16.mxu1 %v9685_v47  ;;  %v9724_v47 = vld [vmem:[%s12384_s4 + $0x540] sm:$0xff]  }
 0x118   :  { %8831 = vmatpush3.bf16.msra.mxu0 %v9686_v48  ;;  %v9725_v48 = vld [vmem:[%s12384_s4 + $0x5c0] sm:$0xff]  }
 0x119   :  { %8832 = vmatprep.subr.bf16.mxu0 %v9688_v50  ;;  %v9727_v50 = vld [vmem:[%s12384_s4 + $0x580] sm:$0xff]  }
 0x11a   :  { %8853 = vmatpush3.bf16.msra.mxu1 %v9687_v49  ;;  %v9726_v49 = vld [vmem:[%s12384_s4 + $0x500] sm:$0xff]  }
 0x11b   :  { %8854 = vmatprep.subr.bf16.mxu1 %v9689_v51  ;;  %v2664_v51 = vrot.slane %v11086_v59, %v10268_v41 }
 0x11c   :  { %8833 = vmatpush3.bf16.msra.mxu0 %v9690_v53  ;;  %v9730_v53 = vld [vmem:[%s12384_s4 + $0x6f8] sm:$0xff]  }
 0x11d   :  { %8834 = vmatprep.subr.bf16.mxu0 %v9692_v57  ;;  %v9733_v57 = vld [vmem:[%s12384_s4 + $0x670] sm:$0xff]  }
 0x11e   :  { %8855 = vmatpush3.bf16.msra.mxu1 %v9691_v56  ;;  %v2680_v56 = vcombine.high %v2664_v51, %v2664_v51 }
 0x11f   :  { %8856 = vmatprep.subr.bf16.mxu1 %v9693_v60  ;;  %v9735_v60 = vld [vmem:[%s12384_s4 + $0x630] sm:$0xff]  }
 0x120   :  { %8835 = vmatpush3.bf16.msra.mxu0 %v9694_v61  ;;  %v9736_v61 = vld [vmem:[%s12384_s4 + $0x6b0] sm:$0xff]  }
 0x121   :  { %8864 = vmatprep.subr.bf16.mxu0 %v9696_v3 }
 0x122   :  { %8857 = vmatpush3.bf16.msra.mxu1 %v9695_v0  ;;  %v9737_v0 = vld [vmem:[%s12384_s4 + $0x668] sm:$0xff]  }
 0x123   :  { %v8572_v12 = vpop.f32.mrf.mxu0  ;;  %6417 = vmatmul.mubr.bf16.vlgmr.msra.gmra.mxu0 %v2657_v2  ;;  %8886 = vmatprep.subr.bf16.mxu1 %v9697_v4  ;;  %v9738_v2 = vld [vmem:[%s12384_s4 + $0x6e8] sm:$0xff]  }
 0x124   :  { %8865 = vmatpush3.bf16.msra.mxu0 %v9698_v6  ;;  %6496 = vmatprep.mubr.bf16.mxu0 %v2678_v5  ;;  %v9739_v5 = vld [vmem:[%s12384_s4 + $0x628] sm:$0xff]  }
 0x125   :  { %v8594_v15 = vpop.f32.mrf.mxu1  ;;  %6457 = vmatmul.mubr.bf16.vlgmr.msra.gmra.mxu1 %v2679_v8  ;;  %v8573_v16 = vpop.f32.mrf.mxu0  ;;  %8866 = vmatprep.subr.bf16.mxu0 %v9700_v9  ;;  %v9740_v8 = vld [vmem:[%s12384_s4 + $0x6a8] sm:$0xff]  }
 0x126   :  { %8887 = vmatpush3.bf16.msra.mxu1 %v9699_v7  ;;  %v8574_v18 = vadd.f32 %v8573_v16, %v8572_v12  ;;  %6536 = vmatprep.mubr.bf16.mxu1 %v2682_v11  ;;  %v9741_v11 = vld [vmem:[%s12384_s4 + $0x660] sm:$0xff]  }
 0x127   :  { %v8595_v20 = vpop.f32.mrf.mxu1  ;;  %v8575_v21 = vpop.f32.mrf.mxu0  ;;  %8888 = vmatprep.subr.bf16.mxu1 %v9701_v10  ;;  %v9744_v16 = vld [vmem:[%s12384_s4 + $0x6a0] sm:$0xff]  }
 0x128   :  { %v2403_v23 = vadd.f32 %v8574_v18, %v11031_v36  ;;  %v8596_v24 = vadd.f32 %v8595_v20, %v8594_v15  ;;  %8867 = vmatpush3.bf16.msra.mxu0 %v9702_v13  ;;  %v9714_v36 = vld [vmem:[%s12384_s4 + $0x518] sm:$0xff]   ;;  %v9742_v13 = vld [vmem:[%s12384_s4 + $0x6e0] sm:$0xff]   ;;  %v9749_v21 = vld [vmem:[%s12384_s4 + $0x650] sm:$0xff]  }
 0x129   :  { %v8597_v26 = vpop.f32.mrf.mxu1  ;;  %v8576_v27 = vpop.f32.mrf.mxu0  ;;  %8868 = vmatprep.subr.bf16.mxu0 %v9704_v17  ;;  %v9743_v15 = vld [vmem:[%s12384_s4 + $0x620] sm:$0xff]   ;;  %v9745_v17 = vld [vmem:[%s12384_s4 + $0x658] sm:$0xff]  }
 0x12a   :  { %v11142_v29 = vadd.f32 %v8596_v24, %v2403_v23  ;;  %8889 = vmatpush3.bf16.msra.mxu1 %v9703_v14  ;;  %v9746_v18 = vld [vmem:[%s12384_s4 + $0x6d8] sm:$0xff]   ;;  %v9751_v23 = vld [vmem:[%s12384_s4 + $0x610] sm:$0xff]   ;;  %v9754_v26 = vld [vmem:[%s12384_s4 + $0x6c8] sm:$0xff]  }
 0x12b   :  { %v8598_v31 = vpop.f32.mrf.mxu1  ;;  %8890 = vmatprep.subr.bf16.mxu1 %v9705_v19  ;;  %v9747_v19 = vld [vmem:[%s12384_s4 + $0x618] sm:$0xff]   ;;  %v9752_v24 = vld [vmem:[%s12384_s4 + $0x690] sm:$0xff]  }
 0x12c   :  { %8869 = vmatpush3.bf16.msra.mxu0 %v9706_v22  ;;  %v9748_v20 = vld [vmem:[%s12384_s4 + $0x698] sm:$0xff]   ;;  %v9750_v22 = vld [vmem:[%s12384_s4 + $0x6d0] sm:$0xff]   ;;  %v9756_v31 = vld [vmem:[%s12384_s4 + $0x688] sm:$0xff]  }
 0x12d   :  { %8870 = vmatprep.subr.bf16.mxu0 %v9708_v28  ;;  %v37_v27 = vld [vmem:[%s12380_s0 + $0x18] sm:$0xff]  ;;  %v9755_v28 = vld [vmem:[%s12384_s4 + $0x608] sm:$0xff]  }
 0x12e   :  { %8891 = vmatpush3.bf16.msra.mxu1 %v9707_v25  ;;  %v9753_v25 = vld [vmem:[%s12384_s4 + $0x648] sm:$0xff]  }
 0x12f   :  { %8892 = vmatprep.subr.bf16.mxu1 %v9709_v30  ;;  %v2683_v30 = vcombine.high %v37_v27, %v37_v27 }
 0x130   :  { %8871 = vmatpush3.bf16.msra.mxu0 %v9710_v32  ;;  %v9757_v32 = vld [vmem:[%s12384_s4 + $0x640] sm:$0xff]  }
 0x131   :  { %8872 = vmatprep.subr.bf16.mxu0 %v9712_v34  ;;  %v11298_v34 = vrot.slane %v2683_v30, %v10268_v41  ;;  %v9797_v30 = vld [vmem:[%s12384_s4 + $0x8b8] sm:$0xff]  }
 0x132   :  { %8893 = vmatpush3.bf16.msra.mxu1 %v9711_v33 }
 0x133   :  { %8894 = vmatprep.subr.bf16.mxu1 %v9713_v35  ;;  %v9758_v35 = vld [vmem:[%s12384_s4 + $0x6c0] sm:$0xff]  }
 0x134   :  { %8873 = vmatpush3.bf16.msra.mxu0 %v9714_v36  ;;  %v9759_v36 = vld [vmem:[%s12384_s4 + $0x600] sm:$0xff]  }
 0x135   :  { %8874 = vmatprep.subr.bf16.mxu0 %v9716_v38  ;;  %v2699_v38 = vcombine.high %v11298_v34, %v11298_v34 }
 0x136   :  { %8895 = vmatpush3.bf16.msra.mxu1 %v9715_v37 }
 0x137   :  { %8896 = vmatprep.subr.bf16.mxu1 %v9717_v39  ;;  %v9760_v39 = vld [vmem:[%s12384_s4 + $0x680] sm:$0xff]  }
 0x138   :  { %8875 = vmatpush3.bf16.msra.mxu0 %v9718_v40 }
 0x139   :  { %8876 = vmatprep.subr.bf16.mxu0 %v9720_v43  ;;  %v9761_v43 = vld [vmem:[%s12384_s4 + $0x778] sm:$0xff]  }
 0x13a   :  { %8897 = vmatpush3.bf16.msra.mxu1 %v9719_v42 }
 0x13b   :  { %8898 = vmatprep.subr.bf16.mxu1 %v9721_v44  ;;  %v9762_v44 = vld [vmem:[%s12384_s4 + $0x7f8] sm:$0xff]  }
 0x13c   :  { %8877 = vmatpush3.bf16.msra.mxu0 %v9722_v45  ;;  %v2727_v45 = vrot.slane %v2699_v38, %v10268_v41 }
 0x13d   :  { %8878 = vmatprep.subr.bf16.mxu0 %v9724_v47  ;;  %v9764_v47 = vld [vmem:[%s12384_s4 + $0x7b8] sm:$0xff]  }
 0x13e   :  { %8899 = vmatpush3.bf16.msra.mxu1 %v9723_v46  ;;  %v9763_v46 = vld [vmem:[%s12384_s4 + $0x738] sm:$0xff]  }
 0x13f   :  { %8900 = vmatprep.subr.bf16.mxu1 %v9725_v48 }
 0x140   :  { %8879 = vmatpush3.bf16.msra.mxu0 %v9726_v49  ;;  %v9765_v49 = vld [vmem:[%s12384_s4 + $0x770] sm:$0xff]  }
 0x141   :  { %8908 = vmatprep.subr.bf16.mxu0 %v9729_v52 }
 0x142   :  { %8901 = vmatpush3.bf16.msra.mxu1 %v9727_v50  ;;  %v9766_v50 = vld [vmem:[%s12384_s4 + $0x7f0] sm:$0xff]  }
 0x143   :  { %v8616_v59 = vpop.f32.mrf.mxu0  ;;  %6497 = vmatmul.mubr.bf16.vlgmr.msra.gmra.mxu0 %v2664_v51  ;;  %8930 = vmatprep.subr.bf16.mxu1 %v9730_v53  ;;  %v2731_v51 = vcombine.high %v2727_v45, %v2727_v45  ;;  %v9767_v53 = vld [vmem:[%s12384_s4 + $0x730] sm:$0xff]  }
 0x144   :  { %8909 = vmatpush3.bf16.msra.mxu0 %v9731_v54  ;;  %v9768_v54 = vld [vmem:[%s12384_s4 + $0x7b0] sm:$0xff]  }
 0x145   :  { %v8638_v62 = vpop.f32.mrf.mxu1  ;;  %6537 = vmatmul.mubr.bf16.vlgmr.msra.gmra.mxu1 %v2680_v56  ;;  %v8617_v63 = vpop.f32.mrf.mxu0  ;;  %8910 = vmatprep.subr.bf16.mxu0 %v9733_v57  ;;  %v9769_v57 = vld [vmem:[%s12384_s4 + $0x768] sm:$0xff]  }
 0x146   :  { %8931 = vmatpush3.bf16.msra.mxu1 %v9732_v55  ;;  %v8618_v1 = vadd.f32 %v8617_v63, %v8616_v59  ;;  %v9770_v59 = vld [vmem:[%s12384_s4 + $0x7e8] sm:$0xff]  }
 0x147   :  { %v8639_v3 = vpop.f32.mrf.mxu1  ;;  %v8619_v4 = vpop.f32.mrf.mxu0  ;;  %8932 = vmatprep.subr.bf16.mxu1 %v9734_v58 }
 0x148   :  { %v2483_v6 = vadd.f32 %v8618_v1, %v11142_v29  ;;  %v8640_v7 = vadd.f32 %v8639_v3, %v8638_v62  ;;  %8911 = vmatpush3.bf16.msra.mxu0 %v9735_v60  ;;  %v2690_v29 = vrot.slane %v37_v27, %v10268_v41  ;;  %v9771_v62 = vld [vmem:[%s12384_s4 + $0x728] sm:$0xff]   ;;  %v9773_v4 = vld [vmem:[%s12384_s4 + $0x760] sm:$0xff]   ;;  %v9794_v27 = vld [vmem:[%s12384_s4 + $0x878] sm:$0xff]  }
 0x149   :  { %v8641_v9 = vpop.f32.mrf.mxu1  ;;  %v8620_v10 = vpop.f32.mrf.mxu0  ;;  %8912 = vmatprep.subr.bf16.mxu0 %v9737_v0  ;;  %v9772_v1 = vld [vmem:[%s12384_s4 + $0x7a8] sm:$0xff]  }
 0x14a   :  { %v11243_v12 = vadd.f32 %v8640_v7, %v2483_v6  ;;  %8933 = vmatpush3.bf16.msra.mxu1 %v9736_v61  ;;  %v2698_v33 = vcombine.high %v2690_v29, %v2690_v29  ;;  %v2706_v42 = vrot.slane %v2690_v29, %v10268_v41  ;;  %v9774_v6 = vld [vmem:[%s12384_s4 + $0x7e0] sm:$0xff]   ;;  %v9777_v10 = vld [vmem:[%s12384_s4 + $0x758] sm:$0xff]  }
 0x14b   :  { %v8642_v14 = vpop.f32.mrf.mxu1  ;;  %8934 = vmatprep.subr.bf16.mxu1 %v9738_v2  ;;  %v9776_v9 = vld [vmem:[%s12384_s4 + $0x7a0] sm:$0xff]   ;;  %v9796_v29 = vld [vmem:[%s12384_s4 + $0x838] sm:$0xff]  }
 0x14c   :  { %8913 = vmatpush3.bf16.msra.mxu0 %v9739_v5  ;;  %v2720_v37 = vrot.slane %v2698_v33, %v10268_v41  ;;  %v2728_v48 = vcombine.high %v2706_v42, %v2706_v42  ;;  %v9781_v14 = vld [vmem:[%s12384_s4 + $0x750] sm:$0xff]  }
 0x14d   :  { %8914 = vmatprep.subr.bf16.mxu0 %v9741_v11  ;;  %v9778_v11 = vld [vmem:[%s12384_s4 + $0x7d8] sm:$0xff]   ;;  %v9799_v33 = vld [vmem:[%s12384_s4 + $0x8f0] sm:$0xff]  }
 0x14e   :  { %8935 = vmatpush3.bf16.msra.mxu1 %v9740_v8  ;;  %6576 = vmatprep.mubr.bf16.mxu0 %v2720_v37  ;;  %v2730_v40 = vcombine.high %v2720_v37, %v2720_v37  ;;  %v9775_v8 = vld [vmem:[%s12384_s4 + $0x720] sm:$0xff]  }
 0x14f   :  { %8936 = vmatprep.subr.bf16.mxu1 %v9742_v13  ;;  %v9780_v13 = vld [vmem:[%s12384_s4 + $0x798] sm:$0xff]  }
 0x150   :  { %8915 = vmatpush3.bf16.msra.mxu0 %v9743_v15  ;;  %6616 = vmatprep.mubr.bf16.mxu1 %v2730_v40  ;;  %v9782_v15 = vld [vmem:[%s12384_s4 + $0x7d0] sm:$0xff]  }
 0x151   :  { %8916 = vmatprep.subr.bf16.mxu0 %v9745_v17  ;;  %v9784_v17 = vld [vmem:[%s12384_s4 + $0x790] sm:$0xff]  }
 0x152   :  { %8937 = vmatpush3.bf16.msra.mxu1 %v9744_v16  ;;  %v9783_v16 = vld [vmem:[%s12384_s4 + $0x710] sm:$0xff]  }
 0x153   :  { %8938 = vmatprep.subr.bf16.mxu1 %v9746_v18  ;;  %v9785_v18 = vld [vmem:[%s12384_s4 + $0x748] sm:$0xff]  }
 0x154   :  { %8917 = vmatpush3.bf16.msra.mxu0 %v9747_v19  ;;  %v9786_v19 = vld [vmem:[%s12384_s4 + $0x7c8] sm:$0xff]  }
 0x155   :  { %8918 = vmatprep.subr.bf16.mxu0 %v9749_v21  ;;  %v9788_v21 = vld [vmem:[%s12384_s4 + $0x788] sm:$0xff]  }
 0x156   :  { %8939 = vmatpush3.bf16.msra.mxu1 %v9748_v20  ;;  %v9787_v20 = vld [vmem:[%s12384_s4 + $0x708] sm:$0xff]  }
 0x157   :  { %8940 = vmatprep.subr.bf16.mxu1 %v9750_v22  ;;  %v9789_v22 = vld [vmem:[%s12384_s4 + $0x740] sm:$0xff]  }
 0x158   :  { %8919 = vmatpush3.bf16.msra.mxu0 %v9751_v23  ;;  %v9790_v23 = vld [vmem:[%s12384_s4 + $0x7c0] sm:$0xff]  }
 0x159   :  { %8920 = vmatprep.subr.bf16.mxu0 %v9753_v25  ;;  %v9792_v25 = vld [vmem:[%s12384_s4 + $0x780] sm:$0xff]  }
 0x15a   :  { %8941 = vmatpush3.bf16.msra.mxu1 %v9752_v24  ;;  %v9791_v24 = vld [vmem:[%s12384_s4 + $0x700] sm:$0xff]  }
 0x15b   :  { %8942 = vmatprep.subr.bf16.mxu1 %v9754_v26  ;;  %v2713_v26 = vrot.slane %v11298_v34, %v10268_v41 }
 0x15c   :  { %8921 = vmatpush3.bf16.msra.mxu0 %v9755_v28  ;;  %v9795_v28 = vld [vmem:[%s12384_s4 + $0x8f8] sm:$0xff]  }
 0x15d   :  { %8922 = vmatprep.subr.bf16.mxu0 %v9757_v32  ;;  %v9798_v32 = vld [vmem:[%s12384_s4 + $0x870] sm:$0xff]  }
 0x15e   :  { %8943 = vmatpush3.bf16.msra.mxu1 %v9756_v31  ;;  %v2729_v31 = vcombine.high %v2713_v26, %v2713_v26 }
 0x15f   :  { %8944 = vmatprep.subr.bf16.mxu1 %v9758_v35  ;;  %v9800_v35 = vld [vmem:[%s12384_s4 + $0x830] sm:$0xff]  }
 0x160   :  { %8923 = vmatpush3.bf16.msra.mxu0 %v9759_v36  ;;  %v9801_v36 = vld [vmem:[%s12384_s4 + $0x8b0] sm:$0xff]  }
 0x161   :  { %8952 = vmatprep.subr.bf16.mxu0 %v9761_v43 }
 0x162   :  { %8945 = vmatpush3.bf16.msra.mxu1 %v9760_v39  ;;  %v9802_v39 = vld [vmem:[%s12384_s4 + $0x868] sm:$0xff]  }
 0x163   :  { %v8660_v52 = vpop.f32.mrf.mxu0  ;;  %6577 = vmatmul.mubr.bf16.vlgmr.msra.gmra.mxu0 %v2706_v42  ;;  %8974 = vmatprep.subr.bf16.mxu1 %v9762_v44  ;;  %v9803_v42 = vld [vmem:[%s12384_s4 + $0x8e8] sm:$0xff]  }
 0x164   :  { %8953 = vmatpush3.bf16.msra.mxu0 %v9763_v46  ;;  %6656 = vmatprep.mubr.bf16.mxu0 %v2727_v45  ;;  %v9804_v45 = vld [vmem:[%s12384_s4 + $0x828] sm:$0xff]  }
 0x165   :  { %v8682_v55 = vpop.f32.mrf.mxu1  ;;  %6617 = vmatmul.mubr.bf16.vlgmr.msra.gmra.mxu1 %v2728_v48  ;;  %v8661_v56 = vpop.f32.mrf.mxu0  ;;  %8954 = vmatprep.subr.bf16.mxu0 %v9765_v49  ;;  %v9805_v48 = vld [vmem:[%s12384_s4 + $0x8a8] sm:$0xff]  }
 0x166   :  { %8975 = vmatpush3.bf16.msra.mxu1 %v9764_v47  ;;  %v8662_v58 = vadd.f32 %v8661_v56, %v8660_v52  ;;  %6696 = vmatprep.mubr.bf16.mxu1 %v2731_v51  ;;  %v9806_v51 = vld [vmem:[%s12384_s4 + $0x860] sm:$0xff]  }
 0x167   :  { %v8683_v60 = vpop.f32.mrf.mxu1  ;;  %v8663_v61 = vpop.f32.mrf.mxu0  ;;  %8976 = vmatprep.subr.bf16.mxu1 %v9766_v50  ;;  %v9809_v56 = vld [vmem:[%s12384_s4 + $0x8a0] sm:$0xff]  }
 0x168   :  { %v6099_v63 = vadd.f32 %v8662_v58, %v11243_v12  ;;  %v8684_v0 = vadd.f32 %v8683_v60, %v8682_v55  ;;  %8955 = vmatpush3.bf16.msra.mxu0 %v9767_v53  ;;  %v9779_v12 = vld [vmem:[%s12384_s4 + $0x718] sm:$0xff]   ;;  %v9807_v53 = vld [vmem:[%s12384_s4 + $0x8e0] sm:$0xff]   ;;  %v9814_v61 = vld [vmem:[%s12384_s4 + $0x850] sm:$0xff]  }
 0x169   :  { %v8685_v2 = vpop.f32.mrf.mxu1  ;;  %v8664_v3 = vpop.f32.mrf.mxu0  ;;  %8956 = vmatprep.subr.bf16.mxu0 %v9769_v57  ;;  %v9808_v55 = vld [vmem:[%s12384_s4 + $0x820] sm:$0xff]   ;;  %v9810_v57 = vld [vmem:[%s12384_s4 + $0x858] sm:$0xff]  }
 0x16a   :  { %v11354_v5 = vadd.f32 %v8684_v0, %v6099_v63  ;;  %8977 = vmatpush3.bf16.msra.mxu1 %v9768_v54  ;;  %v9811_v58 = vld [vmem:[%s12384_s4 + $0x8d8] sm:$0xff]   ;;  %v9816_v63 = vld [vmem:[%s12384_s4 + $0x810] sm:$0xff]   ;;  %v9819_v2 = vld [vmem:[%s12384_s4 + $0x8c8] sm:$0xff]  }
 0x16b   :  { %v8686_v7 = vpop.f32.mrf.mxu1  ;;  %8978 = vmatprep.subr.bf16.mxu1 %v9770_v59  ;;  %v9812_v59 = vld [vmem:[%s12384_s4 + $0x818] sm:$0xff]   ;;  %v9817_v0 = vld [vmem:[%s12384_s4 + $0x890] sm:$0xff]   ;;  %v9820_v3 = vld [vmem:[%s12384_s4 + $0x808] sm:$0xff]  }
 0x16c   :  { %8957 = vmatpush3.bf16.msra.mxu0 %v9771_v62  ;;  %v9813_v60 = vld [vmem:[%s12384_s4 + $0x898] sm:$0xff]   ;;  %v9815_v62 = vld [vmem:[%s12384_s4 + $0x8d0] sm:$0xff]  }
 0x16d   :  { %8958 = vmatprep.subr.bf16.mxu0 %v9773_v4  ;;  %v38_v4 = vld [vmem:[%s12380_s0 + $0x20] sm:$0xff] }
 0x16e   :  { %8979 = vmatpush3.bf16.msra.mxu1 %v9772_v1  ;;  %v9818_v1 = vld [vmem:[%s12384_s4 + $0x848] sm:$0xff]   ;;  %v2732_v7 = vcombine.high %v38_v4, %v38_v4 }
 0x16f   :  { %8980 = vmatprep.subr.bf16.mxu1 %v9774_v6  ;;  %v2739_v6 = vrot.slane %v38_v4, %v10268_v41  ;;  %v9860_v4 = vld [vmem:[%s12384_s4 + $0xaf8] sm:$0xff]  }
 0x170   :  { %8959 = vmatpush3.bf16.msra.mxu0 %v9775_v8  ;;  %v9822_v8 = vld [vmem:[%s12384_s4 + $0x840] sm:$0xff]  }
 0x171   :  { %8960 = vmatprep.subr.bf16.mxu0 %v9777_v10  ;;  %v2747_v10 = vcombine.high %v2739_v6, %v2739_v6 }
 0x172   :  { %8981 = vmatpush3.bf16.msra.mxu1 %v9776_v9  ;;  %v9823_v9 = vld [vmem:[%s12384_s4 + $0x8c0] sm:$0xff]  }
 0x173   :  { %8982 = vmatprep.subr.bf16.mxu1 %v9778_v11  ;;  %v11513_v11 = vrot.slane %v2732_v7, %v10268_v41 }
 0x174   :  { %8961 = vmatpush3.bf16.msra.mxu0 %v9779_v12  ;;  %v9824_v12 = vld [vmem:[%s12384_s4 + $0x800] sm:$0xff]  }
 0x175   :  { %8962 = vmatprep.subr.bf16.mxu0 %v9781_v14  ;;  %v2769_v14 = vrot.slane %v2747_v10, %v10268_v41 }
 0x176   :  { %8983 = vmatpush3.bf16.msra.mxu1 %v9780_v13  ;;  %v9825_v13 = vld [vmem:[%s12384_s4 + $0x880] sm:$0xff]  }
 0x177   :  { %8984 = vmatprep.subr.bf16.mxu1 %v9782_v15  ;;  %v2748_v15 = vcombine.high %v11513_v11, %v11513_v11 }
 0x178   :  { %8963 = vmatpush3.bf16.msra.mxu0 %v9783_v16  ;;  %v2755_v16 = vrot.slane %v2739_v6, %v10268_v41  ;;  %v9862_v6 = vld [vmem:[%s12384_s4 + $0xab8] sm:$0xff]  }
 0x179   :  { %8964 = vmatprep.subr.bf16.mxu0 %v9785_v18  ;;  %v2779_v18 = vcombine.high %v2769_v14, %v2769_v14 }
 0x17a   :  { %8985 = vmatpush3.bf16.msra.mxu1 %v9784_v17  ;;  %v9826_v17 = vld [vmem:[%s12384_s4 + $0x978] sm:$0xff]  }
 0x17b   :  { %8986 = vmatprep.subr.bf16.mxu1 %v9786_v19  ;;  %v9827_v19 = vld [vmem:[%s12384_s4 + $0x9f8] sm:$0xff]  }
 0x17c   :  { %8965 = vmatpush3.bf16.msra.mxu0 %v9787_v20  ;;  %v2776_v20 = vrot.slane %v2748_v15, %v10268_v41  ;;  %v9867_v15 = vld [vmem:[%s12384_s4 + $0xa68] sm:$0xff]  }
 0x17d   :  { %8966 = vmatprep.subr.bf16.mxu0 %v9789_v22  ;;  %v9829_v22 = vld [vmem:[%s12384_s4 + $0x9b8] sm:$0xff]  }
 0x17e   :  { %8987 = vmatpush3.bf16.msra.mxu1 %v9788_v21  ;;  %v9828_v21 = vld [vmem:[%s12384_s4 + $0x938] sm:$0xff]  }
 0x17f   :  { %8988 = vmatprep.subr.bf16.mxu1 %v9790_v23  ;;  %v2777_v23 = vcombine.high %v2755_v16, %v2755_v16 }
 0x180   :  { %8967 = vmatpush3.bf16.msra.mxu0 %v9791_v24  ;;  %v9830_v24 = vld [vmem:[%s12384_s4 + $0x970] sm:$0xff]  }
 0x181   :  { %8996 = vmatprep.subr.bf16.mxu0 %v9794_v27 }
 0x182   :  { %8989 = vmatpush3.bf16.msra.mxu1 %v9792_v25  ;;  %v9831_v25 = vld [vmem:[%s12384_s4 + $0x9f0] sm:$0xff]  }
 0x183   :  { %v8704_v34 = vpop.f32.mrf.mxu0  ;;  %6657 = vmatmul.mubr.bf16.vlgmr.msra.gmra.mxu0 %v2713_v26  ;;  %9018 = vmatprep.subr.bf16.mxu1 %v9795_v28  ;;  %v2780_v26 = vcombine.high %v2776_v20, %v2776_v20  ;;  %v9832_v28 = vld [vmem:[%s12384_s4 + $0x930] sm:$0xff]  }
 0x184   :  { %8997 = vmatpush3.bf16.msra.mxu0 %v9796_v29  ;;  %6736 = vmatprep.mubr.bf16.mxu0 %v2769_v14  ;;  %v9833_v29 = vld [vmem:[%s12384_s4 + $0x9b0] sm:$0xff]  }
 0x185   :  { %v8726_v37 = vpop.f32.mrf.mxu1  ;;  %6697 = vmatmul.mubr.bf16.vlgmr.msra.gmra.mxu1 %v2729_v31  ;;  %v8705_v38 = vpop.f32.mrf.mxu0  ;;  %8998 = vmatprep.subr.bf16.mxu0 %v9798_v32  ;;  %v9834_v32 = vld [vmem:[%s12384_s4 + $0x968] sm:$0xff]  }
 0x186   :  { %9019 = vmatpush3.bf16.msra.mxu1 %v9797_v30  ;;  %v8706_v40 = vadd.f32 %v8705_v38, %v8704_v34  ;;  %6776 = vmatprep.mubr.bf16.mxu1 %v2779_v18  ;;  %v9835_v34 = vld [vmem:[%s12384_s4 + $0x9e8] sm:$0xff]  }
 0x187   :  { %v8727_v43 = vpop.f32.mrf.mxu1  ;;  %v8707_v44 = vpop.f32.mrf.mxu0  ;;  %9020 = vmatprep.subr.bf16.mxu1 %v9799_v33 }
 0x188   :  { %v6179_v46 = vadd.f32 %v8706_v40, %v11354_v5  ;;  %v8728_v47 = vadd.f32 %v8727_v43, %v8726_v37  ;;  %8999 = vmatpush3.bf16.msra.mxu0 %v9800_v35  ;;  %v9821_v5 = vld [vmem:[%s12384_s4 + $0x888] sm:$0xff]   ;;  %v9838_v44 = vld [vmem:[%s12384_s4 + $0x960] sm:$0xff]  }
 0x189   :  { %v8729_v49 = vpop.f32.mrf.mxu1  ;;  %v8708_v50 = vpop.f32.mrf.mxu0  ;;  %9000 = vmatprep.subr.bf16.mxu0 %v9802_v39  ;;  %v9836_v37 = vld [vmem:[%s12384_s4 + $0x928] sm:$0xff]  }
 0x18a   :  { %v11455_v52 = vadd.f32 %v8728_v47, %v6179_v46  ;;  %9021 = vmatpush3.bf16.msra.mxu1 %v9801_v36  ;;  %v9837_v40 = vld [vmem:[%s12384_s4 + $0x9a8] sm:$0xff]   ;;  %v9839_v46 = vld [vmem:[%s12384_s4 + $0x9e0] sm:$0xff]   ;;  %v9842_v50 = vld [vmem:[%s12384_s4 + $0x958] sm:$0xff]  }
 0x18b   :  { %v8730_v54 = vpop.f32.mrf.mxu1  ;;  %9022 = vmatprep.subr.bf16.mxu1 %v9803_v42  ;;  %v9841_v49 = vld [vmem:[%s12384_s4 + $0x9a0] sm:$0xff]  }
 0x18c   :  { %9001 = vmatpush3.bf16.msra.mxu0 %v9804_v45  ;;  %v9846_v54 = vld [vmem:[%s12384_s4 + $0x950] sm:$0xff]  }
 0x18d   :  { %9002 = vmatprep.subr.bf16.mxu0 %v9806_v51  ;;  %v9843_v51 = vld [vmem:[%s12384_s4 + $0x9d8] sm:$0xff]  }
 0x18e   :  { %9023 = vmatpush3.bf16.msra.mxu1 %v9805_v48  ;;  %v9840_v48 = vld [vmem:[%s12384_s4 + $0x920] sm:$0xff]  }
 0x18f   :  { %9024 = vmatprep.subr.bf16.mxu1 %v9807_v53  ;;  %v9845_v53 = vld [vmem:[%s12384_s4 + $0x998] sm:$0xff]  }
 0x190   :  { %9003 = vmatpush3.bf16.msra.mxu0 %v9808_v55  ;;  %v9847_v55 = vld [vmem:[%s12384_s4 + $0x9d0] sm:$0xff]  }
 0x191   :  { %9004 = vmatprep.subr.bf16.mxu0 %v9810_v57  ;;  %v9849_v57 = vld [vmem:[%s12384_s4 + $0x990] sm:$0xff]  }
 0x192   :  { %9025 = vmatpush3.bf16.msra.mxu1 %v9809_v56  ;;  %v9848_v56 = vld [vmem:[%s12384_s4 + $0x910] sm:$0xff]  }
 0x193   :  { %9026 = vmatprep.subr.bf16.mxu1 %v9811_v58  ;;  %v9850_v58 = vld [vmem:[%s12384_s4 + $0x948] sm:$0xff]  }
 0x194   :  { %9005 = vmatpush3.bf16.msra.mxu0 %v9812_v59  ;;  %v9851_v59 = vld [vmem:[%s12384_s4 + $0x9c8] sm:$0xff]  }
 0x195   :  { %9006 = vmatprep.subr.bf16.mxu0 %v9814_v61  ;;  %v9853_v61 = vld [vmem:[%s12384_s4 + $0x988] sm:$0xff]  }
 0x196   :  { %9027 = vmatpush3.bf16.msra.mxu1 %v9813_v60  ;;  %v9852_v60 = vld [vmem:[%s12384_s4 + $0x908] sm:$0xff]  }
 0x197   :  { %9028 = vmatprep.subr.bf16.mxu1 %v9815_v62  ;;  %v9854_v62 = vld [vmem:[%s12384_s4 + $0x940] sm:$0xff]  }
 0x198   :  { %9007 = vmatpush3.bf16.msra.mxu0 %v9816_v63  ;;  %v9855_v63 = vld [vmem:[%s12384_s4 + $0x9c0] sm:$0xff]  }
 0x199   :  { %9008 = vmatprep.subr.bf16.mxu0 %v9818_v1  ;;  %v9857_v1 = vld [vmem:[%s12384_s4 + $0x980] sm:$0xff]  }
 0x19a   :  { %9029 = vmatpush3.bf16.msra.mxu1 %v9817_v0  ;;  %v9856_v0 = vld [vmem:[%s12384_s4 + $0x900] sm:$0xff]  }
 0x19b   :  { %9030 = vmatprep.subr.bf16.mxu1 %v9819_v2  ;;  %v2762_v2 = vrot.slane %v11513_v11, %v10268_v41  ;;  %v9865_v11 = vld [vmem:[%s12384_s4 + $0xa30] sm:$0xff]  }
 0x19c   :  { %9009 = vmatpush3.bf16.msra.mxu0 %v9820_v3  ;;  %v9859_v3 = vld [vmem:[%s12384_s4 + $0xa78] sm:$0xff]  }
 0x19d   :  { %9010 = vmatprep.subr.bf16.mxu0 %v9822_v8  ;;  %v2778_v7 = vcombine.high %v2762_v2, %v2762_v2  ;;  %v9863_v8 = vld [vmem:[%s12384_s4 + $0xa70] sm:$0xff]  }
 0x19e   :  { %9031 = vmatpush3.bf16.msra.mxu1 %v9821_v5  ;;  %v9861_v5 = vld [vmem:[%s12384_s4 + $0xa38] sm:$0xff]  }
 0x19f   :  { %9032 = vmatprep.subr.bf16.mxu1 %v9823_v9  ;;  %v9864_v9 = vld [vmem:[%s12384_s4 + $0xaf0] sm:$0xff]  }
 0x1a0   :  { %9011 = vmatpush3.bf16.msra.mxu0 %v9824_v12  ;;  %v9866_v12 = vld [vmem:[%s12384_s4 + $0xab0] sm:$0xff]  }
 0x1a1   :  { %9040 = vmatprep.subr.bf16.mxu0 %v9826_v17  ;;  %v9868_v17 = vld [vmem:[%s12384_s4 + $0xae8] sm:$0xff]  }
 0x1a2   :  { %9033 = vmatpush3.bf16.msra.mxu1 %v9825_v13 }
 0x1a3   :  { %v8748_v27 = vpop.f32.mrf.mxu0  ;;  %6737 = vmatmul.mubr.bf16.vlgmr.msra.gmra.mxu0 %v2755_v16  ;;  %9062 = vmatprep.subr.bf16.mxu1 %v9827_v19 }
 0x1a4   :  { %9041 = vmatpush3.bf16.msra.mxu0 %v9828_v21  ;;  %6816 = vmatprep.mubr.bf16.mxu0 %v2776_v20  ;;  %v9869_v20 = vld [vmem:[%s12384_s4 + $0xa28] sm:$0xff]  }
 0x1a5   :  { %v8770_v30 = vpop.f32.mrf.mxu1  ;;  %6777 = vmatmul.mubr.bf16.vlgmr.msra.gmra.mxu1 %v2777_v23  ;;  %v8749_v31 = vpop.f32.mrf.mxu0  ;;  %9042 = vmatprep.subr.bf16.mxu0 %v9830_v24  ;;  %v9870_v23 = vld [vmem:[%s12384_s4 + $0xaa8] sm:$0xff]  }
 0x1a6   :  { %9063 = vmatpush3.bf16.msra.mxu1 %v9829_v22  ;;  %v8750_v33 = vadd.f32 %v8749_v31, %v8748_v27  ;;  %6856 = vmatprep.mubr.bf16.mxu1 %v2780_v26  ;;  %v9871_v26 = vld [vmem:[%s12384_s4 + $0xa60] sm:$0xff]  }
 0x1a7   :  { %v8771_v35 = vpop.f32.mrf.mxu1  ;;  %v8751_v36 = vpop.f32.mrf.mxu0  ;;  %9064 = vmatprep.subr.bf16.mxu1 %v9831_v25  ;;  %v9874_v31 = vld [vmem:[%s12384_s4 + $0xaa0] sm:$0xff]  }
 0x1a8   :  { %v6259_v38 = vadd.f32 %v8750_v33, %v11455_v52  ;;  %v8772_v39 = vadd.f32 %v8771_v35, %v8770_v30  ;;  %9043 = vmatpush3.bf16.msra.mxu0 %v9832_v28  ;;  %v9844_v52 = vld [vmem:[%s12384_s4 + $0x918] sm:$0xff]   ;;  %v9872_v28 = vld [vmem:[%s12384_s4 + $0xae0] sm:$0xff]   ;;  %v9879_v36 = vld [vmem:[%s12384_s4 + $0xa50] sm:$0xff]  }
 0x1a9   :  { %v8773_v42 = vpop.f32.mrf.mxu1  ;;  %v8752_v43 = vpop.f32.mrf.mxu0  ;;  %9044 = vmatprep.subr.bf16.mxu0 %v9834_v32  ;;  %v9873_v30 = vld [vmem:[%s12384_s4 + $0xa20] sm:$0xff]   ;;  %v9875_v32 = vld [vmem:[%s12384_s4 + $0xa58] sm:$0xff]  }
 0x1aa   :  { %v11566_v45 = vadd.f32 %v8772_v39, %v6259_v38  ;;  %9065 = vmatpush3.bf16.msra.mxu1 %v9833_v29  ;;  %v9876_v33 = vld [vmem:[%s12384_s4 + $0xad8] sm:$0xff]   ;;  %v9881_v38 = vld [vmem:[%s12384_s4 + $0xa10] sm:$0xff]   ;;  %v9884_v42 = vld [vmem:[%s12384_s4 + $0xac8] sm:$0xff]  }
 0x1ab   :  { %v8774_v47 = vpop.f32.mrf.mxu1  ;;  %9066 = vmatprep.subr.bf16.mxu1 %v9835_v34  ;;  %v9877_v34 = vld [vmem:[%s12384_s4 + $0xa18] sm:$0xff]   ;;  %v9882_v39 = vld [vmem:[%s12384_s4 + $0xa90] sm:$0xff]   ;;  %v9885_v43 = vld [vmem:[%s12384_s4 + $0xa08] sm:$0xff]  }
 0x1ac   :  { %9045 = vmatpush3.bf16.msra.mxu0 %v9836_v37  ;;  %v9878_v35 = vld [vmem:[%s12384_s4 + $0xa98] sm:$0xff]   ;;  %v9880_v37 = vld [vmem:[%s12384_s4 + $0xad0] sm:$0xff]  }
 0x1ad   :  { %9046 = vmatprep.subr.bf16.mxu0 %v9838_v44  ;;  %v39_v44 = vld [vmem:[%s12380_s0 + $0x28] sm:$0xff] }
 0x1ae   :  { %9067 = vmatpush3.bf16.msra.mxu1 %v9837_v40  ;;  %v9883_v40 = vld [vmem:[%s12384_s4 + $0xa48] sm:$0xff]   ;;  %v2781_v47 = vcombine.high %v39_v44, %v39_v44 }
 0x1af   :  { %9068 = vmatprep.subr.bf16.mxu1 %v9839_v46  ;;  %v2788_v46 = vrot.slane %v39_v44, %v10268_v41  ;;  %v9925_v44 = vld [vmem:[%s12384_s4 + $0xcf8] sm:$0xff]  }
 0x1b0   :  { %9047 = vmatpush3.bf16.msra.mxu0 %v9840_v48  ;;  %v9887_v48 = vld [vmem:[%s12384_s4 + $0xa40] sm:$0xff]  }
 0x1b1   :  { %9048 = vmatprep.subr.bf16.mxu0 %v9842_v50  ;;  %v2796_v50 = vcombine.high %v2788_v46, %v2788_v46 }
 0x1b2   :  { %9069 = vmatpush3.bf16.msra.mxu1 %v9841_v49  ;;  %v9888_v49 = vld [vmem:[%s12384_s4 + $0xac0] sm:$0xff]  }
 0x1b3   :  { %9070 = vmatprep.subr.bf16.mxu1 %v9843_v51  ;;  %v11725_v51 = vrot.slane %v2781_v47, %v10268_v41 }
 0x1b4   :  { %9049 = vmatpush3.bf16.msra.mxu0 %v9844_v52  ;;  %v9889_v52 = vld [vmem:[%s12384_s4 + $0xa00] sm:$0xff]  }
 0x1b5   :  { %9050 = vmatprep.subr.bf16.mxu0 %v9846_v54  ;;  %v2818_v54 = vrot.slane %v2796_v50, %v10268_v41 }
 0x1b6   :  { %9071 = vmatpush3.bf16.msra.mxu1 %v9845_v53  ;;  %v9890_v53 = vld [vmem:[%s12384_s4 + $0xa80] sm:$0xff]  }
 0x1b7   :  { %9072 = vmatprep.subr.bf16.mxu1 %v9847_v55  ;;  %v2797_v55 = vcombine.high %v11725_v51, %v11725_v51 }
 0x1b8   :  { %9051 = vmatpush3.bf16.msra.mxu0 %v9848_v56  ;;  %v2804_v56 = vrot.slane %v2788_v46, %v10268_v41  ;;  %v9927_v46 = vld [vmem:[%s12384_s4 + $0xcb8] sm:$0xff]  }
 0x1b9   :  { %9052 = vmatprep.subr.bf16.mxu0 %v9850_v58  ;;  %v2828_v58 = vcombine.high %v2818_v54, %v2818_v54 }
 0x1ba   :  { %9073 = vmatpush3.bf16.msra.mxu1 %v9849_v57  ;;  %v9891_v57 = vld [vmem:[%s12384_s4 + $0xb78] sm:$0xff]  }
 0x1bb   :  { %9074 = vmatprep.subr.bf16.mxu1 %v9851_v59  ;;  %v9892_v59 = vld [vmem:[%s12384_s4 + $0xbf8] sm:$0xff]  }
 0x1bc   :  { %9053 = vmatpush3.bf16.msra.mxu0 %v9852_v60  ;;  %v2825_v60 = vrot.slane %v2797_v55, %v10268_v41  ;;  %v9932_v55 = vld [vmem:[%s12384_s4 + $0xc68] sm:$0xff]  }
 0x1bd   :  { %9054 = vmatprep.subr.bf16.mxu0 %v9854_v62  ;;  %v9894_v62 = vld [vmem:[%s12384_s4 + $0xbb8] sm:$0xff]  }
 0x1be   :  { %9075 = vmatpush3.bf16.msra.mxu1 %v9853_v61  ;;  %v9893_v61 = vld [vmem:[%s12384_s4 + $0xb38] sm:$0xff]  }
 0x1bf   :  { %9076 = vmatprep.subr.bf16.mxu1 %v9855_v63  ;;  %v2826_v63 = vcombine.high %v2804_v56, %v2804_v56 }
 0x1c0   :  { %9055 = vmatpush3.bf16.msra.mxu0 %v9856_v0  ;;  %v9895_v0 = vld [vmem:[%s12384_s4 + $0xb70] sm:$0xff]  }
 0x1c1   :  { %9084 = vmatprep.subr.bf16.mxu0 %v9859_v3 }
 0x1c2   :  { %9077 = vmatpush3.bf16.msra.mxu1 %v9857_v1  ;;  %v9896_v1 = vld [vmem:[%s12384_s4 + $0xbf0] sm:$0xff]  }
 0x1c3   :  { %v8792_v10 = vpop.f32.mrf.mxu0  ;;  %6817 = vmatmul.mubr.bf16.vlgmr.msra.gmra.mxu0 %v2762_v2  ;;  %9106 = vmatprep.subr.bf16.mxu1 %v9860_v4  ;;  %v2829_v2 = vcombine.high %v2825_v60, %v2825_v60  ;;  %v9897_v4 = vld [vmem:[%s12384_s4 + $0xb30] sm:$0xff]  }
 0x1c4   :  { %9085 = vmatpush3.bf16.msra.mxu0 %v9861_v5  ;;  %6896 = vmatprep.mubr.bf16.mxu0 %v2818_v54  ;;  %v9898_v5 = vld [vmem:[%s12384_s4 + $0xbb0] sm:$0xff]  }
 0x1c5   :  { %v8814_v13 = vpop.f32.mrf.mxu1  ;;  %6857 = vmatmul.mubr.bf16.vlgmr.msra.gmra.mxu1 %v2778_v7  ;;  %v8793_v14 = vpop.f32.mrf.mxu0  ;;  %9086 = vmatprep.subr.bf16.mxu0 %v9863_v8  ;;  %v9899_v8 = vld [vmem:[%s12384_s4 + $0xb68] sm:$0xff]  }
 0x1c6   :  { %9107 = vmatpush3.bf16.msra.mxu1 %v9862_v6  ;;  %v8794_v16 = vadd.f32 %v8793_v14, %v8792_v10  ;;  %6936 = vmatprep.mubr.bf16.mxu1 %v2828_v58  ;;  %v9900_v10 = vld [vmem:[%s12384_s4 + $0xbe8] sm:$0xff]  }
 0x1c7   :  { %v8815_v18 = vpop.f32.mrf.mxu1  ;;  %v8795_v19 = vpop.f32.mrf.mxu0  ;;  %9108 = vmatprep.subr.bf16.mxu1 %v9864_v9 }
 0x1c8   :  { %v6339_v21 = vadd.f32 %v8794_v16, %v11566_v45  ;;  %v8816_v22 = vadd.f32 %v8815_v18, %v8814_v13  ;;  %9087 = vmatpush3.bf16.msra.mxu0 %v9865_v11  ;;  %v9886_v45 = vld [vmem:[%s12384_s4 + $0xa88] sm:$0xff]   ;;  %v9903_v19 = vld [vmem:[%s12384_s4 + $0xb60] sm:$0xff]  }
 0x1c9   :  { %v8817_v24 = vpop.f32.mrf.mxu1  ;;  %v8796_v25 = vpop.f32.mrf.mxu0  ;;  %9088 = vmatprep.subr.bf16.mxu0 %v9867_v15  ;;  %v9901_v13 = vld [vmem:[%s12384_s4 + $0xb28] sm:$0xff]  }
 0x1ca   :  { %v11667_v27 = vadd.f32 %v8816_v22, %v6339_v21  ;;  %9109 = vmatpush3.bf16.msra.mxu1 %v9866_v12  ;;  %v9902_v16 = vld [vmem:[%s12384_s4 + $0xba8] sm:$0xff]   ;;  %v9904_v21 = vld [vmem:[%s12384_s4 + $0xbe0] sm:$0xff]   ;;  %v9907_v25 = vld [vmem:[%s12384_s4 + $0xb58] sm:$0xff]  }
 0x1cb   :  { %v8818_v29 = vpop.f32.mrf.mxu1  ;;  %9110 = vmatprep.subr.bf16.mxu1 %v9868_v17  ;;  %v9906_v24 = vld [vmem:[%s12384_s4 + $0xba0] sm:$0xff]  }
 0x1cc   :  { %9089 = vmatpush3.bf16.msra.mxu0 %v9869_v20  ;;  %v9911_v29 = vld [vmem:[%s12384_s4 + $0xb50] sm:$0xff]  }
 0x1cd   :  { %9090 = vmatprep.subr.bf16.mxu0 %v9871_v26  ;;  %v9908_v26 = vld [vmem:[%s12384_s4 + $0xbd8] sm:$0xff]  }
 0x1ce   :  { %9111 = vmatpush3.bf16.msra.mxu1 %v9870_v23  ;;  %v9905_v23 = vld [vmem:[%s12384_s4 + $0xb20] sm:$0xff]  }
 0x1cf   :  { %9112 = vmatprep.subr.bf16.mxu1 %v9872_v28  ;;  %v9910_v28 = vld [vmem:[%s12384_s4 + $0xb98] sm:$0xff]  }
 0x1d0   :  { %9091 = vmatpush3.bf16.msra.mxu0 %v9873_v30  ;;  %v9912_v30 = vld [vmem:[%s12384_s4 + $0xbd0] sm:$0xff]  }
 0x1d1   :  { %9092 = vmatprep.subr.bf16.mxu0 %v9875_v32  ;;  %v9914_v32 = vld [vmem:[%s12384_s4 + $0xb90] sm:$0xff]  }
 0x1d2   :  { %9113 = vmatpush3.bf16.msra.mxu1 %v9874_v31  ;;  %v9913_v31 = vld [vmem:[%s12384_s4 + $0xb10] sm:$0xff]  }
 0x1d3   :  { %9114 = vmatprep.subr.bf16.mxu1 %v9876_v33  ;;  %v9915_v33 = vld [vmem:[%s12384_s4 + $0xb48] sm:$0xff]  }
 0x1d4   :  { %9093 = vmatpush3.bf16.msra.mxu0 %v9877_v34  ;;  %v9916_v34 = vld [vmem:[%s12384_s4 + $0xbc8] sm:$0xff]  }
 0x1d5   :  { %9094 = vmatprep.subr.bf16.mxu0 %v9879_v36  ;;  %v9918_v36 = vld [vmem:[%s12384_s4 + $0xb88] sm:$0xff]  }
 0x1d6   :  { %9115 = vmatpush3.bf16.msra.mxu1 %v9878_v35  ;;  %v9917_v35 = vld [vmem:[%s12384_s4 + $0xb08] sm:$0xff]  }
 0x1d7   :  { %9116 = vmatprep.subr.bf16.mxu1 %v9880_v37  ;;  %v9919_v37 = vld [vmem:[%s12384_s4 + $0xb40] sm:$0xff]  }
 0x1d8   :  { %9095 = vmatpush3.bf16.msra.mxu0 %v9881_v38  ;;  %v9920_v38 = vld [vmem:[%s12384_s4 + $0xbc0] sm:$0xff]  }
 0x1d9   :  { %9096 = vmatprep.subr.bf16.mxu0 %v9883_v40  ;;  %v9922_v40 = vld [vmem:[%s12384_s4 + $0xb80] sm:$0xff]  }
 0x1da   :  { %9117 = vmatpush3.bf16.msra.mxu1 %v9882_v39  ;;  %v9921_v39 = vld [vmem:[%s12384_s4 + $0xb00] sm:$0xff]  }
 0x1db   :  { %9118 = vmatprep.subr.bf16.mxu1 %v9884_v42  ;;  %v2811_v42 = vrot.slane %v11725_v51, %v10268_v41  ;;  %v9930_v51 = vld [vmem:[%s12384_s4 + $0xc30] sm:$0xff]  }
 0x1dc   :  { %9097 = vmatpush3.bf16.msra.mxu0 %v9885_v43  ;;  %v9924_v43 = vld [vmem:[%s12384_s4 + $0xc78] sm:$0xff]  }
 0x1dd   :  { %9098 = vmatprep.subr.bf16.mxu0 %v9887_v48  ;;  %v2827_v47 = vcombine.high %v2811_v42, %v2811_v42  ;;  %v9928_v48 = vld [vmem:[%s12384_s4 + $0xc70] sm:$0xff]  }
 0x1de   :  { %9119 = vmatpush3.bf16.msra.mxu1 %v9886_v45  ;;  %v9926_v45 = vld [vmem:[%s12384_s4 + $0xc38] sm:$0xff]  }
 0x1df   :  { %9120 = vmatprep.subr.bf16.mxu1 %v9888_v49  ;;  %v9929_v49 = vld [vmem:[%s12384_s4 + $0xcf0] sm:$0xff]  }
 0x1e0   :  { %9099 = vmatpush3.bf16.msra.mxu0 %v9889_v52  ;;  %v9931_v52 = vld [vmem:[%s12384_s4 + $0xcb0] sm:$0xff]  }
 0x1e1   :  { %9128 = vmatprep.subr.bf16.mxu0 %v9891_v57  ;;  %v9933_v57 = vld [vmem:[%s12384_s4 + $0xce8] sm:$0xff]  }
 0x1e2   :  { %9121 = vmatpush3.bf16.msra.mxu1 %v9890_v53 }
 0x1e3   :  { %v8836_v3 = vpop.f32.mrf.mxu0  ;;  %6897 = vmatmul.mubr.bf16.vlgmr.msra.gmra.mxu0 %v2804_v56  ;;  %9150 = vmatprep.subr.bf16.mxu1 %v9892_v59 }
 0x1e4   :  { %9129 = vmatpush3.bf16.msra.mxu0 %v9893_v61  ;;  %6976 = vmatprep.mubr.bf16.mxu0 %v2825_v60  ;;  %v9934_v60 = vld [vmem:[%s12384_s4 + $0xc28] sm:$0xff]  }
 0x1e5   :  { %v8858_v6 = vpop.f32.mrf.mxu1  ;;  %6937 = vmatmul.mubr.bf16.vlgmr.msra.gmra.mxu1 %v2826_v63  ;;  %v8837_v7 = vpop.f32.mrf.mxu0  ;;  %9130 = vmatprep.subr.bf16.mxu0 %v9895_v0  ;;  %v9935_v63 = vld [vmem:[%s12384_s4 + $0xca8] sm:$0xff]  }
 0x1e6   :  { %9151 = vmatpush3.bf16.msra.mxu1 %v9894_v62  ;;  %v8838_v9 = vadd.f32 %v8837_v7, %v8836_v3  ;;  %7016 = vmatprep.mubr.bf16.mxu1 %v2829_v2  ;;  %v9936_v2 = vld [vmem:[%s12384_s4 + $0xc60] sm:$0xff]  }
 0x1e7   :  { %v8859_v11 = vpop.f32.mrf.mxu1  ;;  %v8839_v12 = vpop.f32.mrf.mxu0  ;;  %9152 = vmatprep.subr.bf16.mxu1 %v9896_v1  ;;  %v9939_v7 = vld [vmem:[%s12384_s4 + $0xca0] sm:$0xff]  }
 0x1e8   :  { %v6419_v14 = vadd.f32 %v8838_v9, %v11667_v27  ;;  %v8860_v15 = vadd.f32 %v8859_v11, %v8858_v6  ;;  %9131 = vmatpush3.bf16.msra.mxu0 %v9897_v4  ;;  %v9909_v27 = vld [vmem:[%s12384_s4 + $0xb18] sm:$0xff]   ;;  %v9937_v4 = vld [vmem:[%s12384_s4 + $0xce0] sm:$0xff]   ;;  %v9944_v12 = vld [vmem:[%s12384_s4 + $0xc50] sm:$0xff]  }
 0x1e9   :  { %v8861_v17 = vpop.f32.mrf.mxu1  ;;  %v8840_v18 = vpop.f32.mrf.mxu0  ;;  %9132 = vmatprep.subr.bf16.mxu0 %v9899_v8  ;;  %v9938_v6 = vld [vmem:[%s12384_s4 + $0xc20] sm:$0xff]   ;;  %v9940_v8 = vld [vmem:[%s12384_s4 + $0xc58] sm:$0xff]  }
 0x1ea   :  { %v11778_v20 = vadd.f32 %v8860_v15, %v6419_v14  ;;  %9153 = vmatpush3.bf16.msra.mxu1 %v9898_v5  ;;  %v9941_v9 = vld [vmem:[%s12384_s4 + $0xcd8] sm:$0xff]   ;;  %v9946_v14 = vld [vmem:[%s12384_s4 + $0xc10] sm:$0xff]   ;;  %v9949_v17 = vld [vmem:[%s12384_s4 + $0xcc8] sm:$0xff]  }
 0x1eb   :  { %v8862_v22 = vpop.f32.mrf.mxu1  ;;  %9154 = vmatprep.subr.bf16.mxu1 %v9900_v10  ;;  %v9942_v10 = vld [vmem:[%s12384_s4 + $0xc18] sm:$0xff]   ;;  %v9947_v15 = vld [vmem:[%s12384_s4 + $0xc90] sm:$0xff]   ;;  %v9950_v18 = vld [vmem:[%s12384_s4 + $0xc08] sm:$0xff]  }
 0x1ec   :  { %9133 = vmatpush3.bf16.msra.mxu0 %v9901_v13  ;;  %v9943_v11 = vld [vmem:[%s12384_s4 + $0xc98] sm:$0xff]   ;;  %v9945_v13 = vld [vmem:[%s12384_s4 + $0xcd0] sm:$0xff]  }
 0x1ed   :  { %9134 = vmatprep.subr.bf16.mxu0 %v9903_v19  ;;  %v40_v19 = vld [vmem:[%s12380_s0 + $0x30] sm:$0xff] }
 0x1ee   :  { %9155 = vmatpush3.bf16.msra.mxu1 %v9902_v16  ;;  %v9948_v16 = vld [vmem:[%s12384_s4 + $0xc48] sm:$0xff]   ;;  %v2830_v22 = vcombine.high %v40_v19, %v40_v19 }
 0x1ef   :  { %9156 = vmatprep.subr.bf16.mxu1 %v9904_v21  ;;  %v2837_v21 = vrot.slane %v40_v19, %v10268_v41  ;;  %v9990_v19 = vld [vmem:[%s12384_s4 + $0xef8] sm:$0xff]  }
 0x1f0   :  { %9135 = vmatpush3.bf16.msra.mxu0 %v9905_v23  ;;  %v9952_v23 = vld [vmem:[%s12384_s4 + $0xc40] sm:$0xff]  }
 0x1f1   :  { %9136 = vmatprep.subr.bf16.mxu0 %v9907_v25  ;;  %v2845_v25 = vcombine.high %v2837_v21, %v2837_v21 }
 0x1f2   :  { %9157 = vmatpush3.bf16.msra.mxu1 %v9906_v24  ;;  %v9953_v24 = vld [vmem:[%s12384_s4 + $0xcc0] sm:$0xff]  }
 0x1f3   :  { %9158 = vmatprep.subr.bf16.mxu1 %v9908_v26  ;;  %v11937_v26 = vrot.slane %v2830_v22, %v10268_v41 }
 0x1f4   :  { %9137 = vmatpush3.bf16.msra.mxu0 %v9909_v27  ;;  %v9954_v27 = vld [vmem:[%s12384_s4 + $0xc00] sm:$0xff]  }
 0x1f5   :  { %9138 = vmatprep.subr.bf16.mxu0 %v9911_v29  ;;  %v2867_v29 = vrot.slane %v2845_v25, %v10268_v41 }
 0x1f6   :  { %9159 = vmatpush3.bf16.msra.mxu1 %v9910_v28  ;;  %v9955_v28 = vld [vmem:[%s12384_s4 + $0xc80] sm:$0xff]  }
 0x1f7   :  { %9160 = vmatprep.subr.bf16.mxu1 %v9912_v30  ;;  %v2846_v30 = vcombine.high %v11937_v26, %v11937_v26 }
 0x1f8   :  { %9139 = vmatpush3.bf16.msra.mxu0 %v9913_v31  ;;  %v2853_v31 = vrot.slane %v2837_v21, %v10268_v41  ;;  %v9992_v21 = vld [vmem:[%s12384_s4 + $0xeb8] sm:$0xff]  }
 0x1f9   :  { %9140 = vmatprep.subr.bf16.mxu0 %v9915_v33  ;;  %v2877_v33 = vcombine.high %v2867_v29, %v2867_v29 }
 0x1fa   :  { %9161 = vmatpush3.bf16.msra.mxu1 %v9914_v32  ;;  %v9956_v32 = vld [vmem:[%s12384_s4 + $0xd78] sm:$0xff]  }
 0x1fb   :  { %9162 = vmatprep.subr.bf16.mxu1 %v9916_v34  ;;  %v9957_v34 = vld [vmem:[%s12384_s4 + $0xdf8] sm:$0xff]  }
 0x1fc   :  { %9141 = vmatpush3.bf16.msra.mxu0 %v9917_v35  ;;  %v2874_v35 = vrot.slane %v2846_v30, %v10268_v41  ;;  %v9997_v30 = vld [vmem:[%s12384_s4 + $0xe68] sm:$0xff]  }
 0x1fd   :  { %9142 = vmatprep.subr.bf16.mxu0 %v9919_v37  ;;  %v9959_v37 = vld [vmem:[%s12384_s4 + $0xdb8] sm:$0xff]  }
 0x1fe   :  { %9163 = vmatpush3.bf16.msra.mxu1 %v9918_v36  ;;  %v9958_v36 = vld [vmem:[%s12384_s4 + $0xd38] sm:$0xff]  }
 0x1ff   :  { %9164 = vmatprep.subr.bf16.mxu1 %v9920_v38  ;;  %v2875_v38 = vcombine.high %v2853_v31, %v2853_v31 }
 0x200   :  { %9143 = vmatpush3.bf16.msra.mxu0 %v9921_v39  ;;  %v9960_v39 = vld [vmem:[%s12384_s4 + $0xd70] sm:$0xff]  }
 0x201   :  { %9172 = vmatprep.subr.bf16.mxu0 %v9924_v43 }
 0x202   :  { %9165 = vmatpush3.bf16.msra.mxu1 %v9922_v40  ;;  %v9961_v40 = vld [vmem:[%s12384_s4 + $0xdf0] sm:$0xff]  }
 0x203   :  { %v8880_v50 = vpop.f32.mrf.mxu0  ;;  %6977 = vmatmul.mubr.bf16.vlgmr.msra.gmra.mxu0 %v2811_v42  ;;  %9194 = vmatprep.subr.bf16.mxu1 %v9925_v44  ;;  %v2878_v42 = vcombine.high %v2874_v35, %v2874_v35  ;;  %v9962_v44 = vld [vmem:[%s12384_s4 + $0xd30] sm:$0xff]  }
 0x204   :  { %9173 = vmatpush3.bf16.msra.mxu0 %v9926_v45  ;;  %7056 = vmatprep.mubr.bf16.mxu0 %v2867_v29  ;;  %v9963_v45 = vld [vmem:[%s12384_s4 + $0xdb0] sm:$0xff]  }
 0x205   :  { %v8902_v53 = vpop.f32.mrf.mxu1  ;;  %7017 = vmatmul.mubr.bf16.vlgmr.msra.gmra.mxu1 %v2827_v47  ;;  %v8881_v54 = vpop.f32.mrf.mxu0  ;;  %9174 = vmatprep.subr.bf16.mxu0 %v9928_v48  ;;  %v9964_v48 = vld [vmem:[%s12384_s4 + $0xd68] sm:$0xff]  }
 0x206   :  { %9195 = vmatpush3.bf16.msra.mxu1 %v9927_v46  ;;  %v8882_v56 = vadd.f32 %v8881_v54, %v8880_v50  ;;  %7096 = vmatprep.mubr.bf16.mxu1 %v2877_v33  ;;  %v9965_v50 = vld [vmem:[%s12384_s4 + $0xde8] sm:$0xff]  }
 0x207   :  { %v8903_v58 = vpop.f32.mrf.mxu1  ;;  %v8883_v59 = vpop.f32.mrf.mxu0  ;;  %9196 = vmatprep.subr.bf16.mxu1 %v9929_v49 }
 0x208   :  { %v6499_v61 = vadd.f32 %v8882_v56, %v11778_v20  ;;  %v8904_v62 = vadd.f32 %v8903_v58, %v8902_v53  ;;  %9175 = vmatpush3.bf16.msra.mxu0 %v9930_v51  ;;  %v9951_v20 = vld [vmem:[%s12384_s4 + $0xc88] sm:$0xff]   ;;  %v9968_v59 = vld [vmem:[%s12384_s4 + $0xd60] sm:$0xff]  }
 0x209   :  { %v8905_v0 = vpop.f32.mrf.mxu1  ;;  %v8884_v1 = vpop.f32.mrf.mxu0  ;;  %9176 = vmatprep.subr.bf16.mxu0 %v9932_v55  ;;  %v9966_v53 = vld [vmem:[%s12384_s4 + $0xd28] sm:$0xff]  }
 0x20a   :  { %v11879_v3 = vadd.f32 %v8904_v62, %v6499_v61  ;;  %9197 = vmatpush3.bf16.msra.mxu1 %v9931_v52  ;;  %v9967_v56 = vld [vmem:[%s12384_s4 + $0xda8] sm:$0xff]   ;;  %v9969_v61 = vld [vmem:[%s12384_s4 + $0xde0] sm:$0xff]   ;;  %v9972_v1 = vld [vmem:[%s12384_s4 + $0xd58] sm:$0xff]  }
 0x20b   :  { %v8906_v5 = vpop.f32.mrf.mxu1  ;;  %9198 = vmatprep.subr.bf16.mxu1 %v9933_v57  ;;  %v9971_v0 = vld [vmem:[%s12384_s4 + $0xda0] sm:$0xff]  }
 0x20c   :  { %9177 = vmatpush3.bf16.msra.mxu0 %v9934_v60  ;;  %v9976_v5 = vld [vmem:[%s12384_s4 + $0xd50] sm:$0xff]  }
 0x20d   :  { %9178 = vmatprep.subr.bf16.mxu0 %v9936_v2  ;;  %v9973_v2 = vld [vmem:[%s12384_s4 + $0xdd8] sm:$0xff]  }
 0x20e   :  { %9199 = vmatpush3.bf16.msra.mxu1 %v9935_v63  ;;  %v9970_v63 = vld [vmem:[%s12384_s4 + $0xd20] sm:$0xff]  }
 0x20f   :  { %9200 = vmatprep.subr.bf16.mxu1 %v9937_v4  ;;  %v9975_v4 = vld [vmem:[%s12384_s4 + $0xd98] sm:$0xff]  }
 0x210   :  { %9179 = vmatpush3.bf16.msra.mxu0 %v9938_v6  ;;  %v9977_v6 = vld [vmem:[%s12384_s4 + $0xdd0] sm:$0xff]  }
 0x211   :  { %9180 = vmatprep.subr.bf16.mxu0 %v9940_v8  ;;  %v9979_v8 = vld [vmem:[%s12384_s4 + $0xd90] sm:$0xff]  }
 0x212   :  { %9201 = vmatpush3.bf16.msra.mxu1 %v9939_v7  ;;  %v9978_v7 = vld [vmem:[%s12384_s4 + $0xd10] sm:$0xff]  }
 0x213   :  { %9202 = vmatprep.subr.bf16.mxu1 %v9941_v9  ;;  %v9980_v9 = vld [vmem:[%s12384_s4 + $0xd48] sm:$0xff]  }
 0x214   :  { %9181 = vmatpush3.bf16.msra.mxu0 %v9942_v10  ;;  %v9981_v10 = vld [vmem:[%s12384_s4 + $0xdc8] sm:$0xff]  }
 0x215   :  { %9182 = vmatprep.subr.bf16.mxu0 %v9944_v12  ;;  %v9983_v12 = vld [vmem:[%s12384_s4 + $0xd88] sm:$0xff]  }
 0x216   :  { %9203 = vmatpush3.bf16.msra.mxu1 %v9943_v11  ;;  %v9982_v11 = vld [vmem:[%s12384_s4 + $0xd08] sm:$0xff]  }
 0x217   :  { %9204 = vmatprep.subr.bf16.mxu1 %v9945_v13  ;;  %v9984_v13 = vld [vmem:[%s12384_s4 + $0xd40] sm:$0xff]  }
 0x218   :  { %9183 = vmatpush3.bf16.msra.mxu0 %v9946_v14  ;;  %v9985_v14 = vld [vmem:[%s12384_s4 + $0xdc0] sm:$0xff]  }
 0x219   :  { %9184 = vmatprep.subr.bf16.mxu0 %v9948_v16  ;;  %v9987_v16 = vld [vmem:[%s12384_s4 + $0xd80] sm:$0xff]  }
 0x21a   :  { %9205 = vmatpush3.bf16.msra.mxu1 %v9947_v15  ;;  %v9986_v15 = vld [vmem:[%s12384_s4 + $0xd00] sm:$0xff]  }
 0x21b   :  { %9206 = vmatprep.subr.bf16.mxu1 %v9949_v17  ;;  %v2860_v17 = vrot.slane %v11937_v26, %v10268_v41  ;;  %v9995_v26 = vld [vmem:[%s12384_s4 + $0xe30] sm:$0xff]  }
 0x21c   :  { %9185 = vmatpush3.bf16.msra.mxu0 %v9950_v18  ;;  %v9989_v18 = vld [vmem:[%s12384_s4 + $0xe78] sm:$0xff]  }
 0x21d   :  { %9186 = vmatprep.subr.bf16.mxu0 %v9952_v23  ;;  %v2876_v22 = vcombine.high %v2860_v17, %v2860_v17  ;;  %v9993_v23 = vld [vmem:[%s12384_s4 + $0xe70] sm:$0xff]  }
 0x21e   :  { %9207 = vmatpush3.bf16.msra.mxu1 %v9951_v20  ;;  %v9991_v20 = vld [vmem:[%s12384_s4 + $0xe38] sm:$0xff]  }
 0x21f   :  { %9208 = vmatprep.subr.bf16.mxu1 %v9953_v24  ;;  %v9994_v24 = vld [vmem:[%s12384_s4 + $0xef0] sm:$0xff]  }
 0x220   :  { %9187 = vmatpush3.bf16.msra.mxu0 %v9954_v27  ;;  %v9996_v27 = vld [vmem:[%s12384_s4 + $0xeb0] sm:$0xff]  }
 0x221   :  { %9216 = vmatprep.subr.bf16.mxu0 %v9956_v32  ;;  %v9998_v32 = vld [vmem:[%s12384_s4 + $0xee8] sm:$0xff]  }
 0x222   :  { %9209 = vmatpush3.bf16.msra.mxu1 %v9955_v28 }
 0x223   :  { %v8924_v43 = vpop.f32.mrf.mxu0  ;;  %7057 = vmatmul.mubr.bf16.vlgmr.msra.gmra.mxu0 %v2853_v31  ;;  %9238 = vmatprep.subr.bf16.mxu1 %v9957_v34 }
 0x224   :  { %9217 = vmatpush3.bf16.msra.mxu0 %v9958_v36  ;;  %7136 = vmatprep.mubr.bf16.mxu0 %v2874_v35  ;;  %v9999_v35 = vld [vmem:[%s12384_s4 + $0xe28] sm:$0xff]  }
 0x225   :  { %v8946_v46 = vpop.f32.mrf.mxu1  ;;  %7097 = vmatmul.mubr.bf16.vlgmr.msra.gmra.mxu1 %v2875_v38  ;;  %v8925_v47 = vpop.f32.mrf.mxu0  ;;  %9218 = vmatprep.subr.bf16.mxu0 %v9960_v39  ;;  %v10000_v38 = vld [vmem:[%s12384_s4 + $0xea8] sm:$0xff]  }
 0x226   :  { %9239 = vmatpush3.bf16.msra.mxu1 %v9959_v37  ;;  %v8926_v49 = vadd.f32 %v8925_v47, %v8924_v43  ;;  %7176 = vmatprep.mubr.bf16.mxu1 %v2878_v42  ;;  %v10001_v42 = vld [vmem:[%s12384_s4 + $0xe60] sm:$0xff]  }
 0x227   :  { %v8947_v51 = vpop.f32.mrf.mxu1  ;;  %v8927_v52 = vpop.f32.mrf.mxu0  ;;  %9240 = vmatprep.subr.bf16.mxu1 %v9961_v40  ;;  %v10004_v47 = vld [vmem:[%s12384_s4 + $0xea0] sm:$0xff]  }
 0x228   :  { %v6579_v54 = vadd.f32 %v8926_v49, %v11879_v3  ;;  %v8948_v55 = vadd.f32 %v8947_v51, %v8946_v46  ;;  %9219 = vmatpush3.bf16.msra.mxu0 %v9962_v44  ;;  %v9974_v3 = vld [vmem:[%s12384_s4 + $0xd18] sm:$0xff]   ;;  %v10002_v44 = vld [vmem:[%s12384_s4 + $0xee0] sm:$0xff]   ;;  %v10009_v52 = vld [vmem:[%s12384_s4 + $0xe50] sm:$0xff]  }
 0x229   :  { %v8949_v57 = vpop.f32.mrf.mxu1  ;;  %v8928_v58 = vpop.f32.mrf.mxu0  ;;  %9220 = vmatprep.subr.bf16.mxu0 %v9964_v48  ;;  %v10003_v46 = vld [vmem:[%s12384_s4 + $0xe20] sm:$0xff]   ;;  %v10005_v48 = vld [vmem:[%s12384_s4 + $0xe58] sm:$0xff]  }
 0x22a   :  { %v11990_v60 = vadd.f32 %v8948_v55, %v6579_v54  ;;  %9241 = vmatpush3.bf16.msra.mxu1 %v9963_v45  ;;  %v10006_v49 = vld [vmem:[%s12384_s4 + $0xed8] sm:$0xff]   ;;  %v10011_v54 = vld [vmem:[%s12384_s4 + $0xe10] sm:$0xff]   ;;  %v10014_v57 = vld [vmem:[%s12384_s4 + $0xec8] sm:$0xff]  }
 0x22b   :  { %v8950_v62 = vpop.f32.mrf.mxu1  ;;  %9242 = vmatprep.subr.bf16.mxu1 %v9965_v50  ;;  %v10007_v50 = vld [vmem:[%s12384_s4 + $0xe18] sm:$0xff]   ;;  %v10012_v55 = vld [vmem:[%s12384_s4 + $0xe90] sm:$0xff]   ;;  %v10015_v58 = vld [vmem:[%s12384_s4 + $0xe08] sm:$0xff]  }
 0x22c   :  { %9221 = vmatpush3.bf16.msra.mxu0 %v9966_v53  ;;  %v10008_v51 = vld [vmem:[%s12384_s4 + $0xe98] sm:$0xff]   ;;  %v10010_v53 = vld [vmem:[%s12384_s4 + $0xed0] sm:$0xff]  }
 0x22d   :  { %9222 = vmatprep.subr.bf16.mxu0 %v9968_v59  ;;  %v41_v59 = vld [vmem:[%s12380_s0 + $0x38] sm:$0xff] }
 0x22e   :  { %9243 = vmatpush3.bf16.msra.mxu1 %v9967_v56  ;;  %v10013_v56 = vld [vmem:[%s12384_s4 + $0xe48] sm:$0xff]   ;;  %v2879_v62 = vcombine.high %v41_v59, %v41_v59 }
 0x22f   :  { %9244 = vmatprep.subr.bf16.mxu1 %v9969_v61  ;;  %v2886_v61 = vrot.slane %v41_v59, %v10268_v41  ;;  %v10055_v59 = vld [vmem:[%s12386_s6 + $0xf8] sm:$0xff]  }
 0x230   :  { %9223 = vmatpush3.bf16.msra.mxu0 %v9970_v63  ;;  %v10016_v63 = vld [vmem:[%s12384_s4 + $0xe88] sm:$0xff]  }
 0x231   :  { %9224 = vmatprep.subr.bf16.mxu0 %v9972_v1  ;;  %v2894_v1 = vcombine.high %v2886_v61, %v2886_v61 }
 0x232   :  { %9245 = vmatpush3.bf16.msra.mxu1 %v9971_v0  ;;  %v10018_v0 = vld [vmem:[%s12384_s4 + $0xec0] sm:$0xff]  }
 0x233   :  { %9246 = vmatprep.subr.bf16.mxu1 %v9973_v2  ;;  %v12149_v2 = vrot.slane %v2879_v62, %v10268_v41  ;;  %v10058_v62 = vld [vmem:[%s12386_s6 + $0x70] sm:$0xff]  }
 0x234   :  { %9225 = vmatpush3.bf16.msra.mxu0 %v9974_v3  ;;  %v10019_v3 = vld [vmem:[%s12384_s4 + $0xe00] sm:$0xff]  }
 0x235   :  { %9226 = vmatprep.subr.bf16.mxu0 %v9976_v5  ;;  %v2902_v5 = vrot.slane %v2886_v61, %v10268_v41 }
 0x236   :  { %9247 = vmatpush3.bf16.msra.mxu1 %v9975_v4  ;;  %v2916_v4 = vrot.slane %v2894_v1, %v10268_v41  ;;  %v10059_v1 = vld [vmem:[%s12386_s6 + $0xf0] sm:$0xff]  }
 0x237   :  { %9248 = vmatprep.subr.bf16.mxu1 %v9977_v6  ;;  %v10021_v6 = vld [vmem:[%s12384_s4 + $0xf78] sm:$0xff]  }
 0x238   :  { %9227 = vmatpush3.bf16.msra.mxu0 %v9978_v7  ;;  %v2895_v7 = vcombine.high %v12149_v2, %v12149_v2 }
 0x239   :  { %9228 = vmatprep.subr.bf16.mxu0 %v9980_v9  ;;  %v2926_v9 = vcombine.high %v2916_v4, %v2916_v4 }
 0x23a   :  { %9249 = vmatpush3.bf16.msra.mxu1 %v9979_v8  ;;  %v10020_v8 = vld [vmem:[%s12384_s4 + $0xe80] sm:$0xff]  }
 0x23b   :  { %9250 = vmatprep.subr.bf16.mxu1 %v9981_v10  ;;  %v10022_v10 = vld [vmem:[%s12384_s4 + $0xff8] sm:$0xff]  }
 0x23c   :  { %9229 = vmatpush3.bf16.msra.mxu0 %v9982_v11  ;;  %v2923_v11 = vrot.slane %v2895_v7, %v10268_v41  ;;  %v10061_v7 = vld [vmem:[%s12386_s6 + $0xb0] sm:$0xff]  }
 0x23d   :  { %9230 = vmatprep.subr.bf16.mxu0 %v9984_v13  ;;  %v2924_v13 = vcombine.high %v2902_v5, %v2902_v5 }
 0x23e   :  { %9251 = vmatpush3.bf16.msra.mxu1 %v9983_v12  ;;  %v10023_v12 = vld [vmem:[%s12384_s4 + $0xf38] sm:$0xff]  }
 0x23f   :  { %9252 = vmatprep.subr.bf16.mxu1 %v9985_v14  ;;  %v10025_v14 = vld [vmem:[%s12384_s4 + $0xf70] sm:$0xff]  }
 0x240   :  { %9231 = vmatpush3.bf16.msra.mxu0 %v9986_v15  ;;  %v10024_v15 = vld [vmem:[%s12384_s4 + $0xfb8] sm:$0xff]  }
 0x241   :  { %9260 = vmatprep.subr.bf16.mxu0 %v9989_v18  ;;  %v10026_v18 = vld [vmem:[%s12384_s4 + $0xff0] sm:$0xff]  }
 0x242   :  { %9253 = vmatpush3.bf16.msra.mxu1 %v9987_v16  ;;  %v2927_v16 = vcombine.high %v2923_v11, %v2923_v11 }
 0x243   :  { %v8968_v25 = vpop.f32.mrf.mxu0  ;;  %7137 = vmatmul.mubr.bf16.vlgmr.msra.gmra.mxu0 %v2860_v17  ;;  %9282 = vmatprep.subr.bf16.mxu1 %v9990_v19  ;;  %v10027_v19 = vld [vmem:[%s12384_s4 + $0xf30] sm:$0xff]  }
 0x244   :  { %9261 = vmatpush3.bf16.msra.mxu0 %v9991_v20  ;;  %7216 = vmatprep.mubr.bf16.mxu0 %v2916_v4 }
 0x245   :  { %v8990_v28 = vpop.f32.mrf.mxu1  ;;  %7177 = vmatmul.mubr.bf16.vlgmr.msra.gmra.mxu1 %v2876_v22  ;;  %v8969_v29 = vpop.f32.mrf.mxu0  ;;  %9262 = vmatprep.subr.bf16.mxu0 %v9993_v23  ;;  %v10029_v22 = vld [vmem:[%s12384_s4 + $0xf68] sm:$0xff]  }
 0x246   :  { %9283 = vmatpush3.bf16.msra.mxu1 %v9992_v21  ;;  %v8970_v31 = vadd.f32 %v8969_v29, %v8968_v25  ;;  %7256 = vmatprep.mubr.bf16.mxu1 %v2926_v9 }
 0x247   :  { %v8991_v33 = vpop.f32.mrf.mxu1  ;;  %v8971_v34 = vpop.f32.mrf.mxu0  ;;  %9284 = vmatprep.subr.bf16.mxu1 %v9994_v24  ;;  %v10028_v24 = vld [vmem:[%s12384_s4 + $0xfb0] sm:$0xff]  }
 0x248   :  { %v6659_v36 = vadd.f32 %v8970_v31, %v11990_v60  ;;  %v8992_v37 = vadd.f32 %v8991_v33, %v8990_v28  ;;  %9263 = vmatpush3.bf16.msra.mxu0 %v9995_v26  ;;  %v10017_v60 = vld [vmem:[%s12384_s4 + $0xe40] sm:$0xff]  }
 0x249   :  { %v8993_v39 = vpop.f32.mrf.mxu1  ;;  %v8972_v40 = vpop.f32.mrf.mxu0  ;;  %9264 = vmatprep.subr.bf16.mxu0 %v9997_v30  ;;  %v10031_v30 = vld [vmem:[%s12384_s4 + $0xf28] sm:$0xff]   ;;  %v10033_v33 = vld [vmem:[%s12384_s4 + $0xf60] sm:$0xff]  }
 0x24a   :  { %v12091_v43 = vadd.f32 %v8992_v37, %v6659_v36  ;;  %9285 = vmatpush3.bf16.msra.mxu1 %v9996_v27  ;;  %v10030_v27 = vld [vmem:[%s12384_s4 + $0xfe8] sm:$0xff]   ;;  %v10034_v37 = vld [vmem:[%s12384_s4 + $0xfe0] sm:$0xff]   ;;  %v10037_v39 = vld [vmem:[%s12384_s4 + $0xf58] sm:$0xff]  }
 0x24b   :  { %v8994_v45 = vpop.f32.mrf.mxu1  ;;  %9286 = vmatprep.subr.bf16.mxu1 %v9998_v32  ;;  %v10036_v40 = vld [vmem:[%s12384_s4 + $0xfa0] sm:$0xff]  }
 0x24c   :  { %9265 = vmatpush3.bf16.msra.mxu0 %v9999_v35  ;;  %v10032_v35 = vld [vmem:[%s12384_s4 + $0xfa8] sm:$0xff]   ;;  %v10040_v45 = vld [vmem:[%s12384_s4 + $0xf98] sm:$0xff]  }
 0x24d   :  { %9266 = vmatprep.subr.bf16.mxu0 %v10001_v42  ;;  %v10038_v42 = vld [vmem:[%s12384_s4 + $0xfd8] sm:$0xff]  }
 0x24e   :  { %9287 = vmatpush3.bf16.msra.mxu1 %v10000_v38  ;;  %v10035_v38 = vld [vmem:[%s12384_s4 + $0xf20] sm:$0xff]  }
 0x24f   :  { %9288 = vmatprep.subr.bf16.mxu1 %v10002_v44  ;;  %v10041_v44 = vld [vmem:[%s12384_s4 + $0xf50] sm:$0xff]  }
 0x250   :  { %9267 = vmatpush3.bf16.msra.mxu0 %v10003_v46  ;;  %v10042_v46 = vld [vmem:[%s12384_s4 + $0xfd0] sm:$0xff]  }
 0x251   :  { %9268 = vmatprep.subr.bf16.mxu0 %v10005_v48  ;;  %v10045_v48 = vld [vmem:[%s12384_s4 + $0xf48] sm:$0xff]  }
 0x252   :  { %9289 = vmatpush3.bf16.msra.mxu1 %v10004_v47  ;;  %v10043_v47 = vld [vmem:[%s12384_s4 + $0xf10] sm:$0xff]  }
 0x253   :  { %9290 = vmatprep.subr.bf16.mxu1 %v10006_v49  ;;  %v10044_v49 = vld [vmem:[%s12384_s4 + $0xf90] sm:$0xff]  }
 0x254   :  { %9269 = vmatpush3.bf16.msra.mxu0 %v10007_v50  ;;  %v10046_v50 = vld [vmem:[%s12384_s4 + $0xfc8] sm:$0xff]  }
 0x255   :  { %9270 = vmatprep.subr.bf16.mxu0 %v10009_v52  ;;  %v10049_v52 = vld [vmem:[%s12384_s4 + $0xf40] sm:$0xff]  }
 0x256   :  { %9291 = vmatpush3.bf16.msra.mxu1 %v10008_v51  ;;  %v10047_v51 = vld [vmem:[%s12384_s4 + $0xf08] sm:$0xff]  }
 0x257   :  { %9292 = vmatprep.subr.bf16.mxu1 %v10010_v53  ;;  %v10048_v53 = vld [vmem:[%s12384_s4 + $0xf88] sm:$0xff]  }
 0x258   :  { %9271 = vmatpush3.bf16.msra.mxu0 %v10011_v54  ;;  %v10050_v54 = vld [vmem:[%s12384_s4 + $0xfc0] sm:$0xff]  }
 0x259   :  { %9272 = vmatprep.subr.bf16.mxu0 %v10013_v56  ;;  %v2909_v56 = vrot.slane %v12149_v2, %v10268_v41  ;;  %v10060_v2 = vld [vmem:[%s12386_s6 + $0x30] sm:$0xff]  }
 0x25a   :  { %9293 = vmatpush3.bf16.msra.mxu1 %v10012_v55  ;;  %v10051_v55 = vld [vmem:[%s12384_s4 + $0xf00] sm:$0xff]  }
 0x25b   :  { %9294 = vmatprep.subr.bf16.mxu1 %v10014_v57  ;;  %v10054_v57 = vld [vmem:[%s12386_s6 + $0x78] sm:$0xff]   ;;  %v2925_v61 = vcombine.high %v2909_v56, %v2909_v56 }
 0x25c   :  { %9273 = vmatpush3.bf16.msra.mxu0 %v10015_v58  ;;  %v10052_v58 = vld [vmem:[%s12384_s4 + $0xf80] sm:$0xff]  }
 0x25d   :  { %9274 = vmatprep.subr.bf16.mxu0 %v10017_v60  ;;  %v10056_v60 = vld [vmem:[%s12386_s6 + $0x38] sm:$0xff]  }
 0x25e   :  { %9295 = vmatpush3.bf16.msra.mxu1 %v10016_v63  ;;  %v10057_v63 = vld [vmem:[%s12386_s6 + $0xb8] sm:$0xff]  }
 0x25f   :  { %9296 = vmatprep.subr.bf16.mxu1 %v10018_v0 }
 0x260   :  { %9275 = vmatpush3.bf16.msra.mxu0 %v10019_v3 }
 0x261   :  { %9304 = vmatprep.subr.bf16.mxu0 %v10021_v6 }
 0x262   :  { %9297 = vmatpush3.bf16.msra.mxu1 %v10020_v8 }
 0x263   :  { %v9012_v17 = vpop.f32.mrf.mxu0  ;;  %7217 = vmatmul.mubr.bf16.vlgmr.msra.gmra.mxu0 %v2902_v5  ;;  %9326 = vmatprep.subr.bf16.mxu1 %v10022_v10  ;;  %v10062_v5 = vld [vmem:[%s12386_s6 + $0x68] sm:$0xff]  }
 0x264   :  { %9305 = vmatpush3.bf16.msra.mxu0 %v10023_v12  ;;  %7296 = vmatprep.mubr.bf16.mxu0 %v2923_v11  ;;  %v10063_v10 = vld [vmem:[%s12386_s6 + $0xe8] sm:$0xff]  }
 0x265   :  { %v9034_v20 = vpop.f32.mrf.mxu1  ;;  %7257 = vmatmul.mubr.bf16.vlgmr.msra.gmra.mxu1 %v2924_v13  ;;  %v9013_v21 = vpop.f32.mrf.mxu0  ;;  %9306 = vmatprep.subr.bf16.mxu0 %v10025_v14  ;;  %v10064_v13 = vld [vmem:[%s12386_s6 + $0x28] sm:$0xff]  }
 0x266   :  { %9327 = vmatpush3.bf16.msra.mxu1 %v10024_v15  ;;  %v9014_v23 = vadd.f32 %v9013_v21, %v9012_v17  ;;  %7336 = vmatprep.mubr.bf16.mxu1 %v2927_v16  ;;  %v10066_v16 = vld [vmem:[%s12386_s6 + $0x60] sm:$0xff]  }
 0x267   :  { %v9035_v25 = vpop.f32.mrf.mxu1  ;;  %v9015_v26 = vpop.f32.mrf.mxu0  ;;  %9328 = vmatprep.subr.bf16.mxu1 %v10026_v18  ;;  %v10065_v18 = vld [vmem:[%s12386_s6 + $0xa8] sm:$0xff]   ;;  %v10068_v21 = vld [vmem:[%s12386_s6 + $0x20] sm:$0xff]  }
 0x268   :  { %v6739_v28 = vadd.f32 %v9014_v23, %v12091_v43  ;;  %v9036_v29 = vadd.f32 %v9035_v25, %v9034_v20  ;;  %9307 = vmatpush3.bf16.msra.mxu0 %v10027_v19  ;;  %v10039_v43 = vld [vmem:[%s12384_s4 + $0xf18] sm:$0xff]   ;;  %v10067_v20 = vld [vmem:[%s12386_s6 + $0xe0] sm:$0xff]   ;;  %v10074_v26 = vld [vmem:[%s12386_s6 + $0x50] sm:$0xff]  }
 0x269   :  { %v9037_v31 = vpop.f32.mrf.mxu1  ;;  %v9016_v32 = vpop.f32.mrf.mxu0  ;;  %9308 = vmatprep.subr.bf16.mxu0 %v10029_v22  ;;  %v10070_v22 = vld [vmem:[%s12386_s6 + $0x58] sm:$0xff]   ;;  %v10069_v23 = vld [vmem:[%s12386_s6 + $0xa0] sm:$0xff]  }
 0x26a   :  { %v12199_v34 = vadd.f32 %v9036_v29, %v6739_v28  ;;  %9329 = vmatpush3.bf16.msra.mxu1 %v10028_v24  ;;  %v10071_v24 = vld [vmem:[%s12386_s6 + $0xd8] sm:$0xff]   ;;  %v10075_v28 = vld [vmem:[%s12386_s6 + $0xd0] sm:$0xff]   ;;  %v10079_v32 = vld [vmem:[%s12386_s6 + $0xc8] sm:$0xff]  }
 0x26b   :  { %v9038_v36 = vpop.f32.mrf.mxu1  ;;  %9330 = vmatprep.subr.bf16.mxu1 %v10030_v27  ;;  %v10072_v25 = vld [vmem:[%s12386_s6 + $0x18] sm:$0xff]   ;;  %v10076_v29 = vld [vmem:[%s12386_s6 + $0x10] sm:$0xff]  }
 0x26c   :  { %9309 = vmatpush3.bf16.msra.mxu0 %v10031_v30  ;;  %v10073_v27 = vld [vmem:[%s12386_s6 + $0x98] sm:$0xff]   ;;  %v10078_v30 = vld [vmem:[%s12386_s6 + $0x48] sm:$0xff]   ;;  %v10077_v31 = vld [vmem:[%s12386_s6 + $0x90] sm:$0xff]  }
 0x26d   :  { %9310 = vmatprep.subr.bf16.mxu0 %v10033_v33  ;;  %v10080_v33 = vld [vmem:[%s12386_s6 + $0x8] sm:$0xff]  }
 0x26e   :  { %9331 = vmatpush3.bf16.msra.mxu1 %v10032_v35  ;;  %v10082_v35 = vld [vmem:[%s12386_s6 + $0x40] sm:$0xff]  }
 0x26f   :  { %9332 = vmatprep.subr.bf16.mxu1 %v10034_v37  ;;  %v10081_v37 = vld [vmem:[%s12386_s6 + $0x88] sm:$0xff]  }
 0x270   :  { %9311 = vmatpush3.bf16.msra.mxu0 %v10035_v38 }
 0x271   :  { %9312 = vmatprep.subr.bf16.mxu0 %v10037_v39 }
 0x272   :  { %9333 = vmatpush3.bf16.msra.mxu1 %v10036_v40 }
 0x273   :  { %9334 = vmatprep.subr.bf16.mxu1 %v10038_v42 }
 0x274   :  { %9313 = vmatpush3.bf16.msra.mxu0 %v10039_v43 }
 0x275   :  { %9314 = vmatprep.subr.bf16.mxu0 %v10041_v44 }
 0x276   :  { %9335 = vmatpush3.bf16.msra.mxu1 %v10040_v45 }
 0x277   :  { %9336 = vmatprep.subr.bf16.mxu1 %v10042_v46 }
 0x278   :  { %9315 = vmatpush3.bf16.msra.mxu0 %v10043_v47 }
 0x279   :  { %9316 = vmatprep.subr.bf16.mxu0 %v10045_v48 }
 0x27a   :  { %9337 = vmatpush3.bf16.msra.mxu1 %v10044_v49 }
 0x27b   :  { %9338 = vmatprep.subr.bf16.mxu1 %v10046_v50 }
 0x27c   :  { %9317 = vmatpush3.bf16.msra.mxu0 %v10047_v51 }
 0x27d   :  { %9318 = vmatprep.subr.bf16.mxu0 %v10049_v52 }
 0x27e   :  { %9339 = vmatpush3.bf16.msra.mxu1 %v10048_v53 }
 0x27f   :  { %9340 = vmatprep.subr.bf16.mxu1 %v10050_v54 }
 0x280   :  { %9319 = vmatpush3.bf16.msra.mxu0 %v10051_v55 }
 0x281   :  { %9348 = vmatprep.subr.bf16.mxu0 %v10054_v57 }
 0x282   :  { %9341 = vmatpush3.bf16.msra.mxu1 %v10052_v58 }
 0x283   :  { %v9056_v0 = vpop.f32.mrf.mxu0  ;;  %7297 = vmatmul.mubr.bf16.vlgmr.msra.gmra.mxu0 %v2909_v56  ;;  %9370 = vmatprep.subr.bf16.mxu1 %v10055_v59 }
 0x284   :  { %9349 = vmatpush3.bf16.msra.mxu0 %v10056_v60 }
 0x285   :  { %v9078_v3 = vpop.f32.mrf.mxu1  ;;  %7337 = vmatmul.mubr.bf16.vlgmr.msra.gmra.mxu1 %v2925_v61  ;;  %v9057_v4 = vpop.f32.mrf.mxu0  ;;  %9350 = vmatprep.subr.bf16.mxu0 %v10058_v62 }
 0x286   :  { %9371 = vmatpush3.bf16.msra.mxu1 %v10057_v63  ;;  %v9058_v6 = vadd.f32 %v9057_v4, %v9056_v0 }
 0x287   :  { %v9079_v8 = vpop.f32.mrf.mxu1  ;;  %v9059_v9 = vpop.f32.mrf.mxu0  ;;  %9372 = vmatprep.subr.bf16.mxu1 %v10059_v1 }
 0x288   :  { %v6819_v11 = vadd.f32 %v9058_v6, %v12199_v34  ;;  %v9080_v12 = vadd.f32 %v9079_v8, %v9078_v3  ;;  %9351 = vmatpush3.bf16.msra.mxu0 %v10060_v2  ;;  %v8432_v34 = vld.sshfl [vmem:[%s12382_s2] sm:$0x33 pattern:$0x75316420] }
 0x289   :  { %v9081_v14 = vpop.f32.mrf.mxu1  ;;  %v9060_v15 = vpop.f32.mrf.mxu0  ;;  %9352 = vmatprep.subr.bf16.mxu0 %v10062_v5  ;;  %v7417_v36 = vcombine.high %v8432_v34, %v8432_v34 }
 0x28a   :  { %v12300_v17 = vadd.f32 %v9080_v12, %v6819_v11  ;;  %9373 = vmatpush3.bf16.msra.mxu1 %v10061_v7 }
 0x28b   :  { %v9082_v19 = vpop.f32.mrf.mxu1  ;;  %9374 = vmatprep.subr.bf16.mxu1 %v10063_v10 }
 0x28c   :  { %9353 = vmatpush3.bf16.msra.mxu0 %v10064_v13 }
 0x28d   :  { %9354 = vmatprep.subr.bf16.mxu0 %v10066_v16 }
 0x28e   :  { %9375 = vmatpush3.bf16.msra.mxu1 %v10065_v18 }
 0x28f   :  { %9376 = vmatprep.subr.bf16.mxu1 %v10067_v20 }
 0x290   :  { %9355 = vmatpush3.bf16.msra.mxu0 %v10068_v21 }
 0x291   :  { %9356 = vmatprep.subr.bf16.mxu0 %v10070_v22 }
 0x292   :  { %9377 = vmatpush3.bf16.msra.mxu1 %v10069_v23 }
 0x293   :  { %9378 = vmatprep.subr.bf16.mxu1 %v10071_v24 }
 0x294   :  { %9357 = vmatpush3.bf16.msra.mxu0 %v10072_v25 }
 0x295   :  { %9358 = vmatprep.subr.bf16.mxu0 %v10074_v26 }
 0x296   :  { %9379 = vmatpush3.bf16.msra.mxu1 %v10073_v27 }
 0x297   :  { %9380 = vmatprep.subr.bf16.mxu1 %v10075_v28 }
 0x298   :  { %9359 = vmatpush3.bf16.msra.mxu0 %v10076_v29 }
 0x299   :  { %9360 = vmatprep.subr.bf16.mxu0 %v10078_v30 }
 0x29a   :  { %9381 = vmatpush3.bf16.msra.mxu1 %v10077_v31 }
 0x29b   :  { %14 = vsyncpa [#allocation3], 0  ;;  %9382 = vmatprep.subr.bf16.mxu1 %v10079_v32  ;;  %v10083_v38 = vld [vmem:[%s12386_s6 + $0xc0] sm:$0xff]   ;;  %v7431_v39 = vrot.slane %v7417_v36, %v10268_v41  ;;  %v7424_v43 = vrot.slane %v8432_v34, %v10268_v41  ;;  %vm7723_vm0 = vcmask 1044480   ;;  %v10110_v47 = vmov 0.0   ;;  %s10112_s29 = smov [#allocation2]  }
 0x29c   :  { %9361 = vmatpush3.bf16.msra.mxu0 %v10080_v33  ;;  %v10084_v40 = vld [vmem:[%s12386_s6] sm:$0xff]   ;;  %vm10111_vm1 = vmmov 0   ;;  %vm7719_vm2 = vcmask 80896   ;;  %s7784_s30 = sshll.u32 %s10112_s29, 4  ;;  %vm7776_vm3 = vcmask 517120   ;;  %s7785_s30 = int_to_ptr.vmem [resolvable:$true] %s7784_s30 }
 0x29d   :  { %9362 = vmatprep.subr.bf16.mxu0 %v10082_v35  ;;  %7662 = vmatprep.mubr.bf16.mxu0 %v7431_v39  ;;  %v7433_v42 = vcombine.high %v7431_v39, %v7431_v39  ;;  %v10086_v44 = vld [vmem:[%s12387_s7] sm:$0x1f]   ;;  %v7432_v46 = vcombine.high %v7424_v43, %v7424_v43  ;;  %s10087_s10 = scalar_lea.vmem %s7785_s30, 32  ;;  %p10092_p1 = scmp.lt.s32.totalorder %s7785_s30, %s7785_s30 }
 0x29e   :  { %9383 = vmatpush3.bf16.msra.mxu1 %v10081_v37  ;;  %v10085_v45 = vld [vmem:[%s12386_s6 + $0x80] sm:$0xff]   ;;  %v7725_v48 = vsel %vm7723_vm0, %v10086_v44, 0  ;;  %p10088_p0 = scmp.ne.s32.totalorder %s7785_s30, %s10087_s10  ;;  %p10093_p2 = scmp.lt.s32.totalorder %s10087_s10, %s10087_s10 }
 0x29f   :  { %9384 = vmatprep.subr.bf16.mxu1 %v10083_v38  ;;  %7702 = vmatprep.mubr.bf16.mxu1 %v7433_v42  ;;  %v7711_v56 = vld [vmem:[%s12383_s3] sm:$0x1] }
 0x2a0   :  { %9363 = vmatpush3.bf16.msra.mxu0 %v10084_v40  ;;  %p10094_p3 = por %p10093_p2, %p10092_p1 }
 0x2a1   :  { %9394 = vmatprep.subr.bf16.mxu0 %v10110_v47 }
 0x2a2   :  { %9385 = vmatpush3.bf16.msra.mxu1 %v10085_v45  ;;  %p10095_p4 = pnand %p10094_p3, %p10088_p0 }
 0x2a3   :  { %v9100_v49 = vpop.f32.mrf.mxu0  ;;  %7663 = vmatmul.mubr.bf16.vlgmr.msra.gmra.mxu0 %v7424_v43 }
 0x2a4   :  { %9395 = vmatpush3.bf16.msra.mxu0 %v7725_v48  ;;  %9396 = vmatprep.mubr.msk.bf16.mxu0 %vm10111_vm1, %v10110_v47 }
 0x2a5   :  { %v9122_v41 = vpop.f32.mrf.mxu1  ;;  %7703 = vmatmul.mubr.bf16.vlgmr.msra.gmra.mxu1 %v7432_v46  ;;  %v9101_v50 = vpop.f32.mrf.mxu0 }
 0x2a6   :  { %v9102_v51 = vadd.f32 %v9101_v50, %v9100_v49 }
 0x2a7   :  { %v9123_v52 = vpop.f32.mrf.mxu1  ;;  %v9103_v53 = vpop.f32.mrf.mxu0 }
 0x2a8   :  { %v6899_v54 = vadd.f32 %v9102_v51, %v12300_v17  ;;  %v9124_v55 = vadd.f32 %v9123_v52, %v9122_v41 }
 0x2a9   :  { %v9125_v57 = vpop.f32.mrf.mxu1  ;;  %v9104_v58 = vpop.f32.mrf.mxu0 }
 0x2aa   :  { %v6939_v59 = vadd.f32 %v9124_v55, %v6899_v54 }
 0x2ab   :  { %v9126_v60 = vpop.f32.mrf.mxu1  ;;  %9397 = vmatmul.mubr.msk.bf16.vlgmr.msra.gmra.mxu0 %vm7719_vm2, %v7711_v56 }
 0x2c3   :  { %v9144_v61 = vpop.f32.mrf.mxu0 }
 0x2c5   :  { %v9166_v62 = vpop.f32.mrf.mxu1  ;;  %v9145_v63 = vpop.f32.mrf.mxu0 }
 0x2c6   :  { %v9146_v0 = vadd.f32 %v9145_v63, %v9144_v61 }
 0x2c7   :  { %v9167_v1 = vpop.f32.mrf.mxu1  ;;  %v9147_v2 = vpop.f32.mrf.mxu0 }
 0x2c8   :  { %v6979_v3 = vadd.f32 %v9146_v0, %v6939_v59  ;;  %v9168_v4 = vadd.f32 %v9167_v1, %v9166_v62 }
 0x2c9   :  { %v9169_v5 = vpop.f32.mrf.mxu1  ;;  %v9148_v6 = vpop.f32.mrf.mxu0 }
 0x2ca   :  { %v7019_v7 = vadd.f32 %v9168_v4, %v6979_v3  ;;  %v8467_v6 = vld [vmem:[%s12388_s8] ss:$0 sm:$0xff] }
 0x2cb   :  { %v9170_v8 = vpop.f32.mrf.mxu1 }
 0x2e3   :  { %v9188_v9 = vpop.f32.mrf.mxu0 }
 0x2e5   :  { %v9210_v10 = vpop.f32.mrf.mxu1  ;;  %v9189_v11 = vpop.f32.mrf.mxu0 }
 0x2e6   :  { %v9190_v12 = vadd.f32 %v9189_v11, %v9188_v9 }
 0x2e7   :  { %v9211_v13 = vpop.f32.mrf.mxu1  ;;  %v9191_v14 = vpop.f32.mrf.mxu0 }
 0x2e8   :  { %v7059_v15 = vadd.f32 %v9190_v12, %v7019_v7  ;;  %v9212_v16 = vadd.f32 %v9211_v13, %v9210_v10 }
 0x2e9   :  { %v9213_v17 = vpop.f32.mrf.mxu1  ;;  %v9192_v18 = vpop.f32.mrf.mxu0 }
 0x2ea   :  { %v7099_v19 = vadd.f32 %v9212_v16, %v7059_v15 }
 0x2eb   :  { %v9214_v20 = vpop.f32.mrf.mxu1 }
 0x303   :  { %v9232_v21 = vpop.f32.mrf.mxu0 }
 0x305   :  { %v9254_v22 = vpop.f32.mrf.mxu1  ;;  %v9233_v23 = vpop.f32.mrf.mxu0 }
 0x306   :  { %v9234_v24 = vadd.f32 %v9233_v23, %v9232_v21 }
 0x307   :  { %v9255_v25 = vpop.f32.mrf.mxu1  ;;  %v9235_v26 = vpop.f32.mrf.mxu0 }
 0x308   :  { %v7139_v27 = vadd.f32 %v9234_v24, %v7099_v19  ;;  %v9256_v28 = vadd.f32 %v9255_v25, %v9254_v22 }
 0x309   :  { %v9257_v29 = vpop.f32.mrf.mxu1  ;;  %v9236_v30 = vpop.f32.mrf.mxu0 }
 0x30a   :  { %v7179_v31 = vadd.f32 %v9256_v28, %v7139_v27 }
 0x30b   :  { %v9258_v32 = vpop.f32.mrf.mxu1 }
 0x323   :  { %v9276_v33 = vpop.f32.mrf.mxu0 }
 0x325   :  { %v9298_v34 = vpop.f32.mrf.mxu1  ;;  %v9277_v35 = vpop.f32.mrf.mxu0 }
 0x326   :  { %v9278_v41 = vadd.f32 %v9277_v35, %v9276_v33 }
 0x327   :  { %v9299_v36 = vpop.f32.mrf.mxu1  ;;  %v9279_v37 = vpop.f32.mrf.mxu0 }
 0x328   :  { %v7219_v50 = vadd.f32 %v9278_v41, %v7179_v31  ;;  %v9300_v51 = vadd.f32 %v9299_v36, %v9298_v34 }
 0x329   :  { %v9301_v38 = vpop.f32.mrf.mxu1  ;;  %v9280_v39 = vpop.f32.mrf.mxu0 }
 0x32a   :  { %v7259_v54 = vadd.f32 %v9300_v51, %v7219_v50 }
 0x32b   :  { %v9302_v40 = vpop.f32.mrf.mxu1 }
 0x343   :  { %v9320_v42 = vpop.f32.mrf.mxu0 }
 0x345   :  { %v9342_v43 = vpop.f32.mrf.mxu1  ;;  %v9321_v44 = vpop.f32.mrf.mxu0 }
 0x346   :  { %v9322_v52 = vadd.f32 %v9321_v44, %v9320_v42 }
 0x347   :  { %v9343_v45 = vpop.f32.mrf.mxu1  ;;  %v9323_v46 = vpop.f32.mrf.mxu0 }
 0x348   :  { %v7299_v57 = vadd.f32 %v9322_v52, %v7259_v54  ;;  %v9344_v61 = vadd.f32 %v9343_v45, %v9342_v43 }
 0x349   :  { %v9345_v47 = vpop.f32.mrf.mxu1  ;;  %v9324_v48 = vpop.f32.mrf.mxu0 }
 0x34a   :  { %v7339_v1 = vadd.f32 %v9344_v61, %v7299_v57 }
 0x34b   :  { %v9346_v49 = vpop.f32.mrf.mxu1 }
 0x363   :  { %v9364_v53 = vpop.f32.mrf.mxu0 }
 0x365   :  { %v9386_v55 = vpop.f32.mrf.mxu1  ;;  %v9365_v56 = vpop.f32.mrf.mxu0 }
 0x366   :  { %v9366_v58 = vadd.f32 %v9365_v56, %v9364_v53 }
 0x367   :  { %v9387_v59 = vpop.f32.mrf.mxu1  ;;  %v9367_v60 = vpop.f32.mrf.mxu0 }
 0x368   :  { %v9388_v62 = vadd.f32 %v9387_v59, %v9386_v55 }
 0x369   :  { %v9389_v63 = vpop.f32.mrf.mxu1  ;;  %v9368_v0 = vpop.f32.mrf.mxu0 }
 0x36a   :  { %v7705_v2 = vadd.f32 %v9388_v62, %v9366_v58 }
 0x36b   :  { %v9390_v3 = vpop.f32.mrf.mxu1  ;;  %v7761_v4 = vpop.f32.mrf.mxu0 }
 0x36c   :  { %v7710_v5 = vadd.f32 %v7705_v2, %v7339_v1 }
 0x36d   :  { %v9398_v7 = vpop.f32.mrf.mxu0 }
 0x36e   :  { %v7767_v8 = vadd.f32 %v7761_v4, %v7710_v5 }
 0x36f   :  { %v7764_v9 = vpop.f32.mrf.mxu0 }
 0x370   :  { %v7775_v10 = vadd.f32 %v8467_v6, %v7767_v8 }
 0x371   :  { %v9399_v11 = vpop.f32.mrf.mxu0 }
 0x372   :  { %7777 = vst.msk [vmem:[#allocation2] sm:$0x3] %vm7776_vm3, %v7775_v10 }
 0x373   :  { %10098 = shalt.err (!%p10095_p4)
}
 0x374   :  { %7787 = dma.vmem_to_hbm [thread:$0]  %s7785_s30, 32, %s12389_s9, [#allocation3]  }
 0x375   :  { %10107 = dma.done.wait [#allocation3], 32  }
 0x376   :  { %10108 = vsyncadd [#allocation3], 4294967264 }
 0x377   :  { %7791 = vsyncpa [#allocation3], 1 }

</bundles_post_ra>
